<compile_context>
chip_gen: v7x
topology: tpu7x:2x2x1
jax: 0.10.0
libtpu: 0.0.40
codegen_flags: <defaults>
</compile_context>

<pallas_src>
import functools

import numpy as np
import jax
import jax.numpy as jnp
from jax import lax
from jax.experimental import pallas as pl
from jax.experimental.pallas import tpu as pltpu

_EPS = 1e-5
_NEG_SLOPE = 0.2
KSIZE = 4  # all ConvTranspose2d kernels are 4x4

# out[2p+a] = sum over (kh, dh) in _TAPS[a] of x[p+dh] * W[kh]   (stride 2, pad 1)
_TAPS = {0: ((1, 0), (3, -1)), 1: ((2, 0), (0, 1))}
_SHIFTS = tuple((dh, dw) for dh in (-1, 0, 1) for dw in (-1, 0, 1))


def _phase_taps():
    taps = []
    for a in (0, 1):
        for b in (0, 1):
            lst = []
            for kh, dh in _TAPS[a]:
                for kw, dw in _TAPS[b]:
                    lst.append((kh * KSIZE + kw, _SHIFTS.index((dh, dw))))
            taps.append(tuple(lst))
    return tuple(taps)


_PHASE_TAPS = _phase_taps()


# ----------------------------------------------------------------------------
# Host-side (numpy) constant index-plumbing matrices.
# ----------------------------------------------------------------------------
def _make_masks(n, h, w):
    """(9, n*h*w) validity masks (1 in-bounds / 0 out) for the 9 (dh,dw) shifts."""
    m = np.arange(n * h * w)
    p = (m // w) % h
    q = m % w
    out = np.zeros((9, n * h * w), np.float32)
    for s, (dh, dw) in enumerate(_SHIFTS):
        out[s] = ((p + dh >= 0) & (p + dh < h) &
                  (q + dw >= 0) & (q + dw < w)).astype(np.float32)
    return out


def _make_phase_scatter(n, h, w):
    """(4, M, 4M) 0/1 matrices: phase-(a,b) column (n,p,q) -> fine column
    (n, 2p+a, 2q+b) of the (n, 2h, 2w) grid."""
    m = n * h * w
    scat = np.zeros((4, m, 4 * m), np.float32)
    for a in (0, 1):
        for b in (0, 1):
            ph = 2 * a + b
            for ni in range(n):
                for p in range(h):
                    for q in range(w):
                        src = (ni * h + p) * w + q
                        dst = (ni * 2 * h + 2 * p + a) * 2 * w + 2 * q + b
                        scat[ph, src, dst] = 1.0
    return scat


def _make_l1_scatter(n):
    """(16n, 16n) 0/1 matrix: layer-1 tap-major column (t, n) -> fine column
    (n, h, w) with t = h*4 + w."""
    scat = np.zeros((16 * n, 16 * n), np.float32)
    for t in range(16):
        for ni in range(n):
            scat[t * n + ni, ni * 16 + t] = 1.0
    return scat


# ----------------------------------------------------------------------------
# In-kernel building blocks.
# ----------------------------------------------------------------------------
def _bn_leaky(parts, count, gamma, beta, *, tanh=False):
    """Fused training-mode BatchNorm (biased variance) + LeakyReLU(0.2) [+ Tanh].
    `parts` is a list of (C, M_i) f32 blocks jointly covering all output
    positions of the layer; stats are per channel (row)."""
    total = parts[0].sum(axis=-1, keepdims=True)
    for y in parts[1:]:
        total = total + y.sum(axis=-1, keepdims=True)
    mean = total / count
    sq = jnp.square(parts[0] - mean).sum(axis=-1, keepdims=True)
    for y in parts[1:]:
        sq = sq + jnp.square(y - mean).sum(axis=-1, keepdims=True)
    var = sq / count
    scale = gamma * lax.rsqrt(var + _EPS)            # (C, 1)
    shift = beta - mean * scale                      # (C, 1)
    outs = []
    for y in parts:
        z = y * scale + shift
        z = jnp.where(z >= 0, z, _NEG_SLOPE * z)
        if tanh:
            z = jnp.tanh(z)
        outs.append(z)
    return outs


def _up_layer(halo_ref, dims, w_ref, g_ref, b_ref, mask_ref, *, tanh=False):
    """ConvTranspose2d(k=4,s=2,p=1) + BN + LeakyReLU [+ Tanh] on a VMEM-resident
    (Cin, M) input stored inside a zero-padded halo scratch.
    Returns the 4 output-parity phases, each (Cout, N*H*W) f32."""
    n, h, w = dims
    m = n * h * w
    pad = w + 1
    # 9 shifted, boundary-masked views of the input (static halo slices).
    xs = []
    for s, (dh, dw) in enumerate(_SHIFTS):
        sl = halo_ref[:, pl.ds(pad + dh * w + dw, m)]       # (Cin, M) f32
        sl = sl * mask_ref[pl.ds(s, 1), :]                  # zero out-of-bounds
        xs.append(sl.astype(jnp.bfloat16))
    # 4 phases, each the sum of 4 dense (Cout,Cin)@(Cin,M) MXU matmuls.
    ys = []
    for p in range(4):
        acc = None
        for t, s in _PHASE_TAPS[p]:
            d = jnp.dot(w_ref[t], xs[s], preferred_element_type=jnp.float32)
            acc = d if acc is None else acc + d
        ys.append(acc)
    return _bn_leaky(ys, 4 * m, g_ref[...], b_ref[...], tanh=tanh)


def _scatter_to_halo(zs, p_ref, halo_out_ref, pad_out):
    """Depth-to-space: scatter the 4 phase blocks into the next layer's
    fine-grid halo scratch via 0/1 matmuls (exact permutation, stays in VMEM)."""
    m_out = p_ref.shape[2]
    fine = None
    for p in range(4):
        f = jnp.dot(zs[p].astype(jnp.bfloat16), p_ref[p],
                    preferred_element_type=jnp.float32)
        fine = f if fine is None else fine + f
    halo_out_ref[:, pl.ds(pad_out, m_out)] = fine


def _generator_kernel(x_ref,
                      w1_ref, g1_ref, b1_ref, p1_ref,
                      w2_ref, g2_ref, b2_ref, m2_ref, p2_ref,
                      w3_ref, g3_ref, b3_ref, m3_ref, p3_ref,
                      w4_ref, g4_ref, b4_ref, m4_ref,
                      out_ref, hid_ref,
                      t1_ref, halo2_ref, halo3_ref, halo4_ref,
                      *, batch):
    n = batch
    # Zero the halo scratches (their margins provide the zero padding).
    halo2_ref[...] = jnp.zeros(halo2_ref.shape, halo2_ref.dtype)
    halo3_ref[...] = jnp.zeros(halo3_ref.shape, halo3_ref.dtype)
    halo4_ref[...] = jnp.zeros(halo4_ref.shape, halo4_ref.dtype)

    # ---- Layer 1: ConvTranspose2d(Z, 64, 4, 1, 0) on a 1x1 input -----------
    x = x_ref[...]                                           # (Z, N) bf16
    for t in range(16):
        t1_ref[:, pl.ds(t * n, n)] = jnp.dot(
            w1_ref[t], x, preferred_element_type=jnp.float32)
    z1, = _bn_leaky([t1_ref[...]], 16 * n, g1_ref[...], b1_ref[...])
    fine1 = jnp.dot(z1.astype(jnp.bfloat16), p1_ref[...],
                    preferred_element_type=jnp.float32)      # (64, 16N)
    halo2_ref[:, pl.ds(4 + 1, 16 * n)] = fine1

    # ---- Layer 2: 64 -> 32 channels, 4x4 -> 8x8 -----------------------------
    zs2 = _up_layer(halo2_ref, (n, 4, 4), w2_ref, g2_ref, b2_ref, m2_ref)
    _scatter_to_halo(zs2, p2_ref, halo3_ref, pad_out=8 + 1)

    # ---- Layer 3: 32 -> 16 channels, 8x8 -> 16x16 (= hidden_status) ---------
    zs3 = _up_layer(halo3_ref, (n, 8, 8), w3_ref, g3_ref, b3_ref, m3_ref)
    for p in range(4):
        hid_ref[p] = zs3[p]
    _scatter_to_halo(zs3, p3_ref, halo4_ref, pad_out=16 + 1)

    # ---- Layer 4: 16 -> 3 channels, 16x16 -> 32x32, + Tanh ------------------
    zs4 = _up_layer(halo4_ref, (n, 16, 16), w4_ref, g4_ref, b4_ref, m4_ref,
                    tanh=True)
    for p in range(4):
        out_ref[p] = zs4[p]


# ----------------------------------------------------------------------------
# Wrapper: parameter re-layout, one pallas_call, output-side NCHW transposes.
# ----------------------------------------------------------------------------
def _tap_weights(w):
    """PyTorch ConvTranspose2d weight (Cin, Cout, 4, 4) -> (16, Cout, Cin) bf16."""
    cin, cout = w.shape[0], w.shape[1]
    return (jnp.transpose(w, (2, 3, 1, 0))
            .reshape(16, cout, cin).astype(jnp.bfloat16))


def _col(v):
    return v.reshape(-1, 1).astype(jnp.float32)


def generator_forward(x, params):
    """x: (N, z_size) -> (out (N, 3, 32, 32), hidden_status (N, 16, 16, 16))."""
    n = x.shape[0]
    m2, m3, m4 = n * 16, n * 64, n * 256
    pad2, pad3, pad4 = 5, 9, 17

    # Constant 0/1 index-plumbing matrices (built with numpy -> folded by XLA).
    p1 = jnp.asarray(_make_l1_scatter(n), jnp.bfloat16)
    p2 = jnp.asarray(_make_phase_scatter(n, 4, 4), jnp.bfloat16)
    p3 = jnp.asarray(_make_phase_scatter(n, 8, 8), jnp.bfloat16)
    msk2 = jnp.asarray(_make_masks(n, 4, 4), jnp.float32)
    msk3 = jnp.asarray(_make_masks(n, 8, 8), jnp.float32)
    msk4 = jnp.asarray(_make_masks(n, 16, 16), jnp.float32)

    out_ph, hid_ph = pl.pallas_call(
        functools.partial(_generator_kernel, batch=n),
        out_shape=(jax.ShapeDtypeStruct((4, 3, m4), jnp.float32),
                   jax.ShapeDtypeStruct((4, 16, m3), jnp.float32)),
        scratch_shapes=[
            pltpu.VMEM((64, 16 * n), jnp.float32),          # layer-1 tap buffer
            pltpu.VMEM((64, m2 + 2 * pad2), jnp.float32),   # layer-2 input + halo
            pltpu.VMEM((32, m3 + 2 * pad3), jnp.float32),   # layer-3 input + halo
            pltpu.VMEM((16, m4 + 2 * pad4), jnp.float32),   # layer-4 input + halo
        ],
    )(x.T.astype(jnp.bfloat16),
      _tap_weights(params["w1"]), _col(params["g1"]), _col(params["be1"]), p1,
      _tap_weights(params["w2"]), _col(params["g2"]), _col(params["be2"]), msk2, p2,
      _tap_weights(params["w3"]), _col(params["g3"]), _col(params["be3"]), msk3, p3,
      _tap_weights(params["w4"]), _col(params["g4"]), _col(params["be4"]), msk4)

    # Phase-separated (2a+b, C, (n,p,q)) -> NCHW (tiny output-side transposes).
    hidden = (hid_ph.reshape(2, 2, 16, n, 8, 8)
              .transpose(3, 2, 4, 0, 5, 1).reshape(n, 16, 16, 16))
    out = (out_ph.reshape(2, 2, 3, n, 16, 16)
           .transpose(3, 2, 4, 0, 5, 1).reshape(n, 3, 32, 32))
    return out, hidden


# ----------------------------------------------------------------------------
def init_params(key, z_size):
    """DCGAN-style init: conv weights ~ N(0, 0.02), BN gamma ~ N(1, 0.02),
    beta = 0.  Conv biases are omitted: they are exactly cancelled by the
    BatchNorm mean subtraction that immediately follows every conv."""
    keys = jax.random.split(key, 8)
    chans = [(z_size, 64), (64, 32), (32, 16), (16, 3)]
    params = {}
    for li, (cin, cout) in enumerate(chans, start=1):
        params[f"w{li}"] = 0.02 * jax.random.normal(
            keys[2 * (li - 1)], (cin, cout, KSIZE, KSIZE), jnp.float32)
        params[f"g{li}"] = 1.0 + 0.02 * jax.random.normal(
            keys[2 * (li - 1) + 1], (cout,), jnp.float32)
        params[f"be{li}"] = jnp.zeros((cout,), jnp.float32)
    return params


if __name__ == "__main__":
    Z_SIZE = 32
    FEATURE_NUM = 16  # unused by forward (mirrors the PyTorch module signature)
    BATCH = 2

    key = jax.random.PRNGKey(0)
    pkey, xkey = jax.random.split(key)
    params = init_params(pkey, Z_SIZE)
    x = jax.random.normal(xkey, (BATCH, Z_SIZE), jnp.float32)

    fwd = jax.jit(lambda xx: generator_forward(xx, params))
    out, hidden = fwd(x)
    out = jax.block_until_ready(out)
    hidden = jax.block_until_ready(hidden)

    assert out.shape == (BATCH, 3, 32, 32), out.shape
    assert hidden.shape == (BATCH, 16, 16, 16), hidden.shape
    assert bool(jnp.all(jnp.isfinite(out)))
    assert bool(jnp.all(jnp.isfinite(hidden)))
    assert bool(jnp.all(jnp.abs(out) <= 1.0 + 1e-6))  # tanh output range

    print("KERNEL_OK")
</pallas_src>

<mosaic_0001>
module attributes {stable_mosaic.version = 11 : i64} {
  func.func @_generator_kernel(%arg0: memref<32x2xbf16, #tpu.memory_space<vmem>>, %arg1: memref<16x64x32xbf16, #tpu.memory_space<vmem>>, %arg2: memref<64x1xf32, #tpu.memory_space<vmem>>, %arg3: memref<64x1xf32, #tpu.memory_space<vmem>>, %arg4: memref<32x32xbf16, #tpu.memory_space<vmem>>, %arg5: memref<16x32x64xbf16, #tpu.memory_space<vmem>>, %arg6: memref<32x1xf32, #tpu.memory_space<vmem>>, %arg7: memref<32x1xf32, #tpu.memory_space<vmem>>, %arg8: memref<9x32xf32, #tpu.memory_space<vmem>>, %arg9: memref<4x32x128xbf16, #tpu.memory_space<vmem>>, %arg10: memref<16x16x32xbf16, #tpu.memory_space<vmem>>, %arg11: memref<16x1xf32, #tpu.memory_space<vmem>>, %arg12: memref<16x1xf32, #tpu.memory_space<vmem>>, %arg13: memref<9x128xf32, #tpu.memory_space<vmem>>, %arg14: memref<4x128x512xbf16, #tpu.memory_space<vmem>>, %arg15: memref<16x3x16xbf16, #tpu.memory_space<vmem>>, %arg16: memref<3x1xf32, #tpu.memory_space<vmem>>, %arg17: memref<3x1xf32, #tpu.memory_space<vmem>>, %arg18: memref<9x512xf32, #tpu.memory_space<vmem>>, %arg19: memref<4x3x512xf32, #tpu.memory_space<vmem>>, %arg20: memref<4x16x128xf32, #tpu.memory_space<vmem>>, %arg21: memref<64x32xf32, #tpu.memory_space<vmem>>, %arg22: memref<64x42xf32, #tpu.memory_space<vmem>>, %arg23: memref<32x146xf32, #tpu.memory_space<vmem>>, %arg24: memref<16x546xf32, #tpu.memory_space<vmem>>) attributes {dimension_semantics = [], scalar_prefetch = 0 : i64, scratch_operands = 4 : i64, tpu.core_type = #tpu.core_type<tc>} {
    %cst = arith.constant 0.000000e+00 : f32
    %0 = vector.broadcast %cst : f32 to vector<64x42xf32>
    %c0 = arith.constant 0 : index
    %c0_0 = arith.constant 0 : index
    %1 = vector.load %arg22[%c0, %c0_0] : memref<64x42xf32, #tpu.memory_space<vmem>>, vector<64x42xf32>
    tpu.vector_store %arg22[%c0, %c0_0], %0 {strides = array<i32>} : memref<64x42xf32, #tpu.memory_space<vmem>>, vector<64x42xf32>,
    %cst_1 = arith.constant 0.000000e+00 : f32
    %2 = vector.broadcast %cst_1 : f32 to vector<32x146xf32>
    %c0_2 = arith.constant 0 : index
    %c0_3 = arith.constant 0 : index
    %3 = vector.load %arg23[%c0_2, %c0_3] : memref<32x146xf32, #tpu.memory_space<vmem>>, vector<32x146xf32>
    tpu.vector_store %arg23[%c0_2, %c0_3], %2 {strides = array<i32>} : memref<32x146xf32, #tpu.memory_space<vmem>>, vector<32x146xf32>,
    %cst_4 = arith.constant 0.000000e+00 : f32
    %4 = vector.broadcast %cst_4 : f32 to vector<16x546xf32>
    %c0_5 = arith.constant 0 : index
    %c0_6 = arith.constant 0 : index
    %5 = vector.load %arg24[%c0_5, %c0_6] : memref<16x546xf32, #tpu.memory_space<vmem>>, vector<16x546xf32>
    tpu.vector_store %arg24[%c0_5, %c0_6], %4 {strides = array<i32>} : memref<16x546xf32, #tpu.memory_space<vmem>>, vector<16x546xf32>,
    %c0_7 = arith.constant 0 : index
    %c0_8 = arith.constant 0 : index
    %6 = vector.load %arg0[%c0_7, %c0_8] : memref<32x2xbf16, #tpu.memory_space<vmem>>, vector<32x2xbf16>
    %c0_9 = arith.constant 0 : index
    %c0_10 = arith.constant 0 : index
    %c0_11 = arith.constant 0 : index
    %7 = vector.load %arg1[%c0_9, %c0_10, %c0_11] : memref<16x64x32xbf16, #tpu.memory_space<vmem>>, vector<1x64x32xbf16>
    %8 = vector.shape_cast %7 : vector<1x64x32xbf16> to vector<64x32xbf16>
    %cst_12 = arith.constant dense<0.000000e+00> : vector<64x2xf32>
    %9 = tpu.matmul %8, %6, %cst_12 {dimension_numbers = #tpu.dot_dimension_numbers<[1], [0], [0], [1], [0, 0, 1, 1], [], []>} : vector<64x32xbf16>, vector<32x2xbf16>, vector<64x2xf32> -> vector<64x2xf32>
    %c0_13 = arith.constant 0 : index
    %c0_14 = arith.constant 0 : index
    %10 = vector.load %arg21[%c0_13, %c0_14] : memref<64x32xf32, #tpu.memory_space<vmem>>, vector<64x2xf32>
    tpu.vector_store %arg21[%c0_13, %c0_14], %9 {strides = array<i32>} : memref<64x32xf32, #tpu.memory_space<vmem>>, vector<64x2xf32>,
    %c1 = arith.constant 1 : index
    %c0_15 = arith.constant 0 : index
    %c0_16 = arith.constant 0 : index
    %11 = vector.load %arg1[%c1, %c0_15, %c0_16] : memref<16x64x32xbf16, #tpu.memory_space<vmem>>, vector<1x64x32xbf16>
    %12 = vector.shape_cast %11 : vector<1x64x32xbf16> to vector<64x32xbf16>
    %cst_17 = arith.constant dense<0.000000e+00> : vector<64x2xf32>
    %13 = tpu.matmul %12, %6, %cst_17 {dimension_numbers = #tpu.dot_dimension_numbers<[1], [0], [0], [1], [0, 0, 1, 1], [], []>} : vector<64x32xbf16>, vector<32x2xbf16>, vector<64x2xf32> -> vector<64x2xf32>
    %c0_18 = arith.constant 0 : index
    %c2 = arith.constant 2 : index
    %14 = vector.load %arg21[%c0_18, %c2] : memref<64x32xf32, #tpu.memory_space<vmem>>, vector<64x2xf32>
    tpu.vector_store %arg21[%c0_18, %c2], %13 {strides = array<i32>} : memref<64x32xf32, #tpu.memory_space<vmem>>, vector<64x2xf32>,
    %c2_19 = arith.constant 2 : index
    %c0_20 = arith.constant 0 : index
    %c0_21 = arith.constant 0 : index
    %15 = vector.load %arg1[%c2_19, %c0_20, %c0_21] : memref<16x64x32xbf16, #tpu.memory_space<vmem>>, vector<1x64x32xbf16>
    %16 = vector.shape_cast %15 : vector<1x64x32xbf16> to vector<64x32xbf16>
    %cst_22 = arith.constant dense<0.000000e+00> : vector<64x2xf32>
    %17 = tpu.matmul %16, %6, %cst_22 {dimension_numbers = #tpu.dot_dimension_numbers<[1], [0], [0], [1], [0, 0, 1, 1], [], []>} : vector<64x32xbf16>, vector<32x2xbf16>, vector<64x2xf32> -> vector<64x2xf32>
    %c0_23 = arith.constant 0 : index
    %c4 = arith.constant 4 : index
    %18 = vector.load %arg21[%c0_23, %c4] : memref<64x32xf32, #tpu.memory_space<vmem>>, vector<64x2xf32>
    tpu.vector_store %arg21[%c0_23, %c4], %17 {strides = array<i32>} : memref<64x32xf32, #tpu.memory_space<vmem>>, vector<64x2xf32>,
    %c3 = arith.constant 3 : index
    %c0_24 = arith.constant 0 : index
    %c0_25 = arith.constant 0 : index
    %19 = vector.load %arg1[%c3, %c0_24, %c0_25] : memref<16x64x32xbf16, #tpu.memory_space<vmem>>, vector<1x64x32xbf16>
    %20 = vector.shape_cast %19 : vector<1x64x32xbf16> to vector<64x32xbf16>
    %cst_26 = arith.constant dense<0.000000e+00> : vector<64x2xf32>
    %21 = tpu.matmul %20, %6, %cst_26 {dimension_numbers = #tpu.dot_dimension_numbers<[1], [0], [0], [1], [0, 0, 1, 1], [], []>} : vector<64x32xbf16>, vector<32x2xbf16>, vector<64x2xf32> -> vector<64x2xf32>
    %c0_27 = arith.constant 0 : index
    %c6 = arith.constant 6 : index
    %22 = vector.load %arg21[%c0_27, %c6] : memref<64x32xf32, #tpu.memory_space<vmem>>, vector<64x2xf32>
    tpu.vector_store %arg21[%c0_27, %c6], %21 {strides = array<i32>} : memref<64x32xf32, #tpu.memory_space<vmem>>, vector<64x2xf32>,
    %c4_28 = arith.constant 4 : index
    %c0_29 = arith.constant 0 : index
    %c0_30 = arith.constant 0 : index
    %23 = vector.load %arg1[%c4_28, %c0_29, %c0_30] : memref<16x64x32xbf16, #tpu.memory_space<vmem>>, vector<1x64x32xbf16>
    %24 = vector.shape_cast %23 : vector<1x64x32xbf16> to vector<64x32xbf16>
    %cst_31 = arith.constant dense<0.000000e+00> : vector<64x2xf32>
    %25 = tpu.matmul %24, %6, %cst_31 {dimension_numbers = #tpu.dot_dimension_numbers<[1], [0], [0], [1], [0, 0, 1, 1], [], []>} : vector<64x32xbf16>, vector<32x2xbf16>, vector<64x2xf32> -> vector<64x2xf32>
    %c0_32 = arith.constant 0 : index
    %c8 = arith.constant 8 : index
    %26 = vector.load %arg21[%c0_32, %c8] : memref<64x32xf32, #tpu.memory_space<vmem>>, vector<64x2xf32>
    tpu.vector_store %arg21[%c0_32, %c8], %25 {strides = array<i32>} : memref<64x32xf32, #tpu.memory_space<vmem>>, vector<64x2xf32>,
    %c5 = arith.constant 5 : index
    %c0_33 = arith.constant 0 : index
    %c0_34 = arith.constant 0 : index
    %27 = vector.load %arg1[%c5, %c0_33, %c0_34] : memref<16x64x32xbf16, #tpu.memory_space<vmem>>, vector<1x64x32xbf16>
    %28 = vector.shape_cast %27 : vector<1x64x32xbf16> to vector<64x32xbf16>
    %cst_35 = arith.constant dense<0.000000e+00> : vector<64x2xf32>
    %29 = tpu.matmul %28, %6, %cst_35 {dimension_numbers = #tpu.dot_dimension_numbers<[1], [0], [0], [1], [0, 0, 1, 1], [], []>} : vector<64x32xbf16>, vector<32x2xbf16>, vector<64x2xf32> -> vector<64x2xf32>
    %c0_36 = arith.constant 0 : index
    %c10 = arith.constant 10 : index
    %30 = vector.load %arg21[%c0_36, %c10] : memref<64x32xf32, #tpu.memory_space<vmem>>, vector<64x2xf32>
    tpu.vector_store %arg21[%c0_36, %c10], %29 {strides = array<i32>} : memref<64x32xf32, #tpu.memory_space<vmem>>, vector<64x2xf32>,
    %c6_37 = arith.constant 6 : index
    %c0_38 = arith.constant 0 : index
    %c0_39 = arith.constant 0 : index
    %31 = vector.load %arg1[%c6_37, %c0_38, %c0_39] : memref<16x64x32xbf16, #tpu.memory_space<vmem>>, vector<1x64x32xbf16>
    %32 = vector.shape_cast %31 : vector<1x64x32xbf16> to vector<64x32xbf16>
    %cst_40 = arith.constant dense<0.000000e+00> : vector<64x2xf32>
    %33 = tpu.matmul %32, %6, %cst_40 {dimension_numbers = #tpu.dot_dimension_numbers<[1], [0], [0], [1], [0, 0, 1, 1], [], []>} : vector<64x32xbf16>, vector<32x2xbf16>, vector<64x2xf32> -> vector<64x2xf32>
    %c0_41 = arith.constant 0 : index
    %c12 = arith.constant 12 : index
    %34 = vector.load %arg21[%c0_41, %c12] : memref<64x32xf32, #tpu.memory_space<vmem>>, vector<64x2xf32>
    tpu.vector_store %arg21[%c0_41, %c12], %33 {strides = array<i32>} : memref<64x32xf32, #tpu.memory_space<vmem>>, vector<64x2xf32>,
    %c7 = arith.constant 7 : index
    %c0_42 = arith.constant 0 : index
    %c0_43 = arith.constant 0 : index
    %35 = vector.load %arg1[%c7, %c0_42, %c0_43] : memref<16x64x32xbf16, #tpu.memory_space<vmem>>, vector<1x64x32xbf16>
    %36 = vector.shape_cast %35 : vector<1x64x32xbf16> to vector<64x32xbf16>
    %cst_44 = arith.constant dense<0.000000e+00> : vector<64x2xf32>
    %37 = tpu.matmul %36, %6, %cst_44 {dimension_numbers = #tpu.dot_dimension_numbers<[1], [0], [0], [1], [0, 0, 1, 1], [], []>} : vector<64x32xbf16>, vector<32x2xbf16>, vector<64x2xf32> -> vector<64x2xf32>
    %c0_45 = arith.constant 0 : index
    %c14 = arith.constant 14 : index
    %38 = vector.load %arg21[%c0_45, %c14] : memref<64x32xf32, #tpu.memory_space<vmem>>, vector<64x2xf32>
    tpu.vector_store %arg21[%c0_45, %c14], %37 {strides = array<i32>} : memref<64x32xf32, #tpu.memory_space<vmem>>, vector<64x2xf32>,
    %c8_46 = arith.constant 8 : index
    %c0_47 = arith.constant 0 : index
    %c0_48 = arith.constant 0 : index
    %39 = vector.load %arg1[%c8_46, %c0_47, %c0_48] : memref<16x64x32xbf16, #tpu.memory_space<vmem>>, vector<1x64x32xbf16>
    %40 = vector.shape_cast %39 : vector<1x64x32xbf16> to vector<64x32xbf16>
    %cst_49 = arith.constant dense<0.000000e+00> : vector<64x2xf32>
    %41 = tpu.matmul %40, %6, %cst_49 {dimension_numbers = #tpu.dot_dimension_numbers<[1], [0], [0], [1], [0, 0, 1, 1], [], []>} : vector<64x32xbf16>, vector<32x2xbf16>, vector<64x2xf32> -> vector<64x2xf32>
    %c0_50 = arith.constant 0 : index
    %c16 = arith.constant 16 : index
    %42 = vector.load %arg21[%c0_50, %c16] : memref<64x32xf32, #tpu.memory_space<vmem>>, vector<64x2xf32>
    tpu.vector_store %arg21[%c0_50, %c16], %41 {strides = array<i32>} : memref<64x32xf32, #tpu.memory_space<vmem>>, vector<64x2xf32>,
    %c9 = arith.constant 9 : index
    %c0_51 = arith.constant 0 : index
    %c0_52 = arith.constant 0 : index
    %43 = vector.load %arg1[%c9, %c0_51, %c0_52] : memref<16x64x32xbf16, #tpu.memory_space<vmem>>, vector<1x64x32xbf16>
    %44 = vector.shape_cast %43 : vector<1x64x32xbf16> to vector<64x32xbf16>
    %cst_53 = arith.constant dense<0.000000e+00> : vector<64x2xf32>
    %45 = tpu.matmul %44, %6, %cst_53 {dimension_numbers = #tpu.dot_dimension_numbers<[1], [0], [0], [1], [0, 0, 1, 1], [], []>} : vector<64x32xbf16>, vector<32x2xbf16>, vector<64x2xf32> -> vector<64x2xf32>
    %c0_54 = arith.constant 0 : index
    %c18 = arith.constant 18 : index
    %46 = vector.load %arg21[%c0_54, %c18] : memref<64x32xf32, #tpu.memory_space<vmem>>, vector<64x2xf32>
    tpu.vector_store %arg21[%c0_54, %c18], %45 {strides = array<i32>} : memref<64x32xf32, #tpu.memory_space<vmem>>, vector<64x2xf32>,
    %c10_55 = arith.constant 10 : index
    %c0_56 = arith.constant 0 : index
    %c0_57 = arith.constant 0 : index
    %47 = vector.load %arg1[%c10_55, %c0_56, %c0_57] : memref<16x64x32xbf16, #tpu.memory_space<vmem>>, vector<1x64x32xbf16>
    %48 = vector.shape_cast %47 : vector<1x64x32xbf16> to vector<64x32xbf16>
    %cst_58 = arith.constant dense<0.000000e+00> : vector<64x2xf32>
    %49 = tpu.matmul %48, %6, %cst_58 {dimension_numbers = #tpu.dot_dimension_numbers<[1], [0], [0], [1], [0, 0, 1, 1], [], []>} : vector<64x32xbf16>, vector<32x2xbf16>, vector<64x2xf32> -> vector<64x2xf32>
    %c0_59 = arith.constant 0 : index
    %c20 = arith.constant 20 : index
    %50 = vector.load %arg21[%c0_59, %c20] : memref<64x32xf32, #tpu.memory_space<vmem>>, vector<64x2xf32>
    tpu.vector_store %arg21[%c0_59, %c20], %49 {strides = array<i32>} : memref<64x32xf32, #tpu.memory_space<vmem>>, vector<64x2xf32>,
    %c11 = arith.constant 11 : index
    %c0_60 = arith.constant 0 : index
    %c0_61 = arith.constant 0 : index
    %51 = vector.load %arg1[%c11, %c0_60, %c0_61] : memref<16x64x32xbf16, #tpu.memory_space<vmem>>, vector<1x64x32xbf16>
    %52 = vector.shape_cast %51 : vector<1x64x32xbf16> to vector<64x32xbf16>
    %cst_62 = arith.constant dense<0.000000e+00> : vector<64x2xf32>
    %53 = tpu.matmul %52, %6, %cst_62 {dimension_numbers = #tpu.dot_dimension_numbers<[1], [0], [0], [1], [0, 0, 1, 1], [], []>} : vector<64x32xbf16>, vector<32x2xbf16>, vector<64x2xf32> -> vector<64x2xf32>
    %c0_63 = arith.constant 0 : index
    %c22 = arith.constant 22 : index
    %54 = vector.load %arg21[%c0_63, %c22] : memref<64x32xf32, #tpu.memory_space<vmem>>, vector<64x2xf32>
    tpu.vector_store %arg21[%c0_63, %c22], %53 {strides = array<i32>} : memref<64x32xf32, #tpu.memory_space<vmem>>, vector<64x2xf32>,
    %c12_64 = arith.constant 12 : index
    %c0_65 = arith.constant 0 : index
    %c0_66 = arith.constant 0 : index
    %55 = vector.load %arg1[%c12_64, %c0_65, %c0_66] : memref<16x64x32xbf16, #tpu.memory_space<vmem>>, vector<1x64x32xbf16>
    %56 = vector.shape_cast %55 : vector<1x64x32xbf16> to vector<64x32xbf16>
    %cst_67 = arith.constant dense<0.000000e+00> : vector<64x2xf32>
    %57 = tpu.matmul %56, %6, %cst_67 {dimension_numbers = #tpu.dot_dimension_numbers<[1], [0], [0], [1], [0, 0, 1, 1], [], []>} : vector<64x32xbf16>, vector<32x2xbf16>, vector<64x2xf32> -> vector<64x2xf32>
    %c0_68 = arith.constant 0 : index
    %c24 = arith.constant 24 : index
    %58 = vector.load %arg21[%c0_68, %c24] : memref<64x32xf32, #tpu.memory_space<vmem>>, vector<64x2xf32>
    tpu.vector_store %arg21[%c0_68, %c24], %57 {strides = array<i32>} : memref<64x32xf32, #tpu.memory_space<vmem>>, vector<64x2xf32>,
    %c13 = arith.constant 13 : index
    %c0_69 = arith.constant 0 : index
    %c0_70 = arith.constant 0 : index
    %59 = vector.load %arg1[%c13, %c0_69, %c0_70] : memref<16x64x32xbf16, #tpu.memory_space<vmem>>, vector<1x64x32xbf16>
    %60 = vector.shape_cast %59 : vector<1x64x32xbf16> to vector<64x32xbf16>
    %cst_71 = arith.constant dense<0.000000e+00> : vector<64x2xf32>
    %61 = tpu.matmul %60, %6, %cst_71 {dimension_numbers = #tpu.dot_dimension_numbers<[1], [0], [0], [1], [0, 0, 1, 1], [], []>} : vector<64x32xbf16>, vector<32x2xbf16>, vector<64x2xf32> -> vector<64x2xf32>
    %c0_72 = arith.constant 0 : index
    %c26 = arith.constant 26 : index
    %62 = vector.load %arg21[%c0_72, %c26] : memref<64x32xf32, #tpu.memory_space<vmem>>, vector<64x2xf32>
    tpu.vector_store %arg21[%c0_72, %c26], %61 {strides = array<i32>} : memref<64x32xf32, #tpu.memory_space<vmem>>, vector<64x2xf32>,
    %c14_73 = arith.constant 14 : index
    %c0_74 = arith.constant 0 : index
    %c0_75 = arith.constant 0 : index
    %63 = vector.load %arg1[%c14_73, %c0_74, %c0_75] : memref<16x64x32xbf16, #tpu.memory_space<vmem>>, vector<1x64x32xbf16>
    %64 = vector.shape_cast %63 : vector<1x64x32xbf16> to vector<64x32xbf16>
    %cst_76 = arith.constant dense<0.000000e+00> : vector<64x2xf32>
    %65 = tpu.matmul %64, %6, %cst_76 {dimension_numbers = #tpu.dot_dimension_numbers<[1], [0], [0], [1], [0, 0, 1, 1], [], []>} : vector<64x32xbf16>, vector<32x2xbf16>, vector<64x2xf32> -> vector<64x2xf32>
    %c0_77 = arith.constant 0 : index
    %c28 = arith.constant 28 : index
    %66 = vector.load %arg21[%c0_77, %c28] : memref<64x32xf32, #tpu.memory_space<vmem>>, vector<64x2xf32>
    tpu.vector_store %arg21[%c0_77, %c28], %65 {strides = array<i32>} : memref<64x32xf32, #tpu.memory_space<vmem>>, vector<64x2xf32>,
    %c15 = arith.constant 15 : index
    %c0_78 = arith.constant 0 : index
    %c0_79 = arith.constant 0 : index
    %67 = vector.load %arg1[%c15, %c0_78, %c0_79] : memref<16x64x32xbf16, #tpu.memory_space<vmem>>, vector<1x64x32xbf16>
    %68 = vector.shape_cast %67 : vector<1x64x32xbf16> to vector<64x32xbf16>
    %cst_80 = arith.constant dense<0.000000e+00> : vector<64x2xf32>
    %69 = tpu.matmul %68, %6, %cst_80 {dimension_numbers = #tpu.dot_dimension_numbers<[1], [0], [0], [1], [0, 0, 1, 1], [], []>} : vector<64x32xbf16>, vector<32x2xbf16>, vector<64x2xf32> -> vector<64x2xf32>
    %c0_81 = arith.constant 0 : index
    %c30 = arith.constant 30 : index
    %70 = vector.load %arg21[%c0_81, %c30] : memref<64x32xf32, #tpu.memory_space<vmem>>, vector<64x2xf32>
    tpu.vector_store %arg21[%c0_81, %c30], %69 {strides = array<i32>} : memref<64x32xf32, #tpu.memory_space<vmem>>, vector<64x2xf32>,
    %c0_82 = arith.constant 0 : index
    %c0_83 = arith.constant 0 : index
    %71 = vector.load %arg21[%c0_82, %c0_83] : memref<64x32xf32, #tpu.memory_space<vmem>>, vector<64x32xf32>
    %c0_84 = arith.constant 0 : index
    %c0_85 = arith.constant 0 : index
    %72 = vector.load %arg2[%c0_84, %c0_85] : memref<64x1xf32, #tpu.memory_space<vmem>>, vector<64x1xf32>
    %c0_86 = arith.constant 0 : index
    %c0_87 = arith.constant 0 : index
    %73 = vector.load %arg3[%c0_86, %c0_87] : memref<64x1xf32, #tpu.memory_space<vmem>>, vector<64x1xf32>
    %cst_88 = arith.constant dense<0.000000e+00> : vector<64xf32>
    %74 = vector.multi_reduction <add>, %71, %cst_88 [1] : vector<64x32xf32> to vector<64xf32>
    %75 = vector.shape_cast %74 : vector<64xf32> to vector<64x1xf32>
    %cst_89 = arith.constant 3.200000e+01 : f32
    %76 = vector.broadcast %cst_89 : f32 to vector<64x1xf32>
    %77 = arith.divf %75, %76 : vector<64x1xf32>
    %78 = vector.broadcast %77 : vector<64x1xf32> to vector<64x32xf32>
    %79 = arith.subf %71, %78 : vector<64x32xf32>
    %80 = arith.mulf %79, %79 : vector<64x32xf32>
    %cst_90 = arith.constant dense<0.000000e+00> : vector<64xf32>
    %81 = vector.multi_reduction <add>, %80, %cst_90 [1] : vector<64x32xf32> to vector<64xf32>
    %82 = vector.shape_cast %81 : vector<64xf32> to vector<64x1xf32>
    %cst_91 = arith.constant 3.200000e+01 : f32
    %83 = vector.broadcast %cst_91 : f32 to vector<64x1xf32>
    %84 = arith.divf %82, %83 : vector<64x1xf32>
    %cst_92 = arith.constant 9.99999974E-6 : f32
    %85 = vector.broadcast %cst_92 : f32 to vector<64x1xf32>
    %86 = arith.addf %84, %85 : vector<64x1xf32>
    %87 = math.rsqrt %86 : vector<64x1xf32>
    %88 = arith.mulf %72, %87 : vector<64x1xf32>
    %89 = arith.mulf %77, %88 : vector<64x1xf32>
    %90 = arith.subf %73, %89 : vector<64x1xf32>
    %91 = vector.broadcast %88 : vector<64x1xf32> to vector<64x32xf32>
    %92 = arith.mulf %71, %91 : vector<64x32xf32>
    %93 = vector.broadcast %90 : vector<64x1xf32> to vector<64x32xf32>
    %94 = arith.addf %92, %93 : vector<64x32xf32>
    %cst_93 = arith.constant 0.000000e+00 : f32
    %95 = vector.broadcast %cst_93 : f32 to vector<64x32xf32>
    %96 = arith.cmpf oge, %94, %95 : vector<64x32xf32>
    %cst_94 = arith.constant 2.000000e-01 : f32
    %97 = vector.broadcast %cst_94 : f32 to vector<64x32xf32>
    %98 = arith.mulf %97, %94 : vector<64x32xf32>
    %99 = arith.select %96, %94, %98 : vector<64x32xi1>, vector<64x32xf32>
    %100 = arith.truncf %99 : vector<64x32xf32> to vector<64x32xbf16>
    %c0_95 = arith.constant 0 : index
    %c0_96 = arith.constant 0 : index
    %101 = vector.load %arg4[%c0_95, %c0_96] : memref<32x32xbf16, #tpu.memory_space<vmem>>, vector<32x32xbf16>
    %cst_97 = arith.constant dense<0.000000e+00> : vector<64x32xf32>
    %102 = tpu.matmul %100, %101, %cst_97 {dimension_numbers = #tpu.dot_dimension_numbers<[1], [0], [0], [1], [0, 0, 1, 1], [], []>} : vector<64x32xbf16>, vector<32x32xbf16>, vector<64x32xf32> -> vector<64x32xf32>
    %c0_98 = arith.constant 0 : index
    %c5_99 = arith.constant 5 : index
    %103 = vector.load %arg22[%c0_98, %c5_99] : memref<64x42xf32, #tpu.memory_space<vmem>>, vector<64x32xf32>
    tpu.vector_store %arg22[%c0_98, %c5_99], %102 {strides = array<i32>} : memref<64x42xf32, #tpu.memory_space<vmem>>, vector<64x32xf32>,
    %c0_100 = arith.constant 0 : index
    %c0_101 = arith.constant 0 : index
    %104 = vector.load %arg22[%c0_100, %c0_101] : memref<64x42xf32, #tpu.memory_space<vmem>>, vector<64x32xf32>
    %c0_102 = arith.constant 0 : index
    %c0_103 = arith.constant 0 : index
    %105 = vector.load %arg8[%c0_102, %c0_103] : memref<9x32xf32, #tpu.memory_space<vmem>>, vector<1x32xf32>
    %106 = vector.broadcast %105 : vector<1x32xf32> to vector<64x32xf32>
    %107 = arith.mulf %104, %106 : vector<64x32xf32>
    %108 = arith.truncf %107 : vector<64x32xf32> to vector<64x32xbf16>
    %c0_104 = arith.constant 0 : index
    %c1_105 = arith.constant 1 : index
    %109 = vector.load %arg22[%c0_104, %c1_105] : memref<64x42xf32, #tpu.memory_space<vmem>>, vector<64x32xf32>
    %c1_106 = arith.constant 1 : index
    %c0_107 = arith.constant 0 : index
    %110 = vector.load %arg8[%c1_106, %c0_107] : memref<9x32xf32, #tpu.memory_space<vmem>>, vector<1x32xf32>
    %111 = vector.broadcast %110 : vector<1x32xf32> to vector<64x32xf32>
    %112 = arith.mulf %109, %111 : vector<64x32xf32>
    %113 = arith.truncf %112 : vector<64x32xf32> to vector<64x32xbf16>
    %c0_108 = arith.constant 0 : index
    %c2_109 = arith.constant 2 : index
    %114 = vector.load %arg22[%c0_108, %c2_109] : memref<64x42xf32, #tpu.memory_space<vmem>>, vector<64x32xf32>
    %c2_110 = arith.constant 2 : index
    %c0_111 = arith.constant 0 : index
    %115 = vector.load %arg8[%c2_110, %c0_111] : memref<9x32xf32, #tpu.memory_space<vmem>>, vector<1x32xf32>
    %116 = vector.broadcast %115 : vector<1x32xf32> to vector<64x32xf32>
    %117 = arith.mulf %114, %116 : vector<64x32xf32>
    %118 = arith.truncf %117 : vector<64x32xf32> to vector<64x32xbf16>
    %c0_112 = arith.constant 0 : index
    %c4_113 = arith.constant 4 : index
    %119 = vector.load %arg22[%c0_112, %c4_113] : memref<64x42xf32, #tpu.memory_space<vmem>>, vector<64x32xf32>
    %c3_114 = arith.constant 3 : index
    %c0_115 = arith.constant 0 : index
    %120 = vector.load %arg8[%c3_114, %c0_115] : memref<9x32xf32, #tpu.memory_space<vmem>>, vector<1x32xf32>
    %121 = vector.broadcast %120 : vector<1x32xf32> to vector<64x32xf32>
    %122 = arith.mulf %119, %121 : vector<64x32xf32>
    %123 = arith.truncf %122 : vector<64x32xf32> to vector<64x32xbf16>
    %c0_116 = arith.constant 0 : index
    %c5_117 = arith.constant 5 : index
    %124 = vector.load %arg22[%c0_116, %c5_117] : memref<64x42xf32, #tpu.memory_space<vmem>>, vector<64x32xf32>
    %c4_118 = arith.constant 4 : index
    %c0_119 = arith.constant 0 : index
    %125 = vector.load %arg8[%c4_118, %c0_119] : memref<9x32xf32, #tpu.memory_space<vmem>>, vector<1x32xf32>
    %126 = vector.broadcast %125 : vector<1x32xf32> to vector<64x32xf32>
    %127 = arith.mulf %124, %126 : vector<64x32xf32>
    %128 = arith.truncf %127 : vector<64x32xf32> to vector<64x32xbf16>
    %c0_120 = arith.constant 0 : index
    %c6_121 = arith.constant 6 : index
    %129 = vector.load %arg22[%c0_120, %c6_121] : memref<64x42xf32, #tpu.memory_space<vmem>>, vector<64x32xf32>
    %c5_122 = arith.constant 5 : index
    %c0_123 = arith.constant 0 : index
    %130 = vector.load %arg8[%c5_122, %c0_123] : memref<9x32xf32, #tpu.memory_space<vmem>>, vector<1x32xf32>
    %131 = vector.broadcast %130 : vector<1x32xf32> to vector<64x32xf32>
    %132 = arith.mulf %129, %131 : vector<64x32xf32>
    %133 = arith.truncf %132 : vector<64x32xf32> to vector<64x32xbf16>
    %c0_124 = arith.constant 0 : index
    %c8_125 = arith.constant 8 : index
    %134 = vector.load %arg22[%c0_124, %c8_125] : memref<64x42xf32, #tpu.memory_space<vmem>>, vector<64x32xf32>
    %c6_126 = arith.constant 6 : index
    %c0_127 = arith.constant 0 : index
    %135 = vector.load %arg8[%c6_126, %c0_127] : memref<9x32xf32, #tpu.memory_space<vmem>>, vector<1x32xf32>
    %136 = vector.broadcast %135 : vector<1x32xf32> to vector<64x32xf32>
    %137 = arith.mulf %134, %136 : vector<64x32xf32>
    %138 = arith.truncf %137 : vector<64x32xf32> to vector<64x32xbf16>
    %c0_128 = arith.constant 0 : index
    %c9_129 = arith.constant 9 : index
    %139 = vector.load %arg22[%c0_128, %c9_129] : memref<64x42xf32, #tpu.memory_space<vmem>>, vector<64x32xf32>
    %c7_130 = arith.constant 7 : index
    %c0_131 = arith.constant 0 : index
    %140 = vector.load %arg8[%c7_130, %c0_131] : memref<9x32xf32, #tpu.memory_space<vmem>>, vector<1x32xf32>
    %141 = vector.broadcast %140 : vector<1x32xf32> to vector<64x32xf32>
    %142 = arith.mulf %139, %141 : vector<64x32xf32>
    %143 = arith.truncf %142 : vector<64x32xf32> to vector<64x32xbf16>
    %c0_132 = arith.constant 0 : index
    %c10_133 = arith.constant 10 : index
    %144 = vector.load %arg22[%c0_132, %c10_133] : memref<64x42xf32, #tpu.memory_space<vmem>>, vector<64x32xf32>
    %c8_134 = arith.constant 8 : index
    %c0_135 = arith.constant 0 : index
    %145 = vector.load %arg8[%c8_134, %c0_135] : memref<9x32xf32, #tpu.memory_space<vmem>>, vector<1x32xf32>
    %146 = vector.broadcast %145 : vector<1x32xf32> to vector<64x32xf32>
    %147 = arith.mulf %144, %146 : vector<64x32xf32>
    %148 = arith.truncf %147 : vector<64x32xf32> to vector<64x32xbf16>
    %c5_136 = arith.constant 5 : index
    %c0_137 = arith.constant 0 : index
    %c0_138 = arith.constant 0 : index
    %149 = vector.load %arg5[%c5_136, %c0_137, %c0_138] : memref<16x32x64xbf16, #tpu.memory_space<vmem>>, vector<1x32x64xbf16>
    %150 = vector.shape_cast %149 : vector<1x32x64xbf16> to vector<32x64xbf16>
    %cst_139 = arith.constant dense<0.000000e+00> : vector<32x32xf32>
    %151 = tpu.matmul %150, %128, %cst_139 {dimension_numbers = #tpu.dot_dimension_numbers<[1], [0], [0], [1], [0, 0, 1, 1], [], []>} : vector<32x64xbf16>, vector<64x32xbf16>, vector<32x32xf32> -> vector<32x32xf32>
    %c7_140 = arith.constant 7 : index
    %c0_141 = arith.constant 0 : index
    %c0_142 = arith.constant 0 : index
    %152 = vector.load %arg5[%c7_140, %c0_141, %c0_142] : memref<16x32x64xbf16, #tpu.memory_space<vmem>>, vector<1x32x64xbf16>
    %153 = vector.shape_cast %152 : vector<1x32x64xbf16> to vector<32x64xbf16>
    %cst_143 = arith.constant dense<0.000000e+00> : vector<32x32xf32>
    %154 = tpu.matmul %153, %123, %cst_143 {dimension_numbers = #tpu.dot_dimension_numbers<[1], [0], [0], [1], [0, 0, 1, 1], [], []>} : vector<32x64xbf16>, vector<64x32xbf16>, vector<32x32xf32> -> vector<32x32xf32>
    %155 = arith.addf %151, %154 : vector<32x32xf32>
    %c13_144 = arith.constant 13 : index
    %c0_145 = arith.constant 0 : index
    %c0_146 = arith.constant 0 : index
    %156 = vector.load %arg5[%c13_144, %c0_145, %c0_146] : memref<16x32x64xbf16, #tpu.memory_space<vmem>>, vector<1x32x64xbf16>
    %157 = vector.shape_cast %156 : vector<1x32x64xbf16> to vector<32x64xbf16>
    %cst_147 = arith.constant dense<0.000000e+00> : vector<32x32xf32>
    %158 = tpu.matmul %157, %113, %cst_147 {dimension_numbers = #tpu.dot_dimension_numbers<[1], [0], [0], [1], [0, 0, 1, 1], [], []>} : vector<32x64xbf16>, vector<64x32xbf16>, vector<32x32xf32> -> vector<32x32xf32>
    %159 = arith.addf %155, %158 : vector<32x32xf32>
    %c15_148 = arith.constant 15 : index
    %c0_149 = arith.constant 0 : index
    %c0_150 = arith.constant 0 : index
    %160 = vector.load %arg5[%c15_148, %c0_149, %c0_150] : memref<16x32x64xbf16, #tpu.memory_space<vmem>>, vector<1x32x64xbf16>
    %161 = vector.shape_cast %160 : vector<1x32x64xbf16> to vector<32x64xbf16>
    %cst_151 = arith.constant dense<0.000000e+00> : vector<32x32xf32>
    %162 = tpu.matmul %161, %108, %cst_151 {dimension_numbers = #tpu.dot_dimension_numbers<[1], [0], [0], [1], [0, 0, 1, 1], [], []>} : vector<32x64xbf16>, vector<64x32xbf16>, vector<32x32xf32> -> vector<32x32xf32>
    %163 = arith.addf %159, %162 : vector<32x32xf32>
    %c6_152 = arith.constant 6 : index
    %c0_153 = arith.constant 0 : index
    %c0_154 = arith.constant 0 : index
    %164 = vector.load %arg5[%c6_152, %c0_153, %c0_154] : memref<16x32x64xbf16, #tpu.memory_space<vmem>>, vector<1x32x64xbf16>
    %165 = vector.shape_cast %164 : vector<1x32x64xbf16> to vector<32x64xbf16>
    %cst_155 = arith.constant dense<0.000000e+00> : vector<32x32xf32>
    %166 = tpu.matmul %165, %128, %cst_155 {dimension_numbers = #tpu.dot_dimension_numbers<[1], [0], [0], [1], [0, 0, 1, 1], [], []>} : vector<32x64xbf16>, vector<64x32xbf16>, vector<32x32xf32> -> vector<32x32xf32>
    %c4_156 = arith.constant 4 : index
    %c0_157 = arith.constant 0 : index
    %c0_158 = arith.constant 0 : index
    %167 = vector.load %arg5[%c4_156, %c0_157, %c0_158] : memref<16x32x64xbf16, #tpu.memory_space<vmem>>, vector<1x32x64xbf16>
    %168 = vector.shape_cast %167 : vector<1x32x64xbf16> to vector<32x64xbf16>
    %cst_159 = arith.constant dense<0.000000e+00> : vector<32x32xf32>
    %169 = tpu.matmul %168, %133, %cst_159 {dimension_numbers = #tpu.dot_dimension_numbers<[1], [0], [0], [1], [0, 0, 1, 1], [], []>} : vector<32x64xbf16>, vector<64x32xbf16>, vector<32x32xf32> -> vector<32x32xf32>
    %170 = arith.addf %166, %169 : vector<32x32xf32>
    %c14_160 = arith.constant 14 : index
    %c0_161 = arith.constant 0 : index
    %c0_162 = arith.constant 0 : index
    %171 = vector.load %arg5[%c14_160, %c0_161, %c0_162] : memref<16x32x64xbf16, #tpu.memory_space<vmem>>, vector<1x32x64xbf16>
    %172 = vector.shape_cast %171 : vector<1x32x64xbf16> to vector<32x64xbf16>
    %cst_163 = arith.constant dense<0.000000e+00> : vector<32x32xf32>
    %173 = tpu.matmul %172, %113, %cst_163 {dimension_numbers = #tpu.dot_dimension_numbers<[1], [0], [0], [1], [0, 0, 1, 1], [], []>} : vector<32x64xbf16>, vector<64x32xbf16>, vector<32x32xf32> -> vector<32x32xf32>
    %174 = arith.addf %170, %173 : vector<32x32xf32>
    %c12_164 = arith.constant 12 : index
    %c0_165 = arith.constant 0 : index
    %c0_166 = arith.constant 0 : index
    %175 = vector.load %arg5[%c12_164, %c0_165, %c0_166] : memref<16x32x64xbf16, #tpu.memory_space<vmem>>, vector<1x32x64xbf16>
    %176 = vector.shape_cast %175 : vector<1x32x64xbf16> to vector<32x64xbf16>
    %cst_167 = arith.constant dense<0.000000e+00> : vector<32x32xf32>
    %177 = tpu.matmul %176, %118, %cst_167 {dimension_numbers = #tpu.dot_dimension_numbers<[1], [0], [0], [1], [0, 0, 1, 1], [], []>} : vector<32x64xbf16>, vector<64x32xbf16>, vector<32x32xf32> -> vector<32x32xf32>
    %178 = arith.addf %174, %177 : vector<32x32xf32>
    %c9_168 = arith.constant 9 : index
    %c0_169 = arith.constant 0 : index
    %c0_170 = arith.constant 0 : index
    %179 = vector.load %arg5[%c9_168, %c0_169, %c0_170] : memref<16x32x64xbf16, #tpu.memory_space<vmem>>, vector<1x32x64xbf16>
    %180 = vector.shape_cast %179 : vector<1x32x64xbf16> to vector<32x64xbf16>
    %cst_171 = arith.constant dense<0.000000e+00> : vector<32x32xf32>
    %181 = tpu.matmul %180, %128, %cst_171 {dimension_numbers = #tpu.dot_dimension_numbers<[1], [0], [0], [1], [0, 0, 1, 1], [], []>} : vector<32x64xbf16>, vector<64x32xbf16>, vector<32x32xf32> -> vector<32x32xf32>
    %c11_172 = arith.constant 11 : index
    %c0_173 = arith.constant 0 : index
    %c0_174 = arith.constant 0 : index
    %182 = vector.load %arg5[%c11_172, %c0_173, %c0_174] : memref<16x32x64xbf16, #tpu.memory_space<vmem>>, vector<1x32x64xbf16>
    %183 = vector.shape_cast %182 : vector<1x32x64xbf16> to vector<32x64xbf16>
    %cst_175 = arith.constant dense<0.000000e+00> : vector<32x32xf32>
    %184 = tpu.matmul %183, %123, %cst_175 {dimension_numbers = #tpu.dot_dimension_numbers<[1], [0], [0], [1], [0, 0, 1, 1], [], []>} : vector<32x64xbf16>, vector<64x32xbf16>, vector<32x32xf32> -> vector<32x32xf32>
    %185 = arith.addf %181, %184 : vector<32x32xf32>
    %c1_176 = arith.constant 1 : index
    %c0_177 = arith.constant 0 : index
    %c0_178 = arith.constant 0 : index
    %186 = vector.load %arg5[%c1_176, %c0_177, %c0_178] : memref<16x32x64xbf16, #tpu.memory_space<vmem>>, vector<1x32x64xbf16>
    %187 = vector.shape_cast %186 : vector<1x32x64xbf16> to vector<32x64xbf16>
    %cst_179 = arith.constant dense<0.000000e+00> : vector<32x32xf32>
    %188 = tpu.matmul %187, %143, %cst_179 {dimension_numbers = #tpu.dot_dimension_numbers<[1], [0], [0], [1], [0, 0, 1, 1], [], []>} : vector<32x64xbf16>, vector<64x32xbf16>, vector<32x32xf32> -> vector<32x32xf32>
    %189 = arith.addf %185, %188 : vector<32x32xf32>
    %c3_180 = arith.constant 3 : index
    %c0_181 = arith.constant 0 : index
    %c0_182 = arith.constant 0 : index
    %190 = vector.load %arg5[%c3_180, %c0_181, %c0_182] : memref<16x32x64xbf16, #tpu.memory_space<vmem>>, vector<1x32x64xbf16>
    %191 = vector.shape_cast %190 : vector<1x32x64xbf16> to vector<32x64xbf16>
    %cst_183 = arith.constant dense<0.000000e+00> : vector<32x32xf32>
    %192 = tpu.matmul %191, %138, %cst_183 {dimension_numbers = #tpu.dot_dimension_numbers<[1], [0], [0], [1], [0, 0, 1, 1], [], []>} : vector<32x64xbf16>, vector<64x32xbf16>, vector<32x32xf32> -> vector<32x32xf32>
    %193 = arith.addf %189, %192 : vector<32x32xf32>
    %c10_184 = arith.constant 10 : index
    %c0_185 = arith.constant 0 : index
    %c0_186 = arith.constant 0 : index
    %194 = vector.load %arg5[%c10_184, %c0_185, %c0_186] : memref<16x32x64xbf16, #tpu.memory_space<vmem>>, vector<1x32x64xbf16>
    %195 = vector.shape_cast %194 : vector<1x32x64xbf16> to vector<32x64xbf16>
    %cst_187 = arith.constant dense<0.000000e+00> : vector<32x32xf32>
    %196 = tpu.matmul %195, %128, %cst_187 {dimension_numbers = #tpu.dot_dimension_numbers<[1], [0], [0], [1], [0, 0, 1, 1], [], []>} : vector<32x64xbf16>, vector<64x32xbf16>, vector<32x32xf32> -> vector<32x32xf32>
    %c8_188 = arith.constant 8 : index
    %c0_189 = arith.constant 0 : index
    %c0_190 = arith.constant 0 : index
    %197 = vector.load %arg5[%c8_188, %c0_189, %c0_190] : memref<16x32x64xbf16, #tpu.memory_space<vmem>>, vector<1x32x64xbf16>
    %198 = vector.shape_cast %197 : vector<1x32x64xbf16> to vector<32x64xbf16>
    %cst_191 = arith.constant dense<0.000000e+00> : vector<32x32xf32>
    %199 = tpu.matmul %198, %133, %cst_191 {dimension_numbers = #tpu.dot_dimension_numbers<[1], [0], [0], [1], [0, 0, 1, 1], [], []>} : vector<32x64xbf16>, vector<64x32xbf16>, vector<32x32xf32> -> vector<32x32xf32>
    %200 = arith.addf %196, %199 : vector<32x32xf32>
    %c2_192 = arith.constant 2 : index
    %c0_193 = arith.constant 0 : index
    %c0_194 = arith.constant 0 : index
    %201 = vector.load %arg5[%c2_192, %c0_193, %c0_194] : memref<16x32x64xbf16, #tpu.memory_space<vmem>>, vector<1x32x64xbf16>
    %202 = vector.shape_cast %201 : vector<1x32x64xbf16> to vector<32x64xbf16>
    %cst_195 = arith.constant dense<0.000000e+00> : vector<32x32xf32>
    %203 = tpu.matmul %202, %143, %cst_195 {dimension_numbers = #tpu.dot_dimension_numbers<[1], [0], [0], [1], [0, 0, 1, 1], [], []>} : vector<32x64xbf16>, vector<64x32xbf16>, vector<32x32xf32> -> vector<32x32xf32>
    %204 = arith.addf %200, %203 : vector<32x32xf32>
    %c0_196 = arith.constant 0 : index
    %c0_197 = arith.constant 0 : index
    %c0_198 = arith.constant 0 : index
    %205 = vector.load %arg5[%c0_196, %c0_197, %c0_198] : memref<16x32x64xbf16, #tpu.memory_space<vmem>>, vector<1x32x64xbf16>
    %206 = vector.shape_cast %205 : vector<1x32x64xbf16> to vector<32x64xbf16>
    %cst_199 = arith.constant dense<0.000000e+00> : vector<32x32xf32>
    %207 = tpu.matmul %206, %148, %cst_199 {dimension_numbers = #tpu.dot_dimension_numbers<[1], [0], [0], [1], [0, 0, 1, 1], [], []>} : vector<32x64xbf16>, vector<64x32xbf16>, vector<32x32xf32> -> vector<32x32xf32>
    %208 = arith.addf %204, %207 : vector<32x32xf32>
    %c0_200 = arith.constant 0 : index
    %c0_201 = arith.constant 0 : index
    %209 = vector.load %arg6[%c0_200, %c0_201] : memref<32x1xf32, #tpu.memory_space<vmem>>, vector<32x1xf32>
    %c0_202 = arith.constant 0 : index
    %c0_203 = arith.constant 0 : index
    %210 = vector.load %arg7[%c0_202, %c0_203] : memref<32x1xf32, #tpu.memory_space<vmem>>, vector<32x1xf32>
    %cst_204 = arith.constant dense<0.000000e+00> : vector<32xf32>
    %211 = vector.multi_reduction <add>, %163, %cst_204 [1] : vector<32x32xf32> to vector<32xf32>
    %212 = vector.shape_cast %211 : vector<32xf32> to vector<32x1xf32>
    %cst_205 = arith.constant dense<0.000000e+00> : vector<32xf32>
    %213 = vector.multi_reduction <add>, %178, %cst_205 [1] : vector<32x32xf32> to vector<32xf32>
    %214 = vector.shape_cast %213 : vector<32xf32> to vector<32x1xf32>
    %215 = arith.addf %212, %214 : vector<32x1xf32>
    %cst_206 = arith.constant dense<0.000000e+00> : vector<32xf32>
    %216 = vector.multi_reduction <add>, %193, %cst_206 [1] : vector<32x32xf32> to vector<32xf32>
    %217 = vector.shape_cast %216 : vector<32xf32> to vector<32x1xf32>
    %218 = arith.addf %215, %217 : vector<32x1xf32>
    %cst_207 = arith.constant dense<0.000000e+00> : vector<32xf32>
    %219 = vector.multi_reduction <add>, %208, %cst_207 [1] : vector<32x32xf32> to vector<32xf32>
    %220 = vector.shape_cast %219 : vector<32xf32> to vector<32x1xf32>
    %221 = arith.addf %218, %220 : vector<32x1xf32>
    %cst_208 = arith.constant 1.280000e+02 : f32
    %222 = vector.broadcast %cst_208 : f32 to vector<32x1xf32>
    %223 = arith.divf %221, %222 : vector<32x1xf32>
    %224 = vector.broadcast %223 : vector<32x1xf32> to vector<32x32xf32>
    %225 = arith.subf %163, %224 : vector<32x32xf32>
    %226 = arith.mulf %225, %225 : vector<32x32xf32>
    %cst_209 = arith.constant dense<0.000000e+00> : vector<32xf32>
    %227 = vector.multi_reduction <add>, %226, %cst_209 [1] : vector<32x32xf32> to vector<32xf32>
    %228 = vector.shape_cast %227 : vector<32xf32> to vector<32x1xf32>
    %229 = vector.broadcast %223 : vector<32x1xf32> to vector<32x32xf32>
    %230 = arith.subf %178, %229 : vector<32x32xf32>
    %231 = arith.mulf %230, %230 : vector<32x32xf32>
    %cst_210 = arith.constant dense<0.000000e+00> : vector<32xf32>
    %232 = vector.multi_reduction <add>, %231, %cst_210 [1] : vector<32x32xf32> to vector<32xf32>
    %233 = vector.shape_cast %232 : vector<32xf32> to vector<32x1xf32>
    %234 = arith.addf %228, %233 : vector<32x1xf32>
    %235 = vector.broadcast %223 : vector<32x1xf32> to vector<32x32xf32>
    %236 = arith.subf %193, %235 : vector<32x32xf32>
    %237 = arith.mulf %236, %236 : vector<32x32xf32>
    %cst_211 = arith.constant dense<0.000000e+00> : vector<32xf32>
    %238 = vector.multi_reduction <add>, %237, %cst_211 [1] : vector<32x32xf32> to vector<32xf32>
    %239 = vector.shape_cast %238 : vector<32xf32> to vector<32x1xf32>
    %240 = arith.addf %234, %239 : vector<32x1xf32>
    %241 = vector.broadcast %223 : vector<32x1xf32> to vector<32x32xf32>
    %242 = arith.subf %208, %241 : vector<32x32xf32>
    %243 = arith.mulf %242, %242 : vector<32x32xf32>
    %cst_212 = arith.constant dense<0.000000e+00> : vector<32xf32>
    %244 = vector.multi_reduction <add>, %243, %cst_212 [1] : vector<32x32xf32> to vector<32xf32>
    %245 = vector.shape_cast %244 : vector<32xf32> to vector<32x1xf32>
    %246 = arith.addf %240, %245 : vector<32x1xf32>
    %cst_213 = arith.constant 1.280000e+02 : f32
    %247 = vector.broadcast %cst_213 : f32 to vector<32x1xf32>
    %248 = arith.divf %246, %247 : vector<32x1xf32>
    %cst_214 = arith.constant 9.99999974E-6 : f32
    %249 = vector.broadcast %cst_214 : f32 to vector<32x1xf32>
    %250 = arith.addf %248, %249 : vector<32x1xf32>
    %251 = math.rsqrt %250 : vector<32x1xf32>
    %252 = arith.mulf %209, %251 : vector<32x1xf32>
    %253 = arith.mulf %223, %252 : vector<32x1xf32>
    %254 = arith.subf %210, %253 : vector<32x1xf32>
    %255 = vector.broadcast %252 : vector<32x1xf32> to vector<32x32xf32>
    %256 = arith.mulf %163, %255 : vector<32x32xf32>
    %257 = vector.broadcast %254 : vector<32x1xf32> to vector<32x32xf32>
    %258 = arith.addf %256, %257 : vector<32x32xf32>
    %cst_215 = arith.constant 0.000000e+00 : f32
    %259 = vector.broadcast %cst_215 : f32 to vector<32x32xf32>
    %260 = arith.cmpf oge, %258, %259 : vector<32x32xf32>
    %cst_216 = arith.constant 2.000000e-01 : f32
    %261 = vector.broadcast %cst_216 : f32 to vector<32x32xf32>
    %262 = arith.mulf %261, %258 : vector<32x32xf32>
    %263 = arith.select %260, %258, %262 : vector<32x32xi1>, vector<32x32xf32>
    %264 = vector.broadcast %252 : vector<32x1xf32> to vector<32x32xf32>
    %265 = arith.mulf %178, %264 : vector<32x32xf32>
    %266 = vector.broadcast %254 : vector<32x1xf32> to vector<32x32xf32>
    %267 = arith.addf %265, %266 : vector<32x32xf32>
    %cst_217 = arith.constant 0.000000e+00 : f32
    %268 = vector.broadcast %cst_217 : f32 to vector<32x32xf32>
    %269 = arith.cmpf oge, %267, %268 : vector<32x32xf32>
    %cst_218 = arith.constant 2.000000e-01 : f32
    %270 = vector.broadcast %cst_218 : f32 to vector<32x32xf32>
    %271 = arith.mulf %270, %267 : vector<32x32xf32>
    %272 = arith.select %269, %267, %271 : vector<32x32xi1>, vector<32x32xf32>
    %273 = vector.broadcast %252 : vector<32x1xf32> to vector<32x32xf32>
    %274 = arith.mulf %193, %273 : vector<32x32xf32>
    %275 = vector.broadcast %254 : vector<32x1xf32> to vector<32x32xf32>
    %276 = arith.addf %274, %275 : vector<32x32xf32>
    %cst_219 = arith.constant 0.000000e+00 : f32
    %277 = vector.broadcast %cst_219 : f32 to vector<32x32xf32>
    %278 = arith.cmpf oge, %276, %277 : vector<32x32xf32>
    %cst_220 = arith.constant 2.000000e-01 : f32
    %279 = vector.broadcast %cst_220 : f32 to vector<32x32xf32>
    %280 = arith.mulf %279, %276 : vector<32x32xf32>
    %281 = arith.select %278, %276, %280 : vector<32x32xi1>, vector<32x32xf32>
    %282 = vector.broadcast %252 : vector<32x1xf32> to vector<32x32xf32>
    %283 = arith.mulf %208, %282 : vector<32x32xf32>
    %284 = vector.broadcast %254 : vector<32x1xf32> to vector<32x32xf32>
    %285 = arith.addf %283, %284 : vector<32x32xf32>
    %cst_221 = arith.constant 0.000000e+00 : f32
    %286 = vector.broadcast %cst_221 : f32 to vector<32x32xf32>
    %287 = arith.cmpf oge, %285, %286 : vector<32x32xf32>
    %cst_222 = arith.constant 2.000000e-01 : f32
    %288 = vector.broadcast %cst_222 : f32 to vector<32x32xf32>
    %289 = arith.mulf %288, %285 : vector<32x32xf32>
    %290 = arith.select %287, %285, %289 : vector<32x32xi1>, vector<32x32xf32>
    %291 = arith.truncf %263 : vector<32x32xf32> to vector<32x32xbf16>
    %c0_223 = arith.constant 0 : index
    %c0_224 = arith.constant 0 : index
    %c0_225 = arith.constant 0 : index
    %292 = vector.load %arg9[%c0_223, %c0_224, %c0_225] : memref<4x32x128xbf16, #tpu.memory_space<vmem>>, vector<1x32x128xbf16>
    %293 = vector.shape_cast %292 : vector<1x32x128xbf16> to vector<32x128xbf16>
    %cst_226 = arith.constant dense<0.000000e+00> : vector<32x128xf32>
    %294 = tpu.matmul %291, %293, %cst_226 {dimension_numbers = #tpu.dot_dimension_numbers<[1], [0], [0], [1], [0, 0, 1, 1], [], []>} : vector<32x32xbf16>, vector<32x128xbf16>, vector<32x128xf32> -> vector<32x128xf32>
    %295 = arith.truncf %272 : vector<32x32xf32> to vector<32x32xbf16>
    %c1_227 = arith.constant 1 : index
    %c0_228 = arith.constant 0 : index
    %c0_229 = arith.constant 0 : index
    %296 = vector.load %arg9[%c1_227, %c0_228, %c0_229] : memref<4x32x128xbf16, #tpu.memory_space<vmem>>, vector<1x32x128xbf16>
    %297 = vector.shape_cast %296 : vector<1x32x128xbf16> to vector<32x128xbf16>
    %cst_230 = arith.constant dense<0.000000e+00> : vector<32x128xf32>
    %298 = tpu.matmul %295, %297, %cst_230 {dimension_numbers = #tpu.dot_dimension_numbers<[1], [0], [0], [1], [0, 0, 1, 1], [], []>} : vector<32x32xbf16>, vector<32x128xbf16>, vector<32x128xf32> -> vector<32x128xf32>
    %299 = arith.addf %294, %298 : vector<32x128xf32>
    %300 = arith.truncf %281 : vector<32x32xf32> to vector<32x32xbf16>
    %c2_231 = arith.constant 2 : index
    %c0_232 = arith.constant 0 : index
    %c0_233 = arith.constant 0 : index
    %301 = vector.load %arg9[%c2_231, %c0_232, %c0_233] : memref<4x32x128xbf16, #tpu.memory_space<vmem>>, vector<1x32x128xbf16>
    %302 = vector.shape_cast %301 : vector<1x32x128xbf16> to vector<32x128xbf16>
    %cst_234 = arith.constant dense<0.000000e+00> : vector<32x128xf32>
    %303 = tpu.matmul %300, %302, %cst_234 {dimension_numbers = #tpu.dot_dimension_numbers<[1], [0], [0], [1], [0, 0, 1, 1], [], []>} : vector<32x32xbf16>, vector<32x128xbf16>, vector<32x128xf32> -> vector<32x128xf32>
    %304 = arith.addf %299, %303 : vector<32x128xf32>
    %305 = arith.truncf %290 : vector<32x32xf32> to vector<32x32xbf16>
    %c3_235 = arith.constant 3 : index
    %c0_236 = arith.constant 0 : index
    %c0_237 = arith.constant 0 : index
    %306 = vector.load %arg9[%c3_235, %c0_236, %c0_237] : memref<4x32x128xbf16, #tpu.memory_space<vmem>>, vector<1x32x128xbf16>
    %307 = vector.shape_cast %306 : vector<1x32x128xbf16> to vector<32x128xbf16>
    %cst_238 = arith.constant dense<0.000000e+00> : vector<32x128xf32>
    %308 = tpu.matmul %305, %307, %cst_238 {dimension_numbers = #tpu.dot_dimension_numbers<[1], [0], [0], [1], [0, 0, 1, 1], [], []>} : vector<32x32xbf16>, vector<32x128xbf16>, vector<32x128xf32> -> vector<32x128xf32>
    %309 = arith.addf %304, %308 : vector<32x128xf32>
    %c0_239 = arith.constant 0 : index
    %c9_240 = arith.constant 9 : index
    %310 = vector.load %arg23[%c0_239, %c9_240] : memref<32x146xf32, #tpu.memory_space<vmem>>, vector<32x128xf32>
    tpu.vector_store %arg23[%c0_239, %c9_240], %309 {strides = array<i32>} : memref<32x146xf32, #tpu.memory_space<vmem>>, vector<32x128xf32>,
    %c0_241 = arith.constant 0 : index
    %c0_242 = arith.constant 0 : index
    %311 = vector.load %arg23[%c0_241, %c0_242] : memref<32x146xf32, #tpu.memory_space<vmem>>, vector<32x128xf32>
    %c0_243 = arith.constant 0 : index
    %c0_244 = arith.constant 0 : index
    %312 = vector.load %arg13[%c0_243, %c0_244] : memref<9x128xf32, #tpu.memory_space<vmem>>, vector<1x128xf32>
    %313 = vector.broadcast %312 : vector<1x128xf32> to vector<32x128xf32>
    %314 = arith.mulf %311, %313 : vector<32x128xf32>
    %315 = arith.truncf %314 : vector<32x128xf32> to vector<32x128xbf16>
    %c0_245 = arith.constant 0 : index
    %c1_246 = arith.constant 1 : index
    %316 = vector.load %arg23[%c0_245, %c1_246] : memref<32x146xf32, #tpu.memory_space<vmem>>, vector<32x128xf32>
    %c1_247 = arith.constant 1 : index
    %c0_248 = arith.constant 0 : index
    %317 = vector.load %arg13[%c1_247, %c0_248] : memref<9x128xf32, #tpu.memory_space<vmem>>, vector<1x128xf32>
    %318 = vector.broadcast %317 : vector<1x128xf32> to vector<32x128xf32>
    %319 = arith.mulf %316, %318 : vector<32x128xf32>
    %320 = arith.truncf %319 : vector<32x128xf32> to vector<32x128xbf16>
    %c0_249 = arith.constant 0 : index
    %c2_250 = arith.constant 2 : index
    %321 = vector.load %arg23[%c0_249, %c2_250] : memref<32x146xf32, #tpu.memory_space<vmem>>, vector<32x128xf32>
    %c2_251 = arith.constant 2 : index
    %c0_252 = arith.constant 0 : index
    %322 = vector.load %arg13[%c2_251, %c0_252] : memref<9x128xf32, #tpu.memory_space<vmem>>, vector<1x128xf32>
    %323 = vector.broadcast %322 : vector<1x128xf32> to vector<32x128xf32>
    %324 = arith.mulf %321, %323 : vector<32x128xf32>
    %325 = arith.truncf %324 : vector<32x128xf32> to vector<32x128xbf16>
    %c0_253 = arith.constant 0 : index
    %c8_254 = arith.constant 8 : index
    %326 = vector.load %arg23[%c0_253, %c8_254] : memref<32x146xf32, #tpu.memory_space<vmem>>, vector<32x128xf32>
    %c3_255 = arith.constant 3 : index
    %c0_256 = arith.constant 0 : index
    %327 = vector.load %arg13[%c3_255, %c0_256] : memref<9x128xf32, #tpu.memory_space<vmem>>, vector<1x128xf32>
    %328 = vector.broadcast %327 : vector<1x128xf32> to vector<32x128xf32>
    %329 = arith.mulf %326, %328 : vector<32x128xf32>
    %330 = arith.truncf %329 : vector<32x128xf32> to vector<32x128xbf16>
    %c0_257 = arith.constant 0 : index
    %c9_258 = arith.constant 9 : index
    %331 = vector.load %arg23[%c0_257, %c9_258] : memref<32x146xf32, #tpu.memory_space<vmem>>, vector<32x128xf32>
    %c4_259 = arith.constant 4 : index
    %c0_260 = arith.constant 0 : index
    %332 = vector.load %arg13[%c4_259, %c0_260] : memref<9x128xf32, #tpu.memory_space<vmem>>, vector<1x128xf32>
    %333 = vector.broadcast %332 : vector<1x128xf32> to vector<32x128xf32>
    %334 = arith.mulf %331, %333 : vector<32x128xf32>
    %335 = arith.truncf %334 : vector<32x128xf32> to vector<32x128xbf16>
    %c0_261 = arith.constant 0 : index
    %c10_262 = arith.constant 10 : index
    %336 = vector.load %arg23[%c0_261, %c10_262] : memref<32x146xf32, #tpu.memory_space<vmem>>, vector<32x128xf32>
    %c5_263 = arith.constant 5 : index
    %c0_264 = arith.constant 0 : index
    %337 = vector.load %arg13[%c5_263, %c0_264] : memref<9x128xf32, #tpu.memory_space<vmem>>, vector<1x128xf32>
    %338 = vector.broadcast %337 : vector<1x128xf32> to vector<32x128xf32>
    %339 = arith.mulf %336, %338 : vector<32x128xf32>
    %340 = arith.truncf %339 : vector<32x128xf32> to vector<32x128xbf16>
    %c0_265 = arith.constant 0 : index
    %c16_266 = arith.constant 16 : index
    %341 = vector.load %arg23[%c0_265, %c16_266] : memref<32x146xf32, #tpu.memory_space<vmem>>, vector<32x128xf32>
    %c6_267 = arith.constant 6 : index
    %c0_268 = arith.constant 0 : index
    %342 = vector.load %arg13[%c6_267, %c0_268] : memref<9x128xf32, #tpu.memory_space<vmem>>, vector<1x128xf32>
    %343 = vector.broadcast %342 : vector<1x128xf32> to vector<32x128xf32>
    %344 = arith.mulf %341, %343 : vector<32x128xf32>
    %345 = arith.truncf %344 : vector<32x128xf32> to vector<32x128xbf16>
    %c0_269 = arith.constant 0 : index
    %c17 = arith.constant 17 : index
    %346 = vector.load %arg23[%c0_269, %c17] : memref<32x146xf32, #tpu.memory_space<vmem>>, vector<32x128xf32>
    %c7_270 = arith.constant 7 : index
    %c0_271 = arith.constant 0 : index
    %347 = vector.load %arg13[%c7_270, %c0_271] : memref<9x128xf32, #tpu.memory_space<vmem>>, vector<1x128xf32>
    %348 = vector.broadcast %347 : vector<1x128xf32> to vector<32x128xf32>
    %349 = arith.mulf %346, %348 : vector<32x128xf32>
    %350 = arith.truncf %349 : vector<32x128xf32> to vector<32x128xbf16>
    %c0_272 = arith.constant 0 : index
    %c18_273 = arith.constant 18 : index
    %351 = vector.load %arg23[%c0_272, %c18_273] : memref<32x146xf32, #tpu.memory_space<vmem>>, vector<32x128xf32>
    %c8_274 = arith.constant 8 : index
    %c0_275 = arith.constant 0 : index
    %352 = vector.load %arg13[%c8_274, %c0_275] : memref<9x128xf32, #tpu.memory_space<vmem>>, vector<1x128xf32>
    %353 = vector.broadcast %352 : vector<1x128xf32> to vector<32x128xf32>
    %354 = arith.mulf %351, %353 : vector<32x128xf32>
    %355 = arith.truncf %354 : vector<32x128xf32> to vector<32x128xbf16>
    %c5_276 = arith.constant 5 : index
    %c0_277 = arith.constant 0 : index
    %c0_278 = arith.constant 0 : index
    %356 = vector.load %arg10[%c5_276, %c0_277, %c0_278] : memref<16x16x32xbf16, #tpu.memory_space<vmem>>, vector<1x16x32xbf16>
    %357 = vector.shape_cast %356 : vector<1x16x32xbf16> to vector<16x32xbf16>
    %cst_279 = arith.constant dense<0.000000e+00> : vector<16x128xf32>
    %358 = tpu.matmul %357, %335, %cst_279 {dimension_numbers = #tpu.dot_dimension_numbers<[1], [0], [0], [1], [0, 0, 1, 1], [], []>} : vector<16x32xbf16>, vector<32x128xbf16>, vector<16x128xf32> -> vector<16x128xf32>
    %c7_280 = arith.constant 7 : index
    %c0_281 = arith.constant 0 : index
    %c0_282 = arith.constant 0 : index
    %359 = vector.load %arg10[%c7_280, %c0_281, %c0_282] : memref<16x16x32xbf16, #tpu.memory_space<vmem>>, vector<1x16x32xbf16>
    %360 = vector.shape_cast %359 : vector<1x16x32xbf16> to vector<16x32xbf16>
    %cst_283 = arith.constant dense<0.000000e+00> : vector<16x128xf32>
    %361 = tpu.matmul %360, %330, %cst_283 {dimension_numbers = #tpu.dot_dimension_numbers<[1], [0], [0], [1], [0, 0, 1, 1], [], []>} : vector<16x32xbf16>, vector<32x128xbf16>, vector<16x128xf32> -> vector<16x128xf32>
    %362 = arith.addf %358, %361 : vector<16x128xf32>
    %c13_284 = arith.constant 13 : index
    %c0_285 = arith.constant 0 : index
    %c0_286 = arith.constant 0 : index
    %363 = vector.load %arg10[%c13_284, %c0_285, %c0_286] : memref<16x16x32xbf16, #tpu.memory_space<vmem>>, vector<1x16x32xbf16>
    %364 = vector.shape_cast %363 : vector<1x16x32xbf16> to vector<16x32xbf16>
    %cst_287 = arith.constant dense<0.000000e+00> : vector<16x128xf32>
    %365 = tpu.matmul %364, %320, %cst_287 {dimension_numbers = #tpu.dot_dimension_numbers<[1], [0], [0], [1], [0, 0, 1, 1], [], []>} : vector<16x32xbf16>, vector<32x128xbf16>, vector<16x128xf32> -> vector<16x128xf32>
    %366 = arith.addf %362, %365 : vector<16x128xf32>
    %c15_288 = arith.constant 15 : index
    %c0_289 = arith.constant 0 : index
    %c0_290 = arith.constant 0 : index
    %367 = vector.load %arg10[%c15_288, %c0_289, %c0_290] : memref<16x16x32xbf16, #tpu.memory_space<vmem>>, vector<1x16x32xbf16>
    %368 = vector.shape_cast %367 : vector<1x16x32xbf16> to vector<16x32xbf16>
    %cst_291 = arith.constant dense<0.000000e+00> : vector<16x128xf32>
    %369 = tpu.matmul %368, %315, %cst_291 {dimension_numbers = #tpu.dot_dimension_numbers<[1], [0], [0], [1], [0, 0, 1, 1], [], []>} : vector<16x32xbf16>, vector<32x128xbf16>, vector<16x128xf32> -> vector<16x128xf32>
    %370 = arith.addf %366, %369 : vector<16x128xf32>
    %c6_292 = arith.constant 6 : index
    %c0_293 = arith.constant 0 : index
    %c0_294 = arith.constant 0 : index
    %371 = vector.load %arg10[%c6_292, %c0_293, %c0_294] : memref<16x16x32xbf16, #tpu.memory_space<vmem>>, vector<1x16x32xbf16>
    %372 = vector.shape_cast %371 : vector<1x16x32xbf16> to vector<16x32xbf16>
    %cst_295 = arith.constant dense<0.000000e+00> : vector<16x128xf32>
    %373 = tpu.matmul %372, %335, %cst_295 {dimension_numbers = #tpu.dot_dimension_numbers<[1], [0], [0], [1], [0, 0, 1, 1], [], []>} : vector<16x32xbf16>, vector<32x128xbf16>, vector<16x128xf32> -> vector<16x128xf32>
    %c4_296 = arith.constant 4 : index
    %c0_297 = arith.constant 0 : index
    %c0_298 = arith.constant 0 : index
    %374 = vector.load %arg10[%c4_296, %c0_297, %c0_298] : memref<16x16x32xbf16, #tpu.memory_space<vmem>>, vector<1x16x32xbf16>
    %375 = vector.shape_cast %374 : vector<1x16x32xbf16> to vector<16x32xbf16>
    %cst_299 = arith.constant dense<0.000000e+00> : vector<16x128xf32>
    %376 = tpu.matmul %375, %340, %cst_299 {dimension_numbers = #tpu.dot_dimension_numbers<[1], [0], [0], [1], [0, 0, 1, 1], [], []>} : vector<16x32xbf16>, vector<32x128xbf16>, vector<16x128xf32> -> vector<16x128xf32>
    %377 = arith.addf %373, %376 : vector<16x128xf32>
    %c14_300 = arith.constant 14 : index
    %c0_301 = arith.constant 0 : index
    %c0_302 = arith.constant 0 : index
    %378 = vector.load %arg10[%c14_300, %c0_301, %c0_302] : memref<16x16x32xbf16, #tpu.memory_space<vmem>>, vector<1x16x32xbf16>
    %379 = vector.shape_cast %378 : vector<1x16x32xbf16> to vector<16x32xbf16>
    %cst_303 = arith.constant dense<0.000000e+00> : vector<16x128xf32>
    %380 = tpu.matmul %379, %320, %cst_303 {dimension_numbers = #tpu.dot_dimension_numbers<[1], [0], [0], [1], [0, 0, 1, 1], [], []>} : vector<16x32xbf16>, vector<32x128xbf16>, vector<16x128xf32> -> vector<16x128xf32>
    %381 = arith.addf %377, %380 : vector<16x128xf32>
    %c12_304 = arith.constant 12 : index
    %c0_305 = arith.constant 0 : index
    %c0_306 = arith.constant 0 : index
    %382 = vector.load %arg10[%c12_304, %c0_305, %c0_306] : memref<16x16x32xbf16, #tpu.memory_space<vmem>>, vector<1x16x32xbf16>
    %383 = vector.shape_cast %382 : vector<1x16x32xbf16> to vector<16x32xbf16>
    %cst_307 = arith.constant dense<0.000000e+00> : vector<16x128xf32>
    %384 = tpu.matmul %383, %325, %cst_307 {dimension_numbers = #tpu.dot_dimension_numbers<[1], [0], [0], [1], [0, 0, 1, 1], [], []>} : vector<16x32xbf16>, vector<32x128xbf16>, vector<16x128xf32> -> vector<16x128xf32>
    %385 = arith.addf %381, %384 : vector<16x128xf32>
    %c9_308 = arith.constant 9 : index
    %c0_309 = arith.constant 0 : index
    %c0_310 = arith.constant 0 : index
    %386 = vector.load %arg10[%c9_308, %c0_309, %c0_310] : memref<16x16x32xbf16, #tpu.memory_space<vmem>>, vector<1x16x32xbf16>
    %387 = vector.shape_cast %386 : vector<1x16x32xbf16> to vector<16x32xbf16>
    %cst_311 = arith.constant dense<0.000000e+00> : vector<16x128xf32>
    %388 = tpu.matmul %387, %335, %cst_311 {dimension_numbers = #tpu.dot_dimension_numbers<[1], [0], [0], [1], [0, 0, 1, 1], [], []>} : vector<16x32xbf16>, vector<32x128xbf16>, vector<16x128xf32> -> vector<16x128xf32>
    %c11_312 = arith.constant 11 : index
    %c0_313 = arith.constant 0 : index
    %c0_314 = arith.constant 0 : index
    %389 = vector.load %arg10[%c11_312, %c0_313, %c0_314] : memref<16x16x32xbf16, #tpu.memory_space<vmem>>, vector<1x16x32xbf16>
    %390 = vector.shape_cast %389 : vector<1x16x32xbf16> to vector<16x32xbf16>
    %cst_315 = arith.constant dense<0.000000e+00> : vector<16x128xf32>
    %391 = tpu.matmul %390, %330, %cst_315 {dimension_numbers = #tpu.dot_dimension_numbers<[1], [0], [0], [1], [0, 0, 1, 1], [], []>} : vector<16x32xbf16>, vector<32x128xbf16>, vector<16x128xf32> -> vector<16x128xf32>
    %392 = arith.addf %388, %391 : vector<16x128xf32>
    %c1_316 = arith.constant 1 : index
    %c0_317 = arith.constant 0 : index
    %c0_318 = arith.constant 0 : index
    %393 = vector.load %arg10[%c1_316, %c0_317, %c0_318] : memref<16x16x32xbf16, #tpu.memory_space<vmem>>, vector<1x16x32xbf16>
    %394 = vector.shape_cast %393 : vector<1x16x32xbf16> to vector<16x32xbf16>
    %cst_319 = arith.constant dense<0.000000e+00> : vector<16x128xf32>
    %395 = tpu.matmul %394, %350, %cst_319 {dimension_numbers = #tpu.dot_dimension_numbers<[1], [0], [0], [1], [0, 0, 1, 1], [], []>} : vector<16x32xbf16>, vector<32x128xbf16>, vector<16x128xf32> -> vector<16x128xf32>
    %396 = arith.addf %392, %395 : vector<16x128xf32>
    %c3_320 = arith.constant 3 : index
    %c0_321 = arith.constant 0 : index
    %c0_322 = arith.constant 0 : index
    %397 = vector.load %arg10[%c3_320, %c0_321, %c0_322] : memref<16x16x32xbf16, #tpu.memory_space<vmem>>, vector<1x16x32xbf16>
    %398 = vector.shape_cast %397 : vector<1x16x32xbf16> to vector<16x32xbf16>
    %cst_323 = arith.constant dense<0.000000e+00> : vector<16x128xf32>
    %399 = tpu.matmul %398, %345, %cst_323 {dimension_numbers = #tpu.dot_dimension_numbers<[1], [0], [0], [1], [0, 0, 1, 1], [], []>} : vector<16x32xbf16>, vector<32x128xbf16>, vector<16x128xf32> -> vector<16x128xf32>
    %400 = arith.addf %396, %399 : vector<16x128xf32>
    %c10_324 = arith.constant 10 : index
    %c0_325 = arith.constant 0 : index
    %c0_326 = arith.constant 0 : index
    %401 = vector.load %arg10[%c10_324, %c0_325, %c0_326] : memref<16x16x32xbf16, #tpu.memory_space<vmem>>, vector<1x16x32xbf16>
    %402 = vector.shape_cast %401 : vector<1x16x32xbf16> to vector<16x32xbf16>
    %cst_327 = arith.constant dense<0.000000e+00> : vector<16x128xf32>
    %403 = tpu.matmul %402, %335, %cst_327 {dimension_numbers = #tpu.dot_dimension_numbers<[1], [0], [0], [1], [0, 0, 1, 1], [], []>} : vector<16x32xbf16>, vector<32x128xbf16>, vector<16x128xf32> -> vector<16x128xf32>
    %c8_328 = arith.constant 8 : index
    %c0_329 = arith.constant 0 : index
    %c0_330 = arith.constant 0 : index
    %404 = vector.load %arg10[%c8_328, %c0_329, %c0_330] : memref<16x16x32xbf16, #tpu.memory_space<vmem>>, vector<1x16x32xbf16>
    %405 = vector.shape_cast %404 : vector<1x16x32xbf16> to vector<16x32xbf16>
    %cst_331 = arith.constant dense<0.000000e+00> : vector<16x128xf32>
    %406 = tpu.matmul %405, %340, %cst_331 {dimension_numbers = #tpu.dot_dimension_numbers<[1], [0], [0], [1], [0, 0, 1, 1], [], []>} : vector<16x32xbf16>, vector<32x128xbf16>, vector<16x128xf32> -> vector<16x128xf32>
    %407 = arith.addf %403, %406 : vector<16x128xf32>
    %c2_332 = arith.constant 2 : index
    %c0_333 = arith.constant 0 : index
    %c0_334 = arith.constant 0 : index
    %408 = vector.load %arg10[%c2_332, %c0_333, %c0_334] : memref<16x16x32xbf16, #tpu.memory_space<vmem>>, vector<1x16x32xbf16>
    %409 = vector.shape_cast %408 : vector<1x16x32xbf16> to vector<16x32xbf16>
    %cst_335 = arith.constant dense<0.000000e+00> : vector<16x128xf32>
    %410 = tpu.matmul %409, %350, %cst_335 {dimension_numbers = #tpu.dot_dimension_numbers<[1], [0], [0], [1], [0, 0, 1, 1], [], []>} : vector<16x32xbf16>, vector<32x128xbf16>, vector<16x128xf32> -> vector<16x128xf32>
    %411 = arith.addf %407, %410 : vector<16x128xf32>
    %c0_336 = arith.constant 0 : index
    %c0_337 = arith.constant 0 : index
    %c0_338 = arith.constant 0 : index
    %412 = vector.load %arg10[%c0_336, %c0_337, %c0_338] : memref<16x16x32xbf16, #tpu.memory_space<vmem>>, vector<1x16x32xbf16>
    %413 = vector.shape_cast %412 : vector<1x16x32xbf16> to vector<16x32xbf16>
    %cst_339 = arith.constant dense<0.000000e+00> : vector<16x128xf32>
    %414 = tpu.matmul %413, %355, %cst_339 {dimension_numbers = #tpu.dot_dimension_numbers<[1], [0], [0], [1], [0, 0, 1, 1], [], []>} : vector<16x32xbf16>, vector<32x128xbf16>, vector<16x128xf32> -> vector<16x128xf32>
    %415 = arith.addf %411, %414 : vector<16x128xf32>
    %c0_340 = arith.constant 0 : index
    %c0_341 = arith.constant 0 : index
    %416 = vector.load %arg11[%c0_340, %c0_341] : memref<16x1xf32, #tpu.memory_space<vmem>>, vector<16x1xf32>
    %c0_342 = arith.constant 0 : index
    %c0_343 = arith.constant 0 : index
    %417 = vector.load %arg12[%c0_342, %c0_343] : memref<16x1xf32, #tpu.memory_space<vmem>>, vector<16x1xf32>
    %cst_344 = arith.constant dense<0.000000e+00> : vector<16xf32>
    %418 = vector.multi_reduction <add>, %370, %cst_344 [1] : vector<16x128xf32> to vector<16xf32>
    %419 = vector.shape_cast %418 : vector<16xf32> to vector<16x1xf32>
    %cst_345 = arith.constant dense<0.000000e+00> : vector<16xf32>
    %420 = vector.multi_reduction <add>, %385, %cst_345 [1] : vector<16x128xf32> to vector<16xf32>
    %421 = vector.shape_cast %420 : vector<16xf32> to vector<16x1xf32>
    %422 = arith.addf %419, %421 : vector<16x1xf32>
    %cst_346 = arith.constant dense<0.000000e+00> : vector<16xf32>
    %423 = vector.multi_reduction <add>, %400, %cst_346 [1] : vector<16x128xf32> to vector<16xf32>
    %424 = vector.shape_cast %423 : vector<16xf32> to vector<16x1xf32>
    %425 = arith.addf %422, %424 : vector<16x1xf32>
    %cst_347 = arith.constant dense<0.000000e+00> : vector<16xf32>
    %426 = vector.multi_reduction <add>, %415, %cst_347 [1] : vector<16x128xf32> to vector<16xf32>
    %427 = vector.shape_cast %426 : vector<16xf32> to vector<16x1xf32>
    %428 = arith.addf %425, %427 : vector<16x1xf32>
    %cst_348 = arith.constant 5.120000e+02 : f32
    %429 = vector.broadcast %cst_348 : f32 to vector<16x1xf32>
    %430 = arith.divf %428, %429 : vector<16x1xf32>
    %431 = vector.broadcast %430 : vector<16x1xf32> to vector<16x128xf32>
    %432 = arith.subf %370, %431 : vector<16x128xf32>
    %433 = arith.mulf %432, %432 : vector<16x128xf32>
    %cst_349 = arith.constant dense<0.000000e+00> : vector<16xf32>
    %434 = vector.multi_reduction <add>, %433, %cst_349 [1] : vector<16x128xf32> to vector<16xf32>
    %435 = vector.shape_cast %434 : vector<16xf32> to vector<16x1xf32>
    %436 = vector.broadcast %430 : vector<16x1xf32> to vector<16x128xf32>
    %437 = arith.subf %385, %436 : vector<16x128xf32>
    %438 = arith.mulf %437, %437 : vector<16x128xf32>
    %cst_350 = arith.constant dense<0.000000e+00> : vector<16xf32>
    %439 = vector.multi_reduction <add>, %438, %cst_350 [1] : vector<16x128xf32> to vector<16xf32>
    %440 = vector.shape_cast %439 : vector<16xf32> to vector<16x1xf32>
    %441 = arith.addf %435, %440 : vector<16x1xf32>
    %442 = vector.broadcast %430 : vector<16x1xf32> to vector<16x128xf32>
    %443 = arith.subf %400, %442 : vector<16x128xf32>
    %444 = arith.mulf %443, %443 : vector<16x128xf32>
    %cst_351 = arith.constant dense<0.000000e+00> : vector<16xf32>
    %445 = vector.multi_reduction <add>, %444, %cst_351 [1] : vector<16x128xf32> to vector<16xf32>
    %446 = vector.shape_cast %445 : vector<16xf32> to vector<16x1xf32>
    %447 = arith.addf %441, %446 : vector<16x1xf32>
    %448 = vector.broadcast %430 : vector<16x1xf32> to vector<16x128xf32>
    %449 = arith.subf %415, %448 : vector<16x128xf32>
    %450 = arith.mulf %449, %449 : vector<16x128xf32>
    %cst_352 = arith.constant dense<0.000000e+00> : vector<16xf32>
    %451 = vector.multi_reduction <add>, %450, %cst_352 [1] : vector<16x128xf32> to vector<16xf32>
    %452 = vector.shape_cast %451 : vector<16xf32> to vector<16x1xf32>
    %453 = arith.addf %447, %452 : vector<16x1xf32>
    %cst_353 = arith.constant 5.120000e+02 : f32
    %454 = vector.broadcast %cst_353 : f32 to vector<16x1xf32>
    %455 = arith.divf %453, %454 : vector<16x1xf32>
    %cst_354 = arith.constant 9.99999974E-6 : f32
    %456 = vector.broadcast %cst_354 : f32 to vector<16x1xf32>
    %457 = arith.addf %455, %456 : vector<16x1xf32>
    %458 = math.rsqrt %457 : vector<16x1xf32>
    %459 = arith.mulf %416, %458 : vector<16x1xf32>
    %460 = arith.mulf %430, %459 : vector<16x1xf32>
    %461 = arith.subf %417, %460 : vector<16x1xf32>
    %462 = vector.broadcast %459 : vector<16x1xf32> to vector<16x128xf32>
    %463 = arith.mulf %370, %462 : vector<16x128xf32>
    %464 = vector.broadcast %461 : vector<16x1xf32> to vector<16x128xf32>
    %465 = arith.addf %463, %464 : vector<16x128xf32>
    %cst_355 = arith.constant 0.000000e+00 : f32
    %466 = vector.broadcast %cst_355 : f32 to vector<16x128xf32>
    %467 = arith.cmpf oge, %465, %466 : vector<16x128xf32>
    %cst_356 = arith.constant 2.000000e-01 : f32
    %468 = vector.broadcast %cst_356 : f32 to vector<16x128xf32>
    %469 = arith.mulf %468, %465 : vector<16x128xf32>
    %470 = arith.select %467, %465, %469 : vector<16x128xi1>, vector<16x128xf32>
    %471 = vector.broadcast %459 : vector<16x1xf32> to vector<16x128xf32>
    %472 = arith.mulf %385, %471 : vector<16x128xf32>
    %473 = vector.broadcast %461 : vector<16x1xf32> to vector<16x128xf32>
    %474 = arith.addf %472, %473 : vector<16x128xf32>
    %cst_357 = arith.constant 0.000000e+00 : f32
    %475 = vector.broadcast %cst_357 : f32 to vector<16x128xf32>
    %476 = arith.cmpf oge, %474, %475 : vector<16x128xf32>
    %cst_358 = arith.constant 2.000000e-01 : f32
    %477 = vector.broadcast %cst_358 : f32 to vector<16x128xf32>
    %478 = arith.mulf %477, %474 : vector<16x128xf32>
    %479 = arith.select %476, %474, %478 : vector<16x128xi1>, vector<16x128xf32>
    %480 = vector.broadcast %459 : vector<16x1xf32> to vector<16x128xf32>
    %481 = arith.mulf %400, %480 : vector<16x128xf32>
    %482 = vector.broadcast %461 : vector<16x1xf32> to vector<16x128xf32>
    %483 = arith.addf %481, %482 : vector<16x128xf32>
    %cst_359 = arith.constant 0.000000e+00 : f32
    %484 = vector.broadcast %cst_359 : f32 to vector<16x128xf32>
    %485 = arith.cmpf oge, %483, %484 : vector<16x128xf32>
    %cst_360 = arith.constant 2.000000e-01 : f32
    %486 = vector.broadcast %cst_360 : f32 to vector<16x128xf32>
    %487 = arith.mulf %486, %483 : vector<16x128xf32>
    %488 = arith.select %485, %483, %487 : vector<16x128xi1>, vector<16x128xf32>
    %489 = vector.broadcast %459 : vector<16x1xf32> to vector<16x128xf32>
    %490 = arith.mulf %415, %489 : vector<16x128xf32>
    %491 = vector.broadcast %461 : vector<16x1xf32> to vector<16x128xf32>
    %492 = arith.addf %490, %491 : vector<16x128xf32>
    %cst_361 = arith.constant 0.000000e+00 : f32
    %493 = vector.broadcast %cst_361 : f32 to vector<16x128xf32>
    %494 = arith.cmpf oge, %492, %493 : vector<16x128xf32>
    %cst_362 = arith.constant 2.000000e-01 : f32
    %495 = vector.broadcast %cst_362 : f32 to vector<16x128xf32>
    %496 = arith.mulf %495, %492 : vector<16x128xf32>
    %497 = arith.select %494, %492, %496 : vector<16x128xi1>, vector<16x128xf32>
    %c0_363 = arith.constant 0 : index
    %c0_364 = arith.constant 0 : index
    %c0_365 = arith.constant 0 : index
    %498 = vector.load %arg20[%c0_363, %c0_364, %c0_365] : memref<4x16x128xf32, #tpu.memory_space<vmem>>, vector<1x16x128xf32>
    %499 = vector.shape_cast %498 : vector<1x16x128xf32> to vector<16x128xf32>
    %500 = vector.shape_cast %470 : vector<16x128xf32> to vector<1x16x128xf32>
    tpu.vector_store %arg20[%c0_363, %c0_364, %c0_365], %500 {strides = array<i32>} : memref<4x16x128xf32, #tpu.memory_space<vmem>>, vector<1x16x128xf32>,
    %c1_366 = arith.constant 1 : index
    %c0_367 = arith.constant 0 : index
    %c0_368 = arith.constant 0 : index
    %501 = vector.load %arg20[%c1_366, %c0_367, %c0_368] : memref<4x16x128xf32, #tpu.memory_space<vmem>>, vector<1x16x128xf32>
    %502 = vector.shape_cast %501 : vector<1x16x128xf32> to vector<16x128xf32>
    %503 = vector.shape_cast %479 : vector<16x128xf32> to vector<1x16x128xf32>
    tpu.vector_store %arg20[%c1_366, %c0_367, %c0_368], %503 {strides = array<i32>} : memref<4x16x128xf32, #tpu.memory_space<vmem>>, vector<1x16x128xf32>,
    %c2_369 = arith.constant 2 : index
    %c0_370 = arith.constant 0 : index
    %c0_371 = arith.constant 0 : index
    %504 = vector.load %arg20[%c2_369, %c0_370, %c0_371] : memref<4x16x128xf32, #tpu.memory_space<vmem>>, vector<1x16x128xf32>
    %505 = vector.shape_cast %504 : vector<1x16x128xf32> to vector<16x128xf32>
    %506 = vector.shape_cast %488 : vector<16x128xf32> to vector<1x16x128xf32>
    tpu.vector_store %arg20[%c2_369, %c0_370, %c0_371], %506 {strides = array<i32>} : memref<4x16x128xf32, #tpu.memory_space<vmem>>, vector<1x16x128xf32>,
    %c3_372 = arith.constant 3 : index
    %c0_373 = arith.constant 0 : index
    %c0_374 = arith.constant 0 : index
    %507 = vector.load %arg20[%c3_372, %c0_373, %c0_374] : memref<4x16x128xf32, #tpu.memory_space<vmem>>, vector<1x16x128xf32>
    %508 = vector.shape_cast %507 : vector<1x16x128xf32> to vector<16x128xf32>
    %509 = vector.shape_cast %497 : vector<16x128xf32> to vector<1x16x128xf32>
    tpu.vector_store %arg20[%c3_372, %c0_373, %c0_374], %509 {strides = array<i32>} : memref<4x16x128xf32, #tpu.memory_space<vmem>>, vector<1x16x128xf32>,
    %510 = arith.truncf %470 : vector<16x128xf32> to vector<16x128xbf16>
    %c0_375 = arith.constant 0 : index
    %c0_376 = arith.constant 0 : index
    %c0_377 = arith.constant 0 : index
    %511 = vector.load %arg14[%c0_375, %c0_376, %c0_377] : memref<4x128x512xbf16, #tpu.memory_space<vmem>>, vector<1x128x512xbf16>
    %512 = vector.shape_cast %511 : vector<1x128x512xbf16> to vector<128x512xbf16>
    %cst_378 = arith.constant dense<0.000000e+00> : vector<16x512xf32>
    %513 = tpu.matmul %510, %512, %cst_378 {dimension_numbers = #tpu.dot_dimension_numbers<[1], [0], [0], [1], [0, 0, 1, 1], [], []>} : vector<16x128xbf16>, vector<128x512xbf16>, vector<16x512xf32> -> vector<16x512xf32>
    %514 = arith.truncf %479 : vector<16x128xf32> to vector<16x128xbf16>
    %c1_379 = arith.constant 1 : index
    %c0_380 = arith.constant 0 : index
    %c0_381 = arith.constant 0 : index
    %515 = vector.load %arg14[%c1_379, %c0_380, %c0_381] : memref<4x128x512xbf16, #tpu.memory_space<vmem>>, vector<1x128x512xbf16>
    %516 = vector.shape_cast %515 : vector<1x128x512xbf16> to vector<128x512xbf16>
    %cst_382 = arith.constant dense<0.000000e+00> : vector<16x512xf32>
    %517 = tpu.matmul %514, %516, %cst_382 {dimension_numbers = #tpu.dot_dimension_numbers<[1], [0], [0], [1], [0, 0, 1, 1], [], []>} : vector<16x128xbf16>, vector<128x512xbf16>, vector<16x512xf32> -> vector<16x512xf32>
    %518 = arith.addf %513, %517 : vector<16x512xf32>
    %519 = arith.truncf %488 : vector<16x128xf32> to vector<16x128xbf16>
    %c2_383 = arith.constant 2 : index
    %c0_384 = arith.constant 0 : index
    %c0_385 = arith.constant 0 : index
    %520 = vector.load %arg14[%c2_383, %c0_384, %c0_385] : memref<4x128x512xbf16, #tpu.memory_space<vmem>>, vector<1x128x512xbf16>
    %521 = vector.shape_cast %520 : vector<1x128x512xbf16> to vector<128x512xbf16>
    %cst_386 = arith.constant dense<0.000000e+00> : vector<16x512xf32>
    %522 = tpu.matmul %519, %521, %cst_386 {dimension_numbers = #tpu.dot_dimension_numbers<[1], [0], [0], [1], [0, 0, 1, 1], [], []>} : vector<16x128xbf16>, vector<128x512xbf16>, vector<16x512xf32> -> vector<16x512xf32>
    %523 = arith.addf %518, %522 : vector<16x512xf32>
    %524 = arith.truncf %497 : vector<16x128xf32> to vector<16x128xbf16>
    %c3_387 = arith.constant 3 : index
    %c0_388 = arith.constant 0 : index
    %c0_389 = arith.constant 0 : index
    %525 = vector.load %arg14[%c3_387, %c0_388, %c0_389] : memref<4x128x512xbf16, #tpu.memory_space<vmem>>, vector<1x128x512xbf16>
    %526 = vector.shape_cast %525 : vector<1x128x512xbf16> to vector<128x512xbf16>
    %cst_390 = arith.constant dense<0.000000e+00> : vector<16x512xf32>
    %527 = tpu.matmul %524, %526, %cst_390 {dimension_numbers = #tpu.dot_dimension_numbers<[1], [0], [0], [1], [0, 0, 1, 1], [], []>} : vector<16x128xbf16>, vector<128x512xbf16>, vector<16x512xf32> -> vector<16x512xf32>
    %528 = arith.addf %523, %527 : vector<16x512xf32>
    %c0_391 = arith.constant 0 : index
    %c17_392 = arith.constant 17 : index
    %529 = vector.load %arg24[%c0_391, %c17_392] : memref<16x546xf32, #tpu.memory_space<vmem>>, vector<16x512xf32>
    tpu.vector_store %arg24[%c0_391, %c17_392], %528 {strides = array<i32>} : memref<16x546xf32, #tpu.memory_space<vmem>>, vector<16x512xf32>,
    %c0_393 = arith.constant 0 : index
    %c0_394 = arith.constant 0 : index
    %530 = vector.load %arg24[%c0_393, %c0_394] : memref<16x546xf32, #tpu.memory_space<vmem>>, vector<16x512xf32>
    %c0_395 = arith.constant 0 : index
    %c0_396 = arith.constant 0 : index
    %531 = vector.load %arg18[%c0_395, %c0_396] : memref<9x512xf32, #tpu.memory_space<vmem>>, vector<1x512xf32>
    %532 = vector.broadcast %531 : vector<1x512xf32> to vector<16x512xf32>
    %533 = arith.mulf %530, %532 : vector<16x512xf32>
    %534 = arith.truncf %533 : vector<16x512xf32> to vector<16x512xbf16>
    %c0_397 = arith.constant 0 : index
    %c1_398 = arith.constant 1 : index
    %535 = vector.load %arg24[%c0_397, %c1_398] : memref<16x546xf32, #tpu.memory_space<vmem>>, vector<16x512xf32>
    %c1_399 = arith.constant 1 : index
    %c0_400 = arith.constant 0 : index
    %536 = vector.load %arg18[%c1_399, %c0_400] : memref<9x512xf32, #tpu.memory_space<vmem>>, vector<1x512xf32>
    %537 = vector.broadcast %536 : vector<1x512xf32> to vector<16x512xf32>
    %538 = arith.mulf %535, %537 : vector<16x512xf32>
    %539 = arith.truncf %538 : vector<16x512xf32> to vector<16x512xbf16>
    %c0_401 = arith.constant 0 : index
    %c2_402 = arith.constant 2 : index
    %540 = vector.load %arg24[%c0_401, %c2_402] : memref<16x546xf32, #tpu.memory_space<vmem>>, vector<16x512xf32>
    %c2_403 = arith.constant 2 : index
    %c0_404 = arith.constant 0 : index
    %541 = vector.load %arg18[%c2_403, %c0_404] : memref<9x512xf32, #tpu.memory_space<vmem>>, vector<1x512xf32>
    %542 = vector.broadcast %541 : vector<1x512xf32> to vector<16x512xf32>
    %543 = arith.mulf %540, %542 : vector<16x512xf32>
    %544 = arith.truncf %543 : vector<16x512xf32> to vector<16x512xbf16>
    %c0_405 = arith.constant 0 : index
    %c16_406 = arith.constant 16 : index
    %545 = vector.load %arg24[%c0_405, %c16_406] : memref<16x546xf32, #tpu.memory_space<vmem>>, vector<16x512xf32>
    %c3_407 = arith.constant 3 : index
    %c0_408 = arith.constant 0 : index
    %546 = vector.load %arg18[%c3_407, %c0_408] : memref<9x512xf32, #tpu.memory_space<vmem>>, vector<1x512xf32>
    %547 = vector.broadcast %546 : vector<1x512xf32> to vector<16x512xf32>
    %548 = arith.mulf %545, %547 : vector<16x512xf32>
    %549 = arith.truncf %548 : vector<16x512xf32> to vector<16x512xbf16>
    %c0_409 = arith.constant 0 : index
    %c17_410 = arith.constant 17 : index
    %550 = vector.load %arg24[%c0_409, %c17_410] : memref<16x546xf32, #tpu.memory_space<vmem>>, vector<16x512xf32>
    %c4_411 = arith.constant 4 : index
    %c0_412 = arith.constant 0 : index
    %551 = vector.load %arg18[%c4_411, %c0_412] : memref<9x512xf32, #tpu.memory_space<vmem>>, vector<1x512xf32>
    %552 = vector.broadcast %551 : vector<1x512xf32> to vector<16x512xf32>
    %553 = arith.mulf %550, %552 : vector<16x512xf32>
    %554 = arith.truncf %553 : vector<16x512xf32> to vector<16x512xbf16>
    %c0_413 = arith.constant 0 : index
    %c18_414 = arith.constant 18 : index
    %555 = vector.load %arg24[%c0_413, %c18_414] : memref<16x546xf32, #tpu.memory_space<vmem>>, vector<16x512xf32>
    %c5_415 = arith.constant 5 : index
    %c0_416 = arith.constant 0 : index
    %556 = vector.load %arg18[%c5_415, %c0_416] : memref<9x512xf32, #tpu.memory_space<vmem>>, vector<1x512xf32>
    %557 = vector.broadcast %556 : vector<1x512xf32> to vector<16x512xf32>
    %558 = arith.mulf %555, %557 : vector<16x512xf32>
    %559 = arith.truncf %558 : vector<16x512xf32> to vector<16x512xbf16>
    %c0_417 = arith.constant 0 : index
    %c32 = arith.constant 32 : index
    %560 = vector.load %arg24[%c0_417, %c32] : memref<16x546xf32, #tpu.memory_space<vmem>>, vector<16x512xf32>
    %c6_418 = arith.constant 6 : index
    %c0_419 = arith.constant 0 : index
    %561 = vector.load %arg18[%c6_418, %c0_419] : memref<9x512xf32, #tpu.memory_space<vmem>>, vector<1x512xf32>
    %562 = vector.broadcast %561 : vector<1x512xf32> to vector<16x512xf32>
    %563 = arith.mulf %560, %562 : vector<16x512xf32>
    %564 = arith.truncf %563 : vector<16x512xf32> to vector<16x512xbf16>
    %c0_420 = arith.constant 0 : index
    %c33 = arith.constant 33 : index
    %565 = vector.load %arg24[%c0_420, %c33] : memref<16x546xf32, #tpu.memory_space<vmem>>, vector<16x512xf32>
    %c7_421 = arith.constant 7 : index
    %c0_422 = arith.constant 0 : index
    %566 = vector.load %arg18[%c7_421, %c0_422] : memref<9x512xf32, #tpu.memory_space<vmem>>, vector<1x512xf32>
    %567 = vector.broadcast %566 : vector<1x512xf32> to vector<16x512xf32>
    %568 = arith.mulf %565, %567 : vector<16x512xf32>
    %569 = arith.truncf %568 : vector<16x512xf32> to vector<16x512xbf16>
    %c0_423 = arith.constant 0 : index
    %c34 = arith.constant 34 : index
    %570 = vector.load %arg24[%c0_423, %c34] : memref<16x546xf32, #tpu.memory_space<vmem>>, vector<16x512xf32>
    %c8_424 = arith.constant 8 : index
    %c0_425 = arith.constant 0 : index
    %571 = vector.load %arg18[%c8_424, %c0_425] : memref<9x512xf32, #tpu.memory_space<vmem>>, vector<1x512xf32>
    %572 = vector.broadcast %571 : vector<1x512xf32> to vector<16x512xf32>
    %573 = arith.mulf %570, %572 : vector<16x512xf32>
    %574 = arith.truncf %573 : vector<16x512xf32> to vector<16x512xbf16>
    %c5_426 = arith.constant 5 : index
    %c0_427 = arith.constant 0 : index
    %c0_428 = arith.constant 0 : index
    %575 = vector.load %arg15[%c5_426, %c0_427, %c0_428] : memref<16x3x16xbf16, #tpu.memory_space<vmem>>, vector<1x3x16xbf16>
    %576 = vector.shape_cast %575 : vector<1x3x16xbf16> to vector<3x16xbf16>
    %cst_429 = arith.constant dense<0.000000e+00> : vector<3x512xf32>
    %577 = tpu.matmul %576, %554, %cst_429 {dimension_numbers = #tpu.dot_dimension_numbers<[1], [0], [0], [1], [0, 0, 1, 1], [], []>} : vector<3x16xbf16>, vector<16x512xbf16>, vector<3x512xf32> -> vector<3x512xf32>
    %c7_430 = arith.constant 7 : index
    %c0_431 = arith.constant 0 : index
    %c0_432 = arith.constant 0 : index
    %578 = vector.load %arg15[%c7_430, %c0_431, %c0_432] : memref<16x3x16xbf16, #tpu.memory_space<vmem>>, vector<1x3x16xbf16>
    %579 = vector.shape_cast %578 : vector<1x3x16xbf16> to vector<3x16xbf16>
    %cst_433 = arith.constant dense<0.000000e+00> : vector<3x512xf32>
    %580 = tpu.matmul %579, %549, %cst_433 {dimension_numbers = #tpu.dot_dimension_numbers<[1], [0], [0], [1], [0, 0, 1, 1], [], []>} : vector<3x16xbf16>, vector<16x512xbf16>, vector<3x512xf32> -> vector<3x512xf32>
    %581 = arith.addf %577, %580 : vector<3x512xf32>
    %c13_434 = arith.constant 13 : index
    %c0_435 = arith.constant 0 : index
    %c0_436 = arith.constant 0 : index
    %582 = vector.load %arg15[%c13_434, %c0_435, %c0_436] : memref<16x3x16xbf16, #tpu.memory_space<vmem>>, vector<1x3x16xbf16>
    %583 = vector.shape_cast %582 : vector<1x3x16xbf16> to vector<3x16xbf16>
    %cst_437 = arith.constant dense<0.000000e+00> : vector<3x512xf32>
    %584 = tpu.matmul %583, %539, %cst_437 {dimension_numbers = #tpu.dot_dimension_numbers<[1], [0], [0], [1], [0, 0, 1, 1], [], []>} : vector<3x16xbf16>, vector<16x512xbf16>, vector<3x512xf32> -> vector<3x512xf32>
    %585 = arith.addf %581, %584 : vector<3x512xf32>
    %c15_438 = arith.constant 15 : index
    %c0_439 = arith.constant 0 : index
    %c0_440 = arith.constant 0 : index
    %586 = vector.load %arg15[%c15_438, %c0_439, %c0_440] : memref<16x3x16xbf16, #tpu.memory_space<vmem>>, vector<1x3x16xbf16>
    %587 = vector.shape_cast %586 : vector<1x3x16xbf16> to vector<3x16xbf16>
    %cst_441 = arith.constant dense<0.000000e+00> : vector<3x512xf32>
    %588 = tpu.matmul %587, %534, %cst_441 {dimension_numbers = #tpu.dot_dimension_numbers<[1], [0], [0], [1], [0, 0, 1, 1], [], []>} : vector<3x16xbf16>, vector<16x512xbf16>, vector<3x512xf32> -> vector<3x512xf32>
    %589 = arith.addf %585, %588 : vector<3x512xf32>
    %c6_442 = arith.constant 6 : index
    %c0_443 = arith.constant 0 : index
    %c0_444 = arith.constant 0 : index
    %590 = vector.load %arg15[%c6_442, %c0_443, %c0_444] : memref<16x3x16xbf16, #tpu.memory_space<vmem>>, vector<1x3x16xbf16>
    %591 = vector.shape_cast %590 : vector<1x3x16xbf16> to vector<3x16xbf16>
    %cst_445 = arith.constant dense<0.000000e+00> : vector<3x512xf32>
    %592 = tpu.matmul %591, %554, %cst_445 {dimension_numbers = #tpu.dot_dimension_numbers<[1], [0], [0], [1], [0, 0, 1, 1], [], []>} : vector<3x16xbf16>, vector<16x512xbf16>, vector<3x512xf32> -> vector<3x512xf32>
    %c4_446 = arith.constant 4 : index
    %c0_447 = arith.constant 0 : index
    %c0_448 = arith.constant 0 : index
    %593 = vector.load %arg15[%c4_446, %c0_447, %c0_448] : memref<16x3x16xbf16, #tpu.memory_space<vmem>>, vector<1x3x16xbf16>
    %594 = vector.shape_cast %593 : vector<1x3x16xbf16> to vector<3x16xbf16>
    %cst_449 = arith.constant dense<0.000000e+00> : vector<3x512xf32>
    %595 = tpu.matmul %594, %559, %cst_449 {dimension_numbers = #tpu.dot_dimension_numbers<[1], [0], [0], [1], [0, 0, 1, 1], [], []>} : vector<3x16xbf16>, vector<16x512xbf16>, vector<3x512xf32> -> vector<3x512xf32>
    %596 = arith.addf %592, %595 : vector<3x512xf32>
    %c14_450 = arith.constant 14 : index
    %c0_451 = arith.constant 0 : index
    %c0_452 = arith.constant 0 : index
    %597 = vector.load %arg15[%c14_450, %c0_451, %c0_452] : memref<16x3x16xbf16, #tpu.memory_space<vmem>>, vector<1x3x16xbf16>
    %598 = vector.shape_cast %597 : vector<1x3x16xbf16> to vector<3x16xbf16>
    %cst_453 = arith.constant dense<0.000000e+00> : vector<3x512xf32>
    %599 = tpu.matmul %598, %539, %cst_453 {dimension_numbers = #tpu.dot_dimension_numbers<[1], [0], [0], [1], [0, 0, 1, 1], [], []>} : vector<3x16xbf16>, vector<16x512xbf16>, vector<3x512xf32> -> vector<3x512xf32>
    %600 = arith.addf %596, %599 : vector<3x512xf32>
    %c12_454 = arith.constant 12 : index
    %c0_455 = arith.constant 0 : index
    %c0_456 = arith.constant 0 : index
    %601 = vector.load %arg15[%c12_454, %c0_455, %c0_456] : memref<16x3x16xbf16, #tpu.memory_space<vmem>>, vector<1x3x16xbf16>
    %602 = vector.shape_cast %601 : vector<1x3x16xbf16> to vector<3x16xbf16>
    %cst_457 = arith.constant dense<0.000000e+00> : vector<3x512xf32>
    %603 = tpu.matmul %602, %544, %cst_457 {dimension_numbers = #tpu.dot_dimension_numbers<[1], [0], [0], [1], [0, 0, 1, 1], [], []>} : vector<3x16xbf16>, vector<16x512xbf16>, vector<3x512xf32> -> vector<3x512xf32>
    %604 = arith.addf %600, %603 : vector<3x512xf32>
    %c9_458 = arith.constant 9 : index
    %c0_459 = arith.constant 0 : index
    %c0_460 = arith.constant 0 : index
    %605 = vector.load %arg15[%c9_458, %c0_459, %c0_460] : memref<16x3x16xbf16, #tpu.memory_space<vmem>>, vector<1x3x16xbf16>
    %606 = vector.shape_cast %605 : vector<1x3x16xbf16> to vector<3x16xbf16>
    %cst_461 = arith.constant dense<0.000000e+00> : vector<3x512xf32>
    %607 = tpu.matmul %606, %554, %cst_461 {dimension_numbers = #tpu.dot_dimension_numbers<[1], [0], [0], [1], [0, 0, 1, 1], [], []>} : vector<3x16xbf16>, vector<16x512xbf16>, vector<3x512xf32> -> vector<3x512xf32>
    %c11_462 = arith.constant 11 : index
    %c0_463 = arith.constant 0 : index
    %c0_464 = arith.constant 0 : index
    %608 = vector.load %arg15[%c11_462, %c0_463, %c0_464] : memref<16x3x16xbf16, #tpu.memory_space<vmem>>, vector<1x3x16xbf16>
    %609 = vector.shape_cast %608 : vector<1x3x16xbf16> to vector<3x16xbf16>
    %cst_465 = arith.constant dense<0.000000e+00> : vector<3x512xf32>
    %610 = tpu.matmul %609, %549, %cst_465 {dimension_numbers = #tpu.dot_dimension_numbers<[1], [0], [0], [1], [0, 0, 1, 1], [], []>} : vector<3x16xbf16>, vector<16x512xbf16>, vector<3x512xf32> -> vector<3x512xf32>
    %611 = arith.addf %607, %610 : vector<3x512xf32>
    %c1_466 = arith.constant 1 : index
    %c0_467 = arith.constant 0 : index
    %c0_468 = arith.constant 0 : index
    %612 = vector.load %arg15[%c1_466, %c0_467, %c0_468] : memref<16x3x16xbf16, #tpu.memory_space<vmem>>, vector<1x3x16xbf16>
    %613 = vector.shape_cast %612 : vector<1x3x16xbf16> to vector<3x16xbf16>
    %cst_469 = arith.constant dense<0.000000e+00> : vector<3x512xf32>
    %614 = tpu.matmul %613, %569, %cst_469 {dimension_numbers = #tpu.dot_dimension_numbers<[1], [0], [0], [1], [0, 0, 1, 1], [], []>} : vector<3x16xbf16>, vector<16x512xbf16>, vector<3x512xf32> -> vector<3x512xf32>
    %615 = arith.addf %611, %614 : vector<3x512xf32>
    %c3_470 = arith.constant 3 : index
    %c0_471 = arith.constant 0 : index
    %c0_472 = arith.constant 0 : index
    %616 = vector.load %arg15[%c3_470, %c0_471, %c0_472] : memref<16x3x16xbf16, #tpu.memory_space<vmem>>, vector<1x3x16xbf16>
    %617 = vector.shape_cast %616 : vector<1x3x16xbf16> to vector<3x16xbf16>
    %cst_473 = arith.constant dense<0.000000e+00> : vector<3x512xf32>
    %618 = tpu.matmul %617, %564, %cst_473 {dimension_numbers = #tpu.dot_dimension_numbers<[1], [0], [0], [1], [0, 0, 1, 1], [], []>} : vector<3x16xbf16>, vector<16x512xbf16>, vector<3x512xf32> -> vector<3x512xf32>
    %619 = arith.addf %615, %618 : vector<3x512xf32>
    %c10_474 = arith.constant 10 : index
    %c0_475 = arith.constant 0 : index
    %c0_476 = arith.constant 0 : index
    %620 = vector.load %arg15[%c10_474, %c0_475, %c0_476] : memref<16x3x16xbf16, #tpu.memory_space<vmem>>, vector<1x3x16xbf16>
    %621 = vector.shape_cast %620 : vector<1x3x16xbf16> to vector<3x16xbf16>
    %cst_477 = arith.constant dense<0.000000e+00> : vector<3x512xf32>
    %622 = tpu.matmul %621, %554, %cst_477 {dimension_numbers = #tpu.dot_dimension_numbers<[1], [0], [0], [1], [0, 0, 1, 1], [], []>} : vector<3x16xbf16>, vector<16x512xbf16>, vector<3x512xf32> -> vector<3x512xf32>
    %c8_478 = arith.constant 8 : index
    %c0_479 = arith.constant 0 : index
    %c0_480 = arith.constant 0 : index
    %623 = vector.load %arg15[%c8_478, %c0_479, %c0_480] : memref<16x3x16xbf16, #tpu.memory_space<vmem>>, vector<1x3x16xbf16>
    %624 = vector.shape_cast %623 : vector<1x3x16xbf16> to vector<3x16xbf16>
    %cst_481 = arith.constant dense<0.000000e+00> : vector<3x512xf32>
    %625 = tpu.matmul %624, %559, %cst_481 {dimension_numbers = #tpu.dot_dimension_numbers<[1], [0], [0], [1], [0, 0, 1, 1], [], []>} : vector<3x16xbf16>, vector<16x512xbf16>, vector<3x512xf32> -> vector<3x512xf32>
    %626 = arith.addf %622, %625 : vector<3x512xf32>
    %c2_482 = arith.constant 2 : index
    %c0_483 = arith.constant 0 : index
    %c0_484 = arith.constant 0 : index
    %627 = vector.load %arg15[%c2_482, %c0_483, %c0_484] : memref<16x3x16xbf16, #tpu.memory_space<vmem>>, vector<1x3x16xbf16>
    %628 = vector.shape_cast %627 : vector<1x3x16xbf16> to vector<3x16xbf16>
    %cst_485 = arith.constant dense<0.000000e+00> : vector<3x512xf32>
    %629 = tpu.matmul %628, %569, %cst_485 {dimension_numbers = #tpu.dot_dimension_numbers<[1], [0], [0], [1], [0, 0, 1, 1], [], []>} : vector<3x16xbf16>, vector<16x512xbf16>, vector<3x512xf32> -> vector<3x512xf32>
    %630 = arith.addf %626, %629 : vector<3x512xf32>
    %c0_486 = arith.constant 0 : index
    %c0_487 = arith.constant 0 : index
    %c0_488 = arith.constant 0 : index
    %631 = vector.load %arg15[%c0_486, %c0_487, %c0_488] : memref<16x3x16xbf16, #tpu.memory_space<vmem>>, vector<1x3x16xbf16>
    %632 = vector.shape_cast %631 : vector<1x3x16xbf16> to vector<3x16xbf16>
    %cst_489 = arith.constant dense<0.000000e+00> : vector<3x512xf32>
    %633 = tpu.matmul %632, %574, %cst_489 {dimension_numbers = #tpu.dot_dimension_numbers<[1], [0], [0], [1], [0, 0, 1, 1], [], []>} : vector<3x16xbf16>, vector<16x512xbf16>, vector<3x512xf32> -> vector<3x512xf32>
    %634 = arith.addf %630, %633 : vector<3x512xf32>
    %c0_490 = arith.constant 0 : index
    %c0_491 = arith.constant 0 : index
    %635 = vector.load %arg16[%c0_490, %c0_491] : memref<3x1xf32, #tpu.memory_space<vmem>>, vector<3x1xf32>
    %c0_492 = arith.constant 0 : index
    %c0_493 = arith.constant 0 : index
    %636 = vector.load %arg17[%c0_492, %c0_493] : memref<3x1xf32, #tpu.memory_space<vmem>>, vector<3x1xf32>
    %cst_494 = arith.constant dense<0.000000e+00> : vector<3xf32>
    %637 = vector.multi_reduction <add>, %589, %cst_494 [1] : vector<3x512xf32> to vector<3xf32>
    %638 = vector.shape_cast %637 : vector<3xf32> to vector<3x1xf32>
    %cst_495 = arith.constant dense<0.000000e+00> : vector<3xf32>
    %639 = vector.multi_reduction <add>, %604, %cst_495 [1] : vector<3x512xf32> to vector<3xf32>
    %640 = vector.shape_cast %639 : vector<3xf32> to vector<3x1xf32>
    %641 = arith.addf %638, %640 : vector<3x1xf32>
    %cst_496 = arith.constant dense<0.000000e+00> : vector<3xf32>
    %642 = vector.multi_reduction <add>, %619, %cst_496 [1] : vector<3x512xf32> to vector<3xf32>
    %643 = vector.shape_cast %642 : vector<3xf32> to vector<3x1xf32>
    %644 = arith.addf %641, %643 : vector<3x1xf32>
    %cst_497 = arith.constant dense<0.000000e+00> : vector<3xf32>
    %645 = vector.multi_reduction <add>, %634, %cst_497 [1] : vector<3x512xf32> to vector<3xf32>
    %646 = vector.shape_cast %645 : vector<3xf32> to vector<3x1xf32>
    %647 = arith.addf %644, %646 : vector<3x1xf32>
    %cst_498 = arith.constant 2.048000e+03 : f32
    %648 = vector.broadcast %cst_498 : f32 to vector<3x1xf32>
    %649 = arith.divf %647, %648 : vector<3x1xf32>
    %650 = vector.broadcast %649 : vector<3x1xf32> to vector<3x512xf32>
    %651 = arith.subf %589, %650 : vector<3x512xf32>
    %652 = arith.mulf %651, %651 : vector<3x512xf32>
    %cst_499 = arith.constant dense<0.000000e+00> : vector<3xf32>
    %653 = vector.multi_reduction <add>, %652, %cst_499 [1] : vector<3x512xf32> to vector<3xf32>
    %654 = vector.shape_cast %653 : vector<3xf32> to vector<3x1xf32>
    %655 = vector.broadcast %649 : vector<3x1xf32> to vector<3x512xf32>
    %656 = arith.subf %604, %655 : vector<3x512xf32>
    %657 = arith.mulf %656, %656 : vector<3x512xf32>
    %cst_500 = arith.constant dense<0.000000e+00> : vector<3xf32>
    %658 = vector.multi_reduction <add>, %657, %cst_500 [1] : vector<3x512xf32> to vector<3xf32>
    %659 = vector.shape_cast %658 : vector<3xf32> to vector<3x1xf32>
    %660 = arith.addf %654, %659 : vector<3x1xf32>
    %661 = vector.broadcast %649 : vector<3x1xf32> to vector<3x512xf32>
    %662 = arith.subf %619, %661 : vector<3x512xf32>
    %663 = arith.mulf %662, %662 : vector<3x512xf32>
    %cst_501 = arith.constant dense<0.000000e+00> : vector<3xf32>
    %664 = vector.multi_reduction <add>, %663, %cst_501 [1] : vector<3x512xf32> to vector<3xf32>
    %665 = vector.shape_cast %664 : vector<3xf32> to vector<3x1xf32>
    %666 = arith.addf %660, %665 : vector<3x1xf32>
    %667 = vector.broadcast %649 : vector<3x1xf32> to vector<3x512xf32>
    %668 = arith.subf %634, %667 : vector<3x512xf32>
    %669 = arith.mulf %668, %668 : vector<3x512xf32>
    %cst_502 = arith.constant dense<0.000000e+00> : vector<3xf32>
    %670 = vector.multi_reduction <add>, %669, %cst_502 [1] : vector<3x512xf32> to vector<3xf32>
    %671 = vector.shape_cast %670 : vector<3xf32> to vector<3x1xf32>
    %672 = arith.addf %666, %671 : vector<3x1xf32>
    %cst_503 = arith.constant 2.048000e+03 : f32
    %673 = vector.broadcast %cst_503 : f32 to vector<3x1xf32>
    %674 = arith.divf %672, %673 : vector<3x1xf32>
    %cst_504 = arith.constant 9.99999974E-6 : f32
    %675 = vector.broadcast %cst_504 : f32 to vector<3x1xf32>
    %676 = arith.addf %674, %675 : vector<3x1xf32>
    %677 = math.rsqrt %676 : vector<3x1xf32>
    %678 = arith.mulf %635, %677 : vector<3x1xf32>
    %679 = arith.mulf %649, %678 : vector<3x1xf32>
    %680 = arith.subf %636, %679 : vector<3x1xf32>
    %681 = vector.broadcast %678 : vector<3x1xf32> to vector<3x512xf32>
    %682 = arith.mulf %589, %681 : vector<3x512xf32>
    %683 = vector.broadcast %680 : vector<3x1xf32> to vector<3x512xf32>
    %684 = arith.addf %682, %683 : vector<3x512xf32>
    %cst_505 = arith.constant 0.000000e+00 : f32
    %685 = vector.broadcast %cst_505 : f32 to vector<3x512xf32>
    %686 = arith.cmpf oge, %684, %685 : vector<3x512xf32>
    %cst_506 = arith.constant 2.000000e-01 : f32
    %687 = vector.broadcast %cst_506 : f32 to vector<3x512xf32>
    %688 = arith.mulf %687, %684 : vector<3x512xf32>
    %689 = arith.select %686, %684, %688 : vector<3x512xi1>, vector<3x512xf32>
    %690 = math.tanh %689 : vector<3x512xf32>
    %691 = vector.broadcast %678 : vector<3x1xf32> to vector<3x512xf32>
    %692 = arith.mulf %604, %691 : vector<3x512xf32>
    %693 = vector.broadcast %680 : vector<3x1xf32> to vector<3x512xf32>
    %694 = arith.addf %692, %693 : vector<3x512xf32>
    %cst_507 = arith.constant 0.000000e+00 : f32
    %695 = vector.broadcast %cst_507 : f32 to vector<3x512xf32>
    %696 = arith.cmpf oge, %694, %695 : vector<3x512xf32>
    %cst_508 = arith.constant 2.000000e-01 : f32
    %697 = vector.broadcast %cst_508 : f32 to vector<3x512xf32>
    %698 = arith.mulf %697, %694 : vector<3x512xf32>
    %699 = arith.select %696, %694, %698 : vector<3x512xi1>, vector<3x512xf32>
    %700 = math.tanh %699 : vector<3x512xf32>
    %701 = vector.broadcast %678 : vector<3x1xf32> to vector<3x512xf32>
    %702 = arith.mulf %619, %701 : vector<3x512xf32>
    %703 = vector.broadcast %680 : vector<3x1xf32> to vector<3x512xf32>
    %704 = arith.addf %702, %703 : vector<3x512xf32>
    %cst_509 = arith.constant 0.000000e+00 : f32
    %705 = vector.broadcast %cst_509 : f32 to vector<3x512xf32>
    %706 = arith.cmpf oge, %704, %705 : vector<3x512xf32>
    %cst_510 = arith.constant 2.000000e-01 : f32
    %707 = vector.broadcast %cst_510 : f32 to vector<3x512xf32>
    %708 = arith.mulf %707, %704 : vector<3x512xf32>
    %709 = arith.select %706, %704, %708 : vector<3x512xi1>, vector<3x512xf32>
    %710 = math.tanh %709 : vector<3x512xf32>
    %711 = vector.broadcast %678 : vector<3x1xf32> to vector<3x512xf32>
    %712 = arith.mulf %634, %711 : vector<3x512xf32>
    %713 = vector.broadcast %680 : vector<3x1xf32> to vector<3x512xf32>
    %714 = arith.addf %712, %713 : vector<3x512xf32>
    %cst_511 = arith.constant 0.000000e+00 : f32
    %715 = vector.broadcast %cst_511 : f32 to vector<3x512xf32>
    %716 = arith.cmpf oge, %714, %715 : vector<3x512xf32>
    %cst_512 = arith.constant 2.000000e-01 : f32
    %717 = vector.broadcast %cst_512 : f32 to vector<3x512xf32>
    %718 = arith.mulf %717, %714 : vector<3x512xf32>
    %719 = arith.select %716, %714, %718 : vector<3x512xi1>, vector<3x512xf32>
    %720 = math.tanh %719 : vector<3x512xf32>
    %c0_513 = arith.constant 0 : index
    %c0_514 = arith.constant 0 : index
    %c0_515 = arith.constant 0 : index
    %721 = vector.load %arg19[%c0_513, %c0_514, %c0_515] : memref<4x3x512xf32, #tpu.memory_space<vmem>>, vector<1x3x512xf32>
    %722 = vector.shape_cast %721 : vector<1x3x512xf32> to vector<3x512xf32>
    %723 = vector.shape_cast %690 : vector<3x512xf32> to vector<1x3x512xf32>
    tpu.vector_store %arg19[%c0_513, %c0_514, %c0_515], %723 {strides = array<i32>} : memref<4x3x512xf32, #tpu.memory_space<vmem>>, vector<1x3x512xf32>,
    %c1_516 = arith.constant 1 : index
    %c0_517 = arith.constant 0 : index
    %c0_518 = arith.constant 0 : index
    %724 = vector.load %arg19[%c1_516, %c0_517, %c0_518] : memref<4x3x512xf32, #tpu.memory_space<vmem>>, vector<1x3x512xf32>
    %725 = vector.shape_cast %724 : vector<1x3x512xf32> to vector<3x512xf32>
    %726 = vector.shape_cast %700 : vector<3x512xf32> to vector<1x3x512xf32>
    tpu.vector_store %arg19[%c1_516, %c0_517, %c0_518], %726 {strides = array<i32>} : memref<4x3x512xf32, #tpu.memory_space<vmem>>, vector<1x3x512xf32>,
    %c2_519 = arith.constant 2 : index
    %c0_520 = arith.constant 0 : index
    %c0_521 = arith.constant 0 : index
    %727 = vector.load %arg19[%c2_519, %c0_520, %c0_521] : memref<4x3x512xf32, #tpu.memory_space<vmem>>, vector<1x3x512xf32>
    %728 = vector.shape_cast %727 : vector<1x3x512xf32> to vector<3x512xf32>
    %729 = vector.shape_cast %710 : vector<3x512xf32> to vector<1x3x512xf32>
    tpu.vector_store %arg19[%c2_519, %c0_520, %c0_521], %729 {strides = array<i32>} : memref<4x3x512xf32, #tpu.memory_space<vmem>>, vector<1x3x512xf32>,
    %c3_522 = arith.constant 3 : index
    %c0_523 = arith.constant 0 : index
    %c0_524 = arith.constant 0 : index
    %730 = vector.load %arg19[%c3_522, %c0_523, %c0_524] : memref<4x3x512xf32, #tpu.memory_space<vmem>>, vector<1x3x512xf32>
    %731 = vector.shape_cast %730 : vector<1x3x512xf32> to vector<3x512xf32>
    %732 = vector.shape_cast %720 : vector<3x512xf32> to vector<1x3x512xf32>
    tpu.vector_store %arg19[%c3_522, %c0_523, %c0_524], %732 {strides = array<i32>} : memref<4x3x512xf32, #tpu.memory_space<vmem>>, vector<1x3x512xf32>,
    return
  }
}

</mosaic_0001>

<bundles_post_ra>
// kernel: _lambda_.1
= control target key start
LH: loop header
LB: loop body
LE: loop exit
PB: predicated region body
PF: predicated region fallthrough
CT: control target
= control target key end

     0   :  { %s15135_s0 = inlined_call_operand.vmem [shape: bf16[32,2], index: 0, kind: input, shape index: {}]   ;;  %s15136_s1 = inlined_call_operand.hbm [shape: bf16[16,64,32], index: 1, kind: input, shape index: {}]   ;;  %s15137_s2 = inlined_call_operand.hbm [shape: f32[64,1], index: 2, kind: input, shape index: {}]   ;;  %s15138_s3 = inlined_call_operand.vmem [shape: f32[64,1], index: 3, kind: input, shape index: {}]   ;;  %s15139_s4 = inlined_call_operand.hbm [shape: bf16[32,32], index: 4, kind: input, shape index: {}]   ;;  %s15140_s5 = inlined_call_operand.hbm [shape: bf16[16,32,64], index: 5, kind: input, shape index: {}]   ;;  %s15141_s6 = inlined_call_operand.hbm [shape: f32[32,1], index: 6, kind: input, shape index: {}]   ;;  %s15142_s7 = inlined_call_operand.vmem [shape: f32[32,1], index: 7, kind: input, shape index: {}]   ;;  %s15143_s8 = inlined_call_operand.hbm [shape: f32[9,32], index: 8, kind: input, shape index: {}]   ;;  %s15144_s9 = inlined_call_operand.hbm [shape: bf16[4,32,128], index: 9, kind: input, shape index: {}]   ;;  %s15145_s10 = inlined_call_operand.hbm [shape: bf16[16,16,32], index: 10, kind: input, shape index: {}]   ;;  %s15146_s11 = inlined_call_operand.hbm [shape: f32[16,1], index: 11, kind: input, shape index: {}]   ;;  %s15147_s12 = inlined_call_operand.vmem [shape: f32[16,1], index: 12, kind: input, shape index: {}]   ;;  %s15148_s13 = inlined_call_operand.hbm [shape: f32[9,128], index: 13, kind: input, shape index: {}]   ;;  %s15149_s14 = inlined_call_operand.vmem [shape: bf16[4,128,512], index: 14, kind: input, shape index: {}]   ;;  %s15150_s15 = inlined_call_operand.hbm [shape: bf16[16,3,16], index: 15, kind: input, shape index: {}]   ;;  %s15151_s16 = inlined_call_operand.hbm [shape: f32[3,1], index: 16, kind: input, shape index: {}]   ;;  %s15152_s17 = inlined_call_operand.vmem [shape: f32[3,1], index: 17, kind: input, shape index: {}]   ;;  %s15153_s18 = inlined_call_operand.hbm [shape: f32[9,512], index: 18, kind: input, shape index: {}]   ;;  %s15154_s19 = inlined_call_operand.vmem [shape: f32[4,3,512], index: 19, kind: output, shape index: {0}]   ;;  %s15155_s20 = inlined_call_operand.vmem [shape: f32[4,16,128], index: 20, kind: output, shape index: {1}]  }
   0x1   :  { %15162 = sst [smem:[#allocation33_spill]] %s15135_s0 }
   0x2   :  { %15163 = sst [smem:[#allocation34_spill]] %s15136_s1 }
   0x3   :  { %15164 = sst [smem:[#allocation35_spill]] %s15137_s2 }
   0x4   :  { %15165 = sst [smem:[#allocation36_spill]] %s15138_s3 }
   0x5   :  { %15166 = sst [smem:[#allocation37_spill]] %s15139_s4 }
   0x6   :  { %15167 = sst [smem:[#allocation38_spill]] %s15152_s17 }
   0x7   :  { %15168 = sst [smem:[#allocation39_spill]] %s15154_s19 }
   0x8   :  { %26 = vsyncpa [#allocation7], 0 }
   0x9   :  { %27 = vsyncpa [#allocation9], 0 }
   0xa   :  { %28 = vsyncpa [#allocation12], 0 }
   0xb   :  { %29 = vsyncpa [#allocation15], 0 }
   0xc   :  { %30 = vsyncpa [#allocation18], 0 }
   0xd   :  { %31 = vsyncpa [#allocation21], 0 }
   0xe   :  { %32 = vsyncpa [#allocation24], 0  ;;  %s12288_s1 = smov [#allocation8]   ;;  %s15169_s2 = sld [smem:[#allocation35_spill]] }
   0xf   :  { %s52_s22 = sshll.u32 %s12288_s1, 4  ;;  %s53_s22 = int_to_ptr.vmem [resolvable:$true] %s52_s22 }
  0x14   :  { %s11988_s25 = scalar_lea.hbm %s15169_s2, 1024 }
  0x15   :  { %p11989_p0 = scmp.ne.s32.totalorder %s15169_s2, %s11988_s25  ;;  %p11992_p1 = scmp.lt.u32.totalorder %s11988_s25, %s15169_s2 }
  0x17   :  { %p11994_p2 = pnand %p11992_p1, %p11989_p0 }
  0x19   :  { %11997 = shalt.err (!%p11994_p2)
}
  0x1a   :  { %s11998_s4 = scalar_lea.vmem %s53_s22, 1024  ;;  %p12003_p4 = scmp.lt.s32.totalorder %s53_s22, %s53_s22 }
  0x1b   :  { %p11999_p3 = scmp.ne.s32.totalorder %s53_s22, %s11998_s4  ;;  %p12004_p5 = scmp.lt.s32.totalorder %s11998_s4, %s11998_s4 }
  0x1d   :  { %p12005_p6 = por %p12004_p5, %p12003_p4 }
  0x1f   :  { %p12006_p7 = pnand %p12005_p6, %p11999_p3 }
  0x21   :  { %12009 = shalt.err (!%p12006_p7)
}
  0x22   :  { %s12289_s29 = smov 128   ;;  %s12290_s30 = smov 8  }
  0x23   :  { %58 = dma.hbm_to_vmem [thread:$0]  %s15169_s2, 1024, %s53_s22, [#allocation9], %s12289_s29, %s12289_s29, %s12290_s30  }
  0x24   :  { %s12291_s1 = smov [#allocation11]   ;;  %s12292_s24 = smov [#allocation14]  }
  0x25   :  { %s78_s23 = sshll.u32 %s12291_s1, 4  ;;  %s104_s25 = sshll.u32 %s12292_s24, 4  ;;  %s79_s23 = int_to_ptr.vmem [resolvable:$true] %s78_s23  ;;  %s105_s25 = int_to_ptr.vmem [resolvable:$true] %s104_s25 }
  0x26   :  { %s12010_s27 = scalar_lea.hbm %s15140_s5, 4096 }
  0x27   :  { %p12011_p8 = scmp.ne.s32.totalorder %s15140_s5, %s12010_s27  ;;  %p12014_p9 = scmp.lt.u32.totalorder %s12010_s27, %s15140_s5 }
  0x29   :  { %p12016_p10 = pnand %p12014_p9, %p12011_p8 }
  0x2b   :  { %12019 = shalt.err (!%p12016_p10)
}
  0x2c   :  { %s12020_s22 = scalar_lea.vmem %s79_s23, 4096  ;;  %p12025_p12 = scmp.lt.s32.totalorder %s79_s23, %s79_s23 }
  0x2d   :  { %p12021_p11 = scmp.ne.s32.totalorder %s79_s23, %s12020_s22  ;;  %p12026_p13 = scmp.lt.s32.totalorder %s12020_s22, %s12020_s22 }
  0x2f   :  { %p12027_p0 = por %p12026_p13, %p12025_p12 }
  0x31   :  { %p12028_p1 = pnand %p12027_p0, %p12021_p11 }
  0x33   :  { %12031 = shalt.err (!%p12028_p1)
}
  0x34   :  { %s12293_s2 = smov 64   ;;  %s12294_s0 = smov 4  }
  0x35   :  { %84 = dma.hbm_to_vmem [thread:$0]  %s15140_s5, 4096, %s79_s23, [#allocation12], %s12293_s2, %s12293_s2, %s12294_s0  }
  0x36   :  { %s12032_s24 = scalar_lea.hbm %s15143_s8, 256 }
  0x37   :  { %p12033_p2 = scmp.ne.s32.totalorder %s15143_s8, %s12032_s24  ;;  %p12036_p3 = scmp.lt.u32.totalorder %s12032_s24, %s15143_s8 }
  0x39   :  { %p12038_p4 = pnand %p12036_p3, %p12033_p2 }
  0x3b   :  { %12041 = shalt.err (!%p12038_p4)
}
  0x3c   :  { %s12042_s4 = scalar_lea.vmem %s105_s25, 256  ;;  %p12047_p6 = scmp.lt.s32.totalorder %s105_s25, %s105_s25 }
  0x3d   :  { %p12043_p5 = scmp.ne.s32.totalorder %s105_s25, %s12042_s4  ;;  %p12048_p7 = scmp.lt.s32.totalorder %s12042_s4, %s12042_s4 }
  0x3f   :  { %p12049_p8 = por %p12048_p7, %p12047_p6 }
  0x41   :  { %p12050_p9 = pnand %p12049_p8, %p12043_p5 }
  0x43   :  { %12053 = shalt.err (!%p12050_p9)
}
  0x44   :  { %110 = dma.hbm_to_vmem [thread:$0]  %s15143_s8, 256, %s105_s25, [#allocation15], %s12289_s29, %s12289_s29, %s12290_s30  }
  0x45   :  { %s12295_s22 = smov [#allocation17]   ;;  %s12296_s1 = smov [#allocation20]  }
  0x46   :  { %s128_s21 = sshll.u32 %s12295_s22, 4  ;;  %s154_s17 = sshll.u32 %s12296_s1, 4  ;;  %s129_s21 = int_to_ptr.vmem [resolvable:$true] %s128_s21  ;;  %s155_s17 = int_to_ptr.vmem [resolvable:$true] %s154_s17 }
  0x47   :  { %s12054_s3 = scalar_lea.hbm %s15145_s10, 2048 }
  0x48   :  { %p12055_p10 = scmp.ne.s32.totalorder %s15145_s10, %s12054_s3  ;;  %p12058_p11 = scmp.lt.u32.totalorder %s12054_s3, %s15145_s10 }
  0x4a   :  { %p12060_p12 = pnand %p12058_p11, %p12055_p10 }
  0x4c   :  { %12063 = shalt.err (!%p12060_p12)
}
  0x4d   :  { %s12064_s8 = scalar_lea.vmem %s129_s21, 2048  ;;  %p12069_p0 = scmp.lt.s32.totalorder %s129_s21, %s129_s21 }
  0x4e   :  { %p12065_p13 = scmp.ne.s32.totalorder %s129_s21, %s12064_s8  ;;  %p12070_p1 = scmp.lt.s32.totalorder %s12064_s8, %s12064_s8 }
  0x50   :  { %p12071_p2 = por %p12070_p1, %p12069_p0 }
  0x52   :  { %p12072_p3 = pnand %p12071_p2, %p12065_p13 }
  0x54   :  { %12075 = shalt.err (!%p12072_p3)
}
  0x55   :  { %134 = dma.hbm_to_vmem [thread:$0]  %s15145_s10, 2048, %s129_s21, [#allocation18], %s12293_s2, %s12293_s2, %s12294_s0  }
  0x56   :  { %s12076_s1 = scalar_lea.hbm %s15148_s13, 256 }
  0x57   :  { %p12077_p4 = scmp.ne.s32.totalorder %s15148_s13, %s12076_s1  ;;  %p12080_p5 = scmp.lt.u32.totalorder %s12076_s1, %s15148_s13 }
  0x59   :  { %p12082_p6 = pnand %p12080_p5, %p12077_p4 }
  0x5b   :  { %12085 = shalt.err (!%p12082_p6)
}
  0x5c   :  { %s12086_s27 = scalar_lea.vmem %s155_s17, 256  ;;  %p12091_p8 = scmp.lt.s32.totalorder %s155_s17, %s155_s17 }
  0x5d   :  { %p12087_p7 = scmp.ne.s32.totalorder %s155_s17, %s12086_s27  ;;  %p12092_p9 = scmp.lt.s32.totalorder %s12086_s27, %s12086_s27 }
  0x5f   :  { %p12093_p10 = por %p12092_p9, %p12091_p8 }
  0x61   :  { %p12094_p11 = pnand %p12093_p10, %p12087_p7 }
  0x63   :  { %12097 = shalt.err (!%p12094_p11)
}
  0x64   :  { %160 = dma.hbm_to_vmem [thread:$0]  %s15148_s13, 256, %s155_s17, [#allocation21], %s12289_s29, %s12289_s29, %s12290_s30  }
  0x65   :  { %s12297_s28 = smov [#allocation23]   ;;  %s12298_s8 = smov [#allocation6]  }
  0x66   :  { %s181_s4 = sshll.u32 %s12297_s28, 4  ;;  %s40_s25 = sshll.u32 %s12298_s8, 4  ;;  %s182_s4 = int_to_ptr.vmem [resolvable:$true] %s181_s4  ;;  %s41_s25 = int_to_ptr.vmem [resolvable:$true] %s40_s25 }
  0x67   :  { %s12098_s22 = scalar_lea.hbm %s15151_s16, 64 }
  0x68   :  { %p12099_p12 = scmp.ne.s32.totalorder %s15151_s16, %s12098_s22  ;;  %p12102_p13 = scmp.lt.u32.totalorder %s12098_s22, %s15151_s16 }
  0x6a   :  { %p12104_p0 = pnand %p12102_p13, %p12099_p12 }
  0x6c   :  { %12107 = shalt.err (!%p12104_p0)
}
  0x6d   :  { %s12108_s13 = scalar_lea.vmem %s182_s4, 64  ;;  %p12113_p2 = scmp.lt.s32.totalorder %s182_s4, %s182_s4 }
  0x6e   :  { %p12109_p1 = scmp.ne.s32.totalorder %s182_s4, %s12108_s13  ;;  %p12114_p3 = scmp.lt.s32.totalorder %s12108_s13, %s12108_s13 }
  0x70   :  { %p12115_p4 = por %p12114_p3, %p12113_p2 }
  0x72   :  { %p12116_p5 = pnand %p12115_p4, %p12109_p1 }
  0x74   :  { %12119 = shalt.err (!%p12116_p5)
}
  0x75   :  { %184 = dma.hbm_to_vmem [thread:$0]  %s15151_s16, 64, %s182_s4, [#allocation24]  }
  0x76   :  { %s15170_s21 = sld [smem:[#allocation34_spill]] }
  0x7c   :  { %s12120_s28 = scalar_lea.hbm %s15170_s21, 8192 }
  0x7d   :  { %p12121_p6 = scmp.ne.s32.totalorder %s15170_s21, %s12120_s28  ;;  %p12124_p7 = scmp.lt.u32.totalorder %s12120_s28, %s15170_s21 }
  0x7f   :  { %p12126_p8 = pnand %p12124_p7, %p12121_p6 }
  0x81   :  { %12129 = shalt.err (!%p12126_p8)
}
  0x82   :  { %s12130_s1 = scalar_lea.vmem %s41_s25, 8192  ;;  %p12135_p10 = scmp.lt.s32.totalorder %s41_s25, %s41_s25 }
  0x83   :  { %p12131_p9 = scmp.ne.s32.totalorder %s41_s25, %s12130_s1  ;;  %p12136_p11 = scmp.lt.s32.totalorder %s12130_s1, %s12130_s1 }
  0x85   :  { %p12137_p12 = por %p12136_p11, %p12135_p10 }
  0x87   :  { %p12138_p13 = pnand %p12137_p12, %p12131_p9 }
  0x89   :  { %12141 = shalt.err (!%p12138_p13)
}
  0x8a   :  { %46 = dma.hbm_to_vmem [thread:$0]  %s15170_s21, 8192, %s41_s25, [#allocation7], %s12293_s2, %s12293_s2, %s12294_s0  }
  0x8b   :  { %s12299_s19 = smov [#allocation10]   ;;  %s12300_s3 = smov [#allocation13]  }
  0x8c   :  { %s66_s24 = sshll.u32 %s12299_s19, 4  ;;  %s90_s13 = sshll.u32 %s12300_s3, 4  ;;  %s67_s24 = int_to_ptr.vmem [resolvable:$true] %s66_s24  ;;  %s91_s13 = int_to_ptr.vmem [resolvable:$true] %s90_s13 }
  0x8d   :  { %s15171_s27 = sld [smem:[#allocation37_spill]] }
  0x93   :  { %s12142_s10 = scalar_lea.hbm %s15171_s27, 256 }
  0x94   :  { %p12143_p0 = scmp.ne.s32.totalorder %s15171_s27, %s12142_s10  ;;  %p12146_p1 = scmp.lt.u32.totalorder %s12142_s10, %s15171_s27 }
  0x96   :  { %p12148_p2 = pnand %p12146_p1, %p12143_p0 }
  0x98   :  { %12151 = shalt.err (!%p12148_p2)
}
  0x99   :  { %s12152_s25 = scalar_lea.vmem %s67_s24, 256  ;;  %p12157_p4 = scmp.lt.s32.totalorder %s67_s24, %s67_s24 }
  0x9a   :  { %p12153_p3 = scmp.ne.s32.totalorder %s67_s24, %s12152_s25  ;;  %p12158_p5 = scmp.lt.s32.totalorder %s12152_s25, %s12152_s25 }
  0x9c   :  { %p12159_p6 = por %p12158_p5, %p12157_p4 }
  0x9e   :  { %p12160_p7 = pnand %p12159_p6, %p12153_p3 }
  0xa0   :  { %12163 = shalt.err (!%p12160_p7)
}
  0xa1   :  { %72 = dma.hbm_to_vmem [thread:$0]  %s15171_s27, 256, %s67_s24, [#allocation9], %s12293_s2, %s12293_s2, %s12294_s0  }
  0xa2   :  { %s12164_s4 = scalar_lea.hbm %s15141_s6, 512 }
  0xa3   :  { %p12165_p8 = scmp.ne.s32.totalorder %s15141_s6, %s12164_s4  ;;  %p12168_p9 = scmp.lt.u32.totalorder %s12164_s4, %s15141_s6 }
  0xa5   :  { %p12170_p10 = pnand %p12168_p9, %p12165_p8 }
  0xa7   :  { %12173 = shalt.err (!%p12170_p10)
}
  0xa8   :  { %s12174_s10 = scalar_lea.vmem %s91_s13, 512  ;;  %p12179_p12 = scmp.lt.s32.totalorder %s91_s13, %s91_s13 }
  0xa9   :  { %p12175_p11 = scmp.ne.s32.totalorder %s91_s13, %s12174_s10  ;;  %p12180_p13 = scmp.lt.s32.totalorder %s12174_s10, %s12174_s10 }
  0xab   :  { %p12181_p0 = por %p12180_p13, %p12179_p12 }
  0xad   :  { %p12182_p1 = pnand %p12181_p0, %p12175_p11 }
  0xaf   :  { %12185 = shalt.err (!%p12182_p1)
}
  0xb0   :  { %96 = dma.hbm_to_vmem [thread:$0]  %s15141_s6, 512, %s91_s13, [#allocation12], %s12289_s29, %s12289_s29, %s12290_s30  }
  0xb1   :  { %s12301_s28 = smov [#allocation16]   ;;  %s12302_s5 = smov [#allocation19]  }
  0xb2   :  { %s116_s8 = sshll.u32 %s12301_s28, 4  ;;  %s140_s23 = sshll.u32 %s12302_s5, 4  ;;  %s117_s8 = int_to_ptr.vmem [resolvable:$true] %s116_s8  ;;  %s141_s23 = int_to_ptr.vmem [resolvable:$true] %s140_s23 }
  0xb3   :  { %s12186_s22 = scalar_lea.hbm %s15144_s9, 1024 }
  0xb4   :  { %p12187_p2 = scmp.ne.s32.totalorder %s15144_s9, %s12186_s22  ;;  %p12190_p3 = scmp.lt.u32.totalorder %s12186_s22, %s15144_s9 }
  0xb6   :  { %p12192_p4 = pnand %p12190_p3, %p12187_p2 }
  0xb8   :  { %12195 = shalt.err (!%p12192_p4)
}
  0xb9   :  { %s12196_s6 = scalar_lea.vmem %s117_s8, 1024  ;;  %p12201_p6 = scmp.lt.s32.totalorder %s117_s8, %s117_s8 }
  0xba   :  { %p12197_p5 = scmp.ne.s32.totalorder %s117_s8, %s12196_s6  ;;  %p12202_p7 = scmp.lt.s32.totalorder %s12196_s6, %s12196_s6 }
  0xbc   :  { %p12203_p8 = por %p12202_p7, %p12201_p6 }
  0xbe   :  { %p12204_p9 = pnand %p12203_p8, %p12197_p5 }
  0xc0   :  { %12207 = shalt.err (!%p12204_p9)
}
  0xc1   :  { %122 = dma.hbm_to_vmem [thread:$0]  %s15144_s9, 1024, %s117_s8, [#allocation15], %s12293_s2, %s12293_s2, %s12294_s0  }
  0xc2   :  { %s12208_s10 = scalar_lea.hbm %s15146_s11, 256 }
  0xc3   :  { %p12209_p10 = scmp.ne.s32.totalorder %s15146_s11, %s12208_s10  ;;  %p12212_p11 = scmp.lt.u32.totalorder %s12208_s10, %s15146_s11 }
  0xc5   :  { %p12214_p12 = pnand %p12212_p11, %p12209_p10 }
  0xc7   :  { %12217 = shalt.err (!%p12214_p12)
}
  0xc8   :  { %s12218_s25 = scalar_lea.vmem %s141_s23, 256  ;;  %p12223_p0 = scmp.lt.s32.totalorder %s141_s23, %s141_s23 }
  0xc9   :  { %p12219_p13 = scmp.ne.s32.totalorder %s141_s23, %s12218_s25  ;;  %p12224_p1 = scmp.lt.s32.totalorder %s12218_s25, %s12218_s25 }
  0xcb   :  { %p12225_p2 = por %p12224_p1, %p12223_p0 }
  0xcd   :  { %p12226_p3 = pnand %p12225_p2, %p12219_p13 }
  0xcf   :  { %12229 = shalt.err (!%p12226_p3)
}
  0xd0   :  { %146 = dma.hbm_to_vmem [thread:$0]  %s15146_s11, 256, %s141_s23, [#allocation18], %s12289_s29, %s12289_s29, %s12290_s30  }
  0xd1   :  { %s12303_s8 = smov [#allocation22]   ;;  %s12230_s16 = scalar_lea.hbm %s15150_s15, 512 }
  0xd2   :  { %s168_s21 = sshll.u32 %s12303_s8, 4  ;;  %p12231_p4 = scmp.ne.s32.totalorder %s15150_s15, %s12230_s16  ;;  %s169_s21 = int_to_ptr.vmem [resolvable:$true] %s168_s21 }
  0xd3   :  { %p12234_p5 = scmp.lt.u32.totalorder %s12230_s16, %s15150_s15 }
  0xd5   :  { %p12236_p6 = pnand %p12234_p5, %p12231_p4 }
  0xd7   :  { %12239 = shalt.err (!%p12236_p6)
}
  0xd8   :  { %s12240_s3 = scalar_lea.vmem %s169_s21, 512  ;;  %p12245_p8 = scmp.lt.s32.totalorder %s169_s21, %s169_s21 }
  0xd9   :  { %p12241_p7 = scmp.ne.s32.totalorder %s169_s21, %s12240_s3  ;;  %p12246_p9 = scmp.lt.s32.totalorder %s12240_s3, %s12240_s3 }
  0xdb   :  { %p12247_p10 = por %p12246_p9, %p12245_p8 }
  0xdd   :  { %p12248_p11 = pnand %p12247_p10, %p12241_p7 }
  0xdf   :  { %12251 = shalt.err (!%p12248_p11)
}
  0xe0   :  { %s12304_s11 = smov 32   ;;  %s12305_s29 = smov 2  }
  0xe1   :  { %174 = dma.hbm_to_vmem [thread:$0]  %s15150_s15, 512, %s169_s21, [#allocation21], %s12304_s11, %s12304_s11, %s12305_s29  }
  0xe2   :  { %s12306_s26 = smov [#allocation25]   ;;  %s12252_s28 = scalar_lea.hbm %s15153_s18, 1024 }
  0xe3   :  { %s192_s10 = sshll.u32 %s12306_s26, 4  ;;  %p12253_p12 = scmp.ne.s32.totalorder %s15153_s18, %s12252_s28  ;;  %s193_s10 = int_to_ptr.vmem [resolvable:$true] %s192_s10 }
  0xe4   :  { %p12256_p13 = scmp.lt.u32.totalorder %s12252_s28, %s15153_s18 }
  0xe6   :  { %p12258_p0 = pnand %p12256_p13, %p12253_p12 }
  0xe8   :  { %12261 = shalt.err (!%p12258_p0)
}
  0xe9   :  { %s12262_s8 = scalar_lea.vmem %s193_s10, 1024  ;;  %p12267_p2 = scmp.lt.s32.totalorder %s193_s10, %s193_s10 }
  0xea   :  { %p12263_p1 = scmp.ne.s32.totalorder %s193_s10, %s12262_s8  ;;  %p12268_p3 = scmp.lt.s32.totalorder %s12262_s8, %s12262_s8 }
  0xec   :  { %p12269_p4 = por %p12268_p3, %p12267_p2 }
  0xee   :  { %p12270_p5 = pnand %p12269_p4, %p12263_p1 }
  0xf0   :  { %12273 = shalt.err (!%p12270_p5)
}
  0xf1   :  { %s12307_s15 = smov 512  }
  0xf2   :  { %198 = dma.hbm_to_vmem [thread:$0]  %s15153_s18, 1024, %s193_s10, [#allocation24], %s12307_s15, %s12307_s15, %s12304_s11  }
  0xf3   :  { %12274 = dma.done.wait [#allocation7], 8192  }
  0xf4   :  { %12275 = vsyncadd [#allocation7], 4294959104 }
  0xf5   :  { %12276 = dma.done.wait [#allocation9], 1280  }
  0xf6   :  { %12277 = vsyncadd [#allocation9], 4294966016 }
  0xf7   :  { %12278 = dma.done.wait [#allocation12], 4608  }
  0xf8   :  { %12279 = vsyncadd [#allocation12], 4294962688 }
  0xf9   :  { %12280 = dma.done.wait [#allocation15], 1280  }
  0xfa   :  { %12281 = vsyncadd [#allocation15], 4294966016 }
  0xfb   :  { %12282 = dma.done.wait [#allocation18], 2304  }
  0xfc   :  { %12283 = vsyncadd [#allocation18], 4294964992 }
  0xfd   :  { %12284 = dma.done.wait [#allocation21], 768  }
  0xfe   :  { %12285 = vsyncadd [#allocation21], 4294966528 }
  0xff   :  { %12286 = dma.done.wait [#allocation24], 1088  }
 0x100   :  { %12287 = vsyncadd [#allocation24], 4294966208  ;;  %s15172_s4 = sld [smem:[#allocation33_spill]]  ;;  %v11610_v2 = vld [vmem:[#allocation6] sm:$0xff]   ;;  %vm312_vm0 = vcmask 261120   ;;  %v11611_v3 = vld [vmem:[#allocation6 + $0x30] sm:$0xff]  }
 0x101   :  { %10767 = vmatprep.mubr.msk.bf16.mxu0 %vm312_vm0, %v11610_v2  ;;  %10783 = vmatprep.mubr.msk.bf16.mxu1 %vm312_vm0, %v11611_v3  ;;  %v11612_v4 = vld [vmem:[#allocation6 + $0x8] sm:$0xff]   ;;  %v11613_v5 = vld [vmem:[#allocation6 + $0x38] sm:$0xff]   ;;  %v11614_v6 = vld [vmem:[#allocation6 + $0x10] sm:$0xff]   ;;  %vm390_vm1 = vcmask 15360   ;;  %s12308_s6 = smov 6   ;;  %s12309_s13 = smov 10  }
 0x102   :  { %v11615_v7 = vld [vmem:[#allocation6 + $0x60] sm:$0xff]   ;;  %v11616_v8 = vld [vmem:[#allocation6 + $0x18] sm:$0xff]   ;;  %v11617_v9 = vld [vmem:[#allocation6 + $0x68] sm:$0xff]   ;;  %s12310_s3 = smov 14   ;;  %s12311_s23 = smov 12   ;;  %vm537_vm2 = vcmask 31760  }
 0x103   :  { %v11618_v10 = vld [vmem:[#allocation6 + $0x20] sm:$0xff]   ;;  %v11619_v11 = vld [vmem:[#allocation6 + $0x70] sm:$0xff]   ;;  %v11620_v12 = vld [vmem:[#allocation6 + $0x28] sm:$0xff]   ;;  %s12312_s17 = smov 18   ;;  %s12313_s26 = smov 16   ;;  %vm684_vm3 = vcmask 48160  }
 0x104   :  { %v11621_v13 = vld [vmem:[#allocation6 + $0x78] sm:$0xff]   ;;  %v11622_v14 = vld [vmem:[#allocation6 + $0x40] sm:$0xff]   ;;  %v11623_v16 = vld [vmem:[#allocation6 + $0x48] sm:$0xff]   ;;  %s12314_s10 = smov 22   ;;  %vm831_vm4 = vcmask 64560   ;;  %s12315_s24 = smov 20  }
 0x105   :  { %v11624_v15 = vld [vmem:[#allocation6 + $0xa0] sm:$0xff]   ;;  %v11625_v17 = vld [vmem:[#allocation6 + $0xa8] sm:$0xff]   ;;  %v11626_v18 = vld [vmem:[#allocation6 + $0x50] sm:$0xff]   ;;  %s12316_s27 = smov 26   ;;  %vm978_vm5 = vcmask 80960   ;;  %vm1125_vm6 = vcmask 97360  }
 0x106   :  { %v12641_v0 = vld [vmem:[%s15172_s4] sm:$0xff]   ;;  %v12646_v1 = vld [vmem:[%s15172_s4 + $0x8] sm:$0xff]   ;;  %v11630_v22 = vld [vmem:[#allocation6 + $0x80] sm:$0xff]   ;;  %s12317_s28 = smov 24   ;;  %s12318_s5 = smov 30   ;;  %vm1272_vm7 = vcmask 113760  }
 0x107   :  { %10763 = vmatprep.subr.bf16.mxu0 %v12641_v0  ;;  %11319 = vmatprep.subr.bf16.mxu1 %v12641_v0  ;;  %v11628_v19 = vld [vmem:[#allocation6 + $0xb0] sm:$0xff]   ;;  %v11627_v20 = vld [vmem:[#allocation6 + $0x58] sm:$0xff]   ;;  %v11632_v23 = vld [vmem:[#allocation6 + $0xe0] sm:$0xff]   ;;  %vm1419_vm8 = vcmask 130160   ;;  %s12319_s25 = smov 28   ;;  %vm1566_vm9 = vcmask 146560  }
 0x108   :  { %10764 = vmatpush3.bf16.msra.mxu0 %v12641_v0  ;;  %11321 = vmatpush3.bf16.msra.mxu1 %v12641_v0  ;;  %v11629_v21 = vld [vmem:[#allocation6 + $0xb8] sm:$0xff]   ;;  %v11631_v24 = vld [vmem:[#allocation6 + $0x88] sm:$0xff]   ;;  %v11634_v26 = vld [vmem:[#allocation6 + $0x90] sm:$0xff]   ;;  %vm1713_vm10 = vcmask 162960   ;;  %vm1860_vm11 = vcmask 179360   ;;  %vm2007_vm12 = vcmask 195760  }
 0x109   :  { %10765 = vmatprep.subr.bf16.mxu0 %v12646_v1  ;;  %11320 = vmatprep.subr.bf16.mxu1 %v12646_v1  ;;  %v11633_v25 = vld [vmem:[#allocation6 + $0xe8] sm:$0xff]   ;;  %v11636_v27 = vld [vmem:[#allocation6 + $0xf0] sm:$0xff]   ;;  %v11635_v28 = vld [vmem:[#allocation6 + $0x98] sm:$0xff]   ;;  %vm2154_vm13 = vcmask 212160   ;;  %vm2301_vm14 = vcmask 228560   ;;  %vm2448_vm15 = vcmask 244960  }
 0x10a   :  { %v11637_v29 = vld [vmem:[#allocation6 + $0xf8] sm:$0xff]   ;;  %v11638_v30 = vld [vmem:[#allocation6 + $0xc0] sm:$0xff]   ;;  %v11639_v32 = vld [vmem:[#allocation6 + $0xc8] sm:$0xff]   ;;  %s15173_s8 = sld [smem:[#allocation36_spill]]  ;;  %s12326_s9 = smov 123  }
 0x10b   :  { %v11640_v31 = vld [vmem:[#allocation6 + $0x120] sm:$0xff]   ;;  %v11641_v33 = vld [vmem:[#allocation6 + $0x128] sm:$0xff]   ;;  %v11642_v34 = vld [vmem:[#allocation6 + $0xd0] sm:$0xff]   ;;  %s12327_s2 = smov 9   ;;  %s12329_s15 = smov 126  }
 0x10c   :  { %10766 = vmatpush3.bf16.msra.mxu0 %v12646_v1  ;;  %11322 = vmatpush3.bf16.msra.mxu1 %v12646_v1  ;;  %v11644_v35 = vld [vmem:[#allocation6 + $0x130] sm:$0xff]   ;;  %v11643_v36 = vld [vmem:[#allocation6 + $0xd8] sm:$0xff]   ;;  %v11646_v38 = vld [vmem:[#allocation6 + $0x100] sm:$0xff]   ;;  %s12330_s21 = smov 119   ;;  %s12331_s22 = smov 120  }
 0x10d   :  { %10799 = vmatprep.subr.bf16.mxu1 %v12641_v0  ;;  %10775 = vmatprep.subr.bf16.mxu0 %v12641_v0  ;;  %v11645_v37 = vld [vmem:[#allocation6 + $0x138] sm:$0xff]   ;;  %v11648_v39 = vld [vmem:[#allocation6 + $0x160] sm:$0xff]   ;;  %v11647_v40 = vld [vmem:[#allocation6 + $0x108] sm:$0xff]   ;;  %s12332_s1 = smov 118  }
 0x10e   :  { %v11649_v41 = vld [vmem:[#allocation6 + $0x168] sm:$0xff]   ;;  %v11650_v42 = vld [vmem:[#allocation6 + $0x110] sm:$0xff]   ;;  %v11651_v44 = vld [vmem:[#allocation6 + $0x118] sm:$0xff]  }
 0x10f   :  { %10768 = vmatmul.mubr.msk.bf16.vlgmr.msra.gmra.mrb[0].mxu0 %vm312_vm0, %v11612_v4  ;;  %10784 = vmatmul.mubr.msk.bf16.vlgmr.msra.gmra.mrb[0].mxu1 %vm312_vm0, %v11613_v5  ;;  %v11652_v43 = vld [vmem:[#allocation6 + $0x170] sm:$0xff]   ;;  %v11653_v45 = vld [vmem:[#allocation6 + $0x178] sm:$0xff]   ;;  %v11654_v46 = vld [vmem:[#allocation6 + $0x140] sm:$0xff]  }
 0x110   :  { %10800 = vmatpush3.bf16.msra.mxu1 %v12641_v0  ;;  %10771 = vmatprep.mubr.msk.bf16.mxu0 %vm312_vm0, %v11614_v6  ;;  %v11656_v47 = vld [vmem:[#allocation6 + $0x1a0] sm:$0xff]   ;;  %v11655_v48 = vld [vmem:[#allocation6 + $0x148] sm:$0xff]   ;;  %v11658_v50 = vld [vmem:[#allocation6 + $0x150] sm:$0xff]  }
 0x111   :  { %10801 = vmatprep.subr.bf16.mxu1 %v12646_v1  ;;  %10803 = vmatprep.mubr.msk.bf16.mxu1 %vm312_vm0, %v11615_v7  ;;  %v11657_v49 = vld [vmem:[#allocation6 + $0x1a8] sm:$0xff]   ;;  %v11660_v51 = vld [vmem:[#allocation6 + $0x1b0] sm:$0xff]   ;;  %v11659_v52 = vld [vmem:[#allocation6 + $0x158] sm:$0xff]  }
 0x112   :  { %10776 = vmatpush3.bf16.msra.mxu0 %v12641_v0  ;;  %v11661_v53 = vld [vmem:[#allocation6 + $0x1b8] sm:$0xff]   ;;  %v11662_v54 = vld [vmem:[#allocation6 + $0x180] sm:$0xff]   ;;  %v11663_v56 = vld [vmem:[#allocation6 + $0x188] sm:$0xff]  }
 0x113   :  { %10777 = vmatprep.subr.bf16.mxu0 %v12646_v1  ;;  %v11664_v55 = vld [vmem:[#allocation6 + $0x1e0] sm:$0xff]   ;;  %v11665_v57 = vld [vmem:[#allocation6 + $0x1e8] sm:$0xff]   ;;  %v11666_v58 = vld [vmem:[#allocation6 + $0x190] sm:$0xff]  }
 0x114   :  { %10802 = vmatpush3.bf16.msra.mxu1 %v12646_v1  ;;  %v11668_v59 = vld [vmem:[#allocation6 + $0x1f0] sm:$0xff]   ;;  %v11667_v60 = vld [vmem:[#allocation6 + $0x198] sm:$0xff]   ;;  %v11670_v62 = vld [vmem:[#allocation6 + $0x1c0] sm:$0xff]  }
 0x115   :  { %10823 = vmatprep.subr.bf16.mxu1 %v12641_v0  ;;  %v11669_v61 = vld [vmem:[#allocation6 + $0x1f8] sm:$0xff]   ;;  %v11671_v63 = vld [vmem:[#allocation6 + $0x1c8] sm:$0xff]   ;;  %v11672_v2 = vld [vmem:[#allocation6 + $0x1d0] sm:$0xff]  }
 0x116   :  { %10778 = vmatpush3.bf16.msra.mxu0 %v12646_v1 }
 0x117   :  { %10772 = vmatmul.mubr.msk.bf16.gmra.mrb[4].mxu0 %vm312_vm0, %v11616_v8  ;;  %10804 = vmatmul.mubr.msk.bf16.vlgmr.msra.gmra.mrb[4].mxu1 %vm312_vm0, %v11617_v9 }
 0x118   :  { %10779 = vmatprep.mubr.msk.bf16.mxu0 %vm312_vm0, %v11618_v10  ;;  %10807 = vmatprep.mubr.msk.bf16.mxu1 %vm312_vm0, %v11619_v11 }
 0x119   :  { %10787 = vmatprep.subr.bf16.mxu0 %v12641_v0  ;;  %10824 = vmatpush3.bf16.msra.mxu1 %v12641_v0 }
 0x11a   :  { %10825 = vmatprep.subr.bf16.mxu1 %v12646_v1 }
 0x11d   :  { %10826 = vmatpush3.bf16.msra.mxu1 %v12646_v1 }
 0x11e   :  { %10847 = vmatprep.subr.bf16.mxu1 %v12641_v0 }
 0x11f   :  { %10780 = vmatmul.mubr.msk.bf16.vlgmr.msra.gmra.mrb[8].mxu0 %vm312_vm0, %v11620_v12  ;;  %10808 = vmatmul.mubr.msk.bf16.gmra.mrb[8].mxu1 %vm312_vm0, %v11621_v13 }
 0x120   :  { %10788 = vmatpush3.bf16.msra.mxu0 %v12641_v0  ;;  %10791 = vmatprep.mubr.msk.bf16.mxu0 %vm312_vm0, %v11622_v14 }
 0x121   :  { %10789 = vmatprep.subr.bf16.mxu0 %v12646_v1  ;;  %10827 = vmatprep.mubr.msk.bf16.mxu1 %vm312_vm0, %v11624_v15 }
 0x124   :  { %10790 = vmatpush3.bf16.msra.mxu0 %v12646_v1 }
 0x125   :  { %10811 = vmatprep.subr.bf16.mxu0 %v12641_v0 }
 0x127   :  { %10792 = vmatmul.mubr.msk.bf16.vlgmr.msra.gmra.mrb[12].mxu0 %vm312_vm0, %v11623_v16  ;;  %10828 = vmatmul.mubr.msk.bf16.vlgmr.msra.gmra.mrb[12].mxu1 %vm312_vm0, %v11625_v17 }
 0x128   :  { %10795 = vmatprep.mubr.msk.bf16.mxu0 %vm312_vm0, %v11626_v18  ;;  %10831 = vmatprep.mubr.msk.bf16.mxu1 %vm312_vm0, %v11628_v19 }
 0x129   :  { %10812 = vmatpush3.bf16.msra.mxu0 %v12641_v0  ;;  %10848 = vmatpush3.bf16.msra.mxu1 %v12641_v0 }
 0x12a   :  { %10813 = vmatprep.subr.bf16.mxu0 %v12646_v1  ;;  %10849 = vmatprep.subr.bf16.mxu1 %v12646_v1 }
 0x12d   :  { %10814 = vmatpush3.bf16.msra.mxu0 %v12646_v1  ;;  %10850 = vmatpush3.bf16.msra.mxu1 %v12646_v1 }
 0x12e   :  { %10835 = vmatprep.subr.bf16.mxu0 %v12641_v0  ;;  %10871 = vmatprep.subr.bf16.mxu1 %v12641_v0 }
 0x12f   :  { %10796 = vmatmul.mubr.msk.bf16.gmra.mrb[16].mxu0 %vm312_vm0, %v11627_v20  ;;  %10832 = vmatmul.mubr.msk.bf16.gmra.mrb[16].mxu1 %vm312_vm0, %v11629_v21 }
 0x130   :  { %10815 = vmatprep.mubr.msk.bf16.mxu0 %vm312_vm0, %v11630_v22  ;;  %10851 = vmatprep.mubr.msk.bf16.mxu1 %vm312_vm0, %v11632_v23 }
 0x137   :  { %10816 = vmatmul.mubr.msk.bf16.vlgmr.msra.gmra.mrb[20].mxu0 %vm312_vm0, %v11631_v24  ;;  %10852 = vmatmul.mubr.msk.bf16.vlgmr.msra.gmra.mrb[20].mxu1 %vm312_vm0, %v11633_v25 }
 0x138   :  { %10819 = vmatprep.mubr.msk.bf16.mxu0 %vm312_vm0, %v11634_v26  ;;  %10855 = vmatprep.mubr.msk.bf16.mxu1 %vm312_vm0, %v11636_v27 }
 0x139   :  { %10836 = vmatpush3.bf16.msra.mxu0 %v12641_v0  ;;  %10872 = vmatpush3.bf16.msra.mxu1 %v12641_v0 }
 0x13a   :  { %10837 = vmatprep.subr.bf16.mxu0 %v12646_v1  ;;  %10873 = vmatprep.subr.bf16.mxu1 %v12646_v1 }
 0x13d   :  { %10838 = vmatpush3.bf16.msra.mxu0 %v12646_v1  ;;  %10874 = vmatpush3.bf16.msra.mxu1 %v12646_v1 }
 0x13e   :  { %10859 = vmatprep.subr.bf16.mxu0 %v12641_v0  ;;  %10895 = vmatprep.subr.bf16.mxu1 %v12641_v0 }
 0x13f   :  { %10820 = vmatmul.mubr.msk.bf16.gmra.mrb[24].mxu0 %vm312_vm0, %v11635_v28  ;;  %10856 = vmatmul.mubr.msk.bf16.gmra.mrb[24].mxu1 %vm312_vm0, %v11637_v29 }
 0x140   :  { %10839 = vmatprep.mubr.msk.bf16.mxu0 %vm312_vm0, %v11638_v30  ;;  %10875 = vmatprep.mubr.msk.bf16.mxu1 %vm312_vm0, %v11640_v31 }
 0x147   :  { %10840 = vmatmul.mubr.msk.bf16.vlgmr.msra.gmra.mrb[28].mxu0 %vm312_vm0, %v11639_v32  ;;  %10876 = vmatmul.mubr.msk.bf16.vlgmr.msra.gmra.mrb[28].mxu1 %vm312_vm0, %v11641_v33 }
 0x148   :  { %10843 = vmatprep.mubr.msk.bf16.mxu0 %vm312_vm0, %v11642_v34  ;;  %10879 = vmatprep.mubr.msk.bf16.mxu1 %vm312_vm0, %v11644_v35 }
 0x149   :  { %10860 = vmatpush3.bf16.msra.mxu0 %v12641_v0  ;;  %10896 = vmatpush3.bf16.msra.mxu1 %v12641_v0 }
 0x14a   :  { %10861 = vmatprep.subr.bf16.mxu0 %v12646_v1  ;;  %10897 = vmatprep.subr.bf16.mxu1 %v12646_v1 }
 0x14d   :  { %10862 = vmatpush3.bf16.msra.mxu0 %v12646_v1  ;;  %10898 = vmatpush3.bf16.msra.mxu1 %v12646_v1 }
 0x14e   :  { %10883 = vmatprep.subr.bf16.mxu0 %v12641_v0  ;;  %10919 = vmatprep.subr.bf16.mxu1 %v12641_v0 }
 0x14f   :  { %10844 = vmatmul.mubr.msk.bf16.gmra.mrb[32].mxu0 %vm312_vm0, %v11643_v36  ;;  %10880 = vmatmul.mubr.msk.bf16.gmra.mrb[32].mxu1 %vm312_vm0, %v11645_v37 }
 0x150   :  { %10863 = vmatprep.mubr.msk.bf16.mxu0 %vm312_vm0, %v11646_v38  ;;  %10899 = vmatprep.mubr.msk.bf16.mxu1 %vm312_vm0, %v11648_v39 }
 0x157   :  { %10864 = vmatmul.mubr.msk.bf16.vlgmr.msra.gmra.mrb[36].mxu0 %vm312_vm0, %v11647_v40  ;;  %10900 = vmatmul.mubr.msk.bf16.vlgmr.msra.gmra.mrb[36].mxu1 %vm312_vm0, %v11649_v41 }
 0x158   :  { %10867 = vmatprep.mubr.msk.bf16.mxu0 %vm312_vm0, %v11650_v42  ;;  %10903 = vmatprep.mubr.msk.bf16.mxu1 %vm312_vm0, %v11652_v43 }
 0x159   :  { %10884 = vmatpush3.bf16.msra.mxu0 %v12641_v0  ;;  %10920 = vmatpush3.bf16.msra.mxu1 %v12641_v0 }
 0x15a   :  { %10885 = vmatprep.subr.bf16.mxu0 %v12646_v1  ;;  %10921 = vmatprep.subr.bf16.mxu1 %v12646_v1 }
 0x15d   :  { %10886 = vmatpush3.bf16.msra.mxu0 %v12646_v1  ;;  %10922 = vmatpush3.bf16.msra.mxu1 %v12646_v1 }
 0x15e   :  { %10907 = vmatprep.subr.bf16.mxu0 %v12641_v0  ;;  %10943 = vmatprep.subr.bf16.mxu1 %v12641_v0 }
 0x15f   :  { %10868 = vmatmul.mubr.msk.bf16.gmra.mrb[40].mxu0 %vm312_vm0, %v11651_v44  ;;  %10904 = vmatmul.mubr.msk.bf16.gmra.mrb[40].mxu1 %vm312_vm0, %v11653_v45 }
 0x160   :  { %10887 = vmatprep.mubr.msk.bf16.mxu0 %vm312_vm0, %v11654_v46  ;;  %10923 = vmatprep.mubr.msk.bf16.mxu1 %vm312_vm0, %v11656_v47 }
 0x167   :  { %10888 = vmatmul.mubr.msk.bf16.vlgmr.msra.gmra.mrb[44].mxu0 %vm312_vm0, %v11655_v48  ;;  %10924 = vmatmul.mubr.msk.bf16.vlgmr.msra.gmra.mrb[44].mxu1 %vm312_vm0, %v11657_v49 }
 0x168   :  { %10891 = vmatprep.mubr.msk.bf16.mxu0 %vm312_vm0, %v11658_v50  ;;  %10927 = vmatprep.mubr.msk.bf16.mxu1 %vm312_vm0, %v11660_v51 }
 0x169   :  { %10908 = vmatpush3.bf16.msra.mxu0 %v12641_v0  ;;  %10944 = vmatpush3.bf16.msra.mxu1 %v12641_v0 }
 0x16a   :  { %10909 = vmatprep.subr.bf16.mxu0 %v12646_v1  ;;  %10945 = vmatprep.subr.bf16.mxu1 %v12646_v1 }
 0x16d   :  { %10910 = vmatpush3.bf16.msra.mxu0 %v12646_v1  ;;  %10946 = vmatpush3.bf16.msra.mxu1 %v12646_v1 }
 0x16e   :  { %10931 = vmatprep.subr.bf16.mxu0 %v12641_v0 }
 0x16f   :  { %10892 = vmatmul.mubr.msk.bf16.gmra.mrb[48].mxu0 %vm312_vm0, %v11659_v52  ;;  %10928 = vmatmul.mubr.msk.bf16.gmra.mrb[48].mxu1 %vm312_vm0, %v11661_v53 }
 0x170   :  { %10911 = vmatprep.mubr.msk.bf16.mxu0 %vm312_vm0, %v11662_v54  ;;  %10947 = vmatprep.mubr.msk.bf16.mxu1 %vm312_vm0, %v11664_v55 }
 0x177   :  { %10912 = vmatmul.mubr.msk.bf16.vlgmr.msra.gmra.mrb[52].mxu0 %vm312_vm0, %v11663_v56  ;;  %10948 = vmatmul.mubr.msk.bf16.vlgmr.msra.gmra.mrb[52].mxu1 %vm312_vm0, %v11665_v57 }
 0x178   :  { %10915 = vmatprep.mubr.msk.bf16.mxu0 %vm312_vm0, %v11666_v58  ;;  %10932 = vmatpush3.bf16.msra.mxu0 %v12641_v0  ;;  %v11673_v0 = vld [vmem:[#allocation6 + $0x1d8] sm:$0xff]  }
 0x179   :  { %10951 = vmatprep.mubr.msk.bf16.mxu1 %vm312_vm0, %v11668_v59  ;;  %10933 = vmatprep.subr.bf16.mxu0 %v12646_v1 }
 0x17c   :  { %10934 = vmatpush3.bf16.msra.mxu0 %v12646_v1 }
 0x17f   :  { %10916 = vmatmul.mubr.msk.bf16.gmra.mrb[56].mxu0 %vm312_vm0, %v11667_v60  ;;  %10952 = vmatmul.mubr.msk.bf16.gmra.mrb[56].mxu1 %vm312_vm0, %v11669_v61 }
 0x180   :  { %10935 = vmatprep.mubr.msk.bf16.mxu0 %vm312_vm0, %v11670_v62 }
 0x187   :  { %10936 = vmatmul.mubr.msk.bf16.vlgmr.msra.gmra.mrb[60].mxu0 %vm312_vm0, %v11671_v63 }
 0x188   :  { %10939 = vmatprep.mubr.msk.bf16.mxu0 %vm312_vm0, %v11672_v2 }
 0x18f   :  { %10940 = vmatmul.mubr.msk.bf16.gmra.mrb[64].mxu0 %vm312_vm0, %v11673_v0 }
 0x1e2   :  { %v10769_v3 = vpop.f32.mrb[0].mxu0  ;;  %v10785_v4 = vpop.f32.mrb[0].mxu1 }
 0x1e3   :  { %393 = vst.msk [vmem:[#allocation2 + $0x10] sm:$0xff] %vm390_vm1, %v10769_v3  ;;  %525 = vrot.lane.b32.xlu0 %v10785_v4, %s12305_s29  ;;  %v359_v1 = vpop.f32.mrb[1].mxu0  ;;  %v490_v5 = vpop.f32.mrb[1].mxu1 }
 0x1e4   :  { %391 = vst.msk [vmem:[#allocation2] sm:$0xff] %vm390_vm1, %v359_v1  ;;  %v10770_v6 = vpop.f32.mrb[2].mxu0  ;;  %v10786_v7 = vpop.f32.mrb[2].mxu1 }
 0x1e5   :  { %394 = vst.msk [vmem:[#allocation2 + $0x18] sm:$0xff] %vm390_vm1, %v10770_v6  ;;  %527 = vrot.lane.b32.xlu1 %v10786_v7, %s12305_s29  ;;  %v362_v8 = vpop.f32.mrb[3].mxu0  ;;  %v493_v9 = vpop.f32.mrb[3].mxu1 }
 0x1e6   :  { %392 = vst.msk [vmem:[#allocation2 + $0x8] sm:$0xff] %vm390_vm1, %v362_v8 }
 0x1e7   :  { %521 = vrot.lane.b32.xlu0 %v490_v5, %s12305_s29 }
 0x1e9   :  { %523 = vrot.lane.b32.xlu1 %v493_v9, %s12305_s29 }
 0x1ea   :  { %v10773_v10 = vpop.f32.mrb[4].mxu0  ;;  %v10805_v11 = vpop.f32.mrb[4].mxu1 }
 0x1eb   :  { %397 = vst.msk [vmem:[#allocation2 + $0x30] sm:$0xff] %vm390_vm1, %v10773_v10  ;;  %811 = vrot.lane.b32.xlu0 %v10805_v11, %s12308_s6  ;;  %v375_v12 = vpop.f32.mrb[5].mxu0  ;;  %v768_v13 = vpop.f32.mrb[5].mxu1 }
 0x1ec   :  { %395 = vst.msk [vmem:[#allocation2 + $0x20] sm:$0xff] %vm390_vm1, %v375_v12  ;;  %v10774_v14 = vpop.f32.mrb[6].mxu0  ;;  %v10806_v15 = vpop.f32.mrb[6].mxu1 }
 0x1ed   :  { %398 = vst.msk [vmem:[#allocation2 + $0x38] sm:$0xff] %vm390_vm1, %v10774_v14  ;;  %813 = vrot.lane.b32.xlu1 %v10806_v15, %s12308_s6  ;;  %v378_v16 = vpop.f32.mrb[7].mxu0  ;;  %v771_v17 = vpop.f32.mrb[7].mxu1 }
 0x1ee   :  { %396 = vst.msk [vmem:[#allocation2 + $0x28] sm:$0xff] %vm390_vm1, %v378_v16 }
 0x1ef   :  { %807 = vrot.lane.b32.xlu0 %v768_v13, %s12308_s6 }
 0x1f1   :  { %809 = vrot.lane.b32.xlu1 %v771_v17, %s12308_s6 }
 0x1f2   :  { %v10781_v18 = vpop.f32.mrb[8].mxu0  ;;  %v10809_v19 = vpop.f32.mrb[8].mxu1 }
 0x1f3   :  { %819 = vrot.lane.b32.xlu0 %v10809_v19, %s12308_s6  ;;  %v474_v20 = vpop.f32.mrb[9].mxu0  ;;  %v784_v21 = vpop.f32.mrb[9].mxu1 }
 0x1f4   :  { %v10782_v22 = vpop.f32.mrb[10].mxu0  ;;  %v10810_v23 = vpop.f32.mrb[10].mxu1 }
 0x1f5   :  { %v787_v24 = vpop.f32.mrb[11].mxu1  ;;  %517 = vrot.lane.b32.xlu1 %v10781_v18, %s12305_s29  ;;  %v477_v25 = vpop.f32.mrb[11].mxu0 }
 0x1f7   :  { %513 = vrot.lane.b32.xlu0 %v474_v20, %s12305_s29 }
 0x1f9   :  { %519 = vrot.lane.b32.xlu1 %v10782_v22, %s12305_s29 }
 0x1fa   :  { %v10793_v26 = vpop.f32.mrb[12].mxu0  ;;  %v10829_v27 = vpop.f32.mrb[12].mxu1 }
 0x1fb   :  { %815 = vrot.lane.b32.xlu0 %v784_v21, %s12308_s6  ;;  %v621_v28 = vpop.f32.mrb[13].mxu0  ;;  %v1062_v29 = vpop.f32.mrb[13].mxu1 }
 0x1fc   :  { %v10794_v30 = vpop.f32.mrb[14].mxu0  ;;  %v10830_v31 = vpop.f32.mrb[14].mxu1 }
 0x1fd   :  { %821 = vrot.lane.b32.xlu1 %v10810_v23, %s12308_s6  ;;  %v624_v32 = vpop.f32.mrb[15].mxu0  ;;  %v1065_v33 = vpop.f32.mrb[15].mxu1 }
 0x1ff   :  { %515 = vrot.lane.b32.xlu0 %v477_v25, %s12305_s29 }
 0x201   :  { %817 = vrot.lane.b32.xlu1 %v787_v24, %s12308_s6 }
 0x202   :  { %v10797_v34 = vpop.f32.mrb[16].mxu0  ;;  %v10833_v35 = vpop.f32.mrb[16].mxu1 }
 0x203   :  { %664 = vrot.lane.b32.xlu0 %v10793_v26, %s12294_s0  ;;  %v637_v36 = vpop.f32.mrb[17].mxu0  ;;  %v1078_v37 = vpop.f32.mrb[17].mxu1 }
 0x204   :  { %v10798_v38 = vpop.f32.mrb[18].mxu0  ;;  %v10834_v39 = vpop.f32.mrb[18].mxu1 }
 0x205   :  { %666 = vrot.lane.b32.xlu1 %v10794_v30, %s12294_s0  ;;  %v640_v40 = vpop.f32.mrb[19].mxu0  ;;  %v1081_v41 = vpop.f32.mrb[19].mxu1 }
 0x207   :  { %1105 = vrot.lane.b32.xlu0 %v10829_v27, %s12309_s13 }
 0x209   :  { %1107 = vrot.lane.b32.xlu1 %v10830_v31, %s12309_s13 }
 0x20a   :  { %v10817_v42 = vpop.f32.mrb[20].mxu0  ;;  %v10853_v43 = vpop.f32.mrb[20].mxu1 }
 0x20b   :  { %660 = vrot.lane.b32.xlu0 %v621_v28, %s12294_s0  ;;  %v915_v44 = vpop.f32.mrb[21].mxu0  ;;  %v1356_v45 = vpop.f32.mrb[21].mxu1 }
 0x20c   :  { %v10818_v46 = vpop.f32.mrb[22].mxu0  ;;  %v10854_v47 = vpop.f32.mrb[22].mxu1 }
 0x20d   :  { %662 = vrot.lane.b32.xlu1 %v624_v32, %s12294_s0  ;;  %v918_v48 = vpop.f32.mrb[23].mxu0  ;;  %v1359_v49 = vpop.f32.mrb[23].mxu1 }
 0x20f   :  { %1101 = vrot.lane.b32.xlu0 %v1062_v29, %s12309_s13 }
 0x211   :  { %1103 = vrot.lane.b32.xlu1 %v1065_v33, %s12309_s13 }
 0x212   :  { %v10821_v50 = vpop.f32.mrb[24].mxu0  ;;  %v10857_v51 = vpop.f32.mrb[24].mxu1 }
 0x213   :  { %672 = vrot.lane.b32.xlu0 %v10797_v34, %s12294_s0  ;;  %v931_v52 = vpop.f32.mrb[25].mxu0  ;;  %v12813_v53 = vpop.f32.mrb[25].mxu1 }
 0x214   :  { %v10822_v54 = vpop.f32.mrb[26].mxu0  ;;  %v10858_v55 = vpop.f32.mrb[26].mxu1 }
 0x215   :  { %674 = vrot.lane.b32.xlu1 %v10798_v38, %s12294_s0  ;;  %v934_v56 = vpop.f32.mrb[27].mxu0  ;;  %v1375_v57 = vpop.f32.mrb[27].mxu1 }
 0x217   :  { %1113 = vrot.lane.b32.xlu0 %v10833_v35, %s12309_s13 }
 0x219   :  { %1115 = vrot.lane.b32.xlu1 %v10834_v39, %s12309_s13 }
 0x21a   :  { %v12818_v58 = vpop.f32.mrb[28].mxu0  ;;  %v12820_v59 = vpop.f32.mrb[28].mxu1 }
 0x21b   :  { %668 = vrot.lane.b32.xlu0 %v637_v36, %s12294_s0  ;;  %v12823_v60 = vpop.f32.mrb[29].mxu0  ;;  %v12825_v61 = vpop.f32.mrb[29].mxu1 }
 0x21c   :  { %v12827_v62 = vpop.f32.mrb[30].mxu0  ;;  %v12829_v63 = vpop.f32.mrb[30].mxu1 }
 0x21d   :  { %670 = vrot.lane.b32.xlu1 %v640_v40, %s12294_s0  ;;  %v12832_v2 = vpop.f32.mrb[31].mxu0  ;;  %v12834_v0 = vpop.f32.mrb[31].mxu1 }
 0x21f   :  { %1109 = vrot.lane.b32.xlu0 %v1078_v37, %s12309_s13 }
 0x221   :  { %1111 = vrot.lane.b32.xlu1 %v1081_v41, %s12309_s13 }
 0x222   :  { %v12838_v3 = vpop.f32.mrb[32].mxu0  ;;  %v12840_v4 = vpop.f32.mrb[32].mxu1 }
 0x223   :  { %958 = vrot.lane.b32.xlu0 %v10817_v42, %s12290_s30  ;;  %v12843_v1 = vpop.f32.mrb[33].mxu0  ;;  %v12845_v5 = vpop.f32.mrb[33].mxu1 }
 0x224   :  { %v12847_v6 = vpop.f32.mrb[34].mxu0  ;;  %v12849_v7 = vpop.f32.mrb[34].mxu1 }
 0x225   :  { %960 = vrot.lane.b32.xlu1 %v10818_v46, %s12290_s30  ;;  %v12852_v8 = vpop.f32.mrb[35].mxu0  ;;  %v12854_v9 = vpop.f32.mrb[35].mxu1 }
 0x227   :  { %1399 = vrot.lane.b32.xlu0 %v10853_v43, %s12310_s3 }
 0x229   :  { %1401 = vrot.lane.b32.xlu1 %v10854_v47, %s12310_s3 }
 0x22a   :  { %v12858_v10 = vpop.f32.mrb[36].mxu0  ;;  %v12860_v11 = vpop.f32.mrb[36].mxu1 }
 0x22b   :  { %954 = vrot.lane.b32.xlu0 %v915_v44, %s12290_s30  ;;  %v12863_v12 = vpop.f32.mrb[37].mxu0  ;;  %v12865_v13 = vpop.f32.mrb[37].mxu1 }
 0x22c   :  { %v12867_v14 = vpop.f32.mrb[38].mxu0  ;;  %v12869_v15 = vpop.f32.mrb[38].mxu1 }
 0x22d   :  { %956 = vrot.lane.b32.xlu1 %v918_v48, %s12290_s30  ;;  %v12872_v16 = vpop.f32.mrb[39].mxu0  ;;  %v12874_v17 = vpop.f32.mrb[39].mxu1 }
 0x22f   :  { %1395 = vrot.lane.b32.xlu0 %v1356_v45, %s12310_s3 }
 0x231   :  { %1397 = vrot.lane.b32.xlu1 %v1359_v49, %s12310_s3 }
 0x232   :  { %v12878_v18 = vpop.f32.mrb[40].mxu0  ;;  %v12880_v19 = vpop.f32.mrb[40].mxu1 }
 0x233   :  { %966 = vrot.lane.b32.xlu0 %v10821_v50, %s12290_s30  ;;  %v12883_v20 = vpop.f32.mrb[41].mxu0  ;;  %v12885_v21 = vpop.f32.mrb[41].mxu1 }
 0x234   :  { %v12887_v22 = vpop.f32.mrb[42].mxu0  ;;  %v12889_v23 = vpop.f32.mrb[42].mxu1 }
 0x235   :  { %968 = vrot.lane.b32.xlu1 %v10822_v54, %s12290_s30  ;;  %v12892_v24 = vpop.f32.mrb[43].mxu0  ;;  %v12894_v25 = vpop.f32.mrb[43].mxu1 }
 0x237   :  { %1407 = vrot.lane.b32.xlu0 %v10857_v51, %s12310_s3 }
 0x239   :  { %1409 = vrot.lane.b32.xlu1 %v10858_v55, %s12310_s3 }
 0x23a   :  { %v12898_v26 = vpop.f32.mrb[44].mxu0  ;;  %v12900_v27 = vpop.f32.mrb[44].mxu1 }
 0x23b   :  { %962 = vrot.lane.b32.xlu0 %v931_v52, %s12290_s30  ;;  %v12903_v28 = vpop.f32.mrb[45].mxu0  ;;  %v12905_v29 = vpop.f32.mrb[45].mxu1 }
 0x23c   :  { %v12907_v30 = vpop.f32.mrb[46].mxu0  ;;  %v12909_v31 = vpop.f32.mrb[46].mxu1 }
 0x23d   :  { %964 = vrot.lane.b32.xlu1 %v934_v56, %s12290_s30  ;;  %v12912_v32 = vpop.f32.mrb[47].mxu0  ;;  %v12914_v33 = vpop.f32.mrb[47].mxu1 }
 0x23f   :  { %1403 = vrot.lane.b32.xlu0 %v12813_v53, %s12310_s3 }
 0x241   :  { %1405 = vrot.lane.b32.xlu1 %v1375_v57, %s12310_s3 }
 0x242   :  { %v12919_v34 = vpop.f32.mrb[48].mxu0  ;;  %v12921_v35 = vpop.f32.mrb[48].mxu1 }
 0x243   :  { %1252 = vrot.lane.b32.xlu0 %v12818_v58, %s12311_s23  ;;  %v12925_v36 = vpop.f32.mrb[49].mxu0  ;;  %v12927_v37 = vpop.f32.mrb[49].mxu1 }
 0x244   :  { %v12929_v38 = vpop.f32.mrb[50].mxu0  ;;  %v12931_v39 = vpop.f32.mrb[50].mxu1 }
 0x245   :  { %1254 = vrot.lane.b32.xlu1 %v12827_v62, %s12311_s23  ;;  %v12935_v40 = vpop.f32.mrb[51].mxu0  ;;  %v12937_v41 = vpop.f32.mrb[51].mxu1 }
 0x247   :  { %1693 = vrot.lane.b32.xlu0 %v12820_v59, %s12312_s17 }
 0x249   :  { %1695 = vrot.lane.b32.xlu1 %v12829_v63, %s12312_s17 }
 0x24a   :  { %v12943_v42 = vpop.f32.mrb[52].mxu0  ;;  %v12945_v43 = vpop.f32.mrb[52].mxu1 }
 0x24b   :  { %1248 = vrot.lane.b32.xlu0 %v12823_v60, %s12311_s23  ;;  %v12949_v44 = vpop.f32.mrb[53].mxu0  ;;  %v12951_v45 = vpop.f32.mrb[53].mxu1 }
 0x24c   :  { %v12953_v46 = vpop.f32.mrb[54].mxu0  ;;  %v12955_v47 = vpop.f32.mrb[54].mxu1 }
 0x24d   :  { %1250 = vrot.lane.b32.xlu1 %v12832_v2, %s12311_s23  ;;  %v12959_v48 = vpop.f32.mrb[55].mxu0  ;;  %v12961_v49 = vpop.f32.mrb[55].mxu1 }
 0x24f   :  { %1689 = vrot.lane.b32.xlu0 %v12825_v61, %s12312_s17 }
 0x251   :  { %1691 = vrot.lane.b32.xlu1 %v12834_v0, %s12312_s17 }
 0x252   :  { %v12967_v50 = vpop.f32.mrb[56].mxu0  ;;  %v12969_v51 = vpop.f32.mrb[56].mxu1 }
 0x253   :  { %1260 = vrot.lane.b32.xlu0 %v12838_v3, %s12311_s23  ;;  %v12973_v52 = vpop.f32.mrb[57].mxu0  ;;  %v12975_v53 = vpop.f32.mrb[57].mxu1 }
 0x254   :  { %v12977_v54 = vpop.f32.mrb[58].mxu0  ;;  %v12979_v55 = vpop.f32.mrb[58].mxu1 }
 0x255   :  { %v526_v56 = vpop.permute.xlu0 %525  ;;  %1262 = vrot.lane.b32.xlu1 %v12847_v6, %s12311_s23  ;;  %v12983_v57 = vpop.f32.mrb[59].mxu0 }
 0x256   :  { %544 = vst.msk [vmem:[#allocation2 + $0x30] sm:$0xff] %vm537_vm2, %v526_v56  ;;  %v12986_v58 = vpop.f32.mrb[59].mxu1 }
 0x257   :  { %v528_v59 = vpop.permute.xlu1 %527  ;;  %1701 = vrot.lane.b32.xlu0 %v12840_v4, %s12312_s17 }
 0x258   :  { %545 = vst.msk [vmem:[#allocation2 + $0x38] sm:$0xff] %vm537_vm2, %v528_v59 }
 0x259   :  { %v522_v60 = vpop.permute.xlu0 %521  ;;  %1703 = vrot.lane.b32.xlu1 %v12849_v7, %s12312_s17 }
 0x25a   :  { %542 = vst.msk [vmem:[#allocation2 + $0x20] sm:$0xff] %vm537_vm2, %v522_v60  ;;  %v12994_v61 = vpop.f32.mrb[60].mxu0 }
 0x25b   :  { %v524_v62 = vpop.permute.xlu1 %523  ;;  %1256 = vrot.lane.b32.xlu0 %v12843_v1, %s12311_s23  ;;  %v12998_v63 = vpop.f32.mrb[61].mxu0 }
 0x25c   :  { %543 = vst.msk [vmem:[#allocation2 + $0x28] sm:$0xff] %vm537_vm2, %v524_v62  ;;  %v13001_v2 = vpop.f32.mrb[62].mxu0 }
 0x25d   :  { %v812_v0 = vpop.permute.xlu0 %811  ;;  %1258 = vrot.lane.b32.xlu1 %v12852_v8, %s12311_s23  ;;  %v13005_v3 = vpop.f32.mrb[63].mxu0 }
 0x25f   :  { %v814_v4 = vpop.permute.xlu1 %813  ;;  %1697 = vrot.lane.b32.xlu0 %v12845_v5, %s12312_s17 }
 0x261   :  { %v808_v6 = vpop.permute.xlu0 %807  ;;  %1699 = vrot.lane.b32.xlu1 %v12854_v9, %s12312_s17 }
 0x262   :  { %v13011_v1 = vpop.f32.mrb[64].mxu0 }
 0x263   :  { %v810_v7 = vpop.permute.xlu1 %809  ;;  %1546 = vrot.lane.b32.xlu0 %v12858_v10, %s12313_s26  ;;  %v13015_v56 = vpop.f32.mrb[65].mxu0 }
 0x264   :  { %v13017_v8 = vpop.f32.mrb[66].mxu0 }
 0x265   :  { %v820_v59 = vpop.permute.xlu0 %819  ;;  %1548 = vrot.lane.b32.xlu1 %v12867_v14, %s12313_s26  ;;  %v13021_v5 = vpop.f32.mrb[67].mxu0 }
 0x267   :  { %v518_v60 = vpop.permute.xlu1 %517  ;;  %1987 = vrot.lane.b32.xlu0 %v12860_v11, %s12314_s10 }
 0x268   :  { %540 = vst.msk [vmem:[#allocation2 + $0x10] sm:$0xff] %vm537_vm2, %v518_v60 }
 0x269   :  { %v514_v9 = vpop.permute.xlu0 %513  ;;  %1989 = vrot.lane.b32.xlu1 %v12869_v15, %s12314_s10 }
 0x26a   :  { %538 = vst.msk [vmem:[#allocation2] sm:$0xff] %vm537_vm2, %v514_v9 }
 0x26b   :  { %v520_v10 = vpop.permute.xlu1 %519  ;;  %1542 = vrot.lane.b32.xlu0 %v12863_v12, %s12313_s26 }
 0x26c   :  { %541 = vst.msk [vmem:[#allocation2 + $0x18] sm:$0xff] %vm537_vm2, %v520_v10 }
 0x26d   :  { %v816_v14 = vpop.permute.xlu0 %815  ;;  %1544 = vrot.lane.b32.xlu1 %v12872_v16, %s12313_s26 }
 0x26f   :  { %v822_v62 = vpop.permute.xlu1 %821  ;;  %1983 = vrot.lane.b32.xlu0 %v12865_v13, %s12314_s10 }
 0x271   :  { %v516_v11 = vpop.permute.xlu0 %515  ;;  %1985 = vrot.lane.b32.xlu1 %v12874_v17, %s12314_s10 }
 0x272   :  { %539 = vst.msk [vmem:[#allocation2 + $0x8] sm:$0xff] %vm537_vm2, %v516_v11  ;;  %vm2595_vm2 = vcmask 261360  }
 0x273   :  { %v818_v15 = vpop.permute.xlu1 %817  ;;  %1554 = vrot.lane.b32.xlu0 %v12878_v18, %s12313_s26 }
 0x275   :  { %v665_v12 = vpop.permute.xlu0 %664  ;;  %1556 = vrot.lane.b32.xlu1 %v12887_v22, %s12313_s26 }
 0x276   :  { %687 = vst.msk [vmem:[#allocation2 + $0x10] sm:$0xff] %vm684_vm3, %v665_v12 }
 0x277   :  { %v667_v16 = vpop.permute.xlu1 %666  ;;  %1995 = vrot.lane.b32.xlu0 %v12880_v19, %s12314_s10  ;;  %834 = vst.msk [vmem:[#allocation2 + $0x10] sm:$0xff] %vm831_vm4, %v812_v0 }
 0x278   :  { %688 = vst.msk [vmem:[#allocation2 + $0x18] sm:$0xff] %vm684_vm3, %v667_v16 }
 0x279   :  { %v1106_v13 = vpop.permute.xlu0 %1105  ;;  %1997 = vrot.lane.b32.xlu1 %v12889_v23, %s12314_s10  ;;  %835 = vst.msk [vmem:[#allocation2 + $0x18] sm:$0xff] %vm831_vm4, %v814_v4 }
 0x27b   :  { %v1108_v17 = vpop.permute.xlu1 %1107  ;;  %1550 = vrot.lane.b32.xlu0 %v12883_v20, %s12313_s26 }
 0x27d   :  { %v661_v18 = vpop.permute.xlu0 %660  ;;  %1552 = vrot.lane.b32.xlu1 %v12892_v24, %s12313_s26 }
 0x27e   :  { %685 = vst.msk [vmem:[#allocation2] sm:$0xff] %vm684_vm3, %v661_v18 }
 0x27f   :  { %v663_v19 = vpop.permute.xlu1 %662  ;;  %1991 = vrot.lane.b32.xlu0 %v12885_v21, %s12314_s10  ;;  %832 = vst.msk [vmem:[#allocation2] sm:$0xff] %vm831_vm4, %v808_v6 }
 0x280   :  { %686 = vst.msk [vmem:[#allocation2 + $0x8] sm:$0xff] %vm684_vm3, %v663_v19 }
 0x281   :  { %v1102_v22 = vpop.permute.xlu0 %1101  ;;  %1993 = vrot.lane.b32.xlu1 %v12894_v25, %s12314_s10  ;;  %833 = vst.msk [vmem:[#allocation2 + $0x8] sm:$0xff] %vm831_vm4, %v810_v7 }
 0x283   :  { %v1104_v20 = vpop.permute.xlu1 %1103  ;;  %1840 = vrot.lane.b32.xlu0 %v12898_v26, %s12315_s24 }
 0x285   :  { %v673_v23 = vpop.permute.xlu0 %672  ;;  %1842 = vrot.lane.b32.xlu1 %v12907_v30, %s12315_s24 }
 0x286   :  { %691 = vst.msk [vmem:[#allocation2 + $0x30] sm:$0xff] %vm684_vm3, %v673_v23 }
 0x287   :  { %v675_v21 = vpop.permute.xlu1 %674  ;;  %2281 = vrot.lane.b32.xlu0 %v12900_v27, %s12316_s27  ;;  %838 = vst.msk [vmem:[#allocation2 + $0x30] sm:$0xff] %vm831_vm4, %v820_v59 }
 0x288   :  { %692 = vst.msk [vmem:[#allocation2 + $0x38] sm:$0xff] %vm684_vm3, %v675_v21 }
 0x289   :  { %v1114_v24 = vpop.permute.xlu0 %1113  ;;  %2283 = vrot.lane.b32.xlu1 %v12909_v31, %s12316_s27  ;;  %839 = vst.msk [vmem:[#allocation2 + $0x38] sm:$0xff] %vm831_vm4, %v822_v62 }
 0x28b   :  { %v1116_v25 = vpop.permute.xlu1 %1115  ;;  %1836 = vrot.lane.b32.xlu0 %v12903_v28, %s12315_s24 }
 0x28d   :  { %v669_v26 = vpop.permute.xlu0 %668  ;;  %1838 = vrot.lane.b32.xlu1 %v12912_v32, %s12315_s24 }
 0x28e   :  { %689 = vst.msk [vmem:[#allocation2 + $0x20] sm:$0xff] %vm684_vm3, %v669_v26 }
 0x28f   :  { %v671_v27 = vpop.permute.xlu1 %670  ;;  %2277 = vrot.lane.b32.xlu0 %v12905_v29, %s12316_s27  ;;  %836 = vst.msk [vmem:[#allocation2 + $0x20] sm:$0xff] %vm831_vm4, %v816_v14 }
 0x290   :  { %690 = vst.msk [vmem:[#allocation2 + $0x28] sm:$0xff] %vm684_vm3, %v671_v27 }
 0x291   :  { %v1110_v30 = vpop.permute.xlu0 %1109  ;;  %2279 = vrot.lane.b32.xlu1 %v12914_v33, %s12316_s27  ;;  %837 = vst.msk [vmem:[#allocation2 + $0x28] sm:$0xff] %vm831_vm4, %v818_v15 }
 0x293   :  { %v1112_v28 = vpop.permute.xlu1 %1111  ;;  %1848 = vrot.lane.b32.xlu0 %v12919_v34, %s12315_s24 }
 0x295   :  { %v959_v31 = vpop.permute.xlu0 %958  ;;  %1850 = vrot.lane.b32.xlu1 %v12929_v38, %s12315_s24 }
 0x296   :  { %981 = vst.msk [vmem:[#allocation2 + $0x10] sm:$0xff] %vm978_vm5, %v959_v31 }
 0x297   :  { %v961_v29 = vpop.permute.xlu1 %960  ;;  %2289 = vrot.lane.b32.xlu0 %v12921_v35, %s12316_s27  ;;  %1128 = vst.msk [vmem:[#allocation2 + $0x10] sm:$0xff] %vm1125_vm6, %v1106_v13 }
 0x298   :  { %982 = vst.msk [vmem:[#allocation2 + $0x18] sm:$0xff] %vm978_vm5, %v961_v29 }
 0x299   :  { %v1400_v32 = vpop.permute.xlu0 %1399  ;;  %2291 = vrot.lane.b32.xlu1 %v12931_v39, %s12316_s27  ;;  %1129 = vst.msk [vmem:[#allocation2 + $0x18] sm:$0xff] %vm1125_vm6, %v1108_v17 }
 0x29b   :  { %v1402_v33 = vpop.permute.xlu1 %1401  ;;  %1844 = vrot.lane.b32.xlu0 %v12925_v36, %s12315_s24 }
 0x29d   :  { %v955_v34 = vpop.permute.xlu0 %954  ;;  %1846 = vrot.lane.b32.xlu1 %v12935_v40, %s12315_s24 }
 0x29e   :  { %979 = vst.msk [vmem:[#allocation2] sm:$0xff] %vm978_vm5, %v955_v34 }
 0x29f   :  { %v957_v35 = vpop.permute.xlu1 %956  ;;  %2285 = vrot.lane.b32.xlu0 %v12927_v37, %s12316_s27  ;;  %1126 = vst.msk [vmem:[#allocation2] sm:$0xff] %vm1125_vm6, %v1102_v22 }
 0x2a0   :  { %980 = vst.msk [vmem:[#allocation2 + $0x8] sm:$0xff] %vm978_vm5, %v957_v35 }
 0x2a1   :  { %v1396_v38 = vpop.permute.xlu0 %1395  ;;  %2287 = vrot.lane.b32.xlu1 %v12937_v41, %s12316_s27  ;;  %1127 = vst.msk [vmem:[#allocation2 + $0x8] sm:$0xff] %vm1125_vm6, %v1104_v20  ;;  %s12337_s27 = smov 110  }
 0x2a3   :  { %v1398_v36 = vpop.permute.xlu1 %1397  ;;  %2134 = vrot.lane.b32.xlu0 %v12943_v42, %s12317_s28 }
 0x2a5   :  { %v967_v39 = vpop.permute.xlu0 %966  ;;  %2136 = vrot.lane.b32.xlu1 %v12953_v46, %s12317_s28 }
 0x2a6   :  { %985 = vst.msk [vmem:[#allocation2 + $0x30] sm:$0xff] %vm978_vm5, %v967_v39 }
 0x2a7   :  { %v969_v37 = vpop.permute.xlu1 %968  ;;  %2575 = vrot.lane.b32.xlu0 %v12945_v43, %s12318_s5  ;;  %1132 = vst.msk [vmem:[#allocation2 + $0x30] sm:$0xff] %vm1125_vm6, %v1114_v24 }
 0x2a8   :  { %986 = vst.msk [vmem:[#allocation2 + $0x38] sm:$0xff] %vm978_vm5, %v969_v37 }
 0x2a9   :  { %v1408_v40 = vpop.permute.xlu0 %1407  ;;  %2577 = vrot.lane.b32.xlu1 %v12955_v47, %s12318_s5  ;;  %1133 = vst.msk [vmem:[#allocation2 + $0x38] sm:$0xff] %vm1125_vm6, %v1116_v25 }
 0x2ab   :  { %v1410_v41 = vpop.permute.xlu1 %1409  ;;  %2130 = vrot.lane.b32.xlu0 %v12949_v44, %s12317_s28 }
 0x2ad   :  { %v963_v42 = vpop.permute.xlu0 %962  ;;  %2132 = vrot.lane.b32.xlu1 %v12959_v48, %s12317_s28 }
 0x2ae   :  { %983 = vst.msk [vmem:[#allocation2 + $0x20] sm:$0xff] %vm978_vm5, %v963_v42 }
 0x2af   :  { %v965_v43 = vpop.permute.xlu1 %964  ;;  %2571 = vrot.lane.b32.xlu0 %v12951_v45, %s12318_s5  ;;  %1130 = vst.msk [vmem:[#allocation2 + $0x20] sm:$0xff] %vm1125_vm6, %v1110_v30 }
 0x2b0   :  { %984 = vst.msk [vmem:[#allocation2 + $0x28] sm:$0xff] %vm978_vm5, %v965_v43 }
 0x2b1   :  { %v1404_v46 = vpop.permute.xlu0 %1403  ;;  %2573 = vrot.lane.b32.xlu1 %v12961_v49, %s12318_s5  ;;  %1131 = vst.msk [vmem:[#allocation2 + $0x28] sm:$0xff] %vm1125_vm6, %v1112_v28 }
 0x2b3   :  { %v1406_v44 = vpop.permute.xlu1 %1405  ;;  %2142 = vrot.lane.b32.xlu0 %v12967_v50, %s12317_s28 }
 0x2b5   :  { %v1253_v47 = vpop.permute.xlu0 %1252  ;;  %2144 = vrot.lane.b32.xlu1 %v12977_v54, %s12317_s28 }
 0x2b6   :  { %1275 = vst.msk [vmem:[#allocation2 + $0x10] sm:$0xff] %vm1272_vm7, %v1253_v47 }
 0x2b7   :  { %v1255_v45 = vpop.permute.xlu1 %1254  ;;  %2138 = vrot.lane.b32.xlu0 %v12973_v52, %s12317_s28  ;;  %1422 = vst.msk [vmem:[#allocation2 + $0x10] sm:$0xff] %vm1419_vm8, %v1400_v32 }
 0x2b8   :  { %1276 = vst.msk [vmem:[#allocation2 + $0x18] sm:$0xff] %vm1272_vm7, %v1255_v45 }
 0x2b9   :  { %v1694_v48 = vpop.permute.xlu0 %1693  ;;  %2140 = vrot.lane.b32.xlu1 %v12983_v57, %s12317_s28  ;;  %1423 = vst.msk [vmem:[#allocation2 + $0x18] sm:$0xff] %vm1419_vm8, %v1402_v33 }
 0x2bb   :  { %v1696_v49 = vpop.permute.xlu1 %1695  ;;  %2579 = vrot.lane.b32.xlu0 %v12975_v53, %s12318_s5 }
 0x2bd   :  { %v1249_v50 = vpop.permute.xlu0 %1248  ;;  %2581 = vrot.lane.b32.xlu1 %v12986_v58, %s12318_s5 }
 0x2be   :  { %1273 = vst.msk [vmem:[#allocation2] sm:$0xff] %vm1272_vm7, %v1249_v50 }
 0x2bf   :  { %v1251_v52 = vpop.permute.xlu1 %1250  ;;  %2428 = vrot.lane.b32.xlu0 %v12994_v61, %s12319_s25  ;;  %1420 = vst.msk [vmem:[#allocation2] sm:$0xff] %vm1419_vm8, %v1396_v38 }
 0x2c0   :  { %1274 = vst.msk [vmem:[#allocation2 + $0x8] sm:$0xff] %vm1272_vm7, %v1251_v52 }
 0x2c1   :  { %v1690_v54 = vpop.permute.xlu0 %1689  ;;  %2430 = vrot.lane.b32.xlu1 %v13001_v2, %s12319_s25  ;;  %1421 = vst.msk [vmem:[#allocation2 + $0x8] sm:$0xff] %vm1419_vm8, %v1398_v36 }
 0x2c3   :  { %v1692_v53 = vpop.permute.xlu1 %1691  ;;  %2424 = vrot.lane.b32.xlu0 %v12998_v63, %s12319_s25 }
 0x2c5   :  { %v1261_v57 = vpop.permute.xlu0 %1260  ;;  %2426 = vrot.lane.b32.xlu1 %v13005_v3, %s12319_s25 }
 0x2c6   :  { %1279 = vst.msk [vmem:[#allocation2 + $0x30] sm:$0xff] %vm1272_vm7, %v1261_v57 }
 0x2c7   :  { %v1263_v58 = vpop.permute.xlu1 %1262  ;;  %2436 = vrot.lane.b32.xlu0 %v13011_v1, %s12319_s25  ;;  %1426 = vst.msk [vmem:[#allocation2 + $0x30] sm:$0xff] %vm1419_vm8, %v1408_v40 }
 0x2c8   :  { %1280 = vst.msk [vmem:[#allocation2 + $0x38] sm:$0xff] %vm1272_vm7, %v1263_v58 }
 0x2c9   :  { %v1702_v61 = vpop.permute.xlu0 %1701  ;;  %2438 = vrot.lane.b32.xlu1 %v13017_v8, %s12319_s25  ;;  %1427 = vst.msk [vmem:[#allocation2 + $0x38] sm:$0xff] %vm1419_vm8, %v1410_v41 }
 0x2cb   :  { %v1704_v2 = vpop.permute.xlu1 %1703  ;;  %2432 = vrot.lane.b32.xlu0 %v13015_v56, %s12319_s25 }
 0x2cd   :  { %v1257_v63 = vpop.permute.xlu0 %1256  ;;  %2434 = vrot.lane.b32.xlu1 %v13021_v5, %s12319_s25  ;;  %s12323_s25 = smov 1  }
 0x2ce   :  { %1277 = vst.msk [vmem:[#allocation2 + $0x20] sm:$0xff] %vm1272_vm7, %v1257_v63 }
 0x2cf   :  { %v1259_v0 = vpop.permute.xlu1 %1258  ;;  %2583 = vrot.lane.b32.xlu0 %v12969_v51, %s12318_s5  ;;  %1424 = vst.msk [vmem:[#allocation2 + $0x20] sm:$0xff] %vm1419_vm8, %v1404_v46 }
 0x2d0   :  { %1278 = vst.msk [vmem:[#allocation2 + $0x28] sm:$0xff] %vm1272_vm7, %v1259_v0 }
 0x2d1   :  { %v1698_v3 = vpop.permute.xlu0 %1697  ;;  %2585 = vrot.lane.b32.xlu1 %v12979_v55, %s12318_s5  ;;  %1425 = vst.msk [vmem:[#allocation2 + $0x28] sm:$0xff] %vm1419_vm8, %v1406_v44  ;;  %s12322_s5 = smov 5  }
 0x2d3   :  { %v1700_v4 = vpop.permute.xlu1 %1699 }
 0x2d5   :  { %v1547_v6 = vpop.permute.xlu0 %1546 }
 0x2d6   :  { %1569 = vst.msk [vmem:[#allocation2 + $0x10] sm:$0xff] %vm1566_vm9, %v1547_v6 }
 0x2d7   :  { %v1549_v1 = vpop.permute.xlu1 %1548  ;;  %1716 = vst.msk [vmem:[#allocation2 + $0x10] sm:$0xff] %vm1713_vm10, %v1694_v48 }
 0x2d8   :  { %1570 = vst.msk [vmem:[#allocation2 + $0x18] sm:$0xff] %vm1566_vm9, %v1549_v1 }
 0x2d9   :  { %v1988_v51 = vpop.permute.xlu0 %1987  ;;  %1717 = vst.msk [vmem:[#allocation2 + $0x18] sm:$0xff] %vm1713_vm10, %v1696_v49 }
 0x2db   :  { %v1990_v7 = vpop.permute.xlu1 %1989 }
 0x2dd   :  { %v1543_v56 = vpop.permute.xlu0 %1542 }
 0x2de   :  { %1567 = vst.msk [vmem:[#allocation2] sm:$0xff] %vm1566_vm9, %v1543_v56 }
 0x2df   :  { %v1545_v55 = vpop.permute.xlu1 %1544  ;;  %1714 = vst.msk [vmem:[#allocation2] sm:$0xff] %vm1713_vm10, %v1690_v54 }
 0x2e0   :  { %1568 = vst.msk [vmem:[#allocation2 + $0x8] sm:$0xff] %vm1566_vm9, %v1545_v55 }
 0x2e1   :  { %v1984_v8 = vpop.permute.xlu0 %1983  ;;  %1715 = vst.msk [vmem:[#allocation2 + $0x8] sm:$0xff] %vm1713_vm10, %v1692_v53 }
 0x2e3   :  { %v1986_v59 = vpop.permute.xlu1 %1985 }
 0x2e5   :  { %v1555_v5 = vpop.permute.xlu0 %1554 }
 0x2e6   :  { %1573 = vst.msk [vmem:[#allocation2 + $0x30] sm:$0xff] %vm1566_vm9, %v1555_v5 }
 0x2e7   :  { %v1557_v60 = vpop.permute.xlu1 %1556  ;;  %1720 = vst.msk [vmem:[#allocation2 + $0x30] sm:$0xff] %vm1713_vm10, %v1702_v61 }
 0x2e8   :  { %1574 = vst.msk [vmem:[#allocation2 + $0x38] sm:$0xff] %vm1566_vm9, %v1557_v60 }
 0x2e9   :  { %v1996_v9 = vpop.permute.xlu0 %1995  ;;  %1721 = vst.msk [vmem:[#allocation2 + $0x38] sm:$0xff] %vm1713_vm10, %v1704_v2 }
 0x2eb   :  { %v1998_v10 = vpop.permute.xlu1 %1997 }
 0x2ed   :  { %v1551_v14 = vpop.permute.xlu0 %1550 }
 0x2ee   :  { %1571 = vst.msk [vmem:[#allocation2 + $0x20] sm:$0xff] %vm1566_vm9, %v1551_v14 }
 0x2ef   :  { %v1553_v62 = vpop.permute.xlu1 %1552  ;;  %1718 = vst.msk [vmem:[#allocation2 + $0x20] sm:$0xff] %vm1713_vm10, %v1698_v3 }
 0x2f0   :  { %1572 = vst.msk [vmem:[#allocation2 + $0x28] sm:$0xff] %vm1566_vm9, %v1553_v62 }
 0x2f1   :  { %v1992_v11 = vpop.permute.xlu0 %1991  ;;  %1719 = vst.msk [vmem:[#allocation2 + $0x28] sm:$0xff] %vm1713_vm10, %v1700_v4 }
 0x2f3   :  { %v1994_v15 = vpop.permute.xlu1 %1993 }
 0x2f5   :  { %v1841_v12 = vpop.permute.xlu0 %1840 }
 0x2f6   :  { %1863 = vst.msk [vmem:[#allocation2 + $0x10] sm:$0xff] %vm1860_vm11, %v1841_v12 }
 0x2f7   :  { %v1843_v16 = vpop.permute.xlu1 %1842  ;;  %2010 = vst.msk [vmem:[#allocation2 + $0x10] sm:$0xff] %vm2007_vm12, %v1988_v51 }
 0x2f8   :  { %1864 = vst.msk [vmem:[#allocation2 + $0x18] sm:$0xff] %vm1860_vm11, %v1843_v16 }
 0x2f9   :  { %v2282_v13 = vpop.permute.xlu0 %2281  ;;  %2011 = vst.msk [vmem:[#allocation2 + $0x18] sm:$0xff] %vm2007_vm12, %v1990_v7 }
 0x2fb   :  { %v2284_v17 = vpop.permute.xlu1 %2283 }
 0x2fd   :  { %v1837_v18 = vpop.permute.xlu0 %1836 }
 0x2fe   :  { %1861 = vst.msk [vmem:[#allocation2] sm:$0xff] %vm1860_vm11, %v1837_v18 }
 0x2ff   :  { %v1839_v19 = vpop.permute.xlu1 %1838  ;;  %2008 = vst.msk [vmem:[#allocation2] sm:$0xff] %vm2007_vm12, %v1984_v8 }
 0x300   :  { %1862 = vst.msk [vmem:[#allocation2 + $0x8] sm:$0xff] %vm1860_vm11, %v1839_v19 }
 0x301   :  { %v2278_v22 = vpop.permute.xlu0 %2277  ;;  %2009 = vst.msk [vmem:[#allocation2 + $0x8] sm:$0xff] %vm2007_vm12, %v1986_v59 }
 0x303   :  { %v2280_v20 = vpop.permute.xlu1 %2279 }
 0x305   :  { %v1849_v23 = vpop.permute.xlu0 %1848 }
 0x306   :  { %1867 = vst.msk [vmem:[#allocation2 + $0x30] sm:$0xff] %vm1860_vm11, %v1849_v23 }
 0x307   :  { %v1851_v21 = vpop.permute.xlu1 %1850  ;;  %2014 = vst.msk [vmem:[#allocation2 + $0x30] sm:$0xff] %vm2007_vm12, %v1996_v9 }
 0x308   :  { %1868 = vst.msk [vmem:[#allocation2 + $0x38] sm:$0xff] %vm1860_vm11, %v1851_v21 }
 0x309   :  { %v2290_v24 = vpop.permute.xlu0 %2289  ;;  %2015 = vst.msk [vmem:[#allocation2 + $0x38] sm:$0xff] %vm2007_vm12, %v1998_v10 }
 0x30b   :  { %v2292_v25 = vpop.permute.xlu1 %2291 }
 0x30d   :  { %v1845_v26 = vpop.permute.xlu0 %1844 }
 0x30e   :  { %1865 = vst.msk [vmem:[#allocation2 + $0x20] sm:$0xff] %vm1860_vm11, %v1845_v26 }
 0x30f   :  { %v1847_v27 = vpop.permute.xlu1 %1846  ;;  %2012 = vst.msk [vmem:[#allocation2 + $0x20] sm:$0xff] %vm2007_vm12, %v1992_v11 }
 0x310   :  { %1866 = vst.msk [vmem:[#allocation2 + $0x28] sm:$0xff] %vm1860_vm11, %v1847_v27  ;;  %vm239_vm11 = vcmask 343040  }
 0x311   :  { %v2286_v30 = vpop.permute.xlu0 %2285  ;;  %2013 = vst.msk [vmem:[#allocation2 + $0x28] sm:$0xff] %vm2007_vm12, %v1994_v15  ;;  %vm2998_vm12 = vcmask 302120  }
 0x313   :  { %v2288_v28 = vpop.permute.xlu1 %2287 }
 0x315   :  { %v2135_v31 = vpop.permute.xlu0 %2134 }
 0x316   :  { %2157 = vst.msk [vmem:[#allocation2 + $0x10] sm:$0xff] %vm2154_vm13, %v2135_v31 }
 0x317   :  { %v2137_v29 = vpop.permute.xlu1 %2136  ;;  %2304 = vst.msk [vmem:[#allocation2 + $0x10] sm:$0xff] %vm2301_vm14, %v2282_v13 }
 0x318   :  { %2158 = vst.msk [vmem:[#allocation2 + $0x18] sm:$0xff] %vm2154_vm13, %v2137_v29 }
 0x319   :  { %v2576_v32 = vpop.permute.xlu0 %2575  ;;  %2305 = vst.msk [vmem:[#allocation2 + $0x18] sm:$0xff] %vm2301_vm14, %v2284_v17 }
 0x31b   :  { %v2578_v33 = vpop.permute.xlu1 %2577 }
 0x31d   :  { %v2131_v34 = vpop.permute.xlu0 %2130 }
 0x31e   :  { %2155 = vst.msk [vmem:[#allocation2] sm:$0xff] %vm2154_vm13, %v2131_v34 }
 0x31f   :  { %v2133_v35 = vpop.permute.xlu1 %2132  ;;  %2302 = vst.msk [vmem:[#allocation2] sm:$0xff] %vm2301_vm14, %v2278_v22 }
 0x320   :  { %2156 = vst.msk [vmem:[#allocation2 + $0x8] sm:$0xff] %vm2154_vm13, %v2133_v35 }
 0x321   :  { %v2572_v38 = vpop.permute.xlu0 %2571  ;;  %2303 = vst.msk [vmem:[#allocation2 + $0x8] sm:$0xff] %vm2301_vm14, %v2280_v20 }
 0x323   :  { %v2574_v36 = vpop.permute.xlu1 %2573 }
 0x325   :  { %v2143_v39 = vpop.permute.xlu0 %2142 }
 0x326   :  { %2161 = vst.msk [vmem:[#allocation2 + $0x30] sm:$0xff] %vm2154_vm13, %v2143_v39 }
 0x327   :  { %v2145_v37 = vpop.permute.xlu1 %2144  ;;  %2308 = vst.msk [vmem:[#allocation2 + $0x30] sm:$0xff] %vm2301_vm14, %v2290_v24 }
 0x328   :  { %2162 = vst.msk [vmem:[#allocation2 + $0x38] sm:$0xff] %vm2154_vm13, %v2145_v37 }
 0x329   :  { %v2139_v40 = vpop.permute.xlu0 %2138  ;;  %2309 = vst.msk [vmem:[#allocation2 + $0x38] sm:$0xff] %vm2301_vm14, %v2292_v25 }
 0x32a   :  { %2159 = vst.msk [vmem:[#allocation2 + $0x20] sm:$0xff] %vm2154_vm13, %v2139_v40 }
 0x32b   :  { %v2141_v41 = vpop.permute.xlu1 %2140  ;;  %2306 = vst.msk [vmem:[#allocation2 + $0x20] sm:$0xff] %vm2301_vm14, %v2286_v30 }
 0x32c   :  { %2160 = vst.msk [vmem:[#allocation2 + $0x28] sm:$0xff] %vm2154_vm13, %v2141_v41  ;;  %vm3236_vm13 = vcmask 523264  }
 0x32d   :  { %v2580_v42 = vpop.permute.xlu0 %2579  ;;  %2307 = vst.msk [vmem:[#allocation2 + $0x28] sm:$0xff] %vm2301_vm14, %v2288_v28 }
 0x32f   :  { %v2582_v43 = vpop.permute.xlu1 %2581 }
 0x331   :  { %v2429_v46 = vpop.permute.xlu0 %2428 }
 0x332   :  { %2451 = vst.msk [vmem:[#allocation2 + $0x10] sm:$0xff] %vm2448_vm15, %v2429_v46 }
 0x333   :  { %2598 = vst.msk [vmem:[#allocation2 + $0x10] sm:$0xff] %vm2595_vm2, %v2576_v32  ;;  %v2431_v44 = vpop.permute.xlu1 %2430 }
 0x334   :  { %2452 = vst.msk [vmem:[#allocation2 + $0x18] sm:$0xff] %vm2448_vm15, %v2431_v44 }
 0x335   :  { %2599 = vst.msk [vmem:[#allocation2 + $0x18] sm:$0xff] %vm2595_vm2, %v2578_v33  ;;  %v2425_v47 = vpop.permute.xlu0 %2424 }
 0x336   :  { %2449 = vst.msk [vmem:[#allocation2] sm:$0xff] %vm2448_vm15, %v2425_v47  ;;  %v12320_v47 = vmov 0  }
 0x337   :  { %2596 = vst.msk [vmem:[#allocation2] sm:$0xff] %vm2595_vm2, %v2572_v38  ;;  %v2427_v45 = vpop.permute.xlu1 %2426  ;;  %11607 = vset.pattern.permute.xlu0 %v12320_v47  ;;  %11606 = vset.pattern.permute.xlu1 %v12320_v47 }
 0x338   :  { %2450 = vst.msk [vmem:[#allocation2 + $0x8] sm:$0xff] %vm2448_vm15, %v2427_v45 }
 0x339   :  { %2597 = vst.msk [vmem:[#allocation2 + $0x8] sm:$0xff] %vm2595_vm2, %v2574_v36  ;;  %v2437_v48 = vpop.permute.xlu0 %2436 }
 0x33a   :  { %2455 = vst.msk [vmem:[#allocation2 + $0x30] sm:$0xff] %vm2448_vm15, %v2437_v48  ;;  %v13242_v58 = vld [vmem:[#allocation2 + $0x10] sm:$0xff] }
 0x33b   :  { %v2439_v49 = vpop.permute.xlu1 %2438  ;;  %v2634_v0 = vsel %vm312_vm0, %v13242_v58, 0.0 }
 0x33c   :  { %2456 = vst.msk [vmem:[#allocation2 + $0x38] sm:$0xff] %vm2448_vm15, %v2439_v49  ;;  %v13251_v3 = vld [vmem:[#allocation2 + $0x18] sm:$0xff] }
 0x33d   :  { %v2433_v50 = vpop.permute.xlu0 %2432  ;;  %v2637_v6 = vsel %vm312_vm0, %v13251_v3, 0.0 }
 0x33e   :  { %2453 = vst.msk [vmem:[#allocation2 + $0x20] sm:$0xff] %vm2448_vm15, %v2433_v50  ;;  %v13234_v52 = vld [vmem:[#allocation2] sm:$0xff] }
 0x33f   :  { %2600 = vst.msk [vmem:[#allocation2 + $0x20] sm:$0xff] %vm2595_vm2, %v2580_v42  ;;  %v2435_v54 = vpop.permute.xlu1 %2434  ;;  %v2628_v53 = vsel %vm312_vm0, %v13234_v52, 0.0 }
 0x340   :  { %2454 = vst.msk [vmem:[#allocation2 + $0x28] sm:$0xff] %vm2448_vm15, %v2435_v54  ;;  %2629 = vadd.xlane.f32.xlu0 %v2628_v53  ;;  %v13240_v57 = vld [vmem:[#allocation2 + $0x8] sm:$0xff] }
 0x341   :  { %2601 = vst.msk [vmem:[#allocation2 + $0x28] sm:$0xff] %vm2595_vm2, %v2582_v43  ;;  %v2584_v61 = vpop.permute.xlu0 %2583  ;;  %v2631_v2 = vsel %vm312_vm0, %v13240_v57, 0.0 }
 0x342   :  { %2602 = vst.msk [vmem:[#allocation2 + $0x30] sm:$0xff] %vm2595_vm2, %v2584_v61  ;;  %2632 = vadd.xlane.f32.xlu1 %v2631_v2 }
 0x343   :  { %v2586_v63 = vpop.permute.xlu1 %2585 }
 0x344   :  { %2603 = vst.msk [vmem:[#allocation2 + $0x38] sm:$0xff] %vm2595_vm2, %v2586_v63  ;;  %2635 = vadd.xlane.f32.xlu0 %v2634_v0 }
 0x346   :  { %v13253_v4 = vld [vmem:[#allocation2 + $0x20] sm:$0xff] }
 0x347   :  { %v2640_v1 = vsel %vm312_vm0, %v13253_v4, 0.0 }
 0x348   :  { %2638 = vadd.xlane.f32.xlu0 %v2637_v6  ;;  %2641 = vadd.xlane.f32.xlu1 %v2640_v1  ;;  %v13259_v51 = vld [vmem:[#allocation2 + $0x28] sm:$0xff] }
 0x349   :  { %v13261_v7 = vld [vmem:[#allocation2 + $0x30] sm:$0xff]  ;;  %v2643_v55 = vsel %vm312_vm0, %v13259_v51, 0.0 }
 0x34a   :  { %v2646_v56 = vsel %vm312_vm0, %v13261_v7, 0.0 }
 0x34b   :  { %v13267_v8 = vld [vmem:[#allocation2 + $0x38] sm:$0xff] }
 0x34c   :  { %2647 = vadd.xlane.f32.xlu1 %v2646_v56  ;;  %2644 = vadd.xlane.f32.xlu0 %v2643_v55  ;;  %v2649_v59 = vsel %vm312_vm0, %v13267_v8, 0.0 }
 0x350   :  { %2650 = vadd.xlane.f32.xlu0 %v2649_v59 }
 0x3cd   :  { %v2630_v5 = vpop.xlane.xlu0 %2629 }
 0x3ce   :  { %v13271_v60 = vmul.f32 0.03125, %v2630_v5 }
 0x3cf   :  { %v2633_v9 = vpop.xlane.xlu1 %2632 }
 0x3d0   :  { %v2661_v10 = vsub.f32 %v13234_v52, %v13271_v60  ;;  %v13275_v14 = vmul.f32 0.03125, %v2633_v9 }
 0x3d1   :  { %v2636_v62 = vpop.xlane.xlu0 %2635 }
 0x3d2   :  { %v2662_v11 = vsub.f32 %v13240_v57, %v13275_v14  ;;  %v13279_v15 = vmul.f32 0.03125, %v2636_v62  ;;  %v2669_v12 = vmul.f32 %v2661_v10, %v2661_v10  ;;  %v2613_v62 = vld [vmem:[#allocation8 + $0x8] sm:$0xff] }
 0x3d4   :  { %v2663_v16 = vsub.f32 %v13242_v58, %v13279_v15  ;;  %v2677_v13 = vsel %vm312_vm0, %v2669_v12, 0.0  ;;  %v2670_v17 = vmul.f32 %v2662_v11, %v2662_v11  ;;  %v2614_v12 = vld [vmem:[#allocation8 + $0x10] sm:$0xff] }
 0x3d5   :  { %v2639_v18 = vpop.xlane.xlu0 %2638  ;;  %2678 = vadd.xlane.f32.xlu1 %v2677_v13  ;;  %v2642_v19 = vpop.xlane.xlu1 %2641 }
 0x3d6   :  { %v13284_v22 = vmul.f32 0.03125, %v2639_v18  ;;  %v13286_v20 = vmul.f32 0.03125, %v2642_v19  ;;  %v2680_v23 = vsel %vm312_vm0, %v2670_v17, 0.0  ;;  %v2671_v21 = vmul.f32 %v2663_v16, %v2663_v16  ;;  %v2612_v19 = vld [vmem:[#allocation8] sm:$0xff] }
 0x3d7   :  { %2681 = vadd.xlane.f32.xlu0 %v2680_v23  ;;  %v2616_v23 = vld [vmem:[#allocation8 + $0x20] sm:$0xff] }
 0x3d8   :  { %v2664_v24 = vsub.f32 %v13251_v3, %v13284_v22  ;;  %v2665_v25 = vsub.f32 %v13253_v4, %v13286_v20  ;;  %v2683_v26 = vsel %vm312_vm0, %v2671_v21, 0.0 }
 0x3d9   :  { %2684 = vadd.xlane.f32.xlu1 %v2683_v26  ;;  %v2648_v27 = vpop.xlane.xlu1 %2647  ;;  %v2645_v30 = vpop.xlane.xlu0 %2644 }
 0x3da   :  { %v13294_v28 = vmul.f32 0.03125, %v2648_v27  ;;  %v13296_v31 = vmul.f32 0.03125, %v2645_v30  ;;  %v2673_v29 = vmul.f32 %v2665_v25, %v2665_v25  ;;  %v2672_v32 = vmul.f32 %v2664_v24, %v2664_v24  ;;  %v2618_v30 = vld [vmem:[#allocation8 + $0x30] sm:$0xff] }
 0x3dc   :  { %v2667_v33 = vsub.f32 %v13261_v7, %v13294_v28  ;;  %v2666_v34 = vsub.f32 %v13259_v51, %v13296_v31  ;;  %v2689_v35 = vsel %vm312_vm0, %v2673_v29, 0.0  ;;  %v2686_v38 = vsel %vm312_vm0, %v2672_v32, 0.0  ;;  %v2615_v29 = vld [vmem:[#allocation8 + $0x18] sm:$0xff] }
 0x3dd   :  { %2690 = vadd.xlane.f32.xlu1 %v2689_v35  ;;  %2687 = vadd.xlane.f32.xlu0 %v2686_v38  ;;  %v2651_v36 = vpop.xlane.xlu0 %2650 }
 0x3de   :  { %v13304_v39 = vmul.f32 0.03125, %v2651_v36  ;;  %v2675_v37 = vmul.f32 %v2667_v33, %v2667_v33  ;;  %v2674_v40 = vmul.f32 %v2666_v34, %v2666_v34 }
 0x3e0   :  { %v2668_v41 = vsub.f32 %v13267_v8, %v13304_v39  ;;  %v2695_v42 = vsel %vm312_vm0, %v2675_v37, 0.0  ;;  %v2692_v43 = vsel %vm312_vm0, %v2674_v40, 0.0  ;;  %v2624_v37 = vld [vmem:[%s15173_s8 + $0x20] sm:$0xff]  ;;  %v2622_v40 = vld [vmem:[%s15173_s8 + $0x10] sm:$0xff] }
 0x3e1   :  { %2696 = vadd.xlane.f32.xlu1 %v2695_v42  ;;  %2693 = vadd.xlane.f32.xlu0 %v2692_v43 }
 0x3e2   :  { %v2676_v46 = vmul.f32 %v2668_v41, %v2668_v41 }
 0x3e4   :  { %v2698_v44 = vsel %vm312_vm0, %v2676_v46, 0.0 }
 0x3e5   :  { %2699 = vadd.xlane.f32.xlu0 %v2698_v44 }
 0x462   :  { %v2679_v45 = vpop.xlane.xlu1 %2678 }
 0x463   :  { %v2701_v49 = vmul.f32 0.03125, %v2679_v45  ;;  %v2620_v45 = vld [vmem:[%s15173_s8] sm:$0xff] }
 0x464   :  { %v2682_v48 = vpop.xlane.xlu0 %2681 }
 0x465   :  { %v2702_v50 = vmul.f32 0.03125, %v2682_v48  ;;  %v2709_v2 = vadd.f32 1e-05, %v2701_v49 }
 0x466   :  { %v2685_v54 = vpop.xlane.xlu1 %2684 }
 0x467   :  { %v2710_v53 = vadd.f32 1e-05, %v2702_v50  ;;  %v2703_v61 = vmul.f32 0.03125, %v2685_v54 }
 0x469   :  { %11924 = vrsqrt.f32 %v2710_v53  ;;  %v2711_v63 = vadd.f32 1e-05, %v2703_v61 }
 0x46a   :  { %v2691_v0 = vpop.xlane.xlu1 %2690  ;;  %v2688_v6 = vpop.xlane.xlu0 %2687 }
 0x46b   :  { %11926 = vrsqrt.f32 %v2711_v63  ;;  %v2705_v1 = vmul.f32 0.03125, %v2691_v0  ;;  %v2704_v56 = vmul.f32 0.03125, %v2688_v6  ;;  %v11674_v0 = vld [vmem:[#allocation10] sm:$0xff]  }
 0x46c   :  { %11928 = vrsqrt.f32 %v2709_v2  ;;  %v2621_v2 = vld [vmem:[%s15173_s8 + $0x8] sm:$0xff]  ;;  %10955 = vmatprep.subr.bf16.mxu0 %v11674_v0 }
 0x46d   :  { %v2713_v55 = vadd.f32 1e-05, %v2705_v1  ;;  %v2712_v59 = vadd.f32 1e-05, %v2704_v56  ;;  %10956 = vmatpush3.bf16.msra.mxu0 %v11674_v0  ;;  %v2619_v1 = vld [vmem:[#allocation8 + $0x38] sm:$0xff]  ;;  %v2617_v56 = vld [vmem:[#allocation8 + $0x28] sm:$0xff] }
 0x46e   :  { %v2697_v5 = vpop.xlane.xlu1 %2696  ;;  %v2694_v21 = vpop.xlane.xlu0 %2693 }
 0x46f   :  { %11930 = vrsqrt.f32 %v2713_v55  ;;  %v2707_v9 = vmul.f32 0.03125, %v2697_v5  ;;  %v2706_v41 = vmul.f32 0.03125, %v2694_v21  ;;  %v11675_v55 = vld [vmem:[#allocation10 + $0x8] sm:$0xff]  }
 0x470   :  { %11932 = vrsqrt.f32 %v2712_v59  ;;  %10957 = vmatprep.subr.bf16.mxu0 %v11675_v55 }
 0x471   :  { %v2715_v10 = vadd.f32 1e-05, %v2707_v9  ;;  %v2714_v48 = vadd.f32 1e-05, %v2706_v41  ;;  %10958 = vmatpush3.bf16.msra.mxu0 %v11675_v55  ;;  %v2625_v9 = vld [vmem:[%s15173_s8 + $0x28] sm:$0xff] }
 0x472   :  { %v2700_v33 = vpop.xlane.xlu0 %2699 }
 0x473   :  { %v11925_v11 = vpop.eup %11924  ;;  %11934 = vrsqrt.f32 %v2715_v10  ;;  %v2708_v42 = vmul.f32 0.03125, %v2700_v33 }
 0x474   :  { %v2726_v16 = vmul.f32 %v11925_v11, %v2613_v62  ;;  %11936 = vrsqrt.f32 %v2714_v48  ;;  %v2627_v11 = vld [vmem:[%s15173_s8 + $0x38] sm:$0xff] }
 0x475   :  { %v11927_v13 = vpop.eup %11926  ;;  %v2716_v49 = vadd.f32 1e-05, %v2708_v42 }
 0x476   :  { %2756 = vperm.xlu0 %11607, %v2726_v16   ;;  %v2727_v17 = vmul.f32 %v11927_v13, %v2614_v12  ;;  %v11929_v18 = vpop.eup %11928  ;;  %v2734_v61 = vmul.f32 %v2726_v16, %v13275_v14 }
 0x477   :  { %v2725_v25 = vmul.f32 %v11929_v18, %v2612_v19  ;;  %11938 = vrsqrt.f32 %v2716_v49 }
 0x478   :  { %2761 = vperm.xlu1 %11606, %v2727_v17   ;;  %v2735_v36 = vmul.f32 %v2727_v17, %v13279_v15  ;;  %v2626_v15 = vld [vmem:[%s15173_s8 + $0x30] sm:$0xff]  ;;  %v2742_v63 = vsub.f32 %v2621_v2, %v2734_v61 }
 0x479   :  { %v11931_v24 = vpop.eup %11930 }
 0x47a   :  { %v2729_v26 = vmul.f32 %v11931_v24, %v2616_v23  ;;  %v11933_v27 = vpop.eup %11932  ;;  %v2743_v46 = vsub.f32 %v2622_v40, %v2735_v36 }
 0x47b   :  { %v2728_v35 = vmul.f32 %v11933_v27, %v2615_v29 }
 0x47c   :  { %2751 = vperm.xlu1 %11606, %v2725_v25   ;;  %v2737_v38 = vmul.f32 %v2729_v26, %v13286_v20  ;;  %v2733_v20 = vmul.f32 %v2725_v25, %v13271_v60  ;;  %v2623_v60 = vld [vmem:[%s15173_s8 + $0x18] sm:$0xff]  ;;  %s12328_s8 = smov 127  }
 0x47d   :  { %v11935_v32 = vpop.eup %11934  ;;  %v2736_v53 = vmul.f32 %v2728_v35, %v13284_v22 }
 0x47e   :  { %v2731_v34 = vmul.f32 %v11935_v32, %v2618_v30  ;;  %v2745_v43 = vsub.f32 %v2624_v37, %v2737_v38  ;;  %v2741_v54 = vsub.f32 %v2620_v45, %v2733_v20  ;;  %v11937_v22 = vpop.eup %11936 }
 0x47f   :  { %v2730_v5 = vmul.f32 %v11937_v22, %v2617_v56 }
 0x480   :  { %2781 = vperm.xlu0 %11607, %v2731_v34   ;;  %2766 = vperm.xlu1 %11606, %v2728_v35   ;;  %v2739_v44 = vmul.f32 %v2731_v34, %v13294_v28  ;;  %v2744_v28 = vsub.f32 %v2623_v60, %v2736_v53 }
 0x481   :  { %v11939_v6 = vpop.eup %11938  ;;  %v2738_v14 = vmul.f32 %v2730_v5, %v13296_v31 }
 0x482   :  { %v2747_v50 = vsub.f32 %v2626_v15, %v2739_v44  ;;  %v2732_v59 = vmul.f32 %v11939_v6, %v2619_v1 }
 0x483   :  { %v2746_v10 = vsub.f32 %v2625_v9, %v2738_v14  ;;  %v10106_v14 = vld [vmem:[#allocation14 + $0x3] ss:$0 sm:$0xff]  ;;  %v10108_v9 = vld [vmem:[#allocation14 + $0x5] ss:$0 sm:$0xff] }
 0x484   :  { %2819 = vperm.xlu0 %11607, %v2745_v43   ;;  %2809 = vperm.xlu1 %11606, %v2743_v46   ;;  %v2740_v62 = vmul.f32 %v2732_v59, %v13304_v39 }
 0x486   :  { %v2748_v12 = vsub.f32 %v2627_v11, %v2740_v62 }
 0x488   :  { %2829 = vperm.xlu0 %11607, %v2747_v50   ;;  %2799 = vperm.xlu1 %11606, %v2741_v54  }
 0x48c   :  { %2814 = vperm.xlu1 %11606, %v2744_v28  }
 0x490   :  { %2804 = vperm.xlu1 %11606, %v2742_v63  }
 0x494   :  { %2771 = vperm.xlu1 %11606, %v2729_v26  }
 0x498   :  { %2786 = vperm.xlu1 %11606, %v2732_v59  }
 0x49c   :  { %2776 = vperm.xlu1 %11606, %v2730_v5  }
 0x4a0   :  { %2824 = vperm.xlu1 %11606, %v2746_v10  }
 0x4a4   :  { %2834 = vperm.xlu1 %11606, %v2748_v12  }
 0x4f5   :  { %v2757_v21 = vpop.permute.xlu0 %2756 }
 0x4f6   :  { %v2790_v30 = vmul.f32 %v2757_v21, %v13240_v57 }
 0x4f7   :  { %v2762_v16 = vpop.permute.xlu1 %2761 }
 0x4f8   :  { %v2791_v24 = vmul.f32 %v2762_v16, %v13242_v58  ;;  %v10107_v16 = vld [vmem:[#allocation14 + $0x4] ss:$0 sm:$0xff] }
 0x4fb   :  { %v2752_v13 = vpop.permute.xlu1 %2751 }
 0x4fc   :  { %v2789_v19 = vmul.f32 %v2752_v13, %v13234_v52  ;;  %v10104_v13 = vld [vmem:[#allocation14 + $0x1] ss:$0 sm:$0xff] }
 0x4ff   :  { %v2767_v17 = vpop.permute.xlu1 %2766  ;;  %v2782_v35 = vpop.permute.xlu0 %2781 }
 0x500   :  { %v2792_v23 = vmul.f32 %v2767_v17, %v13251_v3  ;;  %v2795_v45 = vmul.f32 %v2782_v35, %v13261_v7  ;;  %v10105_v17 = vld [vmem:[#allocation14 + $0x2] ss:$0 sm:$0xff] }
 0x503   :  { %v2810_v18 = vpop.permute.xlu1 %2809  ;;  %v2820_v43 = vpop.permute.xlu0 %2819 }
 0x504   :  { %v2839_v27 = vadd.f32 %v2810_v18, %v2791_v24 }
 0x506   :  { %v2855_v38 = vmul.f32 0.2, %v2839_v27  ;;  %vm2847_vm5 = vcmp.ge.f32.partialorder %v2839_v27, 0.0 }
 0x507   :  { %v2800_v31 = vpop.permute.xlu1 %2799  ;;  %v2830_v15 = vpop.permute.xlu0 %2829 }
 0x508   :  { %v2837_v25 = vadd.f32 %v2800_v31, %v2789_v19  ;;  %v2863_v40 = vsel %vm2847_vm5, %v2839_v27, %v2855_v38  ;;  %v2843_v50 = vadd.f32 %v2830_v15, %v2795_v45 }
 0x50a   :  { %v2853_v33 = vmul.f32 0.2, %v2837_v25  ;;  %vm2845_vm4 = vcmp.ge.f32.partialorder %v2837_v25, 0.0  ;;  %vm2851_vm9 = vcmp.ge.f32.partialorder %v2843_v50, 0.0 }
 0x50b   :  { %v2815_v39 = vpop.permute.xlu1 %2814 }
 0x50c   :  { %v2840_v26 = vadd.f32 %v2815_v39, %v2792_v23  ;;  %v2861_v58 = vsel %vm2845_vm4, %v2837_v25, %v2853_v33 }
 0x50e   :  { %v2856_v29 = vmul.f32 0.2, %v2840_v26  ;;  %vm2848_vm3 = vcmp.ge.f32.partialorder %v2840_v26, 0.0 }
 0x50f   :  { %v2805_v32 = vpop.permute.xlu1 %2804 }
 0x510   :  { %v2838_v34 = vadd.f32 %v2805_v32, %v2790_v30  ;;  %v2864_v3 = vsel %vm2848_vm3, %v2840_v26, %v2856_v29 }
 0x511   :  { %v2870_v42 = vpack.c.bf16 %v2864_v3, %v2863_v40 }
 0x512   :  { %vm2846_vm6 = vcmp.ge.f32.partialorder %v2838_v34, 0.0  ;;  %v2854_v52 = vmul.f32 0.2, %v2838_v34 }
 0x513   :  { %v2772_v36 = vpop.permute.xlu1 %2771 }
 0x514   :  { %v2862_v37 = vsel %vm2846_vm6, %v2838_v34, %v2854_v52  ;;  %v2793_v46 = vmul.f32 %v2772_v36, %v13253_v4  ;;  %v2859_v4 = vmul.f32 0.2, %v2843_v50 }
 0x515   :  { %v2869_v41 = vpack.c.bf16 %v2862_v37, %v2861_v58 }
 0x516   :  { %v2841_v20 = vadd.f32 %v2820_v43, %v2793_v46  ;;  %v11676_v46 = vld [vmem:[#allocation11 + $0x70] sm:$0xff]  }
 0x517   :  { %v2787_v57 = vpop.permute.xlu1 %2786  ;;  %10959 = vmatprep.mubr.msk.bf16.mxu0 %vm312_vm0, %v2869_v41  ;;  %10975 = vmatprep.mubr.msk.bf16.mxu1 %vm3236_vm13, %v11676_v46 }
 0x518   :  { %10960 = vmatmul.mubr.msk.bf16.vlgmr.msra.gmra.mrb[68].mxu0 %vm312_vm0, %v2870_v42  ;;  %v2857_v54 = vmul.f32 0.2, %v2841_v20  ;;  %vm2849_vm7 = vcmp.ge.f32.partialorder %v2841_v20, 0.0  ;;  %v2796_v60 = vmul.f32 %v2787_v57, %v13267_v8  ;;  %v12321_v8 = vmov 0.0  }
 0x519   :  { %242 = vst.msk [vmem:[#allocation3 + $0x10] sm:$0xff] %vm239_vm11, %v12321_v8  ;;  %240 = vst.msk [vmem:[#allocation3] sm:$0xff] %vm239_vm11, %v12321_v8 }
 0x51a   :  { %v2865_v2 = vsel %vm2849_vm7, %v2841_v20, %v2857_v54  ;;  %241 = vst.msk [vmem:[#allocation3 + $0x8] sm:$0xff] %vm239_vm11, %v12321_v8  ;;  %243 = vst.msk [vmem:[#allocation3 + $0x18] sm:$0xff] %vm239_vm11, %v12321_v8  ;;  %v11677_v20 = vld [vmem:[#allocation11 + $0x40] sm:$0xff]  }
 0x51b   :  { %v2777_v44 = vpop.permute.xlu1 %2776  ;;  %244 = vst.msk [vmem:[#allocation3 + $0x20] sm:$0xff] %vm239_vm11, %v12321_v8  ;;  %245 = vst.msk [vmem:[#allocation3 + $0x28] sm:$0xff] %vm239_vm11, %v12321_v8 }
 0x51c   :  { %v2794_v48 = vmul.f32 %v2777_v44, %v13259_v51  ;;  %v2867_v51 = vsel %vm2851_vm9, %v2843_v50, %v2859_v4  ;;  %246 = vst.msk [vmem:[#allocation3 + $0x30] sm:$0xff] %vm239_vm11, %v12321_v8  ;;  %247 = vst.msk [vmem:[#allocation3 + $0x38] sm:$0xff] %vm239_vm11, %v12321_v8 }
 0x51d   :  { %248 = vst [vmem:[#allocation4] sm:$0xff] %v12321_v8  ;;  %251 = vst [vmem:[#allocation4 + $0x10] sm:$0xff] %v12321_v8 }
 0x51e   :  { %253 = vst [vmem:[#allocation4 + $0x20] sm:$0xff] %v12321_v8  ;;  %255 = vst [vmem:[#allocation4 + $0x30] sm:$0xff] %v12321_v8 }
 0x51f   :  { %v2825_v49 = vpop.permute.xlu1 %2824  ;;  %257 = vst [vmem:[#allocation5] sm:$0xff] %v12321_v8  ;;  %263 = vst [vmem:[#allocation5 + $0x28] sm:$0xff] %v12321_v8 }
 0x520   :  { %v2842_v53 = vadd.f32 %v2825_v49, %v2794_v48 }
 0x522   :  { %vm2850_vm8 = vcmp.ge.f32.partialorder %v2842_v53, 0.0  ;;  %v2858_v28 = vmul.f32 0.2, %v2842_v53 }
 0x523   :  { %v2835_v61 = vpop.permute.xlu1 %2834 }
 0x524   :  { %v2866_v63 = vsel %vm2850_vm8, %v2842_v53, %v2858_v28  ;;  %v2844_v0 = vadd.f32 %v2835_v61, %v2796_v60 }
 0x525   :  { %v2871_v22 = vpack.c.bf16 %v2866_v63, %v2865_v2 }
 0x526   :  { %vm2852_vm10 = vcmp.ge.f32.partialorder %v2844_v0, 0.0  ;;  %v2860_v7 = vmul.f32 0.2, %v2844_v0 }
 0x527   :  { %10963 = vmatprep.mubr.msk.bf16.mxu0 %vm312_vm0, %v2871_v22 }
 0x528   :  { %v2868_v6 = vsel %vm2852_vm10, %v2844_v0, %v2860_v7 }
 0x529   :  { %v2872_v1 = vpack.c.bf16 %v2868_v6, %v2867_v51 }
 0x52b   :  { %10964 = vmatmul.mubr.msk.bf16.gmra.mrb[72].mxu0 %vm312_vm0, %v2872_v1 }
 0x52c   :  { %11023 = vmatprep.mubr.msk.bf16.mxu0 %vm3236_vm13, %v11677_v20 }
 0x5eb   :  { %v10961_v56 = vpop.f32.mrb[68].mxu0 }
 0x5ec   :  { %2978 = vrot.lane.b32.xlu0 %v10961_v56, %s12322_s5  ;;  %v2935_v55 = vpop.f32.mrb[69].mxu0 }
 0x5ed   :  { %v10962_v59 = vpop.f32.mrb[70].mxu0 }
 0x5ee   :  { %2980 = vrot.lane.b32.xlu1 %v10962_v59, %s12322_s5  ;;  %v2938_v5 = vpop.f32.mrb[71].mxu0 }
 0x5f0   :  { %2974 = vrot.lane.b32.xlu0 %v2935_v55, %s12322_s5 }
 0x5f2   :  { %2976 = vrot.lane.b32.xlu1 %v2938_v5, %s12322_s5 }
 0x5f4   :  { %3080 = vrot.lane.b32.xlu0 %v10106_v14, %s12294_s0  ;;  %s12324_s0 = smov 122  }
 0x5f6   :  { %3122 = vrot.lane.b32.xlu1 %v10108_v9, %s12308_s6  ;;  %s12325_s6 = smov 124  }
 0x5fe   :  { %v10965_v10 = vpop.f32.mrb[72].mxu0 }
 0x5ff   :  { %v2951_v62 = vpop.f32.mrb[73].mxu0 }
 0x600   :  { %2982 = vrot.lane.b32.xlu0 %v2951_v62, %s12322_s5  ;;  %v10966_v11 = vpop.f32.mrb[74].mxu0 }
 0x601   :  { %v2954_v12 = vpop.f32.mrb[75].mxu0 }
 0x602   :  { %2984 = vrot.lane.b32.xlu1 %v2954_v12, %s12322_s5 }
 0x604   :  { %2986 = vrot.lane.b32.xlu0 %v10965_v10, %s12322_s5 }
 0x606   :  { %2988 = vrot.lane.b32.xlu1 %v10966_v11, %s12322_s5 }
 0x608   :  { %3101 = vrot.lane.b32.xlu0 %v10107_v16, %s12322_s5 }
 0x60a   :  { %3038 = vrot.lane.b32.xlu1 %v10104_v13, %s12323_s25  ;;  %v10110_v13 = vld [vmem:[#allocation14 + $0x7] ss:$0 sm:$0xff] }
 0x60c   :  { %3059 = vrot.lane.b32.xlu0 %v10105_v17, %s12305_s29 }
 0x65e   :  { %v2979_v18 = vpop.permute.xlu0 %2978 }
 0x65f   :  { %3001 = vst.msk [vmem:[#allocation3 + $0x10] sm:$0xff] %vm2998_vm12, %v2979_v18 }
 0x660   :  { %v2981_v31 = vpop.permute.xlu1 %2980 }
 0x661   :  { %3002 = vst.msk [vmem:[#allocation3 + $0x18] sm:$0xff] %vm2998_vm12, %v2981_v31 }
 0x662   :  { %v2975_v19 = vpop.permute.xlu0 %2974 }
 0x663   :  { %2999 = vst.msk [vmem:[#allocation3] sm:$0xff] %vm2998_vm12, %v2975_v19 }
 0x664   :  { %v2977_v23 = vpop.permute.xlu1 %2976 }
 0x665   :  { %3000 = vst.msk [vmem:[#allocation3 + $0x8] sm:$0xff] %vm2998_vm12, %v2977_v23 }
 0x666   :  { %v3081_v39 = vpop.permute.xlu0 %3080  ;;  %v13389_v33 = vld [vmem:[#allocation3 + $0x10] sm:$0xff] }
 0x667   :  { %v3085_v36 = vmul.f32 %v3081_v39, %v13389_v33 }
 0x668   :  { %v3123_v24 = vpop.permute.xlu1 %3122  ;;  %v13383_v26 = vld [vmem:[#allocation3 + $0x18] sm:$0xff] }
 0x669   :  { %v3127_v34 = vmul.f32 %v3123_v24, %v13389_v33  ;;  %v3128_v52 = vmul.f32 %v3123_v24, %v13383_v26  ;;  %v3086_v3 = vmul.f32 %v3081_v39, %v13383_v26 }
 0x66a   :  { %v13379_v21 = vld [vmem:[#allocation3] sm:$0xff] }
 0x66b   :  { %v3125_v27 = vmul.f32 %v3123_v24, %v13379_v21  ;;  %v3083_v29 = vmul.f32 %v3081_v39, %v13379_v21  ;;  %v3134_v37 = vpack.c.bf16 %v3128_v52, %v3127_v34  ;;  %v3092_v40 = vpack.c.bf16 %v3086_v3, %v3085_v36  ;;  %v10111_v52 = vld [vmem:[#allocation14 + $0x8] ss:$0 sm:$0xff] }
 0x66c   :  { %v13381_v25 = vld [vmem:[#allocation3 + $0x8] sm:$0xff] }
 0x66d   :  { %v3126_v30 = vmul.f32 %v3123_v24, %v13381_v25  ;;  %v3084_v32 = vmul.f32 %v3081_v39, %v13381_v25 }
 0x66f   :  { %v3133_v35 = vpack.c.bf16 %v3126_v30, %v3125_v27  ;;  %v3091_v38 = vpack.c.bf16 %v3084_v32, %v3083_v29  ;;  %v10109_v32 = vld [vmem:[#allocation14 + $0x6] ss:$0 sm:$0xff] }
 0x671   :  { %3561 = vrot.lane.b32.xlu0 %v3133_v35, %s12324_s0  ;;  %3224 = vrot.lane.b32.xlu1 %v3091_v38, %s12325_s6 }
 0x672   :  { %v2983_v58 = vpop.permute.xlu0 %2982 }
 0x673   :  { %3003 = vst.msk [vmem:[#allocation3 + $0x20] sm:$0xff] %vm2998_vm12, %v2983_v58 }
 0x674   :  { %v2985_v41 = vpop.permute.xlu1 %2984 }
 0x675   :  { %3004 = vst.msk [vmem:[#allocation3 + $0x28] sm:$0xff] %vm2998_vm12, %v2985_v41  ;;  %3563 = vrot.lane.b32.xlu0 %v3134_v37, %s12324_s0  ;;  %3226 = vrot.lane.b32.xlu1 %v3092_v40, %s12325_s6 }
 0x676   :  { %v2987_v42 = vpop.permute.xlu0 %2986 }
 0x677   :  { %3005 = vst.msk [vmem:[#allocation3 + $0x30] sm:$0xff] %vm2998_vm12, %v2987_v42 }
 0x678   :  { %v2989_v43 = vpop.permute.xlu1 %2988 }
 0x679   :  { %3006 = vst.msk [vmem:[#allocation3 + $0x38] sm:$0xff] %vm2998_vm12, %v2989_v43 }
 0x67a   :  { %v13403_v57 = vld [vmem:[#allocation3 + $0x20] sm:$0xff]  ;;  %v3102_v54 = vpop.permute.xlu0 %3101 }
 0x67b   :  { %v3129_v15 = vmul.f32 %v3123_v24, %v13403_v57  ;;  %v3087_v48 = vmul.f32 %v3081_v39, %v13403_v57  ;;  %v3106_v0 = vmul.f32 %v3102_v54, %v13389_v33  ;;  %v3107_v22 = vmul.f32 %v3102_v54, %v13383_v26 }
 0x67c   :  { %v13405_v44 = vld [vmem:[#allocation3 + $0x28] sm:$0xff]  ;;  %v3104_v6 = vmul.f32 %v3102_v54, %v13379_v21  ;;  %v3105_v1 = vmul.f32 %v3102_v54, %v13381_v25  ;;  %v3039_v14 = vpop.permute.xlu1 %3038  ;;  %v3108_v10 = vmul.f32 %v3102_v54, %v13403_v57 }
 0x67d   :  { %v3130_v45 = vmul.f32 %v3123_v24, %v13405_v44  ;;  %v3088_v49 = vmul.f32 %v3081_v39, %v13405_v44  ;;  %v3113_v56 = vpack.c.bf16 %v3107_v22, %v3106_v0  ;;  %v3109_v5 = vmul.f32 %v3102_v54, %v13405_v44  ;;  %v11680_v22 = vld [vmem:[#allocation11 + $0x60] sm:$0xff]  }
 0x67e   :  { %v13412_v50 = vld [vmem:[#allocation3 + $0x30] sm:$0xff]  ;;  %v3112_v55 = vpack.c.bf16 %v3105_v1, %v3104_v6  ;;  %v3041_v12 = vmul.f32 %v3039_v14, %v13379_v21  ;;  %v3042_v16 = vmul.f32 %v3039_v14, %v13381_v25  ;;  %v3045_v17 = vmul.f32 %v3039_v14, %v13403_v57  ;;  %v3060_v30 = vpop.permute.xlu0 %3059 }
 0x67f   :  { %v3135_v53 = vpack.c.bf16 %v3130_v45, %v3129_v15  ;;  %v3093_v60 = vpack.c.bf16 %v3088_v49, %v3087_v48  ;;  %v3131_v61 = vmul.f32 %v3123_v24, %v13412_v50  ;;  %v3089_v2 = vmul.f32 %v3081_v39, %v13412_v50 }
 0x680   :  { %v13415_v28 = vld [vmem:[#allocation3 + $0x38] sm:$0xff]  ;;  %v3110_v9 = vmul.f32 %v3102_v54, %v13412_v50  ;;  %v3114_v11 = vpack.c.bf16 %v3109_v5, %v3108_v10  ;;  %v3049_v18 = vpack.c.bf16 %v3042_v16, %v3041_v12  ;;  %v3046_v31 = vmul.f32 %v3039_v14, %v13405_v44 }
 0x681   :  { %3565 = vrot.lane.b32.xlu0 %v3135_v53, %s12324_s0  ;;  %3228 = vrot.lane.b32.xlu1 %v3093_v60, %s12325_s6  ;;  %v3132_v4 = vmul.f32 %v3123_v24, %v13415_v28  ;;  %v3090_v63 = vmul.f32 %v3081_v39, %v13415_v28  ;;  %v3111_v59 = vmul.f32 %v3102_v54, %v13415_v28 }
 0x682   :  { %v3043_v19 = vmul.f32 %v3039_v14, %v13389_v33  ;;  %v3044_v23 = vmul.f32 %v3039_v14, %v13383_v26  ;;  %v3051_v24 = vpack.c.bf16 %v3046_v31, %v3045_v17  ;;  %v3048_v27 = vmul.f32 %v3039_v14, %v13415_v28  ;;  %v11682_v17 = vld [vmem:[#allocation11 + $0x58] sm:$0xff]  }
 0x683   :  { %v3136_v7 = vpack.c.bf16 %v3132_v4, %v3131_v61  ;;  %v3094_v51 = vpack.c.bf16 %v3090_v63, %v3089_v2  ;;  %v3115_v62 = vpack.c.bf16 %v3111_v59, %v3110_v9  ;;  %v3047_v29 = vmul.f32 %v3039_v14, %v13412_v50  ;;  %v11678_v4 = vld [vmem:[#allocation11 + $0x78] sm:$0xff]   ;;  %v11679_v2 = vld [vmem:[#allocation11 + $0x48] sm:$0xff]  }
 0x684   :  { %v3050_v39 = vpack.c.bf16 %v3044_v23, %v3043_v19  ;;  %v3062_v35 = vmul.f32 %v3060_v30, %v13379_v21  ;;  %v3063_v38 = vmul.f32 %v3060_v30, %v13381_v25  ;;  %v3066_v3 = vmul.f32 %v3060_v30, %v13403_v57 }
 0x685   :  { %3567 = vrot.lane.b32.xlu0 %v3136_v7, %s12324_s0  ;;  %3230 = vrot.lane.b32.xlu1 %v3094_v51, %s12325_s6  ;;  %v3052_v34 = vpack.c.bf16 %v3048_v27, %v3047_v29  ;;  %v3067_v58 = vmul.f32 %v3060_v30, %v13405_v44  ;;  %v3064_v37 = vmul.f32 %v3060_v30, %v13389_v33  ;;  %v11681_v7 = vld [vmem:[#allocation11 + $0x50] sm:$0xff]  }
 0x686   :  { %v3070_v36 = vpack.c.bf16 %v3063_v38, %v3062_v35  ;;  %v3065_v40 = vmul.f32 %v3060_v30, %v13383_v26  ;;  %v3069_v43 = vmul.f32 %v3060_v30, %v13415_v28  ;;  %v3068_v46 = vmul.f32 %v3060_v30, %v13412_v50 }
 0x687   :  { %v3072_v41 = vpack.c.bf16 %v3067_v58, %v3066_v3 }
 0x688   :  { %v3071_v42 = vpack.c.bf16 %v3065_v40, %v3064_v37  ;;  %v3073_v20 = vpack.c.bf16 %v3069_v43, %v3068_v46  ;;  %v10103_v46 = vld [vmem:[#allocation14] ss:$0 sm:$0xff] }
 0x689   :  { %3308 = vrot.lane.b32.xlu0 %v3113_v56, %s12326_s9  ;;  %3306 = vrot.lane.b32.xlu1 %v3112_v55, %s12326_s9 }
 0x68d   :  { %3312 = vrot.lane.b32.xlu0 %v3115_v62, %s12326_s9  ;;  %3310 = vrot.lane.b32.xlu1 %v3114_v11, %s12326_s9 }
 0x691   :  { %3164 = vrot.lane.b32.xlu0 %v10110_v13, %s12327_s2  ;;  %3392 = vrot.lane.b32.xlu1 %v3049_v18, %s12328_s8  ;;  %v11683_v18 = vld [vmem:[#allocation11 + $0x68] sm:$0xff]  }
 0x695   :  { %3396 = vrot.lane.b32.xlu0 %v3051_v24, %s12328_s8  ;;  %3394 = vrot.lane.b32.xlu1 %v3050_v39, %s12328_s8 }
 0x699   :  { %3143 = vrot.lane.b32.xlu0 %v10109_v32, %s12290_s30  ;;  %3398 = vrot.lane.b32.xlu1 %v3052_v34, %s12328_s8  ;;  %v11684_v32 = vld [vmem:[#allocation11 + $0xd0] sm:$0xff]   ;;  %v11685_v34 = vld [vmem:[#allocation11 + $0xe0] sm:$0xff]  }
 0x69d   :  { %3185 = vrot.lane.b32.xlu0 %v10111_v52, %s12309_s13  ;;  %3786 = vrot.lane.b32.xlu1 %v3070_v36, %s12329_s15 }
 0x6a1   :  { %3790 = vrot.lane.b32.xlu0 %v3072_v41, %s12329_s15  ;;  %3788 = vrot.lane.b32.xlu1 %v3071_v42, %s12329_s15 }
 0x6a5   :  { %3792 = vrot.lane.b32.xlu1 %v3073_v20, %s12329_s15 }
 0x6e3   :  { %v13460_v15 = vpop.permute.xlu0 %3561  ;;  %v13462_v45 = vpop.permute.xlu1 %3224 }
 0x6e4   :  { %10967 = vmatprep.subr.bf16.mxu1 %v13462_v45  ;;  %11015 = vmatprep.subr.bf16.mxu0 %v13460_v15 }
 0x6e5   :  { %10968 = vmatpush3.bf16.msra.mxu1 %v13462_v45  ;;  %11016 = vmatpush3.bf16.msra.mxu0 %v13460_v15 }
 0x6e7   :  { %v13468_v48 = vpop.permute.xlu0 %3563  ;;  %v13470_v49 = vpop.permute.xlu1 %3226 }
 0x6e8   :  { %10969 = vmatprep.subr.bf16.mxu1 %v13470_v49  ;;  %11017 = vmatprep.subr.bf16.mxu0 %v13468_v48 }
 0x6e9   :  { %10970 = vmatpush3.bf16.msra.mxu1 %v13470_v49  ;;  %11018 = vmatpush3.bf16.msra.mxu0 %v13468_v48 }
 0x6f3   :  { %v13476_v54 = vpop.permute.xlu0 %3565  ;;  %v13478_v53 = vpop.permute.xlu1 %3228 }
 0x6f4   :  { %10971 = vmatprep.subr.bf16.mxu1 %v13478_v53  ;;  %11019 = vmatprep.subr.bf16.mxu0 %v13476_v54 }
 0x6f5   :  { %10972 = vmatpush3.bf16.msra.mxu1 %v13478_v53  ;;  %11020 = vmatpush3.bf16.msra.mxu0 %v13476_v54 }
 0x6f7   :  { %v13484_v60 = vpop.permute.xlu0 %3567  ;;  %v13486_v61 = vpop.permute.xlu1 %3230 }
 0x6f8   :  { %10973 = vmatprep.subr.bf16.mxu1 %v13486_v61  ;;  %11021 = vmatprep.subr.bf16.mxu0 %v13484_v60 }
 0x6f9   :  { %10974 = vmatpush3.bf16.msra.mxu1 %v13486_v61  ;;  %11022 = vmatpush3.bf16.msra.mxu0 %v13484_v60 }
 0x6fb   :  { %v13492_v63 = vpop.permute.xlu0 %3308  ;;  %v13494_v0 = vpop.permute.xlu1 %3306 }
 0x6fc   :  { %10979 = vmatprep.subr.bf16.mxu1 %v13494_v0  ;;  %11027 = vmatprep.subr.bf16.mxu0 %v13494_v0 }
 0x6fd   :  { %10976 = vmatmul.mubr.msk.bf16.vlgmr.msra.gmra.mrb[60].mxu1 %vm3236_vm13, %v11678_v4  ;;  %11024 = vmatmul.mubr.msk.bf16.vlgmr.msra.gmra.mrb[76].mxu0 %vm3236_vm13, %v11679_v2  ;;  %v3021_v4 = vmul.f32 %v10103_v46, %v13381_v25 }
 0x6fe   :  { %10980 = vmatpush3.bf16.msra.mxu1 %v13494_v0  ;;  %11028 = vmatpush3.bf16.msra.mxu0 %v13494_v0 }
 0x6ff   :  { %10981 = vmatprep.subr.bf16.mxu1 %v13492_v63  ;;  %11029 = vmatprep.subr.bf16.mxu0 %v13492_v63  ;;  %v13504_v51 = vpop.permute.xlu0 %3312  ;;  %v13506_v6 = vpop.permute.xlu1 %3310 }
 0x700   :  { %11035 = vmatprep.mubr.msk.bf16.mxu0 %vm3236_vm13, %v11680_v22  ;;  %10987 = vmatprep.mubr.msk.bf16.mxu1 %vm3236_vm13, %v11681_v7 }
 0x702   :  { %10982 = vmatpush3.bf16.msra.mxu1 %v13492_v63  ;;  %11030 = vmatpush3.bf16.msra.mxu0 %v13492_v63 }
 0x703   :  { %10983 = vmatprep.subr.bf16.mxu1 %v13506_v6  ;;  %11031 = vmatprep.subr.bf16.mxu0 %v13506_v6  ;;  %v3165_v1 = vpop.permute.xlu0 %3164  ;;  %v3393_v62 = vpop.permute.xlu1 %3392 }
 0x704   :  { %v3167_v56 = vmul.f32 %v3165_v1, %v13379_v21  ;;  %v3168_v55 = vmul.f32 %v3165_v1, %v13381_v25  ;;  %v3169_v59 = vmul.f32 %v3165_v1, %v13389_v33  ;;  %v3170_v5 = vmul.f32 %v3165_v1, %v13383_v26 }
 0x705   :  { %v3171_v14 = vmul.f32 %v3165_v1, %v13403_v57  ;;  %v3172_v9 = vmul.f32 %v3165_v1, %v13405_v44  ;;  %v3173_v10 = vmul.f32 %v3165_v1, %v13412_v50  ;;  %v3174_v16 = vmul.f32 %v3165_v1, %v13415_v28 }
 0x706   :  { %10984 = vmatpush3.bf16.msra.mxu1 %v13506_v6  ;;  %11032 = vmatpush3.bf16.msra.mxu0 %v13506_v6  ;;  %v3175_v11 = vpack.c.bf16 %v3168_v55, %v3167_v56  ;;  %v3176_v12 = vpack.c.bf16 %v3170_v5, %v3169_v59  ;;  %v3020_v55 = vmul.f32 %v10103_v46, %v13379_v21 }
 0x707   :  { %10985 = vmatprep.subr.bf16.mxu1 %v13504_v51  ;;  %11033 = vmatprep.subr.bf16.mxu0 %v13504_v51  ;;  %v3397_v13 = vpop.permute.xlu0 %3396  ;;  %v3177_v31 = vpack.c.bf16 %v3172_v9, %v3171_v14  ;;  %v3178_v19 = vpack.c.bf16 %v3174_v16, %v3173_v10  ;;  %v3395_v24 = vpop.permute.xlu1 %3394  ;;  %v11686_v14 = vld [vmem:[#allocation11 + $0xd8] sm:$0xff]   ;;  %v11687_v9 = vld [vmem:[#allocation11 + $0xe8] sm:$0xff]   ;;  %v3023_v10 = vmul.f32 %v10103_v46, %v13383_v26  ;;  %v11688_v16 = vld [vmem:[#allocation11 + $0xf0] sm:$0xff]  }
 0x708   :  { %4016 = vrot.lane.b32.xlu0 %v3175_v11, %s12330_s21  ;;  %4018 = vrot.lane.b32.xlu1 %v3176_v12, %s12330_s21 }
 0x70a   :  { %10986 = vmatpush3.bf16.msra.mxu1 %v13504_v51  ;;  %11034 = vmatpush3.bf16.msra.mxu0 %v13504_v51 }
 0x70b   :  { %10991 = vmatprep.subr.bf16.mxu1 %v3393_v62  ;;  %11039 = vmatprep.subr.bf16.mxu0 %v3393_v62  ;;  %v3144_v23 = vpop.permute.xlu0 %3143  ;;  %v3399_v40 = vpop.permute.xlu1 %3398 }
 0x70c   :  { %4020 = vrot.lane.b32.xlu0 %v3177_v31, %s12330_s21  ;;  %4022 = vrot.lane.b32.xlu1 %v3178_v19, %s12330_s21  ;;  %v3146_v39 = vmul.f32 %v3144_v23, %v13379_v21  ;;  %v3147_v27 = vmul.f32 %v3144_v23, %v13381_v25  ;;  %v3148_v30 = vmul.f32 %v3144_v23, %v13389_v33 }
 0x70d   :  { %10988 = vmatmul.mubr.msk.bf16.vlgmr.msra.gmra.mrb[60].mxu1 %vm3236_vm13, %v11682_v17  ;;  %11036 = vmatmul.mubr.msk.bf16.vlgmr.msra.gmra.mrb[76].mxu0 %vm3236_vm13, %v11683_v18  ;;  %v3149_v29 = vmul.f32 %v3144_v23, %v13383_v26  ;;  %v3150_v58 = vmul.f32 %v3144_v23, %v13403_v57  ;;  %v3151_v37 = vmul.f32 %v3144_v23, %v13405_v44  ;;  %v11690_v17 = vld [vmem:[#allocation11 + $0xc0] sm:$0xff]  }
 0x70e   :  { %10992 = vmatpush3.bf16.msra.mxu1 %v3393_v62  ;;  %11040 = vmatpush3.bf16.msra.mxu0 %v3393_v62  ;;  %v3154_v35 = vpack.c.bf16 %v3147_v27, %v3146_v39  ;;  %v3152_v2 = vmul.f32 %v3144_v23, %v13412_v50  ;;  %v3153_v22 = vmul.f32 %v3144_v23, %v13415_v28 }
 0x70f   :  { %10993 = vmatprep.subr.bf16.mxu1 %v3395_v24  ;;  %11041 = vmatprep.subr.bf16.mxu0 %v3395_v24  ;;  %v3186_v38 = vpop.permute.xlu0 %3185  ;;  %v3155_v36 = vpack.c.bf16 %v3149_v29, %v3148_v30  ;;  %v3156_v20 = vpack.c.bf16 %v3151_v37, %v3150_v58  ;;  %v3787_v59 = vpop.permute.xlu1 %3786  ;;  %v3027_v23 = vmul.f32 %v10103_v46, %v13415_v28  ;;  %v11691_v30 = vld [vmem:[#allocation11 + $0xc8] sm:$0xff]   ;;  %v11693_v29 = vld [vmem:[#allocation11 + $0x80] sm:$0xff]  }
 0x710   :  { %4106 = vrot.lane.b32.xlu0 %v3154_v35, %s12331_s22  ;;  %v3188_v52 = vmul.f32 %v3186_v38, %v13379_v21  ;;  %v3189_v3 = vmul.f32 %v3186_v38, %v13381_v25  ;;  %10999 = vmatprep.mubr.msk.bf16.mxu1 %vm3236_vm13, %v11684_v32  ;;  %v3190_v42 = vmul.f32 %v3186_v38, %v13389_v33  ;;  %v11703_v35 = vld [vmem:[#allocation11 + $0x28] sm:$0xff]  }
 0x711   :  { %11047 = vmatprep.mubr.msk.bf16.mxu0 %vm3236_vm13, %v11685_v34  ;;  %v3191_v43 = vmul.f32 %v3186_v38, %v13383_v26  ;;  %v3192_v1 = vmul.f32 %v3186_v38, %v13403_v57  ;;  %v3193_v56 = vmul.f32 %v3186_v38, %v13405_v44  ;;  %v3028_v25 = vpack.c.bf16 %v3021_v4, %v3020_v55  ;;  %v11702_v34 = vld [vmem:[#allocation11 + $0x18] sm:$0xff]  }
 0x712   :  { %10994 = vmatpush3.bf16.msra.mxu1 %v3395_v24  ;;  %11042 = vmatpush3.bf16.msra.mxu0 %v3395_v24  ;;  %v3196_v41 = vpack.c.bf16 %v3189_v3, %v3188_v52  ;;  %v3157_v5 = vpack.c.bf16 %v3153_v22, %v3152_v2  ;;  %v3194_v11 = vmul.f32 %v3186_v38, %v13412_v50  ;;  %v11704_v3 = vld [vmem:[#allocation11 + $0x30] sm:$0xff]  }
 0x713   :  { %10995 = vmatprep.subr.bf16.mxu1 %v3397_v13  ;;  %11043 = vmatprep.subr.bf16.mxu0 %v3397_v13  ;;  %v3197_v7 = vpack.c.bf16 %v3191_v43, %v3190_v42  ;;  %v3198_v62 = vpack.c.bf16 %v3193_v56, %v3192_v1  ;;  %v3195_v12 = vmul.f32 %v3186_v38, %v13415_v28  ;;  %v3789_v18 = vpop.permute.xlu1 %3788  ;;  %v3791_v24 = vpop.permute.xlu0 %3790  ;;  %v11692_v28 = vld [vmem:[#allocation11 + $0xb0] sm:$0xff]   ;;  %v11706_v42 = vld [vmem:[#allocation11 + $0x38] sm:$0xff]   ;;  %v11707_v43 = vld [vmem:[#allocation11 + $0x8] sm:$0xff]  }
 0x714   :  { %4108 = vrot.lane.b32.xlu0 %v3155_v36, %s12331_s22  ;;  %4409 = vrot.lane.b32.xlu1 %v3196_v41, %s12332_s1  ;;  %v3022_v21 = vmul.f32 %v10103_v46, %v13389_v33  ;;  %v3024_v33 = vmul.f32 %v10103_v46, %v13403_v57  ;;  %v11689_v57 = vld [vmem:[#allocation11 + $0xf8] sm:$0xff]   ;;  %v11705_v36 = vld [vmem:[#allocation11] sm:$0xff]  }
 0x715   :  { %v3199_v31 = vpack.c.bf16 %v3195_v12, %v3194_v11 }
 0x716   :  { %10996 = vmatpush3.bf16.msra.mxu1 %v3397_v13  ;;  %11044 = vmatpush3.bf16.msra.mxu0 %v3397_v13  ;;  %v3029_v26 = vpack.c.bf16 %v3023_v10, %v3022_v21  ;;  %v3025_v13 = vmul.f32 %v10103_v46, %v13405_v44  ;;  %v3026_v44 = vmul.f32 %v10103_v46, %v13412_v50  ;;  %v11694_v50 = vld [vmem:[#allocation11 + $0xb8] sm:$0xff]  }
 0x717   :  { %10997 = vmatprep.subr.bf16.mxu1 %v3399_v40  ;;  %11045 = vmatprep.subr.bf16.mxu0 %v3399_v40  ;;  %v3793_v27 = vpop.permute.xlu1 %3792 }
 0x718   :  { %4110 = vrot.lane.b32.xlu0 %v3156_v20, %s12331_s22  ;;  %4411 = vrot.lane.b32.xlu1 %v3197_v7, %s12332_s1  ;;  %v3030_v19 = vpack.c.bf16 %v3025_v13, %v3024_v33  ;;  %v3031_v39 = vpack.c.bf16 %v3027_v23, %v3026_v44 }
 0x71a   :  { %10998 = vmatpush3.bf16.msra.mxu1 %v3399_v40  ;;  %11046 = vmatpush3.bf16.msra.mxu0 %v3399_v40 }
 0x71b   :  { %11003 = vmatprep.subr.bf16.mxu1 %v3028_v25  ;;  %11051 = vmatprep.subr.bf16.mxu0 %v3787_v59 }
 0x71c   :  { %4112 = vrot.lane.b32.xlu0 %v3157_v5, %s12331_s22  ;;  %4413 = vrot.lane.b32.xlu1 %v3198_v62, %s12332_s1 }
 0x71d   :  { %11000 = vmatmul.mubr.msk.bf16.vlgmr.msra.gmra.mrb[60].mxu1 %vm3236_vm13, %v11686_v14  ;;  %11048 = vmatmul.mubr.msk.bf16.vlgmr.msra.gmra.mrb[76].mxu0 %vm3236_vm13, %v11687_v9 }
 0x71e   :  { %11004 = vmatpush3.bf16.msra.mxu1 %v3028_v25  ;;  %11052 = vmatpush3.bf16.msra.mxu0 %v3787_v59 }
 0x71f   :  { %11005 = vmatprep.subr.bf16.mxu1 %v3029_v26  ;;  %11053 = vmatprep.subr.bf16.mxu0 %v3789_v18 }
 0x720   :  { %4415 = vrot.lane.b32.xlu1 %v3199_v31, %s12332_s1  ;;  %11011 = vmatprep.mubr.msk.bf16.mxu1 %vm3236_vm13, %v11688_v16 }
 0x721   :  { %11059 = vmatprep.mubr.msk.bf16.mxu0 %vm3236_vm13, %v11690_v17 }
 0x722   :  { %11006 = vmatpush3.bf16.msra.mxu1 %v3029_v26  ;;  %11054 = vmatpush3.bf16.msra.mxu0 %v3789_v18 }
 0x723   :  { %11007 = vmatprep.subr.bf16.mxu1 %v3030_v19  ;;  %11055 = vmatprep.subr.bf16.mxu0 %v3791_v24 }
 0x726   :  { %11008 = vmatpush3.bf16.msra.mxu1 %v3030_v19  ;;  %11056 = vmatpush3.bf16.msra.mxu0 %v3791_v24 }
 0x727   :  { %11009 = vmatprep.subr.bf16.mxu1 %v3031_v39  ;;  %11057 = vmatprep.subr.bf16.mxu0 %v3793_v27 }
 0x72a   :  { %11010 = vmatpush3.bf16.msra.mxu1 %v3031_v39  ;;  %11058 = vmatpush3.bf16.msra.mxu0 %v3793_v27 }
 0x72b   :  { %11063 = vmatprep.subr.bf16.mxu1 %v13462_v45  ;;  %11111 = vmatprep.subr.bf16.mxu0 %v13460_v15 }
 0x72d   :  { %11012 = vmatmul.mubr.msk.bf16.vlgmr.msra.gmra.mrb[60].mxu1 %vm3236_vm13, %v11689_v57  ;;  %11060 = vmatmul.mubr.msk.bf16.vlgmr.msra.gmra.mrb[76].mxu0 %vm3236_vm13, %v11691_v30 }
 0x72e   :  { %11064 = vmatpush3.bf16.msra.mxu1 %v13462_v45  ;;  %11112 = vmatpush3.bf16.msra.mxu0 %v13460_v15  ;;  %v11695_v15 = vld [vmem:[#allocation11 + $0x88] sm:$0xff]   ;;  %v11696_v45 = vld [vmem:[#allocation11 + $0x90] sm:$0xff]  }
 0x72f   :  { %11065 = vmatprep.subr.bf16.mxu1 %v13470_v49  ;;  %11113 = vmatprep.subr.bf16.mxu0 %v13468_v48 }
 0x730   :  { %11071 = vmatprep.mubr.msk.bf16.mxu1 %vm3236_vm13, %v11692_v28  ;;  %11119 = vmatprep.mubr.msk.bf16.mxu0 %vm3236_vm13, %v11693_v29 }
 0x732   :  { %11066 = vmatpush3.bf16.msra.mxu1 %v13470_v49  ;;  %11114 = vmatpush3.bf16.msra.mxu0 %v13468_v48  ;;  %v11697_v48 = vld [vmem:[#allocation11 + $0xa0] sm:$0xff]   ;;  %v11698_v49 = vld [vmem:[#allocation11 + $0x98] sm:$0xff]  }
 0x733   :  { %11067 = vmatprep.subr.bf16.mxu1 %v13478_v53  ;;  %11115 = vmatprep.subr.bf16.mxu0 %v13476_v54 }
 0x736   :  { %11068 = vmatpush3.bf16.msra.mxu1 %v13478_v53  ;;  %11116 = vmatpush3.bf16.msra.mxu0 %v13476_v54  ;;  %v11699_v54 = vld [vmem:[#allocation11 + $0xa8] sm:$0xff]   ;;  %v11700_v53 = vld [vmem:[#allocation11 + $0x10] sm:$0xff]  }
 0x737   :  { %11069 = vmatprep.subr.bf16.mxu1 %v13486_v61  ;;  %11117 = vmatprep.subr.bf16.mxu0 %v13484_v60 }
 0x73a   :  { %11070 = vmatpush3.bf16.msra.mxu1 %v13486_v61  ;;  %11118 = vmatpush3.bf16.msra.mxu0 %v13484_v60  ;;  %v11701_v60 = vld [vmem:[#allocation11 + $0x20] sm:$0xff]  }
 0x73b   :  { %11075 = vmatprep.subr.bf16.mxu1 %v13494_v0  ;;  %11123 = vmatprep.subr.bf16.mxu0 %v13494_v0 }
 0x73d   :  { %11072 = vmatmul.mubr.msk.bf16.vlgmr.msra.gmra.mrb[64].mxu1 %vm3236_vm13, %v11694_v50  ;;  %11120 = vmatmul.mubr.msk.bf16.vlgmr.msra.gmra.mrb[80].mxu0 %vm3236_vm13, %v11695_v15 }
 0x73e   :  { %11076 = vmatpush3.bf16.msra.mxu1 %v13494_v0  ;;  %11124 = vmatpush3.bf16.msra.mxu0 %v13494_v0 }
 0x73f   :  { %11077 = vmatprep.subr.bf16.mxu1 %v13492_v63  ;;  %11125 = vmatprep.subr.bf16.mxu0 %v13492_v63 }
 0x740   :  { %11083 = vmatprep.mubr.msk.bf16.mxu1 %vm3236_vm13, %v11696_v45  ;;  %11131 = vmatprep.mubr.msk.bf16.mxu0 %vm3236_vm13, %v11697_v48 }
 0x742   :  { %11078 = vmatpush3.bf16.msra.mxu1 %v13492_v63  ;;  %11126 = vmatpush3.bf16.msra.mxu0 %v13492_v63 }
 0x743   :  { %11079 = vmatprep.subr.bf16.mxu1 %v13506_v6  ;;  %11127 = vmatprep.subr.bf16.mxu0 %v13506_v6 }
 0x746   :  { %11080 = vmatpush3.bf16.msra.mxu1 %v13506_v6  ;;  %11128 = vmatpush3.bf16.msra.mxu0 %v13506_v6 }
 0x747   :  { %11081 = vmatprep.subr.bf16.mxu1 %v13504_v51  ;;  %11129 = vmatprep.subr.bf16.mxu0 %v13504_v51 }
 0x74a   :  { %11082 = vmatpush3.bf16.msra.mxu1 %v13504_v51  ;;  %11130 = vmatpush3.bf16.msra.mxu0 %v13504_v51 }
 0x74d   :  { %11084 = vmatmul.mubr.msk.bf16.vlgmr.msra.gmra.mrb[64].mxu1 %vm3236_vm13, %v11698_v49  ;;  %11132 = vmatmul.mubr.msk.bf16.vlgmr.msra.gmra.mrb[80].mxu0 %vm3236_vm13, %v11699_v54 }
 0x74e   :  { %11095 = vmatprep.mubr.msk.bf16.mxu1 %vm3236_vm13, %v11700_v53  ;;  %11143 = vmatprep.mubr.msk.bf16.mxu0 %vm3236_vm13, %v11701_v60 }
 0x77a   :  { %v4017_v61 = vpop.permute.xlu0 %4016  ;;  %v4019_v63 = vpop.permute.xlu1 %4018 }
 0x77b   :  { %11087 = vmatprep.subr.bf16.mxu1 %v4017_v61  ;;  %11135 = vmatprep.subr.bf16.mxu0 %v4017_v61 }
 0x77c   :  { %11088 = vmatpush3.bf16.msra.mxu1 %v4017_v61  ;;  %11136 = vmatpush3.bf16.msra.mxu0 %v4017_v61 }
 0x77d   :  { %11089 = vmatprep.subr.bf16.mxu1 %v4019_v63  ;;  %11137 = vmatprep.subr.bf16.mxu0 %v4019_v63 }
 0x77e   :  { %v4021_v0 = vpop.permute.xlu0 %4020  ;;  %v4023_v51 = vpop.permute.xlu1 %4022 }
 0x780   :  { %11090 = vmatpush3.bf16.msra.mxu1 %v4019_v63  ;;  %11138 = vmatpush3.bf16.msra.mxu0 %v4019_v63 }
 0x781   :  { %11091 = vmatprep.subr.bf16.mxu1 %v4021_v0  ;;  %11139 = vmatprep.subr.bf16.mxu0 %v4021_v0 }
 0x782   :  { %v4107_v6 = vpop.permute.xlu0 %4106 }
 0x784   :  { %11092 = vmatpush3.bf16.msra.mxu1 %v4021_v0  ;;  %11140 = vmatpush3.bf16.msra.mxu0 %v4021_v0 }
 0x785   :  { %11093 = vmatprep.subr.bf16.mxu1 %v4023_v51  ;;  %11141 = vmatprep.subr.bf16.mxu0 %v4023_v51 }
 0x786   :  { %v4410_v32 = vpop.permute.xlu1 %4409  ;;  %v4109_v38 = vpop.permute.xlu0 %4108 }
 0x788   :  { %11094 = vmatpush3.bf16.msra.mxu1 %v4023_v51  ;;  %11142 = vmatpush3.bf16.msra.mxu0 %v4023_v51 }
 0x789   :  { %11099 = vmatprep.subr.bf16.mxu1 %v4107_v6  ;;  %11147 = vmatprep.subr.bf16.mxu0 %v4410_v32 }
 0x78a   :  { %v4412_v52 = vpop.permute.xlu1 %4411  ;;  %v4111_v58 = vpop.permute.xlu0 %4110 }
 0x78b   :  { %11096 = vmatmul.mubr.msk.bf16.vlgmr.msra.gmra.mrb[64].mxu1 %vm3236_vm13, %v11702_v34  ;;  %11144 = vmatmul.mubr.msk.bf16.vlgmr.msra.gmra.mrb[80].mxu0 %vm3236_vm13, %v11703_v35 }
 0x78c   :  { %11100 = vmatpush3.bf16.msra.mxu1 %v4107_v6  ;;  %11148 = vmatpush3.bf16.msra.mxu0 %v4410_v32 }
 0x78d   :  { %11101 = vmatprep.subr.bf16.mxu1 %v4109_v38  ;;  %11149 = vmatprep.subr.bf16.mxu0 %v4412_v52 }
 0x78e   :  { %v4414_v37 = vpop.permute.xlu1 %4413  ;;  %11107 = vmatprep.mubr.msk.bf16.mxu1 %vm3236_vm13, %v11704_v3  ;;  %11155 = vmatprep.mubr.msk.bf16.mxu0 %vm3236_vm13, %v11705_v36  ;;  %v4113_v40 = vpop.permute.xlu0 %4112 }
 0x790   :  { %11102 = vmatpush3.bf16.msra.mxu1 %v4109_v38  ;;  %11150 = vmatpush3.bf16.msra.mxu0 %v4412_v52 }
 0x791   :  { %11103 = vmatprep.subr.bf16.mxu1 %v4111_v58  ;;  %11151 = vmatprep.subr.bf16.mxu0 %v4414_v37 }
 0x792   :  { %v4416_v41 = vpop.permute.xlu1 %4415 }
 0x794   :  { %11104 = vmatpush3.bf16.msra.mxu1 %v4111_v58  ;;  %11152 = vmatpush3.bf16.msra.mxu0 %v4414_v37 }
 0x795   :  { %11105 = vmatprep.subr.bf16.mxu1 %v4113_v40  ;;  %11153 = vmatprep.subr.bf16.mxu0 %v4416_v41 }
 0x798   :  { %11106 = vmatpush3.bf16.msra.mxu1 %v4113_v40  ;;  %11154 = vmatpush3.bf16.msra.mxu0 %v4416_v41 }
 0x799   :  { %11191 = vmatprep.subr.bf16.mxu0 %v12321_v8 }
 0x79b   :  { %11108 = vmatmul.mubr.msk.bf16.vlgmr.msra.gmra.mrb[64].mxu1 %vm3236_vm13, %v11706_v42  ;;  %11156 = vmatmul.mubr.msk.bf16.vlgmr.msra.gmra.mrb[80].mxu0 %vm3236_vm13, %v11707_v43 }
 0x800   :  { %v13623_v46 = vpop.f32.mrb[60].mxu1  ;;  %v13625_v20 = vpop.f32.mrb[76].mxu0 }
 0x801   :  { %v13627_v4 = vpop.f32.mrb[61].mxu1  ;;  %v4494_v2 = vsel %vm312_vm0, %v13623_v46, 0.0  ;;  %v13631_v22 = vpop.f32.mrb[77].mxu0  ;;  %v4506_v55 = vsel %vm312_vm0, %v13625_v20, 0.0 }
 0x802   :  { %4495 = vadd.xlane.f32.xlu1 %v4494_v2  ;;  %v13633_v7 = vpop.f32.mrb[62].mxu1  ;;  %v4488_v8 = vsel %vm312_vm0, %v13627_v4, 0.0  ;;  %v13637_v1 = vpop.f32.mrb[78].mxu0  ;;  %v4500_v25 = vsel %vm312_vm0, %v13631_v22, 0.0 }
 0x803   :  { %4489 = vadd.xlane.f32.xlu0 %v4488_v8  ;;  %v13639_v56 = vpop.f32.mrb[63].mxu1  ;;  %v13643_v59 = vpop.f32.mrb[79].mxu0  ;;  %v4497_v14 = vsel %vm312_vm0, %v13633_v7, 0.0  ;;  %v4509_v9 = vsel %vm312_vm0, %v13637_v1, 0.0 }
 0x804   :  { %v4491_v5 = vsel %vm312_vm0, %v13639_v56, 0.0  ;;  %v4503_v10 = vsel %vm312_vm0, %v13643_v59, 0.0 }
 0x806   :  { %4507 = vadd.xlane.f32.xlu1 %v4506_v55 }
 0x807   :  { %4501 = vadd.xlane.f32.xlu0 %v4500_v25 }
 0x80a   :  { %4492 = vadd.xlane.f32.xlu1 %v4491_v5 }
 0x80b   :  { %4498 = vadd.xlane.f32.xlu0 %v4497_v14 }
 0x80f   :  { %4510 = vadd.xlane.f32.xlu0 %v4509_v9 }
 0x813   :  { %4504 = vadd.xlane.f32.xlu0 %v4503_v10 }
 0x86e   :  { %v13655_v62 = vpop.f32.mrb[64].mxu1  ;;  %v13657_v11 = vpop.f32.mrb[80].mxu0 }
 0x86f   :  { %v13659_v12 = vpop.f32.mrb[65].mxu1  ;;  %v13661_v21 = vpop.f32.mrb[81].mxu0  ;;  %v4522_v16 = vsel %vm312_vm0, %v13655_v62, 0.0  ;;  %v4538_v44 = vsel %vm312_vm0, %v13657_v11, 0.0 }
 0x870   :  { %v13665_v26 = vpop.f32.mrb[82].mxu0  ;;  %4523 = vadd.xlane.f32.xlu1 %v4522_v16  ;;  %v13667_v13 = vpop.f32.mrb[66].mxu1  ;;  %v4516_v33 = vsel %vm312_vm0, %v13659_v12, 0.0  ;;  %v4532_v23 = vsel %vm312_vm0, %v13661_v21, 0.0 }
 0x871   :  { %v13669_v17 = vpop.f32.mrb[67].mxu1  ;;  %v13671_v18 = vpop.f32.mrb[83].mxu0  ;;  %v4525_v31 = vsel %vm312_vm0, %v13667_v13, 0.0  ;;  %v4541_v39 = vsel %vm312_vm0, %v13665_v26, 0.0 }
 0x872   :  { %4526 = vadd.xlane.f32.xlu0 %v4525_v31  ;;  %v4519_v19 = vsel %vm312_vm0, %v13669_v17, 0.0  ;;  %v4535_v24 = vsel %vm312_vm0, %v13671_v18, 0.0 }
 0x874   :  { %4517 = vadd.xlane.f32.xlu1 %v4516_v33 }
 0x876   :  { %4520 = vadd.xlane.f32.xlu0 %v4519_v19 }
 0x878   :  { %4533 = vadd.xlane.f32.xlu1 %v4532_v23 }
 0x87a   :  { %4536 = vadd.xlane.f32.xlu0 %v4535_v24 }
 0x87c   :  { %4539 = vadd.xlane.f32.xlu1 %v4538_v44 }
 0x87e   :  { %4542 = vadd.xlane.f32.xlu0 %v4541_v39 }
 0x88f   :  { %v4496_v30 = vpop.xlane.xlu1 %4495 }
 0x890   :  { %v4490_v27 = vpop.xlane.xlu0 %4489 }
 0x893   :  { %v4508_v29 = vpop.xlane.xlu1 %4507 }
 0x894   :  { %v4502_v57 = vpop.xlane.xlu0 %4501  ;;  %v4514_v61 = vadd.f32 %v4508_v29, %v4496_v30 }
 0x895   :  { %v4512_v6 = vadd.f32 %v4502_v57, %v4490_v27 }
 0x897   :  { %v4493_v15 = vpop.xlane.xlu1 %4492 }
 0x898   :  { %v4499_v28 = vpop.xlane.xlu0 %4498 }
 0x89c   :  { %v4511_v50 = vpop.xlane.xlu0 %4510 }
 0x89d   :  { %v4515_v0 = vadd.f32 %v4511_v50, %v4499_v28 }
 0x8a0   :  { %v4505_v45 = vpop.xlane.xlu0 %4504 }
 0x8a1   :  { %v4513_v3 = vadd.f32 %v4505_v45, %v4493_v15 }
 0x8fd   :  { %v4524_v48 = vpop.xlane.xlu1 %4523 }
 0x8fe   :  { %v4530_v51 = vadd.f32 %v4524_v48, %v4514_v61 }
 0x8ff   :  { %v4527_v49 = vpop.xlane.xlu0 %4526 }
 0x900   :  { %v4531_v34 = vadd.f32 %v4527_v49, %v4515_v0 }
 0x901   :  { %v4518_v54 = vpop.xlane.xlu1 %4517 }
 0x902   :  { %v4528_v38 = vadd.f32 %v4518_v54, %v4512_v6 }
 0x903   :  { %v4521_v53 = vpop.xlane.xlu0 %4520 }
 0x904   :  { %v4529_v40 = vadd.f32 %v4521_v53, %v4513_v3 }
 0x905   :  { %v4534_v60 = vpop.xlane.xlu1 %4533 }
 0x906   :  { %v4544_v37 = vadd.f32 %v4534_v60, %v4528_v38 }
 0x907   :  { %v4537_v63 = vpop.xlane.xlu0 %4536 }
 0x908   :  { %v4545_v2 = vadd.f32 %v4537_v63, %v4529_v40  ;;  %v13699_v5 = vmul.f32 0.0078125, %v4544_v37 }
 0x909   :  { %v4540_v32 = vpop.xlane.xlu1 %4539 }
 0x90a   :  { %v4546_v35 = vadd.f32 %v4540_v32, %v4530_v51  ;;  %v13704_v31 = vmul.f32 0.0078125, %v4545_v2  ;;  %v4553_v39 = vsub.f32 %v13627_v4, %v13699_v5  ;;  %v4573_v50 = vsub.f32 %v13631_v22, %v13699_v5 }
 0x90b   :  { %v4543_v52 = vpop.xlane.xlu0 %4542  ;;  %v4597_v53 = vsub.f32 %v13659_v12, %v13699_v5  ;;  %v4621_v6 = vsub.f32 %v13661_v21, %v13699_v5 }
 0x90c   :  { %v13687_v36 = vmul.f32 0.0078125, %v4546_v35  ;;  %v4547_v58 = vadd.f32 %v4543_v52, %v4531_v34  ;;  %v4554_v30 = vsub.f32 %v13639_v56, %v13704_v31  ;;  %v4557_v29 = vmul.f32 %v4553_v39, %v4553_v39 }
 0x90d   :  { %v4574_v48 = vsub.f32 %v13643_v59, %v13704_v31  ;;  %v4577_v54 = vmul.f32 %v4573_v50, %v4573_v50  ;;  %v4598_v63 = vsub.f32 %v13669_v17, %v13704_v31  ;;  %v4601_v51 = vmul.f32 %v4597_v53, %v4597_v53 }
 0x90e   :  { %v13689_v41 = vmul.f32 0.0078125, %v4547_v58  ;;  %v4555_v42 = vsub.f32 %v13623_v46, %v13687_v36  ;;  %v4575_v43 = vsub.f32 %v13625_v20, %v13687_v36  ;;  %v4599_v16 = vsub.f32 %v13655_v62, %v13687_v36 }
 0x90f   :  { %v4558_v45 = vmul.f32 %v4554_v30, %v4554_v30  ;;  %v4561_v49 = vsel %vm312_vm0, %v4557_v29, 0.0  ;;  %v4578_v61 = vmul.f32 %v4574_v48, %v4574_v48  ;;  %v4581_v0 = vsel %vm312_vm0, %v4577_v54, 0.0 }
 0x910   :  { %v4559_v8 = vmul.f32 %v4555_v42, %v4555_v42  ;;  %v4556_v55 = vsub.f32 %v13633_v7, %v13689_v41  ;;  %v4576_v25 = vsub.f32 %v13637_v1, %v13689_v41  ;;  %v4579_v10 = vmul.f32 %v4575_v43, %v4575_v43 }
 0x911   :  { %v4600_v23 = vsub.f32 %v13667_v13, %v13689_v41  ;;  %v4603_v44 = vmul.f32 %v4599_v16, %v4599_v16  ;;  %v4564_v60 = vsel %vm312_vm0, %v4558_v45, 0.0  ;;  %v4584_v32 = vsel %vm312_vm0, %v4578_v61, 0.0 }
 0x912   :  { %v4567_v14 = vsel %vm312_vm0, %v4559_v8, 0.0  ;;  %v4560_v9 = vmul.f32 %v4556_v55, %v4556_v55  ;;  %v4580_v19 = vmul.f32 %v4576_v25, %v4576_v25  ;;  %v4587_v24 = vsel %vm312_vm0, %v4579_v10, 0.0 }
 0x913   :  { %4568 = vadd.xlane.f32.xlu1 %v4567_v14  ;;  %v4604_v57 = vmul.f32 %v4600_v23, %v4600_v23  ;;  %v4611_v28 = vsel %vm312_vm0, %v4603_v44, 0.0  ;;  %v4602_v34 = vmul.f32 %v4598_v63, %v4598_v63  ;;  %v4622_v35 = vsub.f32 %v13671_v18, %v13704_v31 }
 0x914   :  { %v4570_v33 = vsel %vm312_vm0, %v4560_v9, 0.0  ;;  %v4590_v27 = vsel %vm312_vm0, %v4580_v19, 0.0  ;;  %v4605_v38 = vsel %vm312_vm0, %v4601_v51, 0.0  ;;  %v4625_v52 = vmul.f32 %v4621_v6, %v4621_v6 }
 0x915   :  { %4571 = vadd.xlane.f32.xlu0 %v4570_v33  ;;  %v4614_v15 = vsel %vm312_vm0, %v4604_v57, 0.0  ;;  %v4623_v3 = vsub.f32 %v13657_v11, %v13687_v36  ;;  %v4608_v58 = vsel %vm312_vm0, %v4602_v34, 0.0  ;;  %v4626_v37 = vmul.f32 %v4622_v35, %v4622_v35 }
 0x916   :  { %v4624_v40 = vsub.f32 %v13665_v26, %v13689_v41  ;;  %v4629_v42 = vsel %vm312_vm0, %v4625_v52, 0.0 }
 0x917   :  { %4588 = vadd.xlane.f32.xlu1 %v4587_v24  ;;  %v4627_v43 = vmul.f32 %v4623_v3, %v4623_v3  ;;  %v4632_v2 = vsel %vm312_vm0, %v4626_v37, 0.0 }
 0x918   :  { %v4628_v8 = vmul.f32 %v4624_v40, %v4624_v40  ;;  %v4480_v40 = vld [vmem:[#allocation13] sm:$0xff] }
 0x919   :  { %4591 = vadd.xlane.f32.xlu0 %v4590_v27  ;;  %v4635_v55 = vsel %vm312_vm0, %v4627_v43, 0.0  ;;  %v4481_v43 = vld [vmem:[#allocation13 + $0x8] sm:$0xff] }
 0x91a   :  { %v4638_v25 = vsel %vm312_vm0, %v4628_v8, 0.0 }
 0x91b   :  { %4612 = vadd.xlane.f32.xlu1 %v4611_v28 }
 0x91d   :  { %4615 = vadd.xlane.f32.xlu0 %v4614_v15 }
 0x91f   :  { %4562 = vadd.xlane.f32.xlu1 %v4561_v49 }
 0x921   :  { %4565 = vadd.xlane.f32.xlu0 %v4564_v60 }
 0x923   :  { %4582 = vadd.xlane.f32.xlu1 %v4581_v0 }
 0x925   :  { %4585 = vadd.xlane.f32.xlu0 %v4584_v32 }
 0x927   :  { %4606 = vadd.xlane.f32.xlu1 %v4605_v38 }
 0x929   :  { %4609 = vadd.xlane.f32.xlu0 %v4608_v58 }
 0x92b   :  { %4630 = vadd.xlane.f32.xlu1 %v4629_v42 }
 0x92d   :  { %4633 = vadd.xlane.f32.xlu0 %v4632_v2 }
 0x92f   :  { %4636 = vadd.xlane.f32.xlu1 %v4635_v55  ;;  %v4482_v55 = vld [vmem:[#allocation13 + $0x10] sm:$0xff] }
 0x931   :  { %4639 = vadd.xlane.f32.xlu0 %v4638_v25 }
 0x9a0   :  { %v4569_v14 = vpop.xlane.xlu1 %4568 }
 0x9a2   :  { %v4572_v9 = vpop.xlane.xlu0 %4571 }
 0x9a4   :  { %v4589_v10 = vpop.xlane.xlu1 %4588 }
 0x9a5   :  { %v4595_v15 = vadd.f32 %v4589_v10, %v4569_v14  ;;  %v4484_v10 = vld [vmem:[%s15142_s7] sm:$0xff] }
 0x9a6   :  { %v4592_v16 = vpop.xlane.xlu0 %4591 }
 0x9a7   :  { %v4596_v54 = vadd.f32 %v4592_v16, %v4572_v9 }
 0x9a8   :  { %v4613_v33 = vpop.xlane.xlu1 %4612 }
 0x9a9   :  { %v4619_v53 = vadd.f32 %v4613_v33, %v4595_v15  ;;  %v11709_v15 = vld [vmem:[#allocation16 + $0x18] sm:$0xff]  }
 0x9aa   :  { %v4616_v19 = vpop.xlane.xlu0 %4615 }
 0x9ab   :  { %v4620_v0 = vadd.f32 %v4616_v19, %v4596_v54 }
 0x9ac   :  { %v4563_v23 = vpop.xlane.xlu1 %4562 }
 0x9ae   :  { %v4566_v24 = vpop.xlane.xlu0 %4565 }
 0x9b0   :  { %v4583_v44 = vpop.xlane.xlu1 %4582 }
 0x9b1   :  { %v4593_v57 = vadd.f32 %v4583_v44, %v4563_v23  ;;  %v4486_v23 = vld [vmem:[%s15142_s7 + $0x10] sm:$0xff]  ;;  %v4483_v44 = vld [vmem:[#allocation13 + $0x18] sm:$0xff] }
 0x9b2   :  { %v4586_v39 = vpop.xlane.xlu0 %4585 }
 0x9b3   :  { %v4594_v28 = vadd.f32 %v4586_v39, %v4566_v24 }
 0x9b4   :  { %v4607_v27 = vpop.xlane.xlu1 %4606 }
 0x9b5   :  { %v4617_v29 = vadd.f32 %v4607_v27, %v4593_v57  ;;  %v4485_v57 = vld [vmem:[%s15142_s7 + $0x8] sm:$0xff] }
 0x9b6   :  { %v4610_v30 = vpop.xlane.xlu0 %4609 }
 0x9b7   :  { %v4618_v45 = vadd.f32 %v4610_v30, %v4594_v28  ;;  %v4487_v28 = vld [vmem:[%s15142_s7 + $0x18] sm:$0xff]  ;;  %s12333_s7 = smov 17  }
 0x9b8   :  { %v4631_v50 = vpop.xlane.xlu1 %4630 }
 0x9b9   :  { %v4641_v48 = vadd.f32 %v4631_v50, %v4617_v29  ;;  %v11708_v29 = vld [vmem:[#allocation16 + $0x10] sm:$0xff]  }
 0x9ba   :  { %v4634_v49 = vpop.xlane.xlu0 %4633  ;;  %11159 = vmatprep.subr.bf16.mxu1 %v11708_v29 }
 0x9bb   :  { %v4645_v60 = vmul.f32 0.0078125, %v4641_v48  ;;  %v4642_v61 = vadd.f32 %v4634_v49, %v4618_v45  ;;  %11160 = vmatpush3.bf16.msra.mxu1 %v11708_v29 }
 0x9bc   :  { %v4637_v63 = vpop.xlane.xlu1 %4636  ;;  %11161 = vmatprep.subr.bf16.mxu1 %v11709_v15 }
 0x9bd   :  { %v4649_v51 = vadd.f32 1e-05, %v4645_v60  ;;  %v4646_v6 = vmul.f32 0.0078125, %v4642_v61  ;;  %v4643_v32 = vadd.f32 %v4637_v63, %v4619_v53 }
 0x9be   :  { %v4640_v34 = vpop.xlane.xlu0 %4639 }
 0x9bf   :  { %11940 = vrsqrt.f32 %v4649_v51  ;;  %v4650_v35 = vadd.f32 1e-05, %v4646_v6  ;;  %v4647_v38 = vmul.f32 0.0078125, %v4643_v32  ;;  %v4644_v52 = vadd.f32 %v4640_v34, %v4620_v0  ;;  %11162 = vmatpush3.bf16.msra.mxu1 %v11709_v15 }
 0x9c1   :  { %11942 = vrsqrt.f32 %v4650_v35  ;;  %v4651_v3 = vadd.f32 1e-05, %v4647_v38  ;;  %v4648_v58 = vmul.f32 0.0078125, %v4644_v52 }
 0x9c3   :  { %11944 = vrsqrt.f32 %v4651_v3  ;;  %v4652_v37 = vadd.f32 1e-05, %v4648_v58 }
 0x9c5   :  { %11946 = vrsqrt.f32 %v4652_v37 }
 0x9c9   :  { %v11941_v42 = vpop.eup %11940 }
 0x9ca   :  { %v4657_v2 = vmul.f32 %v11941_v42, %v4480_v40 }
 0x9cb   :  { %v11943_v8 = vpop.eup %11942 }
 0x9cc   :  { %v4658_v25 = vmul.f32 %v11943_v8, %v4481_v43  ;;  %v4661_v14 = vmul.f32 %v4657_v2, %v13699_v5 }
 0x9cd   :  { %v11945_v9 = vpop.eup %11944 }
 0x9ce   :  { %4676 = vperm.xlu0 %11607, %v4658_v25   ;;  %v4659_v16 = vmul.f32 %v11945_v9, %v4482_v55  ;;  %v4665_v33 = vsub.f32 %v4484_v10, %v4661_v14  ;;  %v4662_v27 = vmul.f32 %v4658_v25, %v13704_v31  ;;  %v13759_v31 = vld [vmem:[#allocation16] sm:$0xff]  }
 0x9cf   :  { %v11947_v24 = vpop.eup %11946  ;;  %11167 = vmatprep.subr.bf16.mxu1 %v13759_v31 }
 0x9d0   :  { %4681 = vperm.xlu1 %11606, %v4659_v16   ;;  %v4663_v19 = vmul.f32 %v4659_v16, %v13687_v36  ;;  %v4660_v39 = vmul.f32 %v11947_v24, %v4483_v44  ;;  %v4666_v30 = vsub.f32 %v4485_v57, %v4662_v27 }
 0x9d2   :  { %4695 = vperm.xlu0 %11607, %v4665_v33   ;;  %v4667_v5 = vsub.f32 %v4486_v23, %v4663_v19  ;;  %v4664_v36 = vmul.f32 %v4660_v39, %v13689_v41 }
 0x9d4   :  { %4671 = vperm.xlu1 %11606, %v4657_v2   ;;  %v4668_v50 = vsub.f32 %v4487_v28, %v4664_v36 }
 0x9d6   :  { %4705 = vperm.xlu0 %11607, %v4667_v5  }
 0x9d8   :  { %4686 = vperm.xlu1 %11606, %v4660_v39  }
 0x9dc   :  { %4700 = vperm.xlu1 %11606, %v4666_v30  }
 0x9e0   :  { %4710 = vperm.xlu1 %11606, %v4668_v50  }
 0xa4d   :  { %v4677_v45 = vpop.permute.xlu0 %4676 }
 0xa4e   :  { %v4690_v49 = vmul.f32 %v4677_v45, %v13639_v56  ;;  %v4730_v54 = vmul.f32 %v4677_v45, %v13643_v59  ;;  %v4750_v53 = vmul.f32 %v4677_v45, %v13669_v17  ;;  %v4770_v17 = vmul.f32 %v4677_v45, %v13671_v18 }
 0xa4f   :  { %v4682_v48 = vpop.permute.xlu1 %4681 }
 0xa50   :  { %v4691_v6 = vmul.f32 %v13623_v46, %v4682_v48  ;;  %v4731_v32 = vmul.f32 %v13625_v20, %v4682_v48  ;;  %v4751_v34 = vmul.f32 %v13655_v62, %v4682_v48  ;;  %v4771_v56 = vmul.f32 %v13657_v11, %v4682_v48 }
 0xa51   :  { %v4696_v41 = vpop.permute.xlu0 %4695 }
 0xa53   :  { %v4672_v60 = vpop.permute.xlu1 %4671 }
 0xa54   :  { %v4689_v61 = vmul.f32 %v4672_v60, %v13627_v4  ;;  %v4729_v63 = vmul.f32 %v4672_v60, %v13631_v22  ;;  %v4749_v0 = vmul.f32 %v4672_v60, %v13659_v12  ;;  %v4769_v51 = vmul.f32 %v4672_v60, %v13661_v21 }
 0xa55   :  { %v4706_v59 = vpop.permute.xlu0 %4705 }
 0xa56   :  { %v4713_v35 = vadd.f32 %v4696_v41, %v4689_v61  ;;  %v4733_v38 = vadd.f32 %v4729_v63, %v4696_v41  ;;  %v4753_v4 = vadd.f32 %v4749_v0, %v4696_v41  ;;  %v4715_v52 = vadd.f32 %v4706_v59, %v4691_v6 }
 0xa57   :  { %v4735_v22 = vadd.f32 %v4731_v32, %v4706_v59  ;;  %v13774_v3 = vadd.f32 %v4751_v34, %v4706_v59  ;;  %v13776_v12 = vadd.f32 %v4771_v56, %v4706_v59  ;;  %v4687_v21 = vpop.permute.xlu1 %4686  ;;  %v13778_v46 = vadd.f32 %v4769_v51, %v4696_v41 }
 0xa58   :  { %v4692_v20 = vmul.f32 %v13633_v7, %v4687_v21  ;;  %v4732_v62 = vmul.f32 %v13637_v1, %v4687_v21  ;;  %v4752_v11 = vmul.f32 %v13667_v13, %v4687_v21  ;;  %v4723_v58 = vmul.f32 0.2, %v4715_v52 }
 0xa59   :  { %vm4739_vm14 = vcmp.ge.f32.partialorder %v4735_v22, 0.0  ;;  %v4743_v18 = vmul.f32 0.2, %v4735_v22  ;;  %v4772_v37 = vmul.f32 %v13665_v26, %v4687_v21  ;;  %vm4719_vm15 = vcmp.ge.f32.partialorder %v4715_v52, 0.0 }
 0xa5a   :  { %vm4759_vm2 = vcmp.ge.f32.partialorder %v13774_v3, 0.0  ;;  %v4763_v40 = vmul.f32 0.2, %v13774_v3  ;;  %v4783_v42 = vmul.f32 0.2, %v13776_v12  ;;  %vm4737_vm3 = vcmp.ge.f32.partialorder %v4733_v38, 0.0 }
 0xa5b   :  { %v4701_v43 = vpop.permute.xlu1 %4700  ;;  %v4741_v2 = vmul.f32 0.2, %v4733_v38  ;;  %v4747_v7 = vsel %vm4739_vm14, %v4735_v22, %v4743_v18  ;;  %vm4717_vm4 = vcmp.ge.f32.partialorder %v4713_v35, 0.0  ;;  %vm4779_vm5 = vcmp.ge.f32.partialorder %v13776_v12, 0.0  ;;  %v11714_v22 = vld [vmem:[#allocation16 + $0x30] sm:$0xff]  }
 0xa5c   :  { %v4714_v1 = vadd.f32 %v4701_v43, %v4690_v49  ;;  %v4734_v13 = vadd.f32 %v4730_v54, %v4701_v43  ;;  %v4754_v8 = vadd.f32 %v4750_v53, %v4701_v43  ;;  %v4774_v55 = vadd.f32 %v4770_v17, %v4701_v43  ;;  %v11711_v53 = vld [vmem:[#allocation16 + $0x8] sm:$0xff]   ;;  %v11712_v17 = vld [vmem:[#allocation16 + $0x20] sm:$0xff]   ;;  %v10193_v18 = vld [vmem:[#allocation20 + $0x1] ss:$0 sm:$0xff] }
 0xa5d   :  { %v4745_v25 = vsel %vm4737_vm3, %v4733_v38, %v4741_v2  ;;  %v4721_v26 = vmul.f32 0.2, %v4713_v35  ;;  %v4727_v14 = vsel %vm4719_vm15, %v4715_v52, %v4723_v58  ;;  %vm4757_vm6 = vcmp.ge.f32.partialorder %v4753_v4, 0.0  ;;  %v11713_v52 = vld [vmem:[#allocation16 + $0x28] sm:$0xff]   ;;  %v10196_v58 = vld [vmem:[#allocation20 + $0x4] ss:$0 sm:$0xff] }
 0xa5e   :  { %vm4738_vm7 = vcmp.ge.f32.partialorder %v4734_v13, 0.0  ;;  %v4742_v9 = vmul.f32 0.2, %v4734_v13  ;;  %vm4718_vm8 = vcmp.ge.f32.partialorder %v4714_v1, 0.0  ;;  %v4722_v10 = vmul.f32 0.2, %v4714_v1 }
 0xa5f   :  { %v4711_v16 = vpop.permute.xlu1 %4710  ;;  %v4725_v33 = vsel %vm4717_vm4, %v4713_v35, %v4721_v26  ;;  %vm4758_vm9 = vcmp.ge.f32.partialorder %v4754_v8, 0.0  ;;  %v4761_v19 = vmul.f32 0.2, %v4753_v4  ;;  %v4762_v23 = vmul.f32 0.2, %v4754_v8 }
 0xa60   :  { %v4716_v24 = vadd.f32 %v4711_v16, %v4692_v20  ;;  %v4736_v44 = vadd.f32 %v4732_v62, %v4711_v16  ;;  %v4756_v5 = vadd.f32 %v4752_v11, %v4711_v16  ;;  %v4776_v39 = vadd.f32 %v4772_v37, %v4711_v16  ;;  %v10195_v62 = vld [vmem:[#allocation20 + $0x3] ss:$0 sm:$0xff]  ;;  %v10197_v11 = vld [vmem:[#allocation20 + $0x5] ss:$0 sm:$0xff]  ;;  %v10194_v37 = vld [vmem:[#allocation20 + $0x2] ss:$0 sm:$0xff] }
 0xa61   :  { %v4746_v27 = vsel %vm4738_vm7, %v4734_v13, %v4742_v9  ;;  %v4726_v57 = vsel %vm4718_vm8, %v4714_v1, %v4722_v10  ;;  %v4765_v30 = vsel %vm4757_vm6, %v4753_v4, %v4761_v19  ;;  %v4766_v36 = vsel %vm4758_vm9, %v4754_v8, %v4762_v23 }
 0xa62   :  { %vm4720_vm10 = vcmp.ge.f32.partialorder %v4716_v24, 0.0  ;;  %v4724_v28 = vmul.f32 0.2, %v4716_v24  ;;  %vm4740_vm11 = vcmp.ge.f32.partialorder %v4736_v44, 0.0  ;;  %v4744_v29 = vmul.f32 0.2, %v4736_v44 }
 0xa63   :  { %vm4760_vm12 = vcmp.ge.f32.partialorder %v4756_v5, 0.0  ;;  %v4764_v50 = vmul.f32 0.2, %v4756_v5  ;;  %vm4780_vm13 = vcmp.ge.f32.partialorder %v4776_v39, 0.0  ;;  %v4784_v15 = vmul.f32 0.2, %v4776_v39 }
 0xa64   :  { %v4795_v45 = vpack.c.bf16 %v4746_v27, %v4745_v25  ;;  %v4748_v48 = vsel %vm4740_vm11, %v4736_v44, %v4744_v29  ;;  %v4789_v41 = vpack.c.bf16 %v4726_v57, %v4725_v33  ;;  %v4728_v49 = vsel %vm4720_vm10, %v4716_v24, %v4724_v28 }
 0xa65   :  { %v4796_v54 = vpack.c.bf16 %v4748_v48, %v4747_v7  ;;  %v4790_v60 = vpack.c.bf16 %v4728_v49, %v4727_v14  ;;  %v4936_v61 = vpack.c.bf16 %v4766_v36, %v4765_v30  ;;  %v4767_v63 = vsel %vm4759_vm2, %v13774_v3, %v4763_v40  ;;  %v13808_v3 = vld [vmem:[#allocation4] sm:$0xff] }
 0xa66   :  { %11163 = vmatprep.mubr.msk.bf16.mxu1 %vm312_vm0, %v4795_v45  ;;  %v4768_v0 = vsel %vm4760_vm12, %v4756_v5, %v4764_v50  ;;  %vm4777_vm14 = vcmp.ge.f32.partialorder %v13778_v46, 0.0  ;;  %vm4778_vm15 = vcmp.ge.f32.partialorder %v4774_v55, 0.0  ;;  %v4781_v51 = vmul.f32 0.2, %v13778_v46  ;;  %v10199_v40 = vld [vmem:[#allocation20 + $0x7] ss:$0 sm:$0xff] }
 0xa67   :  { %11164 = vmatmul.mubr.msk.bf16.vlgmr.msra.gmra.mrb[68].mxu1 %vm312_vm0, %v4796_v54  ;;  %v4937_v6 = vpack.c.bf16 %v4768_v0, %v4767_v63  ;;  %v4782_v32 = vmul.f32 0.2, %v4774_v55  ;;  %v4787_v34 = vsel %vm4779_vm5, %v13776_v12, %v4783_v42  ;;  %v4788_v56 = vsel %vm4780_vm13, %v4776_v39, %v4784_v15 }
 0xa68   :  { %11171 = vmatprep.mubr.msk.bf16.mxu1 %vm312_vm0, %v4789_v41  ;;  %11168 = vmatpush3.bf16.msra.mxu1 %v13759_v31  ;;  %v5015_v59 = vpack.c.bf16 %v4788_v56, %v4787_v34  ;;  %v4785_v35 = vsel %vm4777_vm14, %v13778_v46, %v4781_v51  ;;  %v11715_v31 = vld [vmem:[#allocation16 + $0x38] sm:$0xff]   ;;  %vm249_vm2 = vcmask 146432   ;;  %vm5108_vm3 = vcmask 1047624  }
 0xa69   :  { %11169 = vmatprep.subr.bf16.mxu1 %v11711_v53  ;;  %v4786_v38 = vsel %vm4778_vm15, %v4774_v55, %v4782_v32  ;;  %250 = vst.msk [vmem:[#allocation4 + $0x8] sm:$0xff] %vm249_vm2, %v13808_v3  ;;  %252 = vst.msk [vmem:[#allocation4 + $0x18] sm:$0xff] %vm249_vm2, %v13808_v3  ;;  %vm5110_vm4 = vcmask 72704   ;;  %vm12334_vm5 = vmmov 0   ;;  %vm5328_vm6 = vcmask 982016  }
 0xa6a   :  { %v5014_v4 = vpack.c.bf16 %v4786_v38, %v4785_v35  ;;  %254 = vst.msk [vmem:[#allocation4 + $0x28] sm:$0xff] %vm249_vm2, %v13808_v3  ;;  %256 = vst.msk [vmem:[#allocation4 + $0x38] sm:$0xff] %vm249_vm2, %v13808_v3  ;;  %11195 = vmatprep.mubr.msk.bf16.mxu0 %vm12334_vm5, %v13808_v3  ;;  %vm5591_vm7 = vcmask 965632   ;;  %vm5394_vm8 = vcmask 973824   ;;  %vm5463_vm9 = vcmask 1039360  }
 0xa6b   :  { %vm5763_vm10 = vcmask 1031168   ;;  %vm5938_vm11 = vcmask 908288   ;;  %vm6009_vm12 = vcmask 916480   ;;  %vm6237_vm13 = vcmask 900096  }
 0xa6c   :  { %11170 = vmatpush3.bf16.msra.mxu1 %v11711_v53 }
 0xa6d   :  { %11175 = vmatprep.subr.bf16.mxu1 %v11712_v17 }
 0xa73   :  { %11172 = vmatmul.mubr.msk.bf16.vlgmr.msra.gmra.mrb[68].mxu1 %vm312_vm0, %v4790_v60 }
 0xa74   :  { %11179 = vmatprep.mubr.msk.bf16.mxu1 %vm312_vm0, %v4936_v61  ;;  %11176 = vmatpush3.bf16.msra.mxu1 %v11712_v17 }
 0xa75   :  { %11177 = vmatprep.subr.bf16.mxu1 %v11713_v52 }
 0xa78   :  { %11178 = vmatpush3.bf16.msra.mxu1 %v11713_v52 }
 0xa79   :  { %11183 = vmatprep.subr.bf16.mxu1 %v11714_v22 }
 0xa7f   :  { %11180 = vmatmul.mubr.msk.bf16.vlgmr.msra.gmra.mrb[68].mxu1 %vm312_vm0, %v4937_v6 }
 0xa80   :  { %11187 = vmatprep.mubr.msk.bf16.mxu1 %vm312_vm0, %v5014_v4  ;;  %11184 = vmatpush3.bf16.msra.mxu1 %v11714_v22 }
 0xa81   :  { %11185 = vmatprep.subr.bf16.mxu1 %v11715_v31 }
 0xa84   :  { %11186 = vmatpush3.bf16.msra.mxu1 %v11715_v31 }
 0xa85   :  { %11223 = vmatprep.subr.bf16.mxu1 %v13808_v3 }
 0xa8b   :  { %11188 = vmatmul.mubr.msk.bf16.vlgmr.msra.gmra.mrb[68].mxu1 %vm312_vm0, %v5015_v59 }
 0xa8c   :  { %11227 = vmatprep.mubr.msk.bf16.mxu1 %vm12334_vm5, %v13808_v3 }
 0xb5e   :  { %v11189_v12 = vpop.f32.mrb[68].mxu1 }
 0xb5f   :  { %v5073_v21 = vpop.f32.mrb[69].mxu1 }
 0xb60   :  { %5096 = vrot.lane.b32.xlu0 %v5073_v21, %s12327_s2  ;;  %v11190_v46 = vpop.f32.mrb[70].mxu1  ;;  %v10200_v21 = vld [vmem:[#allocation20 + $0x8] ss:$0 sm:$0xff] }
 0xb61   :  { %v5076_v20 = vpop.f32.mrb[71].mxu1 }
 0xb62   :  { %5098 = vrot.lane.b32.xlu1 %v5076_v20, %s12327_s2 }
 0xb64   :  { %5100 = vrot.lane.b32.xlu0 %v11189_v12, %s12327_s2  ;;  %v10198_v12 = vld [vmem:[#allocation20 + $0x6] ss:$0 sm:$0xff] }
 0xb66   :  { %5102 = vrot.lane.b32.xlu1 %v11190_v46, %s12327_s2 }
 0xb68   :  { %5185 = vrot.lane.b32.xlu0 %v10195_v62, %s12290_s30  ;;  %s12335_s30 = smov 111  }
 0xb6a   :  { %5227 = vrot.lane.b32.xlu1 %v10197_v11, %s12309_s13  ;;  %s12336_s13 = smov 112  }
 0xb6c   :  { %5206 = vrot.lane.b32.xlu0 %v10196_v58, %s12327_s2 }
 0xb6e   :  { %5143 = vrot.lane.b32.xlu1 %v10193_v18, %s12323_s25 }
 0xb70   :  { %5164 = vrot.lane.b32.xlu0 %v10194_v37, %s12305_s29 }
 0xb72   :  { %5269 = vrot.lane.b32.xlu1 %v10199_v40, %s12333_s7 }
 0xbd2   :  { %v5097_v42 = vpop.permute.xlu0 %5096 }
 0xbd3   :  { %5109 = vst.msk [vmem:[#allocation4] sm:$0xff] %vm5108_vm3, %v5097_v42 }
 0xbd4   :  { %5111 = vst.msk [vmem:[#allocation4 + $0x8] sm:$0xff] %vm5110_vm4, %v5097_v42  ;;  %v5099_v43 = vpop.permute.xlu1 %5098 }
 0xbd5   :  { %5112 = vst.msk [vmem:[#allocation4 + $0x10] sm:$0xff] %vm5108_vm3, %v5099_v43 }
 0xbd6   :  { %5113 = vst.msk [vmem:[#allocation4 + $0x18] sm:$0xff] %vm5110_vm4, %v5099_v43  ;;  %v5101_v2 = vpop.permute.xlu0 %5100 }
 0xbd7   :  { %5114 = vst.msk [vmem:[#allocation4 + $0x20] sm:$0xff] %vm5108_vm3, %v5101_v2 }
 0xbd8   :  { %5115 = vst.msk [vmem:[#allocation4 + $0x28] sm:$0xff] %vm5110_vm4, %v5101_v2  ;;  %v5103_v7 = vpop.permute.xlu1 %5102 }
 0xbd9   :  { %5116 = vst.msk [vmem:[#allocation4 + $0x30] sm:$0xff] %vm5108_vm3, %v5103_v7 }
 0xbda   :  { %5117 = vst.msk [vmem:[#allocation4 + $0x38] sm:$0xff] %vm5110_vm4, %v5103_v7  ;;  %v5186_v55 = vpop.permute.xlu0 %5185  ;;  %v13848_v23 = vld [vmem:[#allocation4] sm:$0xff] }
 0xbdb   :  { %v13846_v19 = vld [vmem:[#allocation4 + $0x8] sm:$0xff]  ;;  %v5188_v30 = vmul.f32 %v5186_v55, %v13848_v23 }
 0xbdc   :  { %v13840_v14 = vld [vmem:[#allocation4 + $0x10] sm:$0xff]  ;;  %v5228_v24 = vpop.permute.xlu1 %5227  ;;  %v5189_v57 = vmul.f32 %v5186_v55, %v13846_v19 }
 0xbdd   :  { %v13834_v8 = vld [vmem:[#allocation4 + $0x18] sm:$0xff]  ;;  %v5190_v27 = vmul.f32 %v5186_v55, %v13840_v14  ;;  %v5231_v36 = vmul.f32 %v5228_v24, %v13846_v19  ;;  %v5230_v15 = vmul.f32 %v5228_v24, %v13848_v23  ;;  %v5232_v45 = vmul.f32 %v5228_v24, %v13840_v14 }
 0xbde   :  { %v13832_v13 = vld [vmem:[#allocation4 + $0x20] sm:$0xff]  ;;  %v5191_v39 = vmul.f32 %v5186_v55, %v13834_v8  ;;  %v5233_v28 = vmul.f32 %v5228_v24, %v13834_v8  ;;  %v5207_v48 = vpop.permute.xlu0 %5206 }
 0xbdf   :  { %v13830_v1 = vld [vmem:[#allocation4 + $0x28] sm:$0xff]  ;;  %v5192_v16 = vmul.f32 %v5186_v55, %v13832_v13  ;;  %v5196_v50 = vpack.c.bf16 %v5190_v27, %v5188_v30  ;;  %v5238_v49 = vpack.c.bf16 %v5232_v45, %v5230_v15  ;;  %v5234_v60 = vmul.f32 %v5228_v24, %v13832_v13 }
 0xbe0   :  { %v13838_v26 = vld [vmem:[#allocation4 + $0x30] sm:$0xff]  ;;  %v5193_v9 = vmul.f32 %v5186_v55, %v13830_v1  ;;  %v5197_v29 = vpack.c.bf16 %v5191_v39, %v5189_v57  ;;  %v5239_v41 = vpack.c.bf16 %v5233_v28, %v5231_v36  ;;  %v5235_v61 = vmul.f32 %v5228_v24, %v13830_v1  ;;  %v5144_v31 = vpop.permute.xlu1 %5143 }
 0xbe1   :  { %v13836_v25 = vld [vmem:[#allocation4 + $0x38] sm:$0xff]  ;;  %v5194_v33 = vmul.f32 %v5186_v55, %v13838_v26  ;;  %v5236_v54 = vmul.f32 %v5228_v24, %v13838_v26  ;;  %v5209_v63 = vmul.f32 %v5207_v48, %v13848_v23  ;;  %v5211_v0 = vmul.f32 %v5207_v48, %v13840_v14 }
 0xbe2   :  { %v5195_v10 = vmul.f32 %v5186_v55, %v13836_v25  ;;  %v5237_v53 = vmul.f32 %v5228_v24, %v13836_v25  ;;  %v5210_v32 = vmul.f32 %v5207_v48, %v13846_v19  ;;  %v5212_v34 = vmul.f32 %v5207_v48, %v13834_v8  ;;  %v5165_v37 = vpop.permute.xlu0 %5164 }
 0xbe3   :  { %v5198_v5 = vpack.c.bf16 %v5194_v33, %v5192_v16  ;;  %v5240_v51 = vpack.c.bf16 %v5236_v54, %v5234_v60  ;;  %v5217_v56 = vpack.c.bf16 %v5211_v0, %v5209_v63  ;;  %v5215_v17 = vmul.f32 %v5207_v48, %v13838_v26 }
 0xbe4   :  { %v5199_v44 = vpack.c.bf16 %v5195_v10, %v5193_v9  ;;  %v5241_v6 = vpack.c.bf16 %v5237_v53, %v5235_v61  ;;  %v5218_v59 = vpack.c.bf16 %v5212_v34, %v5210_v32  ;;  %v5216_v35 = vmul.f32 %v5207_v48, %v13836_v25 }
 0xbe5   :  { %5324 = vrot.lane.b32.xlu1 %v5198_v5, %s12331_s22  ;;  %v5213_v38 = vmul.f32 %v5207_v48, %v13832_v13  ;;  %v5214_v4 = vmul.f32 %v5207_v48, %v13830_v1  ;;  %v5147_v46 = vmul.f32 %v5144_v31, %v13846_v19  ;;  %v5149_v20 = vmul.f32 %v5144_v31, %v13834_v8  ;;  %v5270_v5 = vpop.permute.xlu1 %5269 }
 0xbe6   :  { %5326 = vrot.lane.b32.xlu0 %v5199_v44, %s12331_s22  ;;  %v5146_v62 = vmul.f32 %v5144_v31, %v13848_v23  ;;  %v5148_v11 = vmul.f32 %v5144_v31, %v13840_v14  ;;  %v5151_v58 = vmul.f32 %v5144_v31, %v13830_v1  ;;  %v5153_v18 = vmul.f32 %v5144_v31, %v13836_v25 }
 0xbe7   :  { %v5219_v52 = vpack.c.bf16 %v5215_v17, %v5213_v38  ;;  %v5220_v22 = vpack.c.bf16 %v5216_v35, %v5214_v4  ;;  %v5155_v40 = vpack.c.bf16 %v5149_v20, %v5147_v46  ;;  %v5150_v43 = vmul.f32 %v5144_v31, %v13832_v13  ;;  %v11716_v38 = vld [vmem:[#allocation17 + $0x38] sm:$0xff]  }
 0xbe8   :  { %v5154_v42 = vpack.c.bf16 %v5148_v11, %v5146_v62  ;;  %v5152_v2 = vmul.f32 %v5144_v31, %v13838_v26  ;;  %v5157_v7 = vpack.c.bf16 %v5153_v18, %v5151_v58  ;;  %v5168_v55 = vmul.f32 %v5165_v37, %v13846_v19  ;;  %v11717_v31 = vld [vmem:[#allocation17 + $0x20] sm:$0xff]   ;;  %v11718_v58 = vld [vmem:[#allocation17 + $0x28] sm:$0xff]  }
 0xbe9   :  { %5320 = vrot.lane.b32.xlu1 %v5196_v50, %s12331_s22  ;;  %v5170_v10 = vmul.f32 %v5165_v37, %v13834_v8  ;;  %v5167_v16 = vmul.f32 %v5165_v37, %v13848_v23  ;;  %v5169_v33 = vmul.f32 %v5165_v37, %v13840_v14  ;;  %v5172_v24 = vmul.f32 %v5165_v37, %v13830_v1 }
 0xbea   :  { %5322 = vrot.lane.b32.xlu0 %v5197_v29, %s12331_s22  ;;  %v5156_v9 = vpack.c.bf16 %v5152_v2, %v5150_v43  ;;  %v5174_v44 = vmul.f32 %v5165_v37, %v13836_v25  ;;  %v5171_v57 = vmul.f32 %v5165_v37, %v13832_v13  ;;  %v5173_v30 = vmul.f32 %v5165_v37, %v13838_v26 }
 0xbeb   :  { %v5176_v39 = vpack.c.bf16 %v5170_v10, %v5168_v55  ;;  %v5175_v27 = vpack.c.bf16 %v5169_v33, %v5167_v16  ;;  %v5273_v36 = vmul.f32 %v5270_v5, %v13846_v19  ;;  %v5275_v28 = vmul.f32 %v5270_v5, %v13834_v8 }
 0xbec   :  { %v5178_v29 = vpack.c.bf16 %v5174_v44, %v5172_v24  ;;  %v5177_v50 = vpack.c.bf16 %v5173_v30, %v5171_v57  ;;  %v5272_v15 = vmul.f32 %v5270_v5, %v13848_v23  ;;  %v5274_v45 = vmul.f32 %v5270_v5, %v13840_v14 }
 0xbed   :  { %5583 = vrot.lane.b32.xlu1 %v5238_v49, %s12332_s1  ;;  %v5281_v48 = vpack.c.bf16 %v5275_v28, %v5273_v36  ;;  %v5279_v54 = vmul.f32 %v5270_v5, %v13836_v25  ;;  %v5276_v53 = vmul.f32 %v5270_v5, %v13832_v13  ;;  %v5278_v60 = vmul.f32 %v5270_v5, %v13838_v26 }
 0xbee   :  { %5585 = vrot.lane.b32.xlu0 %v5239_v41, %s12332_s1  ;;  %v5277_v41 = vmul.f32 %v5270_v5, %v13830_v1  ;;  %v5280_v49 = vpack.c.bf16 %v5274_v45, %v5272_v15 }
 0xbef   :  { %v5282_v63 = vpack.c.bf16 %v5278_v60, %v5276_v53 }
 0xbf0   :  { %v5283_v61 = vpack.c.bf16 %v5279_v54, %v5277_v41 }
 0xbf1   :  { %5589 = vrot.lane.b32.xlu1 %v5241_v6, %s12332_s1 }
 0xbf2   :  { %5587 = vrot.lane.b32.xlu0 %v5240_v51, %s12332_s1 }
 0xbf5   :  { %5388 = vrot.lane.b32.xlu1 %v5218_v59, %s12330_s21 }
 0xbf6   :  { %5386 = vrot.lane.b32.xlu0 %v5217_v56, %s12330_s21 }
 0xbf9   :  { %5392 = vrot.lane.b32.xlu1 %v5220_v22, %s12330_s21 }
 0xbfa   :  { %5390 = vrot.lane.b32.xlu0 %v5219_v52, %s12330_s21 }
 0xbfd   :  { %5290 = vrot.lane.b32.xlu1 %v10200_v21, %s12312_s17 }
 0xbfe   :  { %5248 = vrot.lane.b32.xlu0 %v10198_v12, %s12313_s26 }
 0xc01   :  { %5457 = vrot.lane.b32.xlu1 %v5155_v40, %s12328_s8 }
 0xc02   :  { %5455 = vrot.lane.b32.xlu0 %v5154_v42, %s12328_s8 }
 0xc05   :  { %5461 = vrot.lane.b32.xlu1 %v5157_v7, %s12328_s8  ;;  %v11719_v7 = vld [vmem:[#allocation17 + $0x30] sm:$0xff]  }
 0xc06   :  { %5459 = vrot.lane.b32.xlu0 %v5156_v9, %s12328_s8 }
 0xc09   :  { %5757 = vrot.lane.b32.xlu1 %v5176_v39, %s12329_s15 }
 0xc0a   :  { %5755 = vrot.lane.b32.xlu0 %v5175_v27, %s12329_s15 }
 0xc0d   :  { %5761 = vrot.lane.b32.xlu1 %v5178_v29, %s12329_s15 }
 0xc0e   :  { %5759 = vrot.lane.b32.xlu0 %v5177_v50, %s12329_s15  ;;  %v10192_v50 = vld [vmem:[#allocation20] ss:$0 sm:$0xff] }
 0xc0f   :  { %v5127_v54 = vmul.f32 %v10192_v50, %v13848_v23 }
 0xc11   :  { %5932 = vrot.lane.b32.xlu1 %v5281_v48, %s12335_s30 }
 0xc12   :  { %5930 = vrot.lane.b32.xlu0 %v5280_v49, %s12335_s30  ;;  %v11720_v49 = vld [vmem:[#allocation17 + $0x68] sm:$0xff]  }
 0xc15   :  { %5936 = vrot.lane.b32.xlu1 %v5283_v61, %s12335_s30 }
 0xc16   :  { %5934 = vrot.lane.b32.xlu0 %v5282_v63, %s12335_s30 }
 0xc57   :  { %v5325_v51 = vpop.permute.xlu1 %5324 }
 0xc58   :  { %v5327_v0 = vpop.permute.xlu0 %5326 }
 0xc59   :  { %v13928_v17 = vsel %vm5328_vm6, %v5325_v51, %v5327_v0  ;;  %v11721_v51 = vld [vmem:[#allocation17 + $0x70] sm:$0xff]  }
 0xc5b   :  { %v5321_v32 = vpop.permute.xlu1 %5320 }
 0xc5c   :  { %v5323_v6 = vpop.permute.xlu0 %5322 }
 0xc5d   :  { %v13924_v34 = vsel %vm5328_vm6, %v5321_v32, %v5323_v6  ;;  %v5129_v32 = vmul.f32 %v10192_v50, %v13832_v13 }
 0xc5e   :  { %11192 = vmatpush3.bf16.msra.mxu0 %v13924_v34 }
 0xc5f   :  { %11193 = vmatprep.subr.bf16.mxu0 %v13808_v3  ;;  %v5584_v59 = vpop.permute.xlu1 %5583 }
 0xc60   :  { %v5586_v56 = vpop.permute.xlu0 %5585 }
 0xc61   :  { %v13930_v35 = vsel %vm5591_vm7, %v5584_v59, %v5586_v56 }
 0xc62   :  { %11194 = vmatpush3.bf16.msra.mxu0 %v13928_v17  ;;  %11224 = vmatpush3.bf16.msra.mxu1 %v13930_v35 }
 0xc63   :  { %11225 = vmatprep.subr.bf16.mxu1 %v13808_v3  ;;  %11199 = vmatprep.subr.bf16.mxu0 %v13808_v3  ;;  %v5590_v52 = vpop.permute.xlu1 %5589 }
 0xc64   :  { %v5588_v4 = vpop.permute.xlu0 %5587 }
 0xc65   :  { %v13936_v22 = vsel %vm5591_vm7, %v5588_v4, %v5590_v52  ;;  %11196 = vmatmul.mubr.msk.bf16.vlgmr.msra.gmra.mrb[84].mxu0 %vm312_vm0, %v11716_v38  ;;  %v11722_v4 = vld [vmem:[#allocation17 + $0x78] sm:$0xff]   ;;  %v11723_v52 = vld [vmem:[#allocation17 + $0x60] sm:$0xff]  }
 0xc66   :  { %11226 = vmatpush3.bf16.msra.mxu1 %v13936_v22  ;;  %11203 = vmatprep.mubr.msk.bf16.mxu0 %vm12334_vm5, %v13808_v3 }
 0xc67   :  { %11231 = vmatprep.subr.bf16.mxu1 %v13808_v3  ;;  %v5389_v21 = vpop.permute.xlu1 %5388 }
 0xc68   :  { %v5387_v12 = vpop.permute.xlu0 %5386 }
 0xc69   :  { %v13943_v46 = vsel %vm5394_vm8, %v5387_v12, %v5389_v21  ;;  %11228 = vmatmul.mubr.msk.bf16.vlgmr.msra.gmra.mrb[72].mxu1 %vm312_vm0, %v11717_v31  ;;  %v11724_v31 = vld [vmem:[#allocation17 + $0x58] sm:$0xff]   ;;  %v11727_v21 = vld [vmem:[#allocation17 + $0x50] sm:$0xff]  }
 0xc6a   :  { %11200 = vmatpush3.bf16.msra.mxu0 %v13943_v46  ;;  %11232 = vmatpush3.bf16.msra.mxu1 %v13943_v46 }
 0xc6b   :  { %11201 = vmatprep.subr.bf16.mxu0 %v13808_v3  ;;  %11233 = vmatprep.subr.bf16.mxu1 %v13808_v3  ;;  %v5393_v62 = vpop.permute.xlu1 %5392 }
 0xc6c   :  { %v5391_v20 = vpop.permute.xlu0 %5390  ;;  %11235 = vmatprep.mubr.msk.bf16.mxu1 %vm12334_vm5, %v13808_v3 }
 0xc6d   :  { %v13952_v11 = vsel %vm5394_vm8, %v5391_v20, %v5393_v62 }
 0xc6e   :  { %11202 = vmatpush3.bf16.msra.mxu0 %v13952_v11  ;;  %11234 = vmatpush3.bf16.msra.mxu1 %v13952_v11 }
 0xc6f   :  { %11207 = vmatprep.subr.bf16.mxu0 %v13808_v3  ;;  %11239 = vmatprep.subr.bf16.mxu1 %v13808_v3  ;;  %v5291_v37 = vpop.permute.xlu1 %5290 }
 0xc70   :  { %v5249_v18 = vpop.permute.xlu0 %5248  ;;  %v5294_v27 = vmul.f32 %v5291_v37, %v13846_v19  ;;  %v5296_v57 = vmul.f32 %v5291_v37, %v13834_v8  ;;  %v5293_v30 = vmul.f32 %v5291_v37, %v13848_v23  ;;  %v5295_v36 = vmul.f32 %v5291_v37, %v13840_v14 }
 0xc71   :  { %11204 = vmatmul.mubr.msk.bf16.vlgmr.msra.gmra.mrb[84].mxu0 %vm312_vm0, %v11718_v58  ;;  %v5256_v40 = vmul.f32 %v5249_v18, %v13830_v1  ;;  %v5258_v42 = vmul.f32 %v5249_v18, %v13836_v25  ;;  %v5255_v43 = vmul.f32 %v5249_v18, %v13832_v13  ;;  %v5257_v2 = vmul.f32 %v5249_v18, %v13838_v26  ;;  %v11729_v58 = vld [vmem:[#allocation17 + $0x10] sm:$0xff]  }
 0xc72   :  { %v5252_v55 = vmul.f32 %v5249_v18, %v13846_v19  ;;  %v5254_v9 = vmul.f32 %v5249_v18, %v13834_v8  ;;  %11211 = vmatprep.mubr.msk.bf16.mxu0 %vm12334_vm5, %v13808_v3  ;;  %v5251_v33 = vmul.f32 %v5249_v18, %v13848_v23  ;;  %v5253_v24 = vmul.f32 %v5249_v18, %v13840_v14 }
 0xc73   :  { %v5262_v10 = vpack.c.bf16 %v5258_v42, %v5256_v40  ;;  %v5261_v16 = vpack.c.bf16 %v5257_v2, %v5255_v43  ;;  %v5458_v5 = vpop.permute.xlu1 %5457  ;;  %v5128_v8 = vmul.f32 %v10192_v50, %v13840_v14  ;;  %v5302_v48 = vpack.c.bf16 %v5296_v57, %v5294_v27 }
 0xc74   :  { %v5456_v44 = vpop.permute.xlu0 %5455  ;;  %v5260_v28 = vpack.c.bf16 %v5254_v9, %v5252_v55  ;;  %v5259_v29 = vpack.c.bf16 %v5253_v24, %v5251_v33  ;;  %v5301_v41 = vpack.c.bf16 %v5295_v36, %v5293_v30  ;;  %v5298_v53 = vmul.f32 %v5291_v37, %v13830_v1 }
 0xc75   :  { %v5464_v39 = vsel %vm5463_vm9, %v5456_v44, %v5458_v5  ;;  %6007 = vrot.lane.b32.xlu1 %v5262_v10, %s12336_s13  ;;  %6005 = vrot.lane.b32.xlu0 %v5261_v16, %s12336_s13  ;;  %v5300_v60 = vmul.f32 %v5291_v37, %v13836_v25  ;;  %v5297_v61 = vmul.f32 %v5291_v37, %v13832_v13  ;;  %v11730_v10 = vld [vmem:[#allocation17 + $0x18] sm:$0xff]   ;;  %v11731_v44 = vld [vmem:[#allocation17] sm:$0xff]  }
 0xc76   :  { %11236 = vmatmul.mubr.msk.bf16.vlgmr.msra.gmra.mrb[72].mxu1 %vm312_vm0, %v11719_v7  ;;  %11208 = vmatpush3.bf16.msra.mxu0 %v5464_v39  ;;  %v5299_v63 = vmul.f32 %v5291_v37, %v13838_v26  ;;  %v5131_v23 = vpack.c.bf16 %v5128_v8, %v5127_v54  ;;  %v5130_v1 = vmul.f32 %v10192_v50, %v13838_v26 }
 0xc77   :  { %11240 = vmatpush3.bf16.msra.mxu1 %v5464_v39  ;;  %11209 = vmatprep.subr.bf16.mxu0 %v13808_v3  ;;  %v5462_v45 = vpop.permute.xlu1 %5461  ;;  %v5304_v25 = vpack.c.bf16 %v5300_v60, %v5298_v53 }
 0xc78   :  { %v5460_v15 = vpop.permute.xlu0 %5459  ;;  %11241 = vmatprep.subr.bf16.mxu1 %v13808_v3  ;;  %11243 = vmatprep.mubr.msk.bf16.mxu1 %vm12334_vm5, %v13808_v3  ;;  %v5303_v6 = vpack.c.bf16 %v5299_v63, %v5297_v61  ;;  %v5132_v56 = vpack.c.bf16 %v5130_v1, %v5129_v32 }
 0xc79   :  { %v5465_v19 = vsel %vm5463_vm9, %v5460_v15, %v5462_v45  ;;  %6003 = vrot.lane.b32.xlu1 %v5260_v28, %s12336_s13  ;;  %6001 = vrot.lane.b32.xlu0 %v5259_v29, %s12336_s13 }
 0xc7a   :  { %11210 = vmatpush3.bf16.msra.mxu0 %v5465_v19 }
 0xc7b   :  { %11242 = vmatpush3.bf16.msra.mxu1 %v5465_v19  ;;  %11215 = vmatprep.subr.bf16.mxu0 %v13808_v3  ;;  %v5758_v0 = vpop.permute.xlu1 %5757 }
 0xc7c   :  { %11247 = vmatprep.subr.bf16.mxu1 %v13808_v3  ;;  %v5756_v14 = vpop.permute.xlu0 %5755 }
 0xc7d   :  { %6231 = vrot.lane.b32.xlu1 %v5302_v48, %s12337_s27  ;;  %6229 = vrot.lane.b32.xlu0 %v5301_v41, %s12337_s27  ;;  %v5764_v26 = vsel %vm5763_vm10, %v5756_v14, %v5758_v0 }
 0xc7e   :  { %11212 = vmatmul.mubr.msk.bf16.vlgmr.msra.gmra.mrb[84].mxu0 %vm312_vm0, %v11720_v49 }
 0xc7f   :  { %11216 = vmatpush3.bf16.msra.mxu0 %v5131_v23  ;;  %11219 = vmatprep.mubr.msk.bf16.mxu0 %vm12334_vm5, %v13808_v3  ;;  %v5762_v38 = vpop.permute.xlu1 %5761 }
 0xc80   :  { %11217 = vmatprep.subr.bf16.mxu0 %v13808_v3  ;;  %v5760_v59 = vpop.permute.xlu0 %5759 }
 0xc81   :  { %6235 = vrot.lane.b32.xlu1 %v5304_v25, %s12337_s27  ;;  %6233 = vrot.lane.b32.xlu0 %v5303_v6, %s12337_s27  ;;  %v5765_v13 = vsel %vm5763_vm10, %v5760_v59, %v5762_v38 }
 0xc82   :  { %11244 = vmatmul.mubr.msk.bf16.vlgmr.msra.gmra.mrb[72].mxu1 %vm312_vm0, %v11721_v51 }
 0xc83   :  { %11248 = vmatpush3.bf16.msra.mxu1 %v5764_v26  ;;  %11218 = vmatpush3.bf16.msra.mxu0 %v5132_v56 }
 0xc84   :  { %11249 = vmatprep.subr.bf16.mxu1 %v13808_v3  ;;  %11255 = vmatprep.subr.bf16.mxu0 %v13808_v3 }
 0xc85   :  { %11251 = vmatprep.mubr.msk.bf16.mxu1 %vm12334_vm5, %v13808_v3 }
 0xc87   :  { %11250 = vmatpush3.bf16.msra.mxu1 %v5765_v13 }
 0xc88   :  { %11287 = vmatprep.subr.bf16.mxu1 %v13808_v3 }
 0xc8a   :  { %11220 = vmatmul.mubr.msk.bf16.vlgmr.msra.gmra.mrb[84].mxu0 %vm312_vm0, %v11722_v4 }
 0xc8b   :  { %11256 = vmatpush3.bf16.msra.mxu0 %v13924_v34  ;;  %11259 = vmatprep.mubr.msk.bf16.mxu0 %vm12334_vm5, %v13808_v3  ;;  %v11725_v34 = vld [vmem:[#allocation17 + $0x40] sm:$0xff]  }
 0xc8c   :  { %11257 = vmatprep.subr.bf16.mxu0 %v13808_v3 }
 0xc8e   :  { %11252 = vmatmul.mubr.msk.bf16.vlgmr.msra.gmra.mrb[72].mxu1 %vm312_vm0, %v11723_v52 }
 0xc8f   :  { %11258 = vmatpush3.bf16.msra.mxu0 %v13928_v17  ;;  %11288 = vmatpush3.bf16.msra.mxu1 %v13930_v35  ;;  %v5931_v17 = vpop.permute.xlu0 %5930  ;;  %v5933_v35 = vpop.permute.xlu1 %5932 }
 0xc90   :  { %11263 = vmatprep.subr.bf16.mxu0 %v13808_v3  ;;  %11289 = vmatprep.subr.bf16.mxu1 %v13808_v3  ;;  %v5939_v12 = vsel %vm5938_vm11, %v5931_v17, %v5933_v35 }
 0xc91   :  { %11291 = vmatprep.mubr.msk.bf16.mxu1 %vm12334_vm5, %v13808_v3 }
 0xc92   :  { %11260 = vmatmul.mubr.msk.bf16.vlgmr.msra.gmra.mrb[88].mxu0 %vm312_vm0, %v11724_v31 }
 0xc93   :  { %11264 = vmatpush3.bf16.msra.mxu0 %v13943_v46  ;;  %11290 = vmatpush3.bf16.msra.mxu1 %v13936_v22  ;;  %v11726_v22 = vld [vmem:[#allocation17 + $0x48] sm:$0xff]   ;;  %v5937_v20 = vpop.permute.xlu1 %5936 }
 0xc94   :  { %11265 = vmatprep.subr.bf16.mxu0 %v13808_v3  ;;  %11295 = vmatprep.subr.bf16.mxu1 %v13808_v3 }
 0xc95   :  { %11267 = vmatprep.mubr.msk.bf16.mxu0 %vm12334_vm5, %v13808_v3 }
 0xc96   :  { %11292 = vmatmul.mubr.msk.bf16.vlgmr.msra.gmra.mrb[76].mxu1 %vm312_vm0, %v11725_v34 }
 0xc97   :  { %11266 = vmatpush3.bf16.msra.mxu0 %v13952_v11  ;;  %11296 = vmatpush3.bf16.msra.mxu1 %v13943_v46  ;;  %v5935_v46 = vpop.permute.xlu0 %5934 }
 0xc98   :  { %11297 = vmatprep.subr.bf16.mxu1 %v13808_v3  ;;  %11271 = vmatprep.subr.bf16.mxu0 %v13808_v3  ;;  %v5940_v62 = vsel %vm5938_vm11, %v5935_v46, %v5937_v20 }
 0xc99   :  { %11299 = vmatprep.mubr.msk.bf16.mxu1 %vm12334_vm5, %v13808_v3 }
 0xc9b   :  { %11298 = vmatpush3.bf16.msra.mxu1 %v13952_v11  ;;  %v11728_v11 = vld [vmem:[#allocation17 + $0x8] sm:$0xff]  }
 0xc9c   :  { %11303 = vmatprep.subr.bf16.mxu1 %v13808_v3 }
 0xc9e   :  { %11268 = vmatmul.mubr.msk.bf16.vlgmr.msra.gmra.mrb[88].mxu0 %vm312_vm0, %v11726_v22 }
 0xc9f   :  { %11272 = vmatpush3.bf16.msra.mxu0 %v5939_v12  ;;  %11275 = vmatprep.mubr.msk.bf16.mxu0 %vm12334_vm5, %v13808_v3 }
 0xca0   :  { %11273 = vmatprep.subr.bf16.mxu0 %v13808_v3 }
 0xca2   :  { %11300 = vmatmul.mubr.msk.bf16.vlgmr.msra.gmra.mrb[76].mxu1 %vm312_vm0, %v11727_v21 }
 0xca3   :  { %11274 = vmatpush3.bf16.msra.mxu0 %v5940_v62  ;;  %11304 = vmatpush3.bf16.msra.mxu1 %v5939_v12 }
 0xca4   :  { %11305 = vmatprep.subr.bf16.mxu1 %v13808_v3  ;;  %11307 = vmatprep.mubr.msk.bf16.mxu1 %vm12334_vm5, %v13808_v3 }
 0xca5   :  { %11279 = vmatprep.subr.bf16.mxu0 %v13808_v3 }
 0xca7   :  { %11306 = vmatpush3.bf16.msra.mxu1 %v5940_v62 }
 0xca8   :  { %11311 = vmatprep.subr.bf16.mxu1 %v13808_v3 }
 0xcaa   :  { %11276 = vmatmul.mubr.msk.bf16.vlgmr.msra.gmra.mrb[88].mxu0 %vm312_vm0, %v11728_v11 }
 0xcab   :  { %11283 = vmatprep.mubr.msk.bf16.mxu0 %vm12334_vm5, %v13808_v3 }
 0xcae   :  { %11308 = vmatmul.mubr.msk.bf16.vlgmr.msra.gmra.mrb[76].mxu1 %vm312_vm0, %v11729_v58  ;;  %v11732_v58 = vld [vmem:[%s15149_s14 + $0x100] ss:$16 sps:$4 sm:$0xff]  }
 0xcaf   :  { %11315 = vmatprep.mubr.msk.bf16.mxu1 %vm12334_vm5, %v13808_v3 }
 0xce7   :  { %v6006_v18 = vpop.permute.xlu0 %6005  ;;  %v6008_v37 = vpop.permute.xlu1 %6007 }
 0xce8   :  { %v6011_v55 = vsel %vm6009_vm12, %v6006_v18, %v6008_v37  ;;  %v11734_v18 = vld [vmem:[%s15149_s14 + $0x104] ss:$16 sps:$4 sm:$0xff]   ;;  %v11735_v37 = vld [vmem:[%s15149_s14 + $0x108] ss:$16 sps:$4 sm:$0xff]  }
 0xceb   :  { %v6002_v40 = vpop.permute.xlu0 %6001  ;;  %v6004_v42 = vpop.permute.xlu1 %6003 }
 0xcec   :  { %v6010_v43 = vsel %vm6009_vm12, %v6002_v40, %v6004_v42  ;;  %v11737_v40 = vld [vmem:[%s15149_s14 + $0x10c] ss:$16 sps:$4 sm:$0xff]   ;;  %v11740_v42 = vld [vmem:[%s15149_s14 + $0x124] ss:$16 sps:$4 sm:$0xff]  }
 0xced   :  { %11280 = vmatpush3.bf16.msra.mxu0 %v6010_v43  ;;  %v11743_v43 = vld [vmem:[%s15149_s14 + $0x12c] ss:$16 sps:$4 sm:$0xff]  }
 0xcee   :  { %11281 = vmatprep.subr.bf16.mxu0 %v13808_v3 }
 0xcef   :  { %v6230_v2 = vpop.permute.xlu0 %6229  ;;  %v6232_v7 = vpop.permute.xlu1 %6231 }
 0xcf0   :  { %v6238_v9 = vsel %vm6237_vm13, %v6230_v2, %v6232_v7  ;;  %v11738_v2 = vld [vmem:[%s15149_s14 + $0x120] ss:$16 sps:$4 sm:$0xff]   ;;  %v11741_v7 = vld [vmem:[%s15149_s14 + $0x128] ss:$16 sps:$4 sm:$0xff]  }
 0xcf1   :  { %11282 = vmatpush3.bf16.msra.mxu0 %v6011_v55  ;;  %11312 = vmatpush3.bf16.msra.mxu1 %v6238_v9  ;;  %v11746_v55 = vld [vmem:[%s15149_s14 + $0x144] ss:$16 sps:$4 sm:$0xff]   ;;  %v11749_v9 = vld [vmem:[%s15149_s14 + $0x14c] ss:$16 sps:$4 sm:$0xff]  }
 0xcf2   :  { %11313 = vmatprep.subr.bf16.mxu1 %v13808_v3  ;;  %6665 = vmatprep.subr.bf16.mxu0 %v11734_v18  ;;  %v11771_v18 = vld [vmem:[%s15149_s14 + $0x1c8] ss:$16 sps:$4 sm:$0xff]  }
 0xcf3   :  { %v6234_v16 = vpop.permute.xlu0 %6233  ;;  %v6236_v33 = vpop.permute.xlu1 %6235 }
 0xcf4   :  { %v6239_v24 = vsel %vm6237_vm13, %v6234_v16, %v6236_v33  ;;  %11284 = vmatmul.mubr.msk.bf16.vlgmr.msra.gmra.mrb[88].mxu0 %vm312_vm0, %v11730_v10  ;;  %v11744_v10 = vld [vmem:[%s15149_s14 + $0x140] ss:$16 sps:$4 sm:$0xff]   ;;  %v11747_v16 = vld [vmem:[%s15149_s14 + $0x148] ss:$16 sps:$4 sm:$0xff]   ;;  %v11752_v33 = vld [vmem:[%s15149_s14 + $0x164] ss:$16 sps:$4 sm:$0xff]  }
 0xcf5   :  { %11314 = vmatpush3.bf16.msra.mxu1 %v6239_v24  ;;  %6697 = vmatprep.mubr.bf16.mxu0 %v12320_v47  ;;  %v11755_v24 = vld [vmem:[%s15149_s14 + $0x16c] ss:$16 sps:$4 sm:$0xff]  }
 0xcf6   :  { %6708 = vmatprep.subr.bf16.mxu1 %v11737_v40  ;;  %6666 = vmatpush1.bf16.msra.mxu0 %v11732_v58  ;;  %v11770_v58 = vld [vmem:[%s15149_s14 + $0x1c4] ss:$16 sps:$4 sm:$0xff]   ;;  %v11774_v40 = vld [vmem:[%s15149_s14 + $0x1e0] ss:$16 sps:$4 sm:$0xff]  }
 0xcf7   :  { %6667 = vmatprep.subr.bf16.mxu0 %v11740_v42  ;;  %v11776_v42 = vld [vmem:[%s15149_s14 + $0x1e4] ss:$16 sps:$4 sm:$0xff]  }
 0xcf8   :  { %11316 = vmatmul.mubr.msk.bf16.vlgmr.msra.gmra.mrb[76].mxu1 %vm312_vm0, %v11731_v44  ;;  %v11750_v44 = vld [vmem:[%s15149_s14 + $0x160] ss:$16 sps:$4 sm:$0xff]  }
 0xcf9   :  { %6740 = vmatprep.mubr.bf16.mxu1 %v12320_v47  ;;  %6709 = vmatpush1.bf16.msra.mxu1 %v11735_v37  ;;  %v11773_v37 = vld [vmem:[%s15149_s14 + $0x1cc] ss:$16 sps:$4 sm:$0xff]  }
 0xcfa   :  { %6710 = vmatprep.subr.bf16.mxu1 %v11743_v43  ;;  %6668 = vmatpush1.bf16.msra.mxu0 %v11738_v2  ;;  %v11777_v43 = vld [vmem:[%s15149_s14 + $0x1e8] ss:$16 sps:$4 sm:$0xff]   ;;  %v11779_v2 = vld [vmem:[%s15149_s14 + $0x1ec] ss:$16 sps:$4 sm:$0xff]  }
 0xcfb   :  { %6669 = vmatprep.subr.bf16.mxu0 %v11746_v55  ;;  %v11785_v55 = vld [vmem:[%s15149_s14 + $0xc] ss:$16 sps:$4 sm:$0xff]  }
 0xcfd   :  { %6711 = vmatpush1.bf16.msra.mxu1 %v11741_v7  ;;  %v11782_v7 = vld [vmem:[%s15149_s14 + $0x4] ss:$16 sps:$4 sm:$0xff]  }
 0xcfe   :  { %6712 = vmatprep.subr.bf16.mxu1 %v11749_v9  ;;  %6670 = vmatpush1.bf16.msra.mxu0 %v11744_v10 }
 0xcff   :  { %6671 = vmatprep.subr.bf16.mxu0 %v11752_v33 }
 0xd01   :  { %6713 = vmatpush1.bf16.msra.mxu1 %v11747_v16 }
 0xd02   :  { %6714 = vmatprep.subr.bf16.mxu1 %v11755_v24  ;;  %6672 = vmatpush1.bf16.msra.mxu0 %v11750_v44 }
 0xd5d   :  { %v14066_v5 = vpop.f32.mrb[84].mxu0 }
 0xd5e   :  { %6292 = vadd.xlane.f32.xlu0 %v14066_v5  ;;  %v11221_v39 = vpop.f32.mrb[85].mxu0 }
 0xd5f   :  { %v14069_v3 = vpop.f32.mrb[86].mxu0  ;;  %v11753_v39 = vld [vmem:[%s15149_s14 + $0x168] ss:$16 sps:$4 sm:$0xff]  }
 0xd60   :  { %v11222_v27 = vpop.f32.mrb[87].mxu0  ;;  %6294 = vadd.xlane.f32.xlu1 %v14069_v3  ;;  %6715 = vmatpush1.bf16.msra.mxu1 %v11753_v39 }
 0xd61   :  { %v14072_v57 = vpop.f32.mrb[72].mxu1  ;;  %v11758_v27 = vld [vmem:[%s15149_s14 + $0x184] ss:$16 sps:$4 sm:$0xff]  }
 0xd62   :  { %6296 = vadd.xlane.f32.xlu0 %v14072_v57  ;;  %v11253_v30 = vpop.f32.mrb[73].mxu1  ;;  %6673 = vmatprep.subr.bf16.mxu0 %v11758_v27 }
 0xd63   :  { %v14075_v36 = vpop.f32.mrb[74].mxu1  ;;  %v11761_v30 = vld [vmem:[%s15149_s14 + $0x18c] ss:$16 sps:$4 sm:$0xff]  }
 0xd64   :  { %v11254_v28 = vpop.f32.mrb[75].mxu1  ;;  %6716 = vmatprep.subr.bf16.mxu1 %v11761_v30 }
 0xd65   :  { %v11756_v28 = vld [vmem:[%s15149_s14 + $0x180] ss:$16 sps:$4 sm:$0xff]  }
 0xd66   :  { %6298 = vadd.xlane.f32.xlu0 %v14075_v36  ;;  %6674 = vmatpush1.bf16.msra.mxu0 %v11756_v28 }
 0xdc7   :  { %v14078_v29 = vpop.f32.mrb[88].mxu0 }
 0xdc8   :  { %6302 = vadd.xlane.f32.xlu1 %v14078_v29  ;;  %v11285_v50 = vpop.f32.mrb[89].mxu0 }
 0xdc9   :  { %v14081_v15 = vpop.f32.mrb[90].mxu0  ;;  %v11759_v50 = vld [vmem:[%s15149_s14 + $0x188] ss:$16 sps:$4 sm:$0xff]  }
 0xdca   :  { %6304 = vadd.xlane.f32.xlu0 %v14081_v15  ;;  %v11286_v45 = vpop.f32.mrb[91].mxu0  ;;  %6717 = vmatpush1.bf16.msra.mxu1 %v11759_v50 }
 0xdcb   :  { %v14084_v19 = vpop.f32.mrb[76].mxu1 }
 0xdcc   :  { %6308 = vadd.xlane.f32.xlu1 %v14084_v19  ;;  %v11317_v8 = vpop.f32.mrb[77].mxu1 }
 0xdcd   :  { %v14087_v48 = vpop.f32.mrb[78].mxu1 }
 0xdce   :  { %6310 = vadd.xlane.f32.xlu0 %v14087_v48  ;;  %v11318_v41 = vpop.f32.mrb[79].mxu1 }
 0xdeb   :  { %v6293_v49 = vpop.xlane.xlu0 %6292 }
 0xded   :  { %v6295_v53 = vpop.xlane.xlu1 %6294 }
 0xdef   :  { %v6297_v54 = vpop.xlane.xlu0 %6296 }
 0xdf0   :  { %v6300_v63 = vadd.f32 %v6297_v54, %v6293_v49 }
 0xdf3   :  { %v6299_v60 = vpop.xlane.xlu0 %6298 }
 0xdf4   :  { %v6301_v0 = vadd.f32 %v6299_v60, %v6295_v53 }
 0xe55   :  { %v6303_v61 = vpop.xlane.xlu1 %6302 }
 0xe56   :  { %v6306_v23 = vadd.f32 %v6303_v61, %v6300_v63 }
 0xe57   :  { %v6305_v14 = vpop.xlane.xlu0 %6304 }
 0xe58   :  { %v6307_v51 = vadd.f32 %v6305_v14, %v6301_v0 }
 0xe59   :  { %v6309_v1 = vpop.xlane.xlu1 %6308 }
 0xe5a   :  { %v6312_v25 = vadd.f32 %v6309_v1, %v6306_v23 }
 0xe5b   :  { %v6311_v6 = vpop.xlane.xlu0 %6310 }
 0xe5c   :  { %v14090_v32 = vmul.f32 0.001953125, %v6312_v25  ;;  %v6313_v56 = vadd.f32 %v6311_v6, %v6307_v51 }
 0xe5e   :  { %v14092_v26 = vmul.f32 0.001953125, %v6313_v56  ;;  %v6317_v59 = vsub.f32 %v14066_v5, %v14090_v32  ;;  %v6325_v4 = vsub.f32 %v14072_v57, %v14090_v32  ;;  %v6335_v17 = vsub.f32 %v14078_v29, %v14090_v32 }
 0xe5f   :  { %v6345_v21 = vsub.f32 %v14084_v19, %v14090_v32 }
 0xe60   :  { %v6319_v38 = vmul.f32 %v6317_v59, %v6317_v59  ;;  %v6318_v13 = vsub.f32 %v14069_v3, %v14092_v26  ;;  %v6326_v31 = vsub.f32 %v14075_v36, %v14092_v26  ;;  %v6327_v34 = vmul.f32 %v6325_v4, %v6325_v4  ;;  %v6289_v4 = vld [vmem:[#allocation19 + $0x8] sm:$0xff] }
 0xe61   :  { %v6336_v22 = vsub.f32 %v14081_v15, %v14092_v26  ;;  %v6337_v12 = vmul.f32 %v6335_v17, %v6335_v17  ;;  %v6346_v20 = vsub.f32 %v14087_v48, %v14092_v26  ;;  %v6347_v62 = vmul.f32 %v6345_v21, %v6345_v21  ;;  %v11762_v21 = vld [vmem:[%s15149_s14 + $0x1a0] ss:$16 sps:$4 sm:$0xff]  }
 0xe62   :  { %6321 = vadd.xlane.f32.xlu1 %v6319_v38  ;;  %v6320_v52 = vmul.f32 %v6318_v13, %v6318_v13  ;;  %v6328_v35 = vmul.f32 %v6326_v31, %v6326_v31  ;;  %v6288_v38 = vld [vmem:[#allocation19] sm:$0xff] }
 0xe63   :  { %v6338_v46 = vmul.f32 %v6336_v22, %v6336_v22  ;;  %v6348_v11 = vmul.f32 %v6346_v20, %v6346_v20  ;;  %v11765_v20 = vld [vmem:[%s15149_s14 + $0x1a8] ss:$16 sps:$4 sm:$0xff]  }
 0xe64   :  { %6323 = vadd.xlane.f32.xlu0 %v6320_v52 }
 0xe66   :  { %6329 = vadd.xlane.f32.xlu1 %v6327_v34  ;;  %v6290_v34 = vld [vmem:[%s15147_s12] sm:$0xff] }
 0xe68   :  { %6331 = vadd.xlane.f32.xlu0 %v6328_v35 }
 0xe6a   :  { %6339 = vadd.xlane.f32.xlu1 %v6337_v12 }
 0xe6c   :  { %6341 = vadd.xlane.f32.xlu0 %v6338_v46  ;;  %v11764_v46 = vld [vmem:[%s15149_s14 + $0x1a4] ss:$16 sps:$4 sm:$0xff]  }
 0xe6d   :  { %6675 = vmatprep.subr.bf16.mxu0 %v11764_v46  ;;  %v11792_v46 = vld [vmem:[%s15149_s14 + $0x40] ss:$16 sps:$4 sm:$0xff]  }
 0xe6e   :  { %6349 = vadd.xlane.f32.xlu1 %v6347_v62  ;;  %6676 = vmatpush1.bf16.msra.mxu0 %v11762_v21  ;;  %v11797_v21 = vld [vmem:[%s15149_s14 + $0x4c] ss:$16 sps:$4 sm:$0xff]  }
 0xe6f   :  { %6677 = vmatprep.subr.bf16.mxu0 %v11770_v58  ;;  %v11806_v58 = vld [vmem:[%s15149_s14 + $0x84] ss:$16 sps:$4 sm:$0xff]  }
 0xe70   :  { %6351 = vadd.xlane.f32.xlu0 %v6348_v11  ;;  %v11768_v11 = vld [vmem:[%s15149_s14 + $0x1c0] ss:$16 sps:$4 sm:$0xff]  }
 0xe72   :  { %6678 = vmatpush1.bf16.msra.mxu0 %v11768_v11  ;;  %v11801_v11 = vld [vmem:[%s15149_s14 + $0x68] ss:$16 sps:$4 sm:$0xff]  }
 0xe73   :  { %6679 = vmatprep.subr.bf16.mxu0 %v11776_v42  ;;  %v11812_v42 = vld [vmem:[%s15149_s14 + $0xa4] ss:$16 sps:$4 sm:$0xff]  }
 0xe76   :  { %6680 = vmatpush1.bf16.msra.mxu0 %v11774_v40  ;;  %v11807_v40 = vld [vmem:[%s15149_s14 + $0x88] ss:$16 sps:$4 sm:$0xff]  }
 0xe77   :  { %6911 = vmatprep.subr.bf16.mxu0 %v11782_v7  ;;  %v11813_v7 = vld [vmem:[%s15149_s14 + $0xa8] ss:$16 sps:$4 sm:$0xff]  }
 0xeef   :  { %v6322_v45 = vpop.xlane.xlu1 %6321 }
 0xef1   :  { %v6324_v8 = vpop.xlane.xlu0 %6323 }
 0xef3   :  { %v6330_v41 = vpop.xlane.xlu1 %6329 }
 0xef4   :  { %v6333_v53 = vadd.f32 %v6330_v41, %v6322_v45 }
 0xef5   :  { %v6332_v49 = vpop.xlane.xlu0 %6331 }
 0xef6   :  { %v6334_v61 = vadd.f32 %v6332_v49, %v6324_v8 }
 0xef7   :  { %v6340_v54 = vpop.xlane.xlu1 %6339 }
 0xef8   :  { %v6343_v63 = vadd.f32 %v6340_v54, %v6333_v53 }
 0xef9   :  { %v6342_v60 = vpop.xlane.xlu0 %6341 }
 0xefa   :  { %v6344_v0 = vadd.f32 %v6342_v60, %v6334_v61 }
 0xefb   :  { %v6350_v14 = vpop.xlane.xlu1 %6349 }
 0xefc   :  { %v6353_v23 = vadd.f32 %v6350_v14, %v6343_v63 }
 0xefd   :  { %v6352_v1 = vpop.xlane.xlu0 %6351 }
 0xefe   :  { %v6355_v51 = vmul.f32 0.001953125, %v6353_v23  ;;  %v6354_v25 = vadd.f32 %v6352_v1, %v6344_v0 }
 0xf00   :  { %v6357_v6 = vadd.f32 1e-05, %v6355_v51  ;;  %v6356_v56 = vmul.f32 0.001953125, %v6354_v25  ;;  %v11780_v51 = vld [vmem:[%s15149_s14] ss:$16 sps:$4 sm:$0xff]  }
 0xf01   :  { %v11783_v25 = vld [vmem:[%s15149_s14 + $0x8] ss:$16 sps:$4 sm:$0xff]  }
 0xf02   :  { %11948 = vrsqrt.f32 %v6357_v6  ;;  %v6358_v59 = vadd.f32 1e-05, %v6356_v56 }
 0xf04   :  { %11950 = vrsqrt.f32 %v6358_v59 }
 0xf0c   :  { %v11949_v13 = vpop.eup %11948 }
 0xf0d   :  { %v6361_v52 = vmul.f32 %v11949_v13, %v6288_v38  ;;  %v11788_v38 = vld [vmem:[%s15149_s14 + $0x24] ss:$16 sps:$4 sm:$0xff]   ;;  %v11791_v13 = vld [vmem:[%s15149_s14 + $0x2c] ss:$16 sps:$4 sm:$0xff]  }
 0xf0e   :  { %v11951_v31 = vpop.eup %11950 }
 0xf0f   :  { %6369 = vperm.xlu1 %11606, %v6361_v52   ;;  %v6362_v17 = vmul.f32 %v11951_v31, %v6289_v4  ;;  %v6363_v35 = vmul.f32 %v6361_v52, %v14090_v32  ;;  %v6291_v32 = vld [vmem:[%s15147_s12 + $0x8] sm:$0xff] }
 0xf11   :  { %6374 = vperm.xlu0 %11607, %v6362_v17   ;;  %v6365_v22 = vsub.f32 %v6290_v34, %v6363_v35  ;;  %v6364_v12 = vmul.f32 %v6362_v17, %v14092_v26  ;;  %v11767_v26 = vld [vmem:[%s15149_s14 + $0x1ac] ss:$16 sps:$4 sm:$0xff]   ;;  %v11786_v35 = vld [vmem:[%s15149_s14 + $0x20] ss:$16 sps:$4 sm:$0xff]  }
 0xf12   :  { %6718 = vmatprep.subr.bf16.mxu1 %v11767_v26  ;;  %v11803_v26 = vld [vmem:[%s15149_s14 + $0x6c] ss:$16 sps:$4 sm:$0xff]  }
 0xf13   :  { %6381 = vperm.xlu1 %11606, %v6365_v22   ;;  %v6366_v62 = vsub.f32 %v6291_v32, %v6364_v12  ;;  %6719 = vmatpush1.bf16.msra.mxu1 %v11765_v20  ;;  %v11789_v22 = vld [vmem:[%s15149_s14 + $0x28] ss:$16 sps:$4 sm:$0xff]   ;;  %v11794_v12 = vld [vmem:[%s15149_s14 + $0x44] ss:$16 sps:$4 sm:$0xff]  }
 0xf14   :  { %6720 = vmatprep.subr.bf16.mxu1 %v11773_v37  ;;  %v11795_v20 = vld [vmem:[%s15149_s14 + $0x48] ss:$16 sps:$4 sm:$0xff]   ;;  %v11800_v32 = vld [vmem:[%s15149_s14 + $0x64] ss:$16 sps:$4 sm:$0xff]   ;;  %v11804_v37 = vld [vmem:[%s15149_s14 + $0x80] ss:$16 sps:$4 sm:$0xff]  }
 0xf17   :  { %6386 = vperm.xlu1 %11606, %v6366_v62   ;;  %6721 = vmatpush1.bf16.msra.mxu1 %v11771_v18  ;;  %v11798_v62 = vld [vmem:[%s15149_s14 + $0x60] ss:$16 sps:$4 sm:$0xff]   ;;  %v11809_v18 = vld [vmem:[%s15149_s14 + $0x8c] ss:$16 sps:$4 sm:$0xff]  }
 0xf18   :  { %6722 = vmatprep.subr.bf16.mxu1 %v11779_v2  ;;  %v11810_v2 = vld [vmem:[%s15149_s14 + $0xa0] ss:$16 sps:$4 sm:$0xff]  }
 0xf1b   :  { %6723 = vmatpush1.bf16.msra.mxu1 %v11777_v43  ;;  %v11815_v43 = vld [vmem:[%s15149_s14 + $0xac] ss:$16 sps:$4 sm:$0xff]  }
 0xf1c   :  { %6954 = vmatprep.subr.bf16.mxu1 %v11785_v55  ;;  %v11818_v55 = vld [vmem:[%s15149_s14 + $0xc4] ss:$16 sps:$4 sm:$0xff]  }
 0xf8e   :  { %v6370_v9 = vpop.permute.xlu1 %6369 }
 0xf8f   :  { %v6377_v10 = vmul.f32 %v6370_v9, %v14066_v5  ;;  %v6397_v16 = vmul.f32 %v6370_v9, %v14072_v57  ;;  %v6407_v33 = vmul.f32 %v6370_v9, %v14078_v29  ;;  %v6417_v24 = vmul.f32 %v6370_v9, %v14084_v19  ;;  %v11821_v9 = vld [vmem:[%s15149_s14 + $0xcc] ss:$16 sps:$4 sm:$0xff]  }
 0xf90   :  { %v6375_v44 = vpop.permute.xlu0 %6374 }
 0xf91   :  { %v6378_v45 = vmul.f32 %v6375_v44, %v14069_v3  ;;  %v6398_v8 = vmul.f32 %v6375_v44, %v14075_v36  ;;  %v6408_v41 = vmul.f32 %v6375_v44, %v14081_v15  ;;  %v6418_v5 = vmul.f32 %v6375_v44, %v14087_v48  ;;  %v11822_v44 = vld [vmem:[%s15149_s14 + $0xe0] ss:$16 sps:$4 sm:$0xff]  }
 0xf92   :  { %v6382_v39 = vpop.permute.xlu1 %6381 }
 0xf93   :  { %v6389_v27 = vadd.f32 %v6382_v39, %v6377_v10  ;;  %v6399_v30 = vadd.f32 %v6397_v16, %v6382_v39  ;;  %v6409_v28 = vadd.f32 %v6407_v33, %v6382_v39  ;;  %v6419_v50 = vadd.f32 %v6417_v24, %v6382_v39  ;;  %v11816_v10 = vld [vmem:[%s15149_s14 + $0xc0] ss:$16 sps:$4 sm:$0xff]   ;;  %v11819_v16 = vld [vmem:[%s15149_s14 + $0xc8] ss:$16 sps:$4 sm:$0xff]   ;;  %v11824_v33 = vld [vmem:[%s15149_s14 + $0xe4] ss:$16 sps:$4 sm:$0xff]  }
 0xf94   :  { %v11827_v24 = vld [vmem:[%s15149_s14 + $0xec] ss:$16 sps:$4 sm:$0xff]   ;;  %v11825_v39 = vld [vmem:[%s15149_s14 + $0xe8] ss:$16 sps:$4 sm:$0xff]  }
 0xf95   :  { %vm6391_vm14 = vcmp.ge.f32.partialorder %v6389_v27, 0.0  ;;  %v6393_v57 = vmul.f32 0.2, %v6389_v27  ;;  %vm6401_vm15 = vcmp.ge.f32.partialorder %v6399_v30, 0.0  ;;  %v6403_v29 = vmul.f32 0.2, %v6399_v30 }
 0xf96   :  { %vm6411_vm3 = vcmp.ge.f32.partialorder %v6409_v28, 0.0  ;;  %v6413_v19 = vmul.f32 0.2, %v6409_v28  ;;  %vm6421_vm4 = vcmp.ge.f32.partialorder %v6419_v50, 0.0  ;;  %v6423_v49 = vmul.f32 0.2, %v6419_v50  ;;  %v6387_v54 = vpop.permute.xlu1 %6386 }
 0xf97   :  { %v6390_v53 = vadd.f32 %v6387_v54, %v6378_v45  ;;  %v6400_v60 = vadd.f32 %v6398_v8, %v6387_v54  ;;  %v6410_v61 = vadd.f32 %v6408_v41, %v6387_v54  ;;  %v6420_v63 = vadd.f32 %v6418_v5, %v6387_v54  ;;  %v11836_v45 = vld [vmem:[%s15149_s14 + $0x224] ss:$16 sps:$4 sm:$0xff]   ;;  %v11839_v8 = vld [vmem:[%s15149_s14 + $0x22c] ss:$16 sps:$4 sm:$0xff]   ;;  %v11834_v41 = vld [vmem:[%s15149_s14 + $0x220] ss:$16 sps:$4 sm:$0xff]  }
 0xf98   :  { %v6405_v3 = vsel %vm6401_vm15, %v6399_v30, %v6403_v29  ;;  %v6395_v14 = vsel %vm6391_vm14, %v6389_v27, %v6393_v57  ;;  %v6415_v36 = vsel %vm6411_vm3, %v6409_v28, %v6413_v19  ;;  %v6425_v0 = vsel %vm6421_vm4, %v6419_v50, %v6423_v49  ;;  %v11830_v27 = vld [vmem:[%s15149_s14 + $0x204] ss:$16 sps:$4 sm:$0xff]   ;;  %v11833_v30 = vld [vmem:[%s15149_s14 + $0x20c] ss:$16 sps:$4 sm:$0xff]   ;;  %v11828_v28 = vld [vmem:[%s15149_s14 + $0x200] ss:$16 sps:$4 sm:$0xff]  }
 0xf99   :  { %vm6392_vm5 = vcmp.ge.f32.partialorder %v6390_v53, 0.0  ;;  %v6394_v15 = vmul.f32 0.2, %v6390_v53  ;;  %vm6402_vm6 = vcmp.ge.f32.partialorder %v6400_v60, 0.0  ;;  %v6404_v48 = vmul.f32 0.2, %v6400_v60  ;;  %6427 = vst [vmem:[%s15155_s20] sm:$0xff] %v6395_v14 }
 0xf9a   :  { %10233 = vst [vmem:[%s15155_s20 + $0x10] sm:$0xff] %v6405_v3  ;;  %10235 = vst [vmem:[%s15155_s20 + $0x20] sm:$0xff] %v6415_v36  ;;  %vm6412_vm7 = vcmp.ge.f32.partialorder %v6410_v61, 0.0  ;;  %v6414_v23 = vmul.f32 0.2, %v6410_v61  ;;  %vm6422_vm8 = vcmp.ge.f32.partialorder %v6420_v63, 0.0 }
 0xf9b   :  { %10237 = vst [vmem:[%s15155_s20 + $0x30] sm:$0xff] %v6425_v0  ;;  %v6424_v1 = vmul.f32 0.2, %v6420_v63  ;;  %v6406_v6 = vsel %vm6402_vm6, %v6400_v60, %v6404_v48  ;;  %v6396_v56 = vsel %vm6392_vm5, %v6390_v53, %v6394_v15  ;;  %v11831_v50 = vld [vmem:[%s15149_s14 + $0x208] ss:$16 sps:$4 sm:$0xff]   ;;  %vm261_vm14 = vcmask 277504  }
 0xf9c   :  { %10234 = vst [vmem:[%s15155_s20 + $0x18] sm:$0xff] %v6406_v6  ;;  %v6471_v59 = vpack.c.bf16 %v6406_v6, %v6405_v3  ;;  %6428 = vst [vmem:[%s15155_s20 + $0x8] sm:$0xff] %v6396_v56  ;;  %v14258_v4 = vpack.c.bf16 %v6396_v56, %v6395_v14  ;;  %v6416_v52 = vsel %vm6412_vm7, %v6410_v61, %v6414_v23  ;;  %v11837_v5 = vld [vmem:[%s15149_s14 + $0x228] ss:$16 sps:$4 sm:$0xff]   ;;  %v11842_v57 = vld [vmem:[%s15149_s14 + $0x244] ss:$16 sps:$4 sm:$0xff]  }
 0xf9d   :  { %v6426_v31 = vsel %vm6422_vm8, %v6420_v63, %v6424_v1  ;;  %10236 = vst [vmem:[%s15155_s20 + $0x28] sm:$0xff] %v6416_v52  ;;  %v14263_v34 = vpack.c.bf16 %v6416_v52, %v6415_v36  ;;  %v11845_v29 = vld [vmem:[%s15149_s14 + $0x24c] ss:$16 sps:$4 sm:$0xff]   ;;  %v11840_v19 = vld [vmem:[%s15149_s14 + $0x240] ss:$16 sps:$4 sm:$0xff]   ;;  %vm7614_vm15 = vcmask 1047688  }
 0xf9e   :  { %10238 = vst [vmem:[%s15155_s20 + $0x38] sm:$0xff] %v6426_v31  ;;  %v14268_v17 = vpack.c.bf16 %v6426_v31, %v6425_v0  ;;  %6698 = vmatmul.mubr.bf16.vlgmr.msra.gmra.mrb[92].mxu0 %v6471_v59  ;;  %6741 = vmatmul.mubr.bf16.vlgmr.msra.gmra.mrb[80].mxu1 %v6471_v59  ;;  %v11843_v49 = vld [vmem:[%s15149_s14 + $0x248] ss:$16 sps:$4 sm:$0xff]   ;;  %v11848_v54 = vld [vmem:[%s15149_s14 + $0x264] ss:$16 sps:$4 sm:$0xff]   ;;  %vm7597_vm3 = vcmask 138240  }
 0xf9f   :  { %6912 = vmatpush1.bf16.msra.mxu0 %v11780_v51  ;;  %6955 = vmatpush1.bf16.msra.mxu1 %v11783_v25  ;;  %v11851_v53 = vld [vmem:[%s15149_s14 + $0x26c] ss:$16 sps:$4 sm:$0xff]   ;;  %v11846_v60 = vld [vmem:[%s15149_s14 + $0x260] ss:$16 sps:$4 sm:$0xff]   ;;  %v11849_v61 = vld [vmem:[%s15149_s14 + $0x268] ss:$16 sps:$4 sm:$0xff]  }
 0xfa0   :  { %6913 = vmatprep.subr.bf16.mxu0 %v11788_v38  ;;  %6956 = vmatprep.subr.bf16.mxu1 %v11791_v13  ;;  %v11854_v63 = vld [vmem:[%s15149_s14 + $0x284] ss:$16 sps:$4 sm:$0xff]   ;;  %v11857_v3 = vld [vmem:[%s15149_s14 + $0x28c] ss:$16 sps:$4 sm:$0xff]   ;;  %v11852_v14 = vld [vmem:[%s15149_s14 + $0x280] ss:$16 sps:$4 sm:$0xff]  }
 0xfa1   :  { %6943 = vmatprep.mubr.bf16.mxu0 %v12320_v47  ;;  %6986 = vmatprep.mubr.bf16.mxu1 %v12320_v47  ;;  %v11855_v36 = vld [vmem:[%s15149_s14 + $0x288] ss:$16 sps:$4 sm:$0xff]   ;;  %v11860_v0 = vld [vmem:[%s15149_s14 + $0x2a4] ss:$16 sps:$4 sm:$0xff]   ;;  %v11863_v15 = vld [vmem:[%s15149_s14 + $0x2ac] ss:$16 sps:$4 sm:$0xff]  }
 0xfa2   :  { %v11858_v48 = vld [vmem:[%s15149_s14 + $0x2a0] ss:$16 sps:$4 sm:$0xff]   ;;  %v11861_v23 = vld [vmem:[%s15149_s14 + $0x2a8] ss:$16 sps:$4 sm:$0xff]   ;;  %v11866_v1 = vld [vmem:[%s15149_s14 + $0x2c4] ss:$16 sps:$4 sm:$0xff]  }
 0xfa3   :  { %6914 = vmatpush1.bf16.msra.mxu0 %v11786_v35  ;;  %6957 = vmatpush1.bf16.msra.mxu1 %v11789_v22  ;;  %v11869_v51 = vld [vmem:[%s15149_s14 + $0x2cc] ss:$16 sps:$4 sm:$0xff]   ;;  %v11864_v25 = vld [vmem:[%s15149_s14 + $0x2c0] ss:$16 sps:$4 sm:$0xff]   ;;  %v11867_v6 = vld [vmem:[%s15149_s14 + $0x2c8] ss:$16 sps:$4 sm:$0xff]  }
 0xfa4   :  { %6915 = vmatprep.subr.bf16.mxu0 %v11794_v12  ;;  %6958 = vmatprep.subr.bf16.mxu1 %v11797_v21  ;;  %v11872_v56 = vld [vmem:[%s15149_s14 + $0x2e4] ss:$16 sps:$4 sm:$0xff]   ;;  %v11875_v59 = vld [vmem:[%s15149_s14 + $0x2ec] ss:$16 sps:$4 sm:$0xff]   ;;  %v11870_v38 = vld [vmem:[%s15149_s14 + $0x2e0] ss:$16 sps:$4 sm:$0xff]  }
 0xfa5   :  { %v11873_v13 = vld [vmem:[%s15149_s14 + $0x2e8] ss:$16 sps:$4 sm:$0xff]   ;;  %v11881_v52 = vld [vmem:[%s15149_s14 + $0x30c] ss:$16 sps:$4 sm:$0xff]   ;;  %v11876_v31 = vld [vmem:[%s15149_s14 + $0x300] ss:$16 sps:$4 sm:$0xff]  }
 0xfa6   :  { %v11879_v35 = vld [vmem:[%s15149_s14 + $0x308] ss:$16 sps:$4 sm:$0xff]   ;;  %v11884_v22 = vld [vmem:[%s15149_s14 + $0x324] ss:$16 sps:$4 sm:$0xff]   ;;  %v11887_v12 = vld [vmem:[%s15149_s14 + $0x32c] ss:$16 sps:$4 sm:$0xff]  }
 0xfa7   :  { %6916 = vmatpush1.bf16.msra.mxu0 %v11792_v46  ;;  %6959 = vmatpush1.bf16.msra.mxu1 %v11795_v20  ;;  %v11882_v21 = vld [vmem:[%s15149_s14 + $0x320] ss:$16 sps:$4 sm:$0xff]   ;;  %v11885_v46 = vld [vmem:[%s15149_s14 + $0x328] ss:$16 sps:$4 sm:$0xff]   ;;  %v11890_v20 = vld [vmem:[%s15149_s14 + $0x344] ss:$16 sps:$4 sm:$0xff]  }
 0xfa8   :  { %6917 = vmatprep.subr.bf16.mxu0 %v11800_v32  ;;  %6960 = vmatprep.subr.bf16.mxu1 %v11803_v26  ;;  %v11888_v32 = vld [vmem:[%s15149_s14 + $0x340] ss:$16 sps:$4 sm:$0xff]   ;;  %v11891_v26 = vld [vmem:[%s15149_s14 + $0x348] ss:$16 sps:$4 sm:$0xff]   ;;  %vm7797_vm4 = vcmask 130048  }
 0xfab   :  { %6918 = vmatpush1.bf16.msra.mxu0 %v11798_v62  ;;  %6961 = vmatpush1.bf16.msra.mxu1 %v11801_v11  ;;  %v11896_v62 = vld [vmem:[%s15149_s14 + $0x364] ss:$16 sps:$4 sm:$0xff]   ;;  %v11899_v11 = vld [vmem:[%s15149_s14 + $0x36c] ss:$16 sps:$4 sm:$0xff]  }
 0xfac   :  { %6919 = vmatprep.subr.bf16.mxu0 %v11806_v58  ;;  %6962 = vmatprep.subr.bf16.mxu1 %v11809_v18  ;;  %v11894_v58 = vld [vmem:[%s15149_s14 + $0x360] ss:$16 sps:$4 sm:$0xff]   ;;  %v11897_v18 = vld [vmem:[%s15149_s14 + $0x368] ss:$16 sps:$4 sm:$0xff]  }
 0xfaf   :  { %6920 = vmatpush1.bf16.msra.mxu0 %v11804_v37  ;;  %6963 = vmatpush1.bf16.msra.mxu1 %v11807_v40  ;;  %v11902_v37 = vld [vmem:[%s15149_s14 + $0x384] ss:$16 sps:$4 sm:$0xff]   ;;  %v11905_v40 = vld [vmem:[%s15149_s14 + $0x38c] ss:$16 sps:$4 sm:$0xff]  }
 0xfb0   :  { %6921 = vmatprep.subr.bf16.mxu0 %v11812_v42  ;;  %6964 = vmatprep.subr.bf16.mxu1 %v11815_v43  ;;  %v11900_v42 = vld [vmem:[%s15149_s14 + $0x380] ss:$16 sps:$4 sm:$0xff]   ;;  %v11903_v43 = vld [vmem:[%s15149_s14 + $0x388] ss:$16 sps:$4 sm:$0xff]  }
 0xfb3   :  { %6922 = vmatpush1.bf16.msra.mxu0 %v11810_v2  ;;  %6965 = vmatpush1.bf16.msra.mxu1 %v11813_v7  ;;  %v11908_v2 = vld [vmem:[%s15149_s14 + $0x3a4] ss:$16 sps:$4 sm:$0xff]   ;;  %v11911_v7 = vld [vmem:[%s15149_s14 + $0x3ac] ss:$16 sps:$4 sm:$0xff]  }
 0xfb4   :  { %6923 = vmatprep.subr.bf16.mxu0 %v11818_v55  ;;  %6966 = vmatprep.subr.bf16.mxu1 %v11821_v9  ;;  %v11906_v55 = vld [vmem:[%s15149_s14 + $0x3a0] ss:$16 sps:$4 sm:$0xff]   ;;  %v11909_v9 = vld [vmem:[%s15149_s14 + $0x3a8] ss:$16 sps:$4 sm:$0xff]  }
 0xfb7   :  { %6924 = vmatpush1.bf16.msra.mxu0 %v11816_v10  ;;  %6967 = vmatpush1.bf16.msra.mxu1 %v11819_v16  ;;  %v11914_v10 = vld [vmem:[%s15149_s14 + $0x3c4] ss:$16 sps:$4 sm:$0xff]   ;;  %v11917_v16 = vld [vmem:[%s15149_s14 + $0x3cc] ss:$16 sps:$4 sm:$0xff]  }
 0xfb8   :  { %6925 = vmatprep.subr.bf16.mxu0 %v11824_v33  ;;  %6968 = vmatprep.subr.bf16.mxu1 %v11827_v24  ;;  %v11912_v33 = vld [vmem:[%s15149_s14 + $0x3c0] ss:$16 sps:$4 sm:$0xff]   ;;  %v11915_v24 = vld [vmem:[%s15149_s14 + $0x3c8] ss:$16 sps:$4 sm:$0xff]  }
 0xfbb   :  { %6926 = vmatpush1.bf16.msra.mxu0 %v11822_v44  ;;  %6969 = vmatpush1.bf16.msra.mxu1 %v11825_v39  ;;  %v11920_v44 = vld [vmem:[%s15149_s14 + $0x3e4] ss:$16 sps:$4 sm:$0xff]   ;;  %v11923_v39 = vld [vmem:[%s15149_s14 + $0x3ec] ss:$16 sps:$4 sm:$0xff]  }
 0xfbc   :  { %7191 = vmatprep.subr.bf16.mxu0 %v11830_v27  ;;  %7234 = vmatprep.subr.bf16.mxu1 %v11833_v30  ;;  %v11918_v27 = vld [vmem:[%s15149_s14 + $0x3e0] ss:$16 sps:$4 sm:$0xff]   ;;  %v11921_v30 = vld [vmem:[%s15149_s14 + $0x3e8] ss:$16 sps:$4 sm:$0xff]  }
 0xfbe   :  { %6944 = vmatmul.mubr.bf16.vlgmr.msra.gmra.mrb[92].mxu0 %v14258_v4  ;;  %6987 = vmatmul.mubr.bf16.vlgmr.msra.gmra.mrb[80].mxu1 %v14258_v4  ;;  %v11878_v4 = vld [vmem:[%s15149_s14 + $0x304] ss:$16 sps:$4 sm:$0xff]  }
 0xfbf   :  { %7192 = vmatpush1.bf16.msra.mxu0 %v11828_v28  ;;  %7235 = vmatpush1.bf16.msra.mxu1 %v11831_v50  ;;  %v11987_v28 = vld [vmem:[#allocation5] sm:$0xff]  ;;  %v7635_v50 = vlaneseq }
 0xfc0   :  { %7193 = vmatprep.subr.bf16.mxu0 %v11836_v45  ;;  %7236 = vmatprep.subr.bf16.mxu1 %v11839_v8  ;;  %262 = vst.msk [vmem:[#allocation5 + $0x20] sm:$0xff] %vm261_vm14, %v11987_v28  ;;  %267 = vst.msk [vmem:[#allocation5 + $0x48] sm:$0xff] %vm261_vm14, %v11987_v28 }
 0xfc1   :  { %7223 = vmatprep.mubr.bf16.mxu0 %v12320_v47  ;;  %7266 = vmatprep.mubr.bf16.mxu1 %v12320_v47 }
 0xfc3   :  { %7194 = vmatpush1.bf16.msra.mxu0 %v11834_v41  ;;  %7237 = vmatpush1.bf16.msra.mxu1 %v11837_v5 }
 0xfc4   :  { %7195 = vmatprep.subr.bf16.mxu0 %v11842_v57  ;;  %7238 = vmatprep.subr.bf16.mxu1 %v11845_v29  ;;  %v7636_v29 = vshrl.u32 %v7635_v50, 7 }
 0xfc7   :  { %7196 = vmatpush1.bf16.msra.mxu0 %v11840_v19  ;;  %7239 = vmatpush1.bf16.msra.mxu1 %v11843_v49 }
 0xfc8   :  { %7197 = vmatprep.subr.bf16.mxu0 %v11848_v54  ;;  %7240 = vmatprep.subr.bf16.mxu1 %v11851_v53  ;;  %v14560_v54 = vsub.s32 1, %v7636_v29  ;;  %v7771_v53 = vld [vmem:[#allocation25 + $0x3] ss:$8 sm:$0xf] }
 0xfcb   :  { %7198 = vmatpush1.bf16.msra.mxu0 %v11846_v60  ;;  %7241 = vmatpush1.bf16.msra.mxu1 %v11849_v61  ;;  %v14563_v60 = vsub.s32 0, %v7636_v29  ;;  %v7780_v61 = vrot.slane %v7771_v53, %v14560_v54 }
 0xfcc   :  { %7199 = vmatprep.subr.bf16.mxu0 %v11854_v63  ;;  %7242 = vmatprep.subr.bf16.mxu1 %v11857_v3  ;;  %v7872_v63 = vld [vmem:[#allocation25 + $0x5] ss:$8 sm:$0xf] }
 0xfcd   :  { %v7776_v3 = vrot.slane %v7771_v53, %v14563_v60 }
 0xfcf   :  { %7200 = vmatpush1.bf16.msra.mxu0 %v11852_v14  ;;  %7243 = vmatpush1.bf16.msra.mxu1 %v11855_v36  ;;  %v14569_v14 = vsub.s32 2, %v7636_v29  ;;  %v7877_v36 = vrot.slane %v7872_v63, %v14563_v60 }
 0xfd0   :  { %7201 = vmatprep.subr.bf16.mxu0 %v11860_v0  ;;  %7244 = vmatprep.subr.bf16.mxu1 %v11863_v15  ;;  %v7881_v15 = vrot.slane %v7872_v63, %v14560_v54 }
 0xfd1   :  { %v7784_v0 = vrot.slane %v7771_v53, %v14569_v14 }
 0xfd3   :  { %7202 = vmatpush1.bf16.msra.mxu0 %v11858_v48  ;;  %7245 = vmatpush1.bf16.msra.mxu1 %v11861_v23  ;;  %v14578_v48 = vsub.s32 3, %v7636_v29  ;;  %v7885_v23 = vrot.slane %v7872_v63, %v14569_v14 }
 0xfd4   :  { %7203 = vmatprep.subr.bf16.mxu0 %v11866_v1  ;;  %7246 = vmatprep.subr.bf16.mxu1 %v11869_v51 }
 0xfd5   :  { %v7788_v1 = vrot.slane %v7771_v53, %v14578_v48  ;;  %v7889_v51 = vrot.slane %v7872_v63, %v14578_v48 }
 0xfd7   :  { %7204 = vmatpush1.bf16.msra.mxu0 %v11864_v25  ;;  %7247 = vmatpush1.bf16.msra.mxu1 %v11867_v6  ;;  %v7822_v25 = vld [vmem:[#allocation25 + $0x4] ss:$8 sm:$0xf] }
 0xfd8   :  { %7205 = vmatprep.subr.bf16.mxu0 %v11872_v56  ;;  %7248 = vmatprep.subr.bf16.mxu1 %v11875_v59  ;;  %v7827_v6 = vrot.slane %v7822_v25, %v14563_v60  ;;  %v7831_v56 = vrot.slane %v7822_v25, %v14560_v54  ;;  %v7835_v59 = vrot.slane %v7822_v25, %v14569_v14 }
 0xfdb   :  { %7206 = vmatpush1.bf16.msra.mxu0 %v11870_v38  ;;  %7249 = vmatpush1.bf16.msra.mxu1 %v11873_v13  ;;  %v7839_v38 = vrot.slane %v7822_v25, %v14578_v48  ;;  %v7670_v13 = vld [vmem:[#allocation25 + $0x1] ss:$8 sm:$0xf] }
 0xfdc   :  { %7479 = vmatprep.subr.bf16.mxu0 %v11878_v4  ;;  %7522 = vmatprep.subr.bf16.mxu1 %v11881_v52  ;;  %v7675_v4 = vrot.slane %v7670_v13, %v14563_v60  ;;  %v7679_v52 = vrot.slane %v7670_v13, %v14560_v54 }
 0xfde   :  { %7224 = vmatmul.mubr.bf16.vlgmr.msra.gmra.mrb[92].mxu0 %v14263_v34  ;;  %7267 = vmatmul.mubr.bf16.vlgmr.msra.gmra.mrb[80].mxu1 %v14263_v34  ;;  %v11893_v34 = vld [vmem:[%s15149_s14 + $0x34c] ss:$16 sps:$4 sm:$0xff]   ;;  %s12338_s14 = smov 33  }
 0xfdf   :  { %7480 = vmatpush1.bf16.msra.mxu0 %v11876_v31  ;;  %7523 = vmatpush1.bf16.msra.mxu1 %v11879_v35  ;;  %v7683_v31 = vrot.slane %v7670_v13, %v14569_v14  ;;  %v7687_v35 = vrot.slane %v7670_v13, %v14578_v48 }
 0xfe0   :  { %7481 = vmatprep.subr.bf16.mxu0 %v11884_v22  ;;  %7524 = vmatprep.subr.bf16.mxu1 %v11887_v12  ;;  %v7721_v22 = vld [vmem:[#allocation25 + $0x2] ss:$8 sm:$0xf] }
 0xfe1   :  { %7511 = vmatprep.mubr.bf16.mxu0 %v12320_v47  ;;  %7554 = vmatprep.mubr.bf16.mxu1 %v12320_v47  ;;  %v7726_v12 = vrot.slane %v7721_v22, %v14563_v60 }
 0xfe3   :  { %7482 = vmatpush1.bf16.msra.mxu0 %v11882_v21  ;;  %7525 = vmatpush1.bf16.msra.mxu1 %v11885_v46  ;;  %v7730_v21 = vrot.slane %v7721_v22, %v14560_v54  ;;  %v7734_v46 = vrot.slane %v7721_v22, %v14569_v14 }
 0xfe4   :  { %7483 = vmatprep.subr.bf16.mxu0 %v11890_v20  ;;  %7526 = vmatprep.subr.bf16.mxu1 %v11893_v34  ;;  %v7738_v20 = vrot.slane %v7721_v22, %v14578_v48 }
 0xfe7   :  { %7484 = vmatpush1.bf16.msra.mxu0 %v11888_v32  ;;  %7527 = vmatpush1.bf16.msra.mxu1 %v11891_v26 }
 0xfe8   :  { %7485 = vmatprep.subr.bf16.mxu0 %v11896_v62  ;;  %7528 = vmatprep.subr.bf16.mxu1 %v11899_v11 }
 0xfeb   :  { %7486 = vmatpush1.bf16.msra.mxu0 %v11894_v58  ;;  %7529 = vmatpush1.bf16.msra.mxu1 %v11897_v18 }
 0xfec   :  { %7487 = vmatprep.subr.bf16.mxu0 %v11902_v37  ;;  %7530 = vmatprep.subr.bf16.mxu1 %v11905_v40 }
 0xfef   :  { %7488 = vmatpush1.bf16.msra.mxu0 %v11900_v42  ;;  %7531 = vmatpush1.bf16.msra.mxu1 %v11903_v43 }
 0xff0   :  { %7489 = vmatprep.subr.bf16.mxu0 %v11908_v2  ;;  %7532 = vmatprep.subr.bf16.mxu1 %v11911_v7 }
 0xff3   :  { %7490 = vmatpush1.bf16.msra.mxu0 %v11906_v55  ;;  %7533 = vmatpush1.bf16.msra.mxu1 %v11909_v9 }
 0xff4   :  { %7491 = vmatprep.subr.bf16.mxu0 %v11914_v10  ;;  %7534 = vmatprep.subr.bf16.mxu1 %v11917_v16 }
 0xff7   :  { %7492 = vmatpush1.bf16.msra.mxu0 %v11912_v33  ;;  %7535 = vmatpush1.bf16.msra.mxu1 %v11915_v24 }
 0xff8   :  { %7493 = vmatprep.subr.bf16.mxu0 %v11920_v44  ;;  %7536 = vmatprep.subr.bf16.mxu1 %v11923_v39 }
 0xffb   :  { %7494 = vmatpush1.bf16.msra.mxu0 %v11918_v27  ;;  %7537 = vmatpush1.bf16.msra.mxu1 %v11921_v30 }
 0xffe   :  { %7512 = vmatmul.mubr.bf16.vlgmr.msra.gmra.mrb[92].mxu0 %v14268_v17  ;;  %7555 = vmatmul.mubr.bf16.vlgmr.msra.gmra.mrb[80].mxu1 %v14268_v17 }
 0xfff   :  { %8134 = vmatprep.mubr.bf16.mxu0 %v12320_v47  ;;  %8559 = vmatprep.mubr.bf16.mxu1 %v12320_v47 }
0x10d1   :  { %v7513_v45 = vpop.f32.mrb[92].mxu0  ;;  %v7556_v8 = vpop.f32.mrb[80].mxu1 }
0x10d2   :  { %v7558_v41 = vpop.f32.mrb[81].mxu1  ;;  %7581 = vrot.lane.b32.xlu0 %v7513_v45, %s12333_s7  ;;  %v7515_v5 = vpop.f32.mrb[93].mxu0 }
0x10d3   :  { %v7560_v57 = vpop.f32.mrb[82].mxu1  ;;  %7583 = vrot.lane.b32.xlu1 %v7515_v5, %s12333_s7  ;;  %v7517_v17 = vpop.f32.mrb[94].mxu0 }
0x10d4   :  { %v7519_v19 = vpop.f32.mrb[95].mxu0  ;;  %v7562_v49 = vpop.f32.mrb[83].mxu1 }
0x10d6   :  { %7585 = vrot.lane.b32.xlu0 %v7556_v8, %s12333_s7 }
0x10d7   :  { %7589 = vrot.lane.b32.xlu1 %v7517_v17, %s12333_s7 }
0x10da   :  { %7587 = vrot.lane.b32.xlu0 %v7558_v41, %s12333_s7 }
0x10db   :  { %7593 = vrot.lane.b32.xlu1 %v7560_v57, %s12333_s7 }
0x10de   :  { %7591 = vrot.lane.b32.xlu0 %v7519_v19, %s12333_s7 }
0x10df   :  { %7791 = vrot.lane.b32.xlu1 %v7780_v61, %s12313_s26 }
0x10e2   :  { %7789 = vrot.lane.b32.xlu0 %v7776_v3, %s12313_s26 }
0x10e3   :  { %7890 = vrot.lane.b32.xlu1 %v7877_v36, %s12312_s17 }
0x10e6   :  { %7793 = vrot.lane.b32.xlu0 %v7784_v0, %s12313_s26 }
0x10e7   :  { %7595 = vrot.lane.b32.xlu1 %v7562_v49, %s12333_s7 }
0x10ea   :  { %7892 = vrot.lane.b32.xlu0 %v7881_v15, %s12312_s17 }
0x10eb   :  { %7894 = vrot.lane.b32.xlu1 %v7885_v23, %s12312_s17 }
0x10ee   :  { %7795 = vrot.lane.b32.xlu0 %v7788_v1, %s12313_s26  ;;  %s12342_s26 = smov 94  }
0x10ef   :  { %7896 = vrot.lane.b32.xlu1 %v7889_v51, %s12312_s17  ;;  %s12341_s17 = smov 96  }
0x10f2   :  { %7840 = vrot.lane.b32.xlu0 %v7827_v6, %s12333_s7 }
0x10f3   :  { %7842 = vrot.lane.b32.xlu1 %v7831_v56, %s12333_s7 }
0x10f6   :  { %7844 = vrot.lane.b32.xlu0 %v7835_v59, %s12333_s7 }
0x10f7   :  { %7846 = vrot.lane.b32.xlu1 %v7839_v38, %s12333_s7 }
0x10fa   :  { %7688 = vrot.lane.b32.xlu0 %v7675_v4, %s12323_s25 }
0x10fb   :  { %7690 = vrot.lane.b32.xlu1 %v7679_v52, %s12323_s25 }
0x10fe   :  { %7692 = vrot.lane.b32.xlu0 %v7683_v31, %s12323_s25 }
0x10ff   :  { %7694 = vrot.lane.b32.xlu1 %v7687_v35, %s12323_s25 }
0x1102   :  { %7739 = vrot.lane.b32.xlu0 %v7726_v12, %s12305_s29 }
0x1103   :  { %7741 = vrot.lane.b32.xlu1 %v7730_v21, %s12305_s29 }
0x1106   :  { %7743 = vrot.lane.b32.xlu0 %v7734_v46, %s12305_s29 }
0x1107   :  { %7745 = vrot.lane.b32.xlu1 %v7738_v20, %s12305_s29  ;;  %s12339_s29 = smov 34  }
0x1144   :  { %v7582_v34 = vpop.permute.xlu0 %7581 }
0x1145   :  { %7615 = vst.msk [vmem:[#allocation5] sm:$0xff] %vm7614_vm15, %v7582_v34  ;;  %v7584_v32 = vpop.permute.xlu1 %7583 }
0x1146   :  { %v14613_v26 = vsel %vm7597_vm3, %v7582_v34, %v7584_v32 }
0x1148   :  { %v7586_v62 = vpop.permute.xlu0 %7585 }
0x1149   :  { %v14616_v11 = vsel %vm7597_vm3, %v7584_v32, %v7586_v62  ;;  %v7590_v58 = vpop.permute.xlu1 %7589 }
0x114a   :  { %7620 = vst.msk [vmem:[#allocation5 + $0x28] sm:$0xff] %vm7614_vm15, %v7590_v58 }
0x114c   :  { %v7588_v18 = vpop.permute.xlu0 %7587  ;;  %v14628_v55 = vld [vmem:[#allocation5] sm:$0xff] }
0x114d   :  { %v14619_v37 = vsel %vm7597_vm3, %v7586_v62, %v7588_v18  ;;  %7619 = vst.msk [vmem:[#allocation5 + $0x20] sm:$0xff] %vm7597_vm3, %v7588_v18  ;;  %v7594_v40 = vpop.permute.xlu1 %7593 }
0x1150   :  { %v7592_v42 = vpop.permute.xlu0 %7591 }
0x1151   :  { %v14623_v43 = vsel %vm7597_vm3, %v7590_v58, %v7592_v42  ;;  %v14626_v2 = vsel %vm7597_vm3, %v7592_v42, %v7594_v40  ;;  %v7792_v7 = vpop.permute.xlu1 %7791  ;;  %v14630_v9 = vld [vmem:[#allocation5 + $0x28] sm:$0xff] }
0x1154   :  { %v7790_v10 = vpop.permute.xlu0 %7789  ;;  %v14646_v19 = vld [vmem:[#allocation5 + $0x20] sm:$0xff] }
0x1155   :  { %v7798_v16 = vsel %vm7797_vm4, %v7790_v10, %v7792_v7  ;;  %v7806_v33 = vmul.f32 %v7790_v10, %v14628_v55  ;;  %v7811_v24 = vmul.f32 %v7790_v10, %v14630_v9  ;;  %v7891_v44 = vpop.permute.xlu1 %7890 }
0x1156   :  { %v7906_v39 = vmul.f32 %v7891_v44, %v14628_v55  ;;  %v7911_v27 = vmul.f32 %v7891_v44, %v14630_v9  ;;  %v7807_v30 = vmul.f32 %v7798_v16, %v14613_v26  ;;  %v7812_v28 = vmul.f32 %v7798_v16, %v14623_v43 }
0x1157   :  { %v7816_v50 = vpack.c.bf16 %v7811_v24, %v7806_v33 }
0x1158   :  { %v7916_v45 = vpack.c.bf16 %v7911_v27, %v7906_v39  ;;  %v7794_v8 = vpop.permute.xlu0 %7793  ;;  %v7817_v57 = vpack.c.bf16 %v7812_v28, %v7807_v30 }
0x1159   :  { %v7596_v41 = vpop.permute.xlu1 %7595  ;;  %8081 = vrot.lane.b32.xlu0 %v7816_v50, %s12336_s13  ;;  %v7799_v53 = vsel %vm7797_vm4, %v7792_v7, %v7794_v8  ;;  %v7972_v7 = vld [vmem:[#allocation25 + $0x7] ss:$8 sm:$0xf] }
0x115a   :  { %v14641_v5 = vsel %vm7597_vm3, %v7594_v40, %v7596_v41  ;;  %7624 = vst.msk [vmem:[#allocation5 + $0x48] sm:$0xff] %vm7597_vm3, %v7596_v41  ;;  %8506 = vrot.lane.b32.xlu1 %v7916_v45, %s12337_s27  ;;  %v7808_v36 = vmul.f32 %v7799_v53, %v14616_v11  ;;  %v7813_v0 = vmul.f32 %v7799_v53, %v14626_v2 }
0x115b   :  { %v7977_v24 = vrot.slane %v7972_v7, %v14563_v60 }
0x115c   :  { %v7893_v17 = vpop.permute.xlu0 %7892  ;;  %v7818_v4 = vpack.c.bf16 %v7813_v0, %v7808_v36  ;;  %v7981_v0 = vrot.slane %v7972_v7, %v14560_v54 }
0x115d   :  { %8083 = vrot.lane.b32.xlu0 %v7817_v57, %s12336_s13  ;;  %v7895_v29 = vpop.permute.xlu1 %7894  ;;  %v7898_v25 = vsel %vm249_vm2, %v7891_v44, %v7893_v17 }
0x115e   :  { %v7899_v15 = vsel %vm249_vm2, %v7893_v17, %v7895_v29  ;;  %v7907_v52 = vmul.f32 %v7898_v25, %v14613_v26  ;;  %v7912_v31 = vmul.f32 %v7898_v25, %v14623_v43 }
0x115f   :  { %v7908_v59 = vmul.f32 %v7899_v15, %v14616_v11  ;;  %v7913_v38 = vmul.f32 %v7899_v15, %v14626_v2 }
0x1160   :  { %v7796_v49 = vpop.permute.xlu0 %7795  ;;  %v7917_v20 = vpack.c.bf16 %v7912_v31, %v7907_v52 }
0x1161   :  { %v14649_v61 = vld [vmem:[#allocation5 + $0x48] sm:$0xff]  ;;  %v7810_v63 = vmul.f32 %v7796_v49, %v14646_v19  ;;  %v7897_v1 = vpop.permute.xlu1 %7896  ;;  %v7800_v35 = vsel %vm7797_vm4, %v7794_v8, %v7796_v49  ;;  %v7918_v12 = vpack.c.bf16 %v7913_v38, %v7908_v59 }
0x1162   :  { %v7815_v3 = vmul.f32 %v7796_v49, %v14649_v61  ;;  %v7809_v21 = vmul.f32 %v7800_v35, %v14619_v37  ;;  %v7814_v46 = vmul.f32 %v7800_v35, %v14641_v5  ;;  %v7900_v34 = vsel %vm249_vm2, %v7895_v29, %v7897_v1 }
0x1163   :  { %v7910_v32 = vmul.f32 %v7897_v1, %v14646_v19  ;;  %v7915_v62 = vmul.f32 %v7897_v1, %v14649_v61  ;;  %v7909_v40 = vmul.f32 %v7900_v34, %v14619_v37  ;;  %v7914_v42 = vmul.f32 %v7900_v34, %v14641_v5 }
0x1164   :  { %v7820_v23 = vpack.c.bf16 %v7815_v3, %v7810_v63  ;;  %v7841_v51 = vpop.permute.xlu0 %7840  ;;  %v7819_v18 = vpack.c.bf16 %v7814_v46, %v7809_v21  ;;  %v7985_v49 = vrot.slane %v7972_v7, %v14569_v14  ;;  %vm7696_vm2 = vcmask 7168   ;;  %v7922_v21 = vld [vmem:[#allocation25 + $0x6] ss:$8 sm:$0xf] }
0x1165   :  { %v7856_v6 = vmul.f32 %v7841_v51, %v14628_v55  ;;  %v7861_v56 = vmul.f32 %v7841_v51, %v14630_v9  ;;  %v7843_v22 = vpop.permute.xlu1 %7842  ;;  %v7920_v10 = vpack.c.bf16 %v7915_v62, %v7910_v32  ;;  %v7919_v44 = vpack.c.bf16 %v7914_v42, %v7909_v40  ;;  %v8023_v42 = vld [vmem:[#allocation25 + $0x20] ss:$8 sm:$0xf] }
0x1166   :  { %8089 = vrot.lane.b32.xlu1 %v7820_v23, %s12336_s13  ;;  %v7848_v30 = vsel %vm7597_vm3, %v7841_v51, %v7843_v22  ;;  %v7931_v34 = vrot.slane %v7922_v21, %v14560_v54  ;;  %v7927_v40 = vrot.slane %v7922_v21, %v14563_v60 }
0x1167   :  { %v7866_v13 = vpack.c.bf16 %v7861_v56, %v7856_v6  ;;  %v7857_v45 = vmul.f32 %v7848_v30, %v14613_v26  ;;  %v7862_v8 = vmul.f32 %v7848_v30, %v14623_v43  ;;  %v7989_v56 = vrot.slane %v7972_v7, %v14578_v48 }
0x1168   :  { %v7845_v58 = vpop.permute.xlu0 %7844  ;;  %v8036_v30 = vrot.slane %v8023_v42, %v14569_v14 }
0x1169   :  { %8189 = vrot.lane.b32.xlu0 %v7866_v13, %s12335_s30  ;;  %v7847_v16 = vpop.permute.xlu1 %7846  ;;  %v7849_v33 = vsel %vm7597_vm3, %v7843_v22, %v7845_v58  ;;  %v7867_v53 = vpack.c.bf16 %v7862_v8, %v7857_v45 }
0x116a   :  { %8085 = vrot.lane.b32.xlu1 %v7818_v4, %s12336_s13  ;;  %v7860_v39 = vmul.f32 %v7847_v16, %v14646_v19  ;;  %v7865_v27 = vmul.f32 %v7847_v16, %v14649_v61  ;;  %v7858_v28 = vmul.f32 %v7849_v33, %v14616_v11  ;;  %v7863_v50 = vmul.f32 %v7849_v33, %v14626_v2 }
0x116b   :  { %v7850_v17 = vsel %vm7597_vm3, %v7845_v58, %v7847_v16  ;;  %v7935_v16 = vrot.slane %v7922_v21, %v14569_v14 }
0x116c   :  { %v7870_v41 = vpack.c.bf16 %v7865_v27, %v7860_v39  ;;  %v7868_v57 = vpack.c.bf16 %v7863_v50, %v7858_v28  ;;  %v7689_v63 = vpop.permute.xlu0 %7688  ;;  %v7859_v3 = vmul.f32 %v7850_v17, %v14619_v37  ;;  %v7864_v36 = vmul.f32 %v7850_v17, %v14641_v5 }
0x116d   :  { %8510 = vrot.lane.b32.xlu0 %v7918_v12, %s12337_s27  ;;  %v7691_v29 = vpop.permute.xlu1 %7690  ;;  %v7705_v15 = vmul.f32 %v7689_v63, %v14628_v55  ;;  %v7710_v23 = vmul.f32 %v7689_v63, %v14630_v9  ;;  %v8032_v27 = vrot.slane %v8023_v42, %v14560_v54 }
0x116e   :  { %8508 = vrot.lane.b32.xlu1 %v7917_v20, %s12337_s27  ;;  %v7869_v1 = vpack.c.bf16 %v7864_v36, %v7859_v3  ;;  %v7697_v25 = vsel %vm7696_vm2, %v7689_v63, %v7691_v29  ;;  %v7939_v63 = vrot.slane %v7922_v21, %v14578_v48 }
0x116f   :  { %v7715_v59 = vpack.c.bf16 %v7710_v23, %v7705_v15  ;;  %v7706_v4 = vmul.f32 %v7697_v25, %v14613_v26  ;;  %v7711_v52 = vmul.f32 %v7697_v25, %v14623_v43  ;;  %v8040_v25 = vrot.slane %v8023_v42, %v14578_v48 }
0x1170   :  { %v7693_v6 = vpop.permute.xlu0 %7692 }
0x1171   :  { %8087 = vrot.lane.b32.xlu0 %v7819_v18, %s12336_s13  ;;  %v7695_v51 = vpop.permute.xlu1 %7694  ;;  %v7698_v31 = vsel %vm7696_vm2, %v7691_v29, %v7693_v6  ;;  %v7716_v46 = vpack.c.bf16 %v7711_v52, %v7706_v4  ;;  %s15175_s13 = sld [smem:[#allocation39_spill]] }
0x1172   :  { %8514 = vrot.lane.b32.xlu1 %v7920_v10, %s12337_s27  ;;  %v7709_v38 = vmul.f32 %v7695_v51, %v14646_v19  ;;  %v7714_v13 = vmul.f32 %v7695_v51, %v14649_v61  ;;  %v7707_v35 = vmul.f32 %v7698_v31, %v14616_v11  ;;  %v7712_v22 = vmul.f32 %v7698_v31, %v14626_v2 }
0x1173   :  { %v7699_v20 = vsel %vm7696_vm2, %v7693_v6, %v7695_v51 }
0x1174   :  { %v7719_v12 = vpack.c.bf16 %v7714_v13, %v7709_v38  ;;  %v7717_v32 = vpack.c.bf16 %v7712_v22, %v7707_v35  ;;  %v7740_v62 = vpop.permute.xlu0 %7739  ;;  %v7708_v58 = vmul.f32 %v7699_v20, %v14619_v37  ;;  %v7713_v18 = vmul.f32 %v7699_v20, %v14641_v5  ;;  %v8075_v22 = vld [vmem:[#allocation22 + $0xe] sm:$0x3] }
0x1175   :  { %8512 = vrot.lane.b32.xlu0 %v7919_v44, %s12337_s27  ;;  %v7742_v33 = vpop.permute.xlu1 %7741  ;;  %v7760_v17 = vmul.f32 %v7740_v62, %v14630_v9 }
0x1176   :  { %7990 = vrot.lane.b32.xlu1 %v7977_v24, %s12338_s14  ;;  %v7718_v7 = vpack.c.bf16 %v7713_v18, %v7708_v58  ;;  %v8028_v24 = vrot.slane %v8023_v42, %v14563_v60  ;;  %v7747_v39 = vsel %vm390_vm1, %v7740_v62, %v7742_v33 }
0x1177   :  { %v7756_v45 = vmul.f32 %v7747_v39, %v14613_v26  ;;  %v7761_v8 = vmul.f32 %v7747_v39, %v14623_v43 }
0x1178   :  { %v7744_v10 = vpop.permute.xlu0 %7743 }
0x1179   :  { %8197 = vrot.lane.b32.xlu0 %v7870_v41, %s12335_s30  ;;  %v7748_v44 = vsel %vm390_vm1, %v7742_v33, %v7744_v10  ;;  %v7746_v41 = vpop.permute.xlu1 %7745 }
0x117a   :  { %8193 = vrot.lane.b32.xlu1 %v7868_v57, %s12335_s30  ;;  %v7757_v28 = vmul.f32 %v7748_v44, %v14616_v11  ;;  %v7762_v50 = vmul.f32 %v7748_v44, %v14626_v2  ;;  %v7755_v57 = vmul.f32 %v7740_v62, %v14628_v55  ;;  %v7759_v15 = vmul.f32 %v7746_v41, %v14646_v19 }
0x117b   :  { %v7764_v23 = vmul.f32 %v7746_v41, %v14649_v61 }
0x117c   :  { %v7767_v29 = vpack.c.bf16 %v7762_v50, %v7757_v28  ;;  %v7765_v3 = vpack.c.bf16 %v7760_v17, %v7755_v57  ;;  %v8498_v28 = vld [vmem:[#allocation22 + $0xc] sm:$0x3] }
0x117d   :  { %8191 = vrot.lane.b32.xlu0 %v7867_v53, %s12335_s30  ;;  %v7749_v53 = vsel %vm390_vm1, %v7744_v10, %v7746_v41  ;;  %v7769_v51 = vpack.c.bf16 %v7764_v23, %v7759_v15  ;;  %vm7998_vm1 = vcmask 269312  }
0x117e   :  { %7994 = vrot.lane.b32.xlu1 %v7985_v49, %s12338_s14  ;;  %v7766_v49 = vpack.c.bf16 %v7761_v8, %v7756_v45  ;;  %v7758_v36 = vmul.f32 %v7749_v53, %v14619_v37 }
0x1181   :  { %7992 = vrot.lane.b32.xlu0 %v7981_v0, %s12338_s14  ;;  %v7763_v0 = vmul.f32 %v7749_v53, %v14641_v5 }
0x1182   :  { %8195 = vrot.lane.b32.xlu1 %v7869_v1, %s12335_s30 }
0x1183   :  { %v7768_v1 = vpack.c.bf16 %v7763_v0, %v7758_v36 }
0x1185   :  { %8299 = vrot.lane.b32.xlu0 %v7715_v59, %s12328_s8 }
0x1186   :  { %7996 = vrot.lane.b32.xlu1 %v7989_v56, %s12338_s14 }
0x1189   :  { %8307 = vrot.lane.b32.xlu0 %v7719_v12, %s12328_s8 }
0x118a   :  { %8301 = vrot.lane.b32.xlu1 %v7716_v46, %s12328_s8 }
0x118d   :  { %8303 = vrot.lane.b32.xlu0 %v7717_v32, %s12328_s8 }
0x118e   :  { %7942 = vrot.lane.b32.xlu1 %v7931_v34, %s12304_s11  ;;  %v8500_v34 = vld [vmem:[#allocation22 + $0x8] sm:$0x3] }
0x1191   :  { %7940 = vrot.lane.b32.xlu0 %v7927_v40, %s12304_s11 }
0x1192   :  { %8305 = vrot.lane.b32.xlu1 %v7718_v7, %s12328_s8 }
0x1195   :  { %7944 = vrot.lane.b32.xlu0 %v7935_v16, %s12304_s11 }
0x1196   :  { %8041 = vrot.lane.b32.xlu1 %v8028_v24, %s12339_s29 }
0x1199   :  { %8043 = vrot.lane.b32.xlu0 %v8032_v27, %s12339_s29  ;;  %v8073_v27 = vld [vmem:[#allocation22 + $0xa] sm:$0x3] }
0x119a   :  { %8045 = vrot.lane.b32.xlu1 %v8036_v30, %s12339_s29 }
0x119d   :  { %8796 = vrot.lane.b32.xlu0 %v7767_v29, %s12329_s15 }
0x119e   :  { %8794 = vrot.lane.b32.xlu1 %v7766_v49, %s12329_s15 }
0x11a1   :  { %8792 = vrot.lane.b32.xlu0 %v7765_v3, %s12329_s15 }
0x11a2   :  { %7946 = vrot.lane.b32.xlu1 %v7939_v63, %s12304_s11  ;;  %s12340_s11 = smov 95  }
0x11a5   :  { %8798 = vrot.lane.b32.xlu0 %v7768_v1, %s12329_s15 }
0x11a6   :  { %8800 = vrot.lane.b32.xlu1 %v7769_v51, %s12329_s15  ;;  %s15174_s15 = sld [smem:[#allocation38_spill]] }
0x11a9   :  { %8047 = vrot.lane.b32.xlu0 %v8040_v25, %s12339_s29 }
0x11cb   :  { %v8082_v6 = vpop.permute.xlu0 %8081 }
0x11cc   :  { %v8507_v56 = vpop.permute.xlu1 %8506 }
0x11cf   :  { %v8084_v59 = vpop.permute.xlu0 %8083 }
0x11d0   :  { %v14758_v31 = vsel %vm6009_vm12, %v8082_v6, %v8084_v59 }
0x11d8   :  { %v8090_v38 = vpop.permute.xlu1 %8089 }
0x11db   :  { %v8190_v13 = vpop.permute.xlu0 %8189 }
0x11dc   :  { %v8086_v4 = vpop.permute.xlu1 %8085 }
0x11dd   :  { %v14755_v52 = vsel %vm6009_vm12, %v8084_v59, %v8086_v4 }
0x11de   :  { %8102 = vmatprep.subr.bf16.mxu0 %v14755_v52 }
0x11df   :  { %8103 = vmatpush1.bf16.msra.mxu0 %v14758_v31  ;;  %v8511_v35 = vpop.permute.xlu0 %8510 }
0x11e0   :  { %v8509_v12 = vpop.permute.xlu1 %8508 }
0x11e1   :  { %v14763_v21 = vsel %vm6237_vm13, %v8507_v56, %v8509_v12  ;;  %v14766_v46 = vsel %vm6237_vm13, %v8509_v12, %v8511_v35 }
0x11e2   :  { %8527 = vmatprep.subr.bf16.mxu1 %v14766_v46  ;;  %10463 = vmatmul.mubr.msk.bf16.vlgmr.msra.gmra.mrb[96].mxu0 %vm7797_vm4, %v8075_v22 }
0x11e3   :  { %8528 = vmatpush1.bf16.msra.mxu1 %v14763_v21  ;;  %v8088_v20 = vpop.permute.xlu0 %8087  ;;  %8175 = vmatprep.mubr.bf16.mxu0 %v12320_v47 }
0x11e4   :  { %v14773_v32 = vsel %vm6009_vm12, %v8086_v4, %v8088_v20  ;;  %v8515_v62 = vpop.permute.xlu1 %8514  ;;  %v14776_v58 = vsel %vm6009_vm12, %v8088_v20, %v8090_v38 }
0x11e5   :  { %8143 = vmatprep.subr.bf16.mxu0 %v14776_v58 }
0x11e6   :  { %8144 = vmatpush1.bf16.msra.mxu0 %v14773_v32  ;;  %10471 = vmatmul.mubr.msk.bf16.vlgmr.msra.gmra.mrb[84].mxu1 %vm7797_vm4, %v8500_v34 }
0x11e7   :  { %v8513_v18 = vpop.permute.xlu0 %8512  ;;  %8600 = vmatprep.mubr.bf16.mxu1 %v12320_v47 }
0x11e8   :  { %v14783_v40 = vsel %vm6237_vm13, %v8511_v35, %v8513_v18  ;;  %v7991_v42 = vpop.permute.xlu1 %7990  ;;  %v14786_v7 = vsel %vm6237_vm13, %v8513_v18, %v8515_v62  ;;  %v14832_v35 = vld [vmem:[#allocation25] ss:$8 sm:$0xf] }
0x11e9   :  { %8568 = vmatprep.subr.bf16.mxu1 %v14786_v7  ;;  %v8007_v49 = vmul.f32 %v7991_v42, %v14628_v55  ;;  %v8012_v3 = vmul.f32 %v7991_v42, %v14630_v9  ;;  %v7642_v62 = vrot.slane %v14832_v35, %v14560_v54 }
0x11ea   :  { %8569 = vmatpush1.bf16.msra.mxu1 %v14783_v40  ;;  %10464 = vmatmul.mubr.msk.bf16.vlgmr.msra.gmra.mrb[100].mxu0 %vm7797_vm4, %v8075_v22 }
0x11eb   :  { %v8198_v10 = vpop.permute.xlu0 %8197  ;;  %8242 = vmatprep.mubr.bf16.mxu0 %v12320_v47  ;;  %v8017_v6 = vpack.c.bf16 %v8012_v3, %v8007_v49  ;;  %v7656_v54 = vmul.f32 %v7642_v62, %v14613_v26 }
0x11ec   :  { %v8194_v16 = vpop.permute.xlu1 %8193 }
0x11ee   :  { %10472 = vmatmul.mubr.msk.bf16.vlgmr.msra.gmra.mrb[88].mxu1 %vm7797_vm4, %v8500_v34 }
0x11ef   :  { %v8192_v33 = vpop.permute.xlu0 %8191  ;;  %8644 = vmatprep.mubr.bf16.mxu1 %v12320_v47 }
0x11f0   :  { %v14795_v24 = vsel %vm5938_vm11, %v8190_v13, %v8192_v33  ;;  %v14798_v44 = vsel %vm5938_vm11, %v8192_v33, %v8194_v16  ;;  %v7995_v39 = vpop.permute.xlu1 %7994 }
0x11f1   :  { %8210 = vmatprep.subr.bf16.mxu0 %v14798_v44  ;;  %8612 = vmatprep.subr.bf16.mxu1 %v14798_v44 }
0x11f2   :  { %8211 = vmatpush1.bf16.msra.mxu0 %v14795_v24  ;;  %8613 = vmatpush1.bf16.msra.mxu1 %v14795_v24 }
0x11f3   :  { %v7993_v30 = vpop.permute.xlu0 %7992 }
0x11f4   :  { %v7999_v50 = vsel %vm7998_vm1, %v7991_v42, %v7993_v30  ;;  %v8000_v45 = vsel %vm7998_vm1, %v7993_v30, %v7995_v39  ;;  %v8196_v8 = vpop.permute.xlu1 %8195  ;;  %v8293_v42 = vld [vmem:[#allocation22 + $0x1a] sm:$0x3] }
0x11f5   :  { %v8008_v41 = vmul.f32 %v7999_v50, %v14613_v26  ;;  %v8009_v57 = vmul.f32 %v8000_v45, %v14616_v11  ;;  %v8013_v17 = vmul.f32 %v7999_v50, %v14623_v43  ;;  %v8014_v29 = vmul.f32 %v8000_v45, %v14626_v2  ;;  %10465 = vmatmul.mubr.msk.bf16.vlgmr.msra.gmra.mrb[96].mxu0 %vm7797_vm4, %v8073_v27 }
0x11f6   :  { %v14813_v53 = vsel %vm5938_vm11, %v8194_v16, %v8196_v8  ;;  %v14816_v63 = vsel %vm5938_vm11, %v8196_v8, %v8198_v10  ;;  %10473 = vmatmul.mubr.msk.bf16.vlgmr.msra.gmra.mrb[84].mxu1 %vm7797_vm4, %v8498_v28  ;;  %8283 = vmatprep.mubr.bf16.mxu0 %v12320_v47  ;;  %v7660_v10 = vmul.f32 %v7642_v62, %v14623_v43  ;;  %vm9684_vm11 = vcmask 1042432  }
0x11f7   :  { %v8018_v36 = vpack.c.bf16 %v8013_v17, %v8008_v41  ;;  %v8019_v0 = vpack.c.bf16 %v8014_v29, %v8009_v57  ;;  %8251 = vmatprep.subr.bf16.mxu0 %v14816_v63  ;;  %8653 = vmatprep.subr.bf16.mxu1 %v14816_v63  ;;  %v8300_v15 = vpop.permute.xlu0 %8299  ;;  %v7638_v57 = vrot.slane %v14832_v35, %v14563_v60 }
0x11f8   :  { %8252 = vmatpush1.bf16.msra.mxu0 %v14813_v53  ;;  %8654 = vmatpush1.bf16.msra.mxu1 %v14813_v53  ;;  %v7997_v23 = vpop.permute.xlu1 %7996  ;;  %v7664_v41 = vpack.c.bf16 %v7660_v10, %v7656_v54 }
0x11f9   :  { %v8001_v1 = vsel %vm7998_vm1, %v7995_v39, %v7997_v23  ;;  %9084 = vrot.lane.b32.xlu0 %v8019_v0, %s12340_s11  ;;  %9082 = vrot.lane.b32.xlu1 %v8018_v36, %s12340_s11  ;;  %v8011_v56 = vmul.f32 %v7997_v23, %v14646_v19  ;;  %v8016_v59 = vmul.f32 %v7997_v23, %v14649_v61 }
0x11fa   :  { %v8010_v51 = vmul.f32 %v8001_v1, %v14619_v37  ;;  %v8015_v25 = vmul.f32 %v8001_v1, %v14641_v5  ;;  %8685 = vmatprep.mubr.bf16.mxu1 %v12320_v47  ;;  %v7650_v0 = vrot.slane %v14832_v35, %v14578_v48  ;;  %v7659_v23 = vmul.f32 %v7638_v57, %v14630_v9 }
0x11fb   :  { %v8308_v38 = vpop.permute.xlu0 %8307  ;;  %v8021_v22 = vpack.c.bf16 %v8016_v59, %v8011_v56  ;;  %v7655_v1 = vmul.f32 %v7638_v57, %v14628_v55 }
0x11fc   :  { %v8020_v13 = vpack.c.bf16 %v8015_v25, %v8010_v51  ;;  %v8302_v4 = vpop.permute.xlu1 %8301  ;;  %v7662_v51 = vmul.f32 %v7650_v0, %v14641_v5 }
0x11fd   :  { %10466 = vmatmul.mubr.msk.bf16.vlgmr.msra.gmra.mrb[100].mxu0 %vm7797_vm4, %v8073_v27  ;;  %9080 = vrot.lane.b32.xlu1 %v8017_v6, %s12340_s11  ;;  %v8309_v18 = vsel %vm5463_vm9, %v8300_v15, %v8302_v4 }
0x11fe   :  { %9086 = vrot.lane.b32.xlu0 %v8020_v13, %s12340_s11  ;;  %10474 = vmatmul.mubr.msk.bf16.vlgmr.msra.gmra.mrb[88].mxu1 %vm7797_vm4, %v8498_v28  ;;  %v8695_v28 = vld [vmem:[#allocation22 + $0x1c] sm:$0x3] }
0x11ff   :  { %v8304_v12 = vpop.permute.xlu0 %8303  ;;  %8352 = vmatprep.mubr.bf16.mxu0 %v12320_v47  ;;  %8731 = vmatprep.mubr.bf16.mxu1 %v12320_v47 }
0x1200   :  { %v7943_v20 = vpop.permute.xlu1 %7942  ;;  %v8310_v34 = vsel %vm5463_vm9, %v8302_v4, %v8304_v12 }
0x1201   :  { %9088 = vrot.lane.b32.xlu1 %v8021_v22, %s12340_s11  ;;  %8320 = vmatprep.subr.bf16.mxu0 %v8310_v34 }
0x1202   :  { %8699 = vmatprep.subr.bf16.mxu1 %v8310_v34  ;;  %8321 = vmatpush1.bf16.msra.mxu0 %v8309_v18  ;;  %v7646_v34 = vrot.slane %v14832_v35, %v14569_v14 }
0x1203   :  { %8700 = vmatpush1.bf16.msra.mxu1 %v8309_v18  ;;  %v7941_v16 = vpop.permute.xlu0 %7940 }
0x1204   :  { %v7948_v33 = vsel %vm312_vm0, %v7941_v16, %v7943_v20  ;;  %v7956_v39 = vmul.f32 %v7941_v16, %v14628_v55  ;;  %v7961_v27 = vmul.f32 %v7941_v16, %v14630_v9  ;;  %v8306_v30 = vpop.permute.xlu1 %8305 }
0x1205   :  { %v8311_v50 = vsel %vm5463_vm9, %v8304_v12, %v8306_v30  ;;  %10467 = vmatmul.mubr.msk.bf16.vlgmr.msra.gmra.mrb[96].mxu0 %vm7797_vm4, %v8293_v42  ;;  %v8312_v45 = vsel %vm5463_vm9, %v8306_v30, %v8308_v38  ;;  %v7957_v17 = vmul.f32 %v7948_v33, %v14613_v26  ;;  %v7962_v29 = vmul.f32 %v7948_v33, %v14623_v43 }
0x1206   :  { %v7966_v8 = vpack.c.bf16 %v7961_v27, %v7956_v39  ;;  %8361 = vmatprep.subr.bf16.mxu0 %v8312_v45  ;;  %8740 = vmatprep.subr.bf16.mxu1 %v8312_v45  ;;  %v8407_v27 = vld [vmem:[#allocation22 + $0x1e] sm:$0x3]  ;;  %vm9205_vm9 = vcmask 785408  }
0x1207   :  { %8362 = vmatpush1.bf16.msra.mxu0 %v8311_v50  ;;  %10475 = vmatmul.mubr.msk.bf16.vlgmr.msra.gmra.mrb[84].mxu1 %vm7797_vm4, %v8695_v28  ;;  %v7945_v49 = vpop.permute.xlu0 %7944  ;;  %v7967_v25 = vpack.c.bf16 %v7962_v29, %v7957_v17 }
0x1208   :  { %8741 = vmatpush1.bf16.msra.mxu1 %v8311_v50  ;;  %v7949_v3 = vsel %vm312_vm0, %v7943_v20, %v7945_v49  ;;  %v8042_v36 = vpop.permute.xlu1 %8041  ;;  %8411 = vmatprep.subr.bf16.mxu0 %v7664_v41 }
0x1209   :  { %v8057_v15 = vmul.f32 %v8042_v36, %v14628_v55  ;;  %v8062_v60 = vmul.f32 %v8042_v36, %v14630_v9  ;;  %9195 = vrot.lane.b32.xlu0 %v7966_v8, %s12341_s17  ;;  %8393 = vmatprep.mubr.bf16.mxu0 %v12320_v47  ;;  %v7958_v48 = vmul.f32 %v7949_v3, %v14616_v11  ;;  %v8786_v8 = vld [vmem:[#allocation22 + $0x18] sm:$0x3] }
0x120a   :  { %8772 = vmatprep.mubr.bf16.mxu1 %v12320_v47  ;;  %v7963_v6 = vmul.f32 %v7949_v3, %v14626_v2  ;;  %v7658_v9 = vmul.f32 %v7650_v0, %v14619_v37  ;;  %v7663_v55 = vpack.c.bf16 %v7659_v23, %v7655_v1 }
0x120b   :  { %v8067_v56 = vpack.c.bf16 %v8062_v60, %v8057_v15  ;;  %v8044_v59 = vpop.permute.xlu0 %8043 }
0x120c   :  { %v8049_v38 = vsel %vm261_vm14, %v8042_v36, %v8044_v59  ;;  %v8046_v13 = vpop.permute.xlu1 %8045  ;;  %v7666_v20 = vpack.c.bf16 %v7662_v51, %v7658_v9  ;;  %v7968_v62 = vpack.c.bf16 %v7963_v6, %v7958_v48  ;;  %v9189_v9 = vld [vmem:[#allocation22 + $0x6] sm:$0x3] }
0x120d   :  { %v8050_v4 = vsel %vm261_vm14, %v8044_v59, %v8046_v13  ;;  %9197 = vrot.lane.b32.xlu0 %v7967_v25, %s12341_s17  ;;  %9574 = vrot.lane.b32.xlu1 %v8067_v56, %s12342_s26  ;;  %v8058_v18 = vmul.f32 %v8049_v38, %v14613_v26  ;;  %v8063_v10 = vmul.f32 %v8049_v38, %v14623_v43 }
0x120e   :  { %v8059_v22 = vmul.f32 %v8050_v4, %v14616_v11  ;;  %v8064_v12 = vmul.f32 %v8050_v4, %v14626_v2  ;;  %10468 = vmatmul.mubr.msk.bf16.vlgmr.msra.gmra.mrb[100].mxu0 %vm7797_vm4, %v8293_v42  ;;  %v7661_v42 = vmul.f32 %v7646_v34, %v14626_v2  ;;  %v7657_v26 = vmul.f32 %v7646_v34, %v14616_v11 }
0x120f   :  { %8412 = vmatpush1.bf16.msra.mxu0 %v7663_v55  ;;  %v8797_v16 = vpop.permute.xlu0 %8796  ;;  %10476 = vmatmul.mubr.msk.bf16.vlgmr.msra.gmra.mrb[88].mxu1 %vm7797_vm4, %v8695_v28  ;;  %v8068_v43 = vpack.c.bf16 %v8063_v10, %v8058_v18 }
0x1210   :  { %v8069_v33 = vpack.c.bf16 %v8064_v12, %v8059_v22  ;;  %8452 = vmatprep.subr.bf16.mxu0 %v7666_v20  ;;  %v8795_v39 = vpop.permute.xlu1 %8794  ;;  %8443 = vmatprep.mubr.bf16.mxu0 %v12320_v47  ;;  %v7665_v54 = vpack.c.bf16 %v7661_v42, %v7657_v26  ;;  %v9568_v20 = vld [vmem:[#allocation22] sm:$0x3] }
0x1211   :  { %9199 = vrot.lane.b32.xlu1 %v7968_v62, %s12341_s17  ;;  %v8803_v14 = vsel %vm5763_vm10, %v8795_v39, %v8797_v16  ;;  %8845 = vmatprep.mubr.bf16.mxu1 %v12320_v47 }
0x1212   :  { %9578 = vrot.lane.b32.xlu0 %v8069_v33, %s12342_s26  ;;  %8813 = vmatprep.subr.bf16.mxu1 %v8803_v14 }
0x1213   :  { %v8793_v35 = vpop.permute.xlu0 %8792 }
0x1214   :  { %v8802_v30 = vsel %vm5763_vm10, %v8793_v35, %v8795_v39  ;;  %v7947_v28 = vpop.permute.xlu1 %7946 }
0x1215   :  { %v7950_v2 = vsel %vm312_vm0, %v7945_v49, %v7947_v28  ;;  %v7960_v50 = vmul.f32 %v7947_v28, %v14646_v19  ;;  %v7965_v45 = vmul.f32 %v7947_v28, %v14649_v61  ;;  %9576 = vrot.lane.b32.xlu1 %v8068_v43, %s12342_s26  ;;  %8814 = vmatpush1.bf16.msra.mxu1 %v8802_v30  ;;  %vm9090_vm0 = vcmask 777216  }
0x1216   :  { %v7959_v41 = vmul.f32 %v7950_v2, %v14619_v37  ;;  %v7964_v11 = vmul.f32 %v7950_v2, %v14641_v5  ;;  %10469 = vmatmul.mubr.msk.bf16.vlgmr.msra.gmra.mrb[96].mxu0 %vm7797_vm4, %v8407_v27 }
0x1217   :  { %v7970_v57 = vpack.c.bf16 %v7965_v45, %v7960_v50  ;;  %8453 = vmatpush1.bf16.msra.mxu0 %v7665_v54  ;;  %v8799_v17 = vpop.permute.xlu0 %8798  ;;  %8484 = vmatprep.mubr.bf16.mxu0 %v12320_v47 }
0x1218   :  { %v7969_v29 = vpack.c.bf16 %v7964_v11, %v7959_v41  ;;  %8906 = vmatprep.subr.bf16.mxu0 %v14755_v52  ;;  %v8801_v49 = vpop.permute.xlu1 %8800  ;;  %10477 = vmatmul.mubr.msk.bf16.vlgmr.msra.gmra.mrb[84].mxu1 %vm7797_vm4, %v8786_v8  ;;  %v8804_v36 = vsel %vm5763_vm10, %v8797_v16, %v8799_v17 }
0x1219   :  { %9203 = vrot.lane.b32.xlu1 %v7970_v57, %s12341_s17  ;;  %v8805_v3 = vsel %vm5763_vm10, %v8799_v17, %v8801_v49  ;;  %8886 = vmatprep.mubr.bf16.mxu1 %v12320_v47  ;;  %vm9584_vm10 = vcmask 769024  }
0x121a   :  { %9201 = vrot.lane.b32.xlu0 %v7969_v29, %s12341_s17  ;;  %8854 = vmatprep.subr.bf16.mxu1 %v8805_v3 }
0x121b   :  { %8855 = vmatpush1.bf16.msra.mxu1 %v8804_v36  ;;  %v8048_v0 = vpop.permute.xlu0 %8047 }
0x121c   :  { %v8051_v15 = vsel %vm261_vm14, %v8046_v13, %v8048_v0  ;;  %v8061_v52 = vmul.f32 %v8048_v0, %v14646_v19  ;;  %v8066_v60 = vmul.f32 %v8048_v0, %v14649_v61  ;;  %9310 = vmatprep.subr.bf16.mxu1 %v14766_v46  ;;  %v8900_v19 = vld [vmem:[#allocation22 + $0x12] sm:$0x3]  ;;  %v9304_v61 = vld [vmem:[#allocation22 + $0x14] sm:$0x3] }
0x121d   :  { %v8060_v23 = vmul.f32 %v8051_v15, %v14619_v37  ;;  %v8065_v1 = vmul.f32 %v8051_v15, %v14641_v5  ;;  %v8902_v37 = vld [vmem:[#allocation22 + $0x16] sm:$0x3]  ;;  %v9306_v5 = vld [vmem:[#allocation22 + $0x10] sm:$0x3] }
0x121e   :  { %v8071_v51 = vpack.c.bf16 %v8066_v60, %v8061_v52  ;;  %10470 = vmatmul.mubr.msk.bf16.vlgmr.msra.gmra.mrb[100].mxu0 %vm7797_vm4, %v8407_v27 }
0x121f   :  { %v8070_v25 = vpack.c.bf16 %v8065_v1, %v8060_v23  ;;  %8907 = vmatpush1.bf16.msra.mxu0 %v14758_v31  ;;  %8938 = vmatprep.mubr.bf16.mxu0 %v12320_v47 }
0x1220   :  { %8947 = vmatprep.subr.bf16.mxu0 %v14776_v58  ;;  %10478 = vmatmul.mubr.msk.bf16.vlgmr.msra.gmra.mrb[88].mxu1 %vm7797_vm4, %v8786_v8 }
0x1221   :  { %9311 = vmatpush1.bf16.msra.mxu1 %v14763_v21  ;;  %9582 = vrot.lane.b32.xlu1 %v8071_v51, %s12342_s26 }
0x1222   :  { %9351 = vmatprep.subr.bf16.mxu1 %v14786_v7  ;;  %9580 = vrot.lane.b32.xlu0 %v8070_v25, %s12342_s26  ;;  %v9478_v7 = vld [vmem:[#allocation22 + $0x4] sm:$0x3] }
0x1223   :  { %9342 = vmatprep.mubr.bf16.mxu1 %v12320_v47 }
0x1226   :  { %10479 = vmatmul.mubr.msk.bf16.vlgmr.msra.gmra.mrb[104].mxu0 %vm7797_vm4, %v8902_v37 }
0x1227   :  { %8948 = vmatpush1.bf16.msra.mxu0 %v14773_v32  ;;  %8979 = vmatprep.mubr.bf16.mxu0 %v12320_v47 }
0x1228   :  { %8991 = vmatprep.subr.bf16.mxu0 %v14798_v44  ;;  %10487 = vmatmul.mubr.msk.bf16.vlgmr.msra.gmra.mrb[92].mxu1 %vm7797_vm4, %v9306_v5 }
0x1229   :  { %9352 = vmatpush1.bf16.msra.mxu1 %v14783_v40  ;;  %9383 = vmatprep.mubr.bf16.mxu1 %v12320_v47  ;;  %v9074_v40 = vld [vmem:[#allocation22 + $0x2] sm:$0x3] }
0x122a   :  { %9395 = vmatprep.subr.bf16.mxu1 %v14798_v44 }
0x122e   :  { %10480 = vmatmul.mubr.msk.bf16.vlgmr.msra.gmra.mrb[108].mxu0 %vm7797_vm4, %v8902_v37 }
0x122f   :  { %8992 = vmatpush1.bf16.msra.mxu0 %v14795_v24  ;;  %9023 = vmatprep.mubr.bf16.mxu0 %v12320_v47 }
0x1230   :  { %9032 = vmatprep.subr.bf16.mxu0 %v14816_v63  ;;  %10488 = vmatmul.mubr.msk.bf16.vlgmr.msra.gmra.mrb[96].mxu1 %vm7797_vm4, %v9306_v5 }
0x1231   :  { %9396 = vmatpush1.bf16.msra.mxu1 %v14795_v24  ;;  %9427 = vmatprep.mubr.bf16.mxu1 %v12320_v47 }
0x1232   :  { %9436 = vmatprep.subr.bf16.mxu1 %v14816_v63 }
0x1236   :  { %10481 = vmatmul.mubr.msk.bf16.vlgmr.msra.gmra.mrb[104].mxu0 %vm7797_vm4, %v8900_v19 }
0x1237   :  { %9033 = vmatpush1.bf16.msra.mxu0 %v14813_v53  ;;  %9064 = vmatprep.mubr.bf16.mxu0 %v12320_v47 }
0x1238   :  { %10489 = vmatmul.mubr.msk.bf16.vlgmr.msra.gmra.mrb[92].mxu1 %vm7797_vm4, %v9304_v61 }
0x1239   :  { %9437 = vmatpush1.bf16.msra.mxu1 %v14813_v53  ;;  %9468 = vmatprep.mubr.bf16.mxu1 %v12320_v47 }
0x123e   :  { %10482 = vmatmul.mubr.msk.bf16.vlgmr.msra.gmra.mrb[108].mxu0 %vm7797_vm4, %v8900_v19 }
0x123f   :  { %9134 = vmatprep.mubr.bf16.mxu0 %v12320_v47 }
0x1240   :  { %10490 = vmatmul.mubr.msk.bf16.vlgmr.msra.gmra.mrb[96].mxu1 %vm7797_vm4, %v9304_v61 }
0x1241   :  { %9514 = vmatprep.mubr.bf16.mxu1 %v12320_v47 }
0x126b   :  { %v9083_v31 = vpop.permute.xlu1 %9082  ;;  %v9085_v21 = vpop.permute.xlu0 %9084 }
0x126c   :  { %v9092_v46 = vsel %vm9090_vm0, %v9083_v31, %v9085_v21 }
0x126d   :  { %9102 = vmatprep.subr.bf16.mxu0 %v9092_v46  ;;  %9482 = vmatprep.subr.bf16.mxu1 %v9092_v46 }
0x126f   :  { %v9081_v32 = vpop.permute.xlu1 %9080 }
0x1270   :  { %v9091_v58 = vsel %vm9090_vm0, %v9081_v32, %v9083_v31  ;;  %v9087_v24 = vpop.permute.xlu0 %9086 }
0x1271   :  { %9103 = vmatpush1.bf16.msra.mxu0 %v9091_v58  ;;  %9483 = vmatpush1.bf16.msra.mxu1 %v9091_v58  ;;  %v9093_v63 = vsel %vm9090_vm0, %v9085_v21, %v9087_v24 }
0x1273   :  { %v9089_v44 = vpop.permute.xlu1 %9088 }
0x1274   :  { %v9094_v53 = vsel %vm9090_vm0, %v9087_v24, %v9089_v44  ;;  %10483 = vmatmul.mubr.msk.bf16.vlgmr.msra.gmra.mrb[104].mxu0 %vm7797_vm4, %v9074_v40  ;;  %10491 = vmatmul.mubr.msk.bf16.vlgmr.msra.gmra.mrb[92].mxu1 %vm7797_vm4, %v9478_v7 }
0x1275   :  { %9143 = vmatprep.subr.bf16.mxu0 %v9094_v53  ;;  %9523 = vmatprep.subr.bf16.mxu1 %v9094_v53 }
0x1276   :  { %9144 = vmatpush1.bf16.msra.mxu0 %v9093_v63  ;;  %9524 = vmatpush1.bf16.msra.mxu1 %v9093_v63 }
0x1277   :  { %9175 = vmatprep.mubr.bf16.mxu0 %v12320_v47  ;;  %9555 = vmatprep.mubr.bf16.mxu1 %v12320_v47 }
0x127b   :  { %v9196_v48 = vpop.permute.xlu0 %9195 }
0x127c   :  { %10484 = vmatmul.mubr.msk.bf16.vlgmr.msra.gmra.mrb[108].mxu0 %vm7797_vm4, %v9074_v40  ;;  %10492 = vmatmul.mubr.msk.bf16.vlgmr.msra.gmra.mrb[96].mxu1 %vm7797_vm4, %v9478_v7 }
0x127d   :  { %9249 = vmatprep.mubr.bf16.mxu0 %v12320_v47  ;;  %9628 = vmatprep.mubr.bf16.mxu1 %v12320_v47 }
0x127f   :  { %v9575_v6 = vpop.permute.xlu1 %9574  ;;  %v9198_v56 = vpop.permute.xlu0 %9197 }
0x1280   :  { %v9206_v13 = vsel %vm9205_vm9, %v9196_v48, %v9198_v56 }
0x1283   :  { %v9200_v59 = vpop.permute.xlu1 %9199 }
0x1284   :  { %v9207_v38 = vsel %vm9205_vm9, %v9198_v56, %v9200_v59  ;;  %v9579_v4 = vpop.permute.xlu0 %9578 }
0x1285   :  { %9217 = vmatprep.subr.bf16.mxu0 %v9207_v38 }
0x1286   :  { %9218 = vmatpush1.bf16.msra.mxu0 %v9206_v13 }
0x1287   :  { %v9577_v55 = vpop.permute.xlu1 %9576 }
0x1288   :  { %v9585_v22 = vsel %vm9584_vm10, %v9575_v6, %v9577_v55  ;;  %v9586_v12 = vsel %vm9584_vm10, %v9577_v55, %v9579_v4 }
0x1289   :  { %10485 = vmatmul.mubr.msk.bf16.vlgmr.msra.gmra.mrb[104].mxu0 %vm7797_vm4, %v9189_v9  ;;  %9596 = vmatprep.subr.bf16.mxu1 %v9586_v12 }
0x128a   :  { %9597 = vmatpush1.bf16.msra.mxu1 %v9585_v22  ;;  %9290 = vmatprep.mubr.bf16.mxu0 %v12320_v47 }
0x128b   :  { %v9204_v34 = vpop.permute.xlu1 %9203 }
0x128c   :  { %v9202_v62 = vpop.permute.xlu0 %9201 }
0x128d   :  { %v9208_v18 = vsel %vm9205_vm9, %v9200_v59, %v9202_v62  ;;  %10493 = vmatmul.mubr.msk.bf16.vlgmr.msra.gmra.mrb[92].mxu1 %vm7797_vm4, %v9568_v20  ;;  %v9209_v10 = vsel %vm9205_vm9, %v9202_v62, %v9204_v34 }
0x128e   :  { %9258 = vmatprep.subr.bf16.mxu0 %v9209_v10  ;;  %9669 = vmatprep.mubr.bf16.mxu1 %v12320_v47 }
0x128f   :  { %9259 = vmatpush1.bf16.msra.mxu0 %v9208_v18 }
0x1292   :  { %10486 = vmatmul.mubr.msk.bf16.vlgmr.msra.gmra.mrb[108].mxu0 %vm7797_vm4, %v9189_v9 }
0x1293   :  { %v9583_v16 = vpop.permute.xlu1 %9582 }
0x1294   :  { %v9581_v33 = vpop.permute.xlu0 %9580 }
0x1295   :  { %v9587_v39 = vsel %vm9584_vm10, %v9579_v4, %v9581_v33  ;;  %v9588_v42 = vsel %vm9584_vm10, %v9581_v33, %v9583_v16 }
0x1296   :  { %9637 = vmatprep.subr.bf16.mxu1 %v9588_v42 }
0x1297   :  { %9638 = vmatpush1.bf16.msra.mxu1 %v9587_v39 }
0x129a   :  { %10494 = vmatmul.mubr.msk.bf16.vlgmr.msra.gmra.mrb[96].mxu1 %vm7797_vm4, %v9568_v20 }
0x12e9   :  { %v14971_v14 = vpop.f32.mrb[96].mxu0 }
0x12ea   :  { %v9685_v26 = vsel %vm9684_vm11, %v14971_v14, 0.0  ;;  %v14975_v47 = vpop.f32.mrb[97].mxu0 }
0x12eb   :  { %v9686_v43 = vsel %vm9684_vm11, %v14975_v47, 0.0  ;;  %v14979_v35 = vpop.f32.mrb[84].mxu1  ;;  %v8449_v27 = vpop.f32.mrb[98].mxu0 }
0x12ec   :  { %v9687_v30 = vadd.f32 %v9686_v43, %v9685_v26  ;;  %v9694_v28 = vsel %vm9684_vm11, %v14979_v35, 0.0  ;;  %v14983_v54 = vpop.f32.mrb[85].mxu1  ;;  %v8450_v2 = vpop.f32.mrb[99].mxu0 }
0x12ed   :  { %v9695_v50 = vsel %vm9684_vm11, %v14983_v54, 0.0  ;;  %v8851_v45 = vpop.f32.mrb[86].mxu1 }
0x12ee   :  { %v9696_v8 = vadd.f32 %v9695_v50, %v9694_v28  ;;  %v8852_v41 = vpop.f32.mrb[87].mxu1 }
0x12f1   :  { %v14987_v11 = vpop.f32.mrb[100].mxu0 }
0x12f2   :  { %v9688_v57 = vsel %vm9684_vm11, %v14987_v11, 0.0  ;;  %v14991_v17 = vpop.f32.mrb[101].mxu0 }
0x12f3   :  { %v9689_v29 = vadd.f32 %v9688_v57, %v9687_v30  ;;  %v14993_v49 = vpop.f32.mrb[88].mxu1  ;;  %v9690_v3 = vsel %vm9684_vm11, %v14991_v17, 0.0  ;;  %v8490_v36 = vpop.f32.mrb[102].mxu0 }
0x12f4   :  { %v9697_v0 = vsel %vm9684_vm11, %v14993_v49, 0.0  ;;  %v14999_v15 = vpop.f32.mrb[89].mxu1  ;;  %v8491_v52 = vpop.f32.mrb[103].mxu0 }
0x12f5   :  { %v9698_v60 = vadd.f32 %v9697_v0, %v9696_v8  ;;  %v9699_v23 = vsel %vm9684_vm11, %v14999_v15, 0.0  ;;  %v9691_v1 = vadd.f32 %v9690_v3, %v9689_v29  ;;  %v8892_v51 = vpop.f32.mrb[90].mxu1 }
0x12f6   :  { %v8893_v25 = vpop.f32.mrb[91].mxu1 }
0x12f7   :  { %v9700_v37 = vadd.f32 %v9699_v23, %v9698_v60  ;;  %9692 = vadd.xlane.f32.xlu0 %v9691_v1 }
0x12f9   :  { %9701 = vadd.xlane.f32.xlu1 %v9700_v37 }
0x135c   :  { %v15003_v5 = vpop.f32.mrb[104].mxu0 }
0x135d   :  { %v9704_v19 = vsel %vm9684_vm11, %v15003_v5, 0.0  ;;  %v15007_v61 = vpop.f32.mrb[105].mxu0 }
0x135e   :  { %v9705_v31 = vsel %vm9684_vm11, %v15007_v61, 0.0  ;;  %v9255_v21 = vpop.f32.mrb[106].mxu0 }
0x135f   :  { %v9706_v46 = vadd.f32 %v9705_v31, %v9704_v19  ;;  %v9256_v32 = vpop.f32.mrb[107].mxu0 }
0x1360   :  { %v15011_v58 = vpop.f32.mrb[92].mxu1 }
0x1361   :  { %v9714_v40 = vsel %vm9684_vm11, %v15011_v58, 0.0  ;;  %v15015_v7 = vpop.f32.mrb[93].mxu1 }
0x1362   :  { %v9715_v24 = vsel %vm9684_vm11, %v15015_v7, 0.0  ;;  %v9634_v44 = vpop.f32.mrb[94].mxu1 }
0x1363   :  { %v9716_v53 = vadd.f32 %v9715_v24, %v9714_v40  ;;  %v9635_v63 = vpop.f32.mrb[95].mxu1 }
0x1365   :  { %v15019_v48 = vpop.f32.mrb[108].mxu0 }
0x1366   :  { %v9707_v6 = vsel %vm9684_vm11, %v15019_v48, 0.0  ;;  %v15023_v56 = vpop.f32.mrb[109].mxu0 }
0x1367   :  { %v9708_v59 = vadd.f32 %v9707_v6, %v9706_v46  ;;  %v9709_v38 = vsel %vm9684_vm11, %v15023_v56, 0.0  ;;  %v9296_v13 = vpop.f32.mrb[110].mxu0 }
0x1368   :  { %v9297_v9 = vpop.f32.mrb[111].mxu0 }
0x1369   :  { %v9710_v4 = vadd.f32 %v9709_v38, %v9708_v59 }
0x136b   :  { %9711 = vadd.xlane.f32.xlu0 %v9710_v4 }
0x136d   :  { %v15027_v55 = vpop.f32.mrb[96].mxu1 }
0x136e   :  { %v9717_v22 = vsel %vm9684_vm11, %v15027_v55, 0.0  ;;  %v15031_v12 = vpop.f32.mrb[97].mxu1 }
0x136f   :  { %v9718_v20 = vadd.f32 %v9717_v22, %v9716_v53  ;;  %v9719_v34 = vsel %vm9684_vm11, %v15031_v12, 0.0  ;;  %v9675_v62 = vpop.f32.mrb[98].mxu1 }
0x1370   :  { %v9676_v18 = vpop.f32.mrb[99].mxu1 }
0x1371   :  { %v9720_v10 = vadd.f32 %v9719_v34, %v9718_v20 }
0x1373   :  { %9721 = vadd.xlane.f32.xlu0 %v9720_v10 }
0x1384   :  { %v9693_v16 = vpop.xlane.xlu0 %9692 }
0x1386   :  { %v9702_v33 = vpop.xlane.xlu1 %9701 }
0x1387   :  { %v9703_v42 = vadd.f32 %v9702_v33, %v9693_v16 }
0x13f8   :  { %v9712_v39 = vpop.xlane.xlu0 %9711 }
0x13f9   :  { %v9713_v26 = vadd.f32 %v9712_v39, %v9703_v42 }
0x1400   :  { %v9722_v43 = vpop.xlane.xlu0 %9721 }
0x1401   :  { %v9723_v27 = vadd.f32 %v9722_v43, %v9713_v26 }
0x1403   :  { %v15035_v30 = vmul.f32 0.00048828125, %v9723_v27 }
0x1405   :  { %v9743_v28 = vsub.f32 %v14979_v35, %v15035_v30  ;;  %v9744_v2 = vsub.f32 %v14983_v54, %v15035_v30  ;;  %v9745_v50 = vsub.f32 %v14993_v49, %v15035_v30  ;;  %v9746_v45 = vsub.f32 %v14999_v15, %v15035_v30 }
0x1406   :  { %v9726_v8 = vsub.f32 %v14971_v14, %v15035_v30  ;;  %v9727_v41 = vsub.f32 %v14975_v47, %v15035_v30  ;;  %v9728_v57 = vsub.f32 %v14987_v11, %v15035_v30  ;;  %v9729_v29 = vsub.f32 %v14991_v17, %v15035_v30 }
0x1407   :  { %v9747_v3 = vmul.f32 %v9743_v28, %v9743_v28  ;;  %v9748_v36 = vmul.f32 %v9744_v2, %v9744_v2  ;;  %v9749_v0 = vmul.f32 %v9745_v50, %v9745_v50  ;;  %v9750_v52 = vmul.f32 %v9746_v45, %v9746_v45 }
0x1408   :  { %v9730_v60 = vmul.f32 %v9726_v8, %v9726_v8  ;;  %v9731_v23 = vmul.f32 %v9727_v41, %v9727_v41  ;;  %v9732_v1 = vmul.f32 %v9728_v57, %v9728_v57  ;;  %v9733_v51 = vmul.f32 %v9729_v29, %v9729_v29 }
0x1409   :  { %v9751_v25 = vsel %vm9684_vm11, %v9747_v3, 0.0  ;;  %v9752_v37 = vsel %vm9684_vm11, %v9748_v36, 0.0  ;;  %v9754_v19 = vsel %vm9684_vm11, %v9749_v0, 0.0  ;;  %v9756_v31 = vsel %vm9684_vm11, %v9750_v52, 0.0 }
0x140a   :  { %v9753_v21 = vadd.f32 %v9752_v37, %v9751_v25  ;;  %v9734_v46 = vsel %vm9684_vm11, %v9730_v60, 0.0  ;;  %v9735_v32 = vsel %vm9684_vm11, %v9731_v23, 0.0  ;;  %v9737_v40 = vsel %vm9684_vm11, %v9732_v1, 0.0 }
0x140b   :  { %v9736_v24 = vadd.f32 %v9735_v32, %v9734_v46  ;;  %v9739_v44 = vsel %vm9684_vm11, %v9733_v51, 0.0  ;;  %v9779_v53 = vsub.f32 %v15011_v58, %v15035_v30  ;;  %v9780_v63 = vsub.f32 %v15015_v7, %v15035_v30  ;;  %v9682_v32 = vld [vmem:[#allocation23] sm:$0x7] }
0x140c   :  { %v9755_v6 = vadd.f32 %v9754_v19, %v9753_v21  ;;  %v9781_v59 = vsub.f32 %v15027_v55, %v15035_v30  ;;  %v9782_v38 = vsub.f32 %v15031_v12, %v15035_v30  ;;  %v9761_v13 = vsub.f32 %v15003_v5, %v15035_v30 }
0x140d   :  { %v9738_v9 = vadd.f32 %v9737_v40, %v9736_v24  ;;  %v9783_v4 = vmul.f32 %v9779_v53, %v9779_v53  ;;  %v9784_v22 = vmul.f32 %v9780_v63, %v9780_v63  ;;  %v9762_v20 = vsub.f32 %v15007_v61, %v15035_v30 }
0x140e   :  { %v9757_v34 = vadd.f32 %v9756_v31, %v9755_v6  ;;  %v9785_v62 = vmul.f32 %v9781_v59, %v9781_v59  ;;  %v9786_v18 = vmul.f32 %v9782_v38, %v9782_v38  ;;  %v9763_v10 = vsub.f32 %v15019_v48, %v15035_v30 }
0x140f   :  { %v9740_v16 = vadd.f32 %v9739_v44, %v9738_v9  ;;  %v9787_v33 = vsel %vm9684_vm11, %v9783_v4, 0.0  ;;  %v9788_v39 = vsel %vm9684_vm11, %v9784_v22, 0.0  ;;  %v9764_v42 = vsub.f32 %v15023_v56, %v15035_v30  ;;  %v9683_v44 = vld [vmem:[%s15174_s15] sm:$0x7] }
0x1410   :  { %9758 = vadd.xlane.f32.xlu0 %v9757_v34  ;;  %v9789_v26 = vadd.f32 %v9788_v39, %v9787_v33  ;;  %v9765_v43 = vmul.f32 %v9761_v13, %v9761_v13  ;;  %v9790_v27 = vsel %vm9684_vm11, %v9785_v62, 0.0  ;;  %v9766_v28 = vmul.f32 %v9762_v20, %v9762_v20 }
0x1411   :  { %9741 = vadd.xlane.f32.xlu1 %v9740_v16  ;;  %v9767_v2 = vmul.f32 %v9763_v10, %v9763_v10  ;;  %v9792_v8 = vsel %vm9684_vm11, %v9786_v18, 0.0  ;;  %v9768_v41 = vmul.f32 %v9764_v42, %v9764_v42 }
0x1412   :  { %v9791_v50 = vadd.f32 %v9790_v27, %v9789_v26  ;;  %v9769_v45 = vsel %vm9684_vm11, %v9765_v43, 0.0  ;;  %v9770_v57 = vsel %vm9684_vm11, %v9766_v28, 0.0 }
0x1413   :  { %v9771_v3 = vadd.f32 %v9770_v57, %v9769_v45  ;;  %v9772_v36 = vsel %vm9684_vm11, %v9767_v2, 0.0  ;;  %v9774_v52 = vsel %vm9684_vm11, %v9768_v41, 0.0 }
0x1414   :  { %v9793_v29 = vadd.f32 %v9792_v8, %v9791_v50 }
0x1415   :  { %v9773_v0 = vadd.f32 %v9772_v36, %v9771_v3 }
0x1416   :  { %9794 = vadd.xlane.f32.xlu0 %v9793_v29 }
0x1417   :  { %v9775_v60 = vadd.f32 %v9774_v52, %v9773_v0 }
0x1419   :  { %9776 = vadd.xlane.f32.xlu1 %v9775_v60 }
0x149d   :  { %v9759_v1 = vpop.xlane.xlu0 %9758 }
0x149e   :  { %v9742_v23 = vpop.xlane.xlu1 %9741 }
0x149f   :  { %v9760_v51 = vadd.f32 %v9759_v1, %v9742_v23 }
0x14a3   :  { %v9795_v19 = vpop.xlane.xlu0 %9794 }
0x14a6   :  { %v9777_v25 = vpop.xlane.xlu1 %9776 }
0x14a7   :  { %v9778_v37 = vadd.f32 %v9777_v25, %v9760_v51 }
0x14a9   :  { %v9796_v31 = vadd.f32 %v9795_v19, %v9778_v37 }
0x14ab   :  { %v9797_v21 = vmul.f32 0.00048828125, %v9796_v31 }
0x14ad   :  { %v9798_v46 = vadd.f32 1e-05, %v9797_v21 }
0x14af   :  { %11952 = vrsqrt.f32 %v9798_v46 }
0x14b9   :  { %v11953_v40 = vpop.eup %11952 }
0x14ba   :  { %v9800_v24 = vmul.f32 %v11953_v40, %v9682_v32 }
0x14bc   :  { %9805 = vperm.xlu1 %11606, %v9800_v24   ;;  %v9801_v53 = vmul.f32 %v9800_v24, %v15035_v30 }
0x14be   :  { %v9802_v63 = vsub.f32 %v9683_v44, %v9801_v53 }
0x14c0   :  { %9814 = vperm.xlu0 %11607, %v9802_v63  }
0x153b   :  { %v9806_v6 = vpop.permute.xlu1 %9805 }
0x153c   :  { %v9808_v59 = vmul.f32 %v9806_v6, %v14971_v14  ;;  %v9809_v38 = vmul.f32 %v9806_v6, %v14975_v47  ;;  %v9810_v13 = vmul.f32 %v9806_v6, %v14987_v11  ;;  %v9811_v9 = vmul.f32 %v9806_v6, %v14991_v17 }
0x153d   :  { %v9837_v4 = vmul.f32 %v9806_v6, %v14979_v35  ;;  %v9838_v22 = vmul.f32 %v9806_v6, %v14983_v54  ;;  %v9839_v20 = vmul.f32 %v9806_v6, %v14993_v49  ;;  %v9840_v34 = vmul.f32 %v9806_v6, %v14999_v15 }
0x153e   :  { %v9861_v30 = vmul.f32 %v9806_v6, %v15003_v5  ;;  %v9862_v62 = vmul.f32 %v9806_v6, %v15007_v61  ;;  %v9863_v14 = vmul.f32 %v9806_v6, %v15019_v48  ;;  %v9864_v47 = vmul.f32 %v9806_v6, %v15023_v56 }
0x153f   :  { %v9885_v11 = vmul.f32 %v9806_v6, %v15011_v58  ;;  %v9886_v17 = vmul.f32 %v9806_v6, %v15015_v7  ;;  %v9887_v35 = vmul.f32 %v9806_v6, %v15027_v55  ;;  %v15105_v54 = vmul.f32 %v9806_v6, %v15031_v12  ;;  %v9815_v49 = vpop.permute.xlu0 %9814 }
0x1540   :  { %v9817_v18 = vadd.f32 %v9815_v49, %v9808_v59  ;;  %v9818_v15 = vadd.f32 %v9815_v49, %v9809_v38  ;;  %v9819_v10 = vadd.f32 %v9815_v49, %v9810_v13  ;;  %v9820_v5 = vadd.f32 %v9815_v49, %v9811_v9 }
0x1541   :  { %v9841_v16 = vadd.f32 %v9837_v4, %v9815_v49  ;;  %v9842_v61 = vadd.f32 %v9838_v22, %v9815_v49  ;;  %v9843_v33 = vadd.f32 %v9839_v20, %v9815_v49  ;;  %v9844_v48 = vadd.f32 %v9840_v34, %v9815_v49 }
0x1542   :  { %vm9821_vm12 = vcmp.ge.f32.partialorder %v9817_v18, 0.0  ;;  %vm9822_vm13 = vcmp.ge.f32.partialorder %v9818_v15, 0.0  ;;  %vm9823_vm5 = vcmp.ge.f32.partialorder %v9819_v10, 0.0  ;;  %vm9824_vm6 = vcmp.ge.f32.partialorder %v9820_v5, 0.0 }
0x1543   :  { %v9825_v58 = vmul.f32 0.2, %v9817_v18  ;;  %v9826_v7 = vmul.f32 0.2, %v9818_v15  ;;  %v9827_v56 = vmul.f32 0.2, %v9819_v10  ;;  %v9865_v55 = vadd.f32 %v9861_v30, %v9815_v49 }
0x1544   :  { %v9828_v39 = vmul.f32 0.2, %v9820_v5  ;;  %vm9845_vm7 = vcmp.ge.f32.partialorder %v9841_v16, 0.0  ;;  %vm9846_vm8 = vcmp.ge.f32.partialorder %v9842_v61, 0.0  ;;  %vm9847_vm14 = vcmp.ge.f32.partialorder %v9843_v33, 0.0 }
0x1545   :  { %v9829_v12 = vsel %vm9821_vm12, %v9817_v18, %v9825_v58  ;;  %v9830_v42 = vsel %vm9822_vm13, %v9818_v15, %v9826_v7  ;;  %v9831_v26 = vsel %vm9823_vm5, %v9819_v10, %v9827_v56  ;;  %vm9848_vm15 = vcmp.ge.f32.partialorder %v9844_v48, 0.0 }
0x1546   :  { %v9832_v43 = vsel %vm9824_vm6, %v9820_v5, %v9828_v39  ;;  %11954 = vtanh.f32 %v9829_v12  ;;  %v9849_v27 = vmul.f32 0.2, %v9841_v16  ;;  %v9850_v28 = vmul.f32 0.2, %v9842_v61 }
0x1547   :  { %11956 = vtanh.f32 %v9830_v42  ;;  %v9851_v2 = vmul.f32 0.2, %v9843_v33  ;;  %v9852_v50 = vmul.f32 0.2, %v9844_v48  ;;  %v9866_v45 = vadd.f32 %v9862_v62, %v9815_v49 }
0x1548   :  { %11958 = vtanh.f32 %v9831_v26  ;;  %v9853_v8 = vsel %vm9845_vm7, %v9841_v16, %v9849_v27  ;;  %v9854_v41 = vsel %vm9846_vm8, %v9842_v61, %v9850_v28  ;;  %v9867_v57 = vadd.f32 %v9863_v14, %v9815_v49 }
0x1549   :  { %11960 = vtanh.f32 %v9832_v43  ;;  %v9855_v29 = vsel %vm9847_vm14, %v9843_v33, %v9851_v2  ;;  %v9856_v3 = vsel %vm9848_vm15, %v9844_v48, %v9852_v50  ;;  %v9868_v36 = vadd.f32 %v9864_v47, %v9815_v49 }
0x154a   :  { %11962 = vtanh.f32 %v9853_v8  ;;  %vm9869_vm3 = vcmp.ge.f32.partialorder %v9865_v55, 0.0  ;;  %vm9870_vm4 = vcmp.ge.f32.partialorder %v9866_v45, 0.0  ;;  %vm9871_vm2 = vcmp.ge.f32.partialorder %v9867_v57, 0.0 }
0x154b   :  { %11964 = vtanh.f32 %v9854_v41  ;;  %vm9872_vm1 = vcmp.ge.f32.partialorder %v9868_v36, 0.0  ;;  %v9873_v0 = vmul.f32 0.2, %v9865_v55  ;;  %v9874_v52 = vmul.f32 0.2, %v9866_v45 }
0x154c   :  { %11966 = vtanh.f32 %v9855_v29  ;;  %v9875_v60 = vmul.f32 0.2, %v9867_v57  ;;  %v9876_v23 = vmul.f32 0.2, %v9868_v36  ;;  %v9889_v1 = vadd.f32 %v9885_v11, %v9815_v49 }
0x154d   :  { %11968 = vtanh.f32 %v9856_v3  ;;  %v9877_v51 = vsel %vm9869_vm3, %v9865_v55, %v9873_v0  ;;  %v9878_v25 = vsel %vm9870_vm4, %v9866_v45, %v9874_v52  ;;  %v9890_v37 = vadd.f32 %v9886_v17, %v9815_v49 }
0x154e   :  { %v9879_v19 = vsel %vm9871_vm2, %v9867_v57, %v9875_v60  ;;  %v9880_v31 = vsel %vm9872_vm1, %v9868_v36, %v9876_v23  ;;  %11970 = vtanh.f32 %v9877_v51  ;;  %v9891_v21 = vadd.f32 %v9887_v35, %v9815_v49 }
0x154f   :  { %11972 = vtanh.f32 %v9878_v25  ;;  %v9892_v46 = vadd.f32 %v15105_v54, %v9815_v49  ;;  %vm9893_vm0 = vcmp.ge.f32.partialorder %v9889_v1, 0.0  ;;  %vm9894_vm9 = vcmp.ge.f32.partialorder %v9890_v37, 0.0 }
0x1550   :  { %v11955_v32 = vpop.eup %11954  ;;  %11974 = vtanh.f32 %v9879_v19  ;;  %vm9895_vm10 = vcmp.ge.f32.partialorder %v9891_v21, 0.0  ;;  %v9897_v40 = vmul.f32 0.2, %v9889_v1  ;;  %v9898_v24 = vmul.f32 0.2, %v9890_v37 }
0x1551   :  { %v11957_v44 = vpop.eup %11956  ;;  %11976 = vtanh.f32 %v9880_v31  ;;  %vm9896_vm11 = vcmp.ge.f32.partialorder %v9892_v46, 0.0  ;;  %v9899_v53 = vmul.f32 0.2, %v9891_v21  ;;  %v9900_v63 = vmul.f32 0.2, %v9892_v46 }
0x1552   :  { %v11959_v6 = vpop.eup %11958  ;;  %v9901_v59 = vsel %vm9893_vm0, %v9889_v1, %v9897_v40  ;;  %v9902_v38 = vsel %vm9894_vm9, %v9890_v37, %v9898_v24  ;;  %v9913_v13 = vcombine.low %v11955_v32, %v11957_v44 }
0x1553   :  { %v11961_v9 = vpop.eup %11960  ;;  %v9903_v4 = vsel %vm9895_vm10, %v9891_v21, %v9899_v53  ;;  %v9904_v22 = vsel %vm9896_vm11, %v9892_v46, %v9900_v63  ;;  %11978 = vtanh.f32 %v9901_v59 }
0x1554   :  { %v11963_v20 = vpop.eup %11962  ;;  %11980 = vtanh.f32 %v9902_v38  ;;  %v9914_v34 = vcombine.low %v11959_v6, %v11961_v9  ;;  %9917 = vst [vmem:[%s15175_s13] sm:$0x77] %v9913_v13 }
0x1555   :  { %v11965_v30 = vpop.eup %11964  ;;  %11982 = vtanh.f32 %v9903_v4 }
0x1556   :  { %v11967_v62 = vpop.eup %11966  ;;  %11984 = vtanh.f32 %v9904_v22  ;;  %9918 = vst [vmem:[%s15175_s13 + $0x8] sm:$0x77] %v9914_v34  ;;  %v9923_v14 = vcombine.low %v11963_v20, %v11965_v30 }
0x1557   :  { %v11969_v47 = vpop.eup %11968 }
0x1558   :  { %v11971_v11 = vpop.eup %11970  ;;  %v9924_v17 = vcombine.low %v11967_v62, %v11969_v47  ;;  %10495 = vst [vmem:[%s15175_s13 + $0x10] sm:$0x77] %v9923_v14 }
0x1559   :  { %v11973_v35 = vpop.eup %11972 }
0x155a   :  { %v11975_v54 = vpop.eup %11974  ;;  %10496 = vst [vmem:[%s15175_s13 + $0x18] sm:$0x77] %v9924_v17  ;;  %v9934_v49 = vcombine.low %v11971_v11, %v11973_v35 }
0x155b   :  { %v11977_v18 = vpop.eup %11976 }
0x155c   :  { %v9935_v15 = vcombine.low %v11975_v54, %v11977_v18  ;;  %10497 = vst [vmem:[%s15175_s13 + $0x20] sm:$0x77] %v9934_v49 }
0x155d   :  { %v11979_v10 = vpop.eup %11978 }
0x155e   :  { %v11981_v5 = vpop.eup %11980  ;;  %10498 = vst [vmem:[%s15175_s13 + $0x28] sm:$0x77] %v9935_v15 }
0x155f   :  { %v11983_v16 = vpop.eup %11982  ;;  %v9945_v61 = vcombine.low %v11979_v10, %v11981_v5 }
0x1560   :  { %v11985_v33 = vpop.eup %11984 }
0x1561   :  { %v9946_v48 = vcombine.low %v11983_v16, %v11985_v33  ;;  %10499 = vst [vmem:[%s15175_s13 + $0x30] sm:$0x77] %v9945_v61 }
0x1563   :  { %10500 = vst [vmem:[%s15175_s13 + $0x38] sm:$0x77] %v9946_v48 }
0x1564   :  { %9960 = vsyncpa [#allocation7], 1 }
0x1565   :  { %9961 = vsyncpa [#allocation9], 1 }
0x1566   :  { %9962 = vsyncpa [#allocation12], 1 }
0x1567   :  { %9963 = vsyncpa [#allocation15], 1 }
0x1568   :  { %9964 = vsyncpa [#allocation18], 1 }
0x1569   :  { %9965 = vsyncpa [#allocation21], 1 }
0x156a   :  { %9966 = vsyncpa [#allocation24], 1 }

</bundles_post_ra>
